<compile_context>
chip_gen: v5e
topology: v5e:2x2
jax: 0.10.0
libtpu: 0.0.40
codegen_flags: <defaults>
</compile_context>

<pallas_src>
import functools
import math

import jax
import jax.numpy as jnp
from jax.experimental import pallas as pl
from jax.experimental.pallas import tpu as pltpu


def _round_up(v, m):
    return ((v + m - 1) // m) * m


def _pick_tile(p, cap):
    """Largest multiple of 128 <= cap dividing p (p is a multiple of 128)."""
    if p <= cap:
        return p
    t = (cap // 128) * 128
    while t > 128 and p % t != 0:
        t -= 128
    return t


def _is_multi_tc():
    """True only for multi-TensorCore parts (v7x); used to decide M splitting."""
    try:
        kind = jax.devices()[0].device_kind.lower()
    except Exception:
        return False
    return "v7" in kind


# ---------------------------------------------------------------------------
# Pallas kernels 1a/1b: matmul + bias + activation (bf16 MXU, f32 accumulate)
#   1a: single K step, no scratch (accumulate directly into the output tile).
#   1b: K-tiled with a VMEM f32 accumulator for larger K.
#   Tile caps (tk<=1024, tn<=512) keep worst-case VMEM well under v5e's 16 MiB
#   default scoped limit and leave headroom on v7x's 64 MiB physical VMEM.
# ---------------------------------------------------------------------------
def _mm_single_kernel(x_ref, w_ref, b_ref, o_ref, *, activation):
    acc = jnp.dot(x_ref[...], w_ref[...], preferred_element_type=jnp.float32)
    acc = acc + b_ref[...]
    if activation == "relu":
        acc = jnp.maximum(acc, 0.0)
    elif activation == "leaky_relu":
        acc = jnp.where(acc >= 0.0, acc, 0.01 * acc)
    o_ref[...] = acc.astype(o_ref.dtype)


def _mm_acc_kernel(x_ref, w_ref, b_ref, o_ref, acc_ref, *, activation):
    @pl.when(pl.program_id(2) == 0)
    def _():
        acc_ref[...] = jnp.zeros_like(acc_ref)

    acc_ref[...] += jnp.dot(x_ref[...], w_ref[...],
                            preferred_element_type=jnp.float32)

    @pl.when(pl.program_id(2) == pl.num_programs(2) - 1)
    def _():
        acc = acc_ref[...] + b_ref[...]
        if activation == "relu":
            acc = jnp.maximum(acc, 0.0)
        elif activation == "leaky_relu":
            acc = jnp.where(acc >= 0.0, acc, 0.01 * acc)
        o_ref[...] = acc.astype(o_ref.dtype)


def pack_dense(w, b):
    """Pre-pad to (8,128) multiples and pre-cast to bf16 ONCE (outside jit)."""
    K, N = w.shape
    Kp, Np = _round_up(K, 128), _round_up(N, 128)
    return {
        "w": jnp.pad(w, ((0, Kp - K), (0, Np - N))).astype(jnp.bfloat16),
        "b": jnp.pad(b, (0, Np - N)).reshape(1, Np).astype(jnp.float32),
    }


def matmul_bias_packed(x, wp, bp, n_out, activation="none",
                       out_dtype=jnp.float32):
    """x:(M,K) @ pre-packed wp:(Kp,Np) + bp -> (M,n_out)."""
    M, K = x.shape
    Kp, Np = wp.shape
    tm = min(_round_up(max(M, 1), 8), 256)
    Mp = _round_up(M, tm)
    tk = _pick_tile(Kp, 1024)   # v5e-safe caps
    tn = _pick_tile(Np, 512)

    xp = x if x.dtype == jnp.bfloat16 else x.astype(jnp.bfloat16)
    xp = jnp.pad(xp, ((0, Mp - M), (0, Kp - K)))

    if tk == Kp:  # single K step: no accumulator scratch, no epilogue copy
        out = pl.pallas_call(
            functools.partial(_mm_single_kernel, activation=activation),
            out_shape=jax.ShapeDtypeStruct((Mp, Np), out_dtype),
            grid_spec=pltpu.PrefetchScalarGridSpec(
                num_scalar_prefetch=0,
                grid=(Mp // tm, Np // tn),
                in_specs=[
                    pl.BlockSpec((tm, Kp), lambda i, j: (i, 0)),
                    pl.BlockSpec((Kp, tn), lambda i, j: (0, j)),
                    pl.BlockSpec((1, tn), lambda i, j: (0, j)),
                ],
                out_specs=pl.BlockSpec((tm, tn), lambda i, j: (i, j)),
            ),
            compiler_params=pltpu.CompilerParams(
                dimension_semantics=("parallel", "parallel")),
        )(xp, wp, bp)
    else:
        out = pl.pallas_call(
            functools.partial(_mm_acc_kernel, activation=activation),
            out_shape=jax.ShapeDtypeStruct((Mp, Np), out_dtype),
            grid_spec=pltpu.PrefetchScalarGridSpec(
                num_scalar_prefetch=0,
                grid=(Mp // tm, Np // tn, Kp // tk),
                in_specs=[
                    pl.BlockSpec((tm, tk), lambda i, j, k: (i, k)),
                    pl.BlockSpec((tk, tn), lambda i, j, k: (k, j)),
                    pl.BlockSpec((1, tn), lambda i, j, k: (0, j)),
                ],
                out_specs=pl.BlockSpec((tm, tn), lambda i, j, k: (i, j)),
                scratch_shapes=[pltpu.VMEM((tm, tn), jnp.float32)],
            ),
            compiler_params=pltpu.CompilerParams(
                dimension_semantics=("parallel", "parallel", "arbitrary")),
        )(xp, wp, bp)
    return out[:M, :n_out]


def conv1x1_nhwc(x, layer, n_out, activation="none", out_dtype=jnp.float32):
    B, H, W, Cin = x.shape
    y = matmul_bias_packed(x.reshape(B * H * W, Cin), layer["w"], layer["b"],
                           n_out, activation, out_dtype)
    return y.reshape(B, H, W, -1)


def conv3x3_nhwc(x, layer, n_out, activation="none", out_dtype=jnp.float32):
    # TODO(synk): overlapping 3x3 im2col stays in XLA (shifted windows are not
    # expressible via BlockSpec index_map); it is built in bf16 so its HBM
    # round trip is half of the previous f32 version.
    B, H, W, Cin = x.shape
    xb = x if x.dtype == jnp.bfloat16 else x.astype(jnp.bfloat16)
    xp = jnp.pad(xb, ((0, 0), (1, 1), (1, 1), (0, 0)))
    cols = [xp[:, dy:dy + H, dx:dx + W, :] for dy in range(3) for dx in range(3)]
    patches = jnp.concatenate(cols, axis=-1).reshape(B * H * W, 9 * Cin)
    y = matmul_bias_packed(patches, layer["w"], layer["b"], n_out,
                           activation, out_dtype)
    return y.reshape(B, H, W, -1)


# ---------------------------------------------------------------------------
# Pallas kernel 2: mega-fused backbone + input_proj + FCOS branch
#   rows = (bs*bh*bw) backbone pixels.  Inside one call:
#     bb    = relu(patches @ W_bb + b_bb)                 (backbone patch-embed)
#     src   = bb @ W_proj + b_proj                        (input_proj 1x1)
#     tower = relu(bb @ W_tower[3584:] + rank1_rows)      (FCOS tower; the
#              repeated-density half W_tower[:3584] is a rank-1 per-row bias)
#     heads = tower @ [W_cls|W_box|W_ctr] + bias          (3 heads, f32 matmul)
#     exp() applied to the box columns in the epilogue (EUP, free slot).
#   The (rows, 3584) backbone intermediate never touches HBM.  Weights arrive
#   pre-padded bf16 (packed once outside jit).
# ---------------------------------------------------------------------------
def _backbone_fcos_kernel(patch_ref, wbb_ref, bbb_ref, wproj_ref, bproj_ref,
                          wtow_ref, towb_ref, whead_ref, bhead_ref,
                          src_ref, head_ref):
    bb = jnp.dot(patch_ref[...], wbb_ref[...], preferred_element_type=jnp.float32)
    bb = jnp.maximum(bb + bbb_ref[...], 0.0)
    bb16 = bb.astype(jnp.bfloat16)

    src_ref[...] = (jnp.dot(bb16, wproj_ref[...],
                            preferred_element_type=jnp.float32) + bproj_ref[...])

    tower = jnp.maximum(
        jnp.dot(bb16, wtow_ref[...], preferred_element_type=jnp.float32)
        + towb_ref[...], 0.0)

    # tiny 128x128 head matmul kept in f32 to protect the exp'd box branch
    head = (jnp.dot(tower, whead_ref[...], preferred_element_type=jnp.float32)
            + bhead_ref[...])
    col = jax.lax.broadcasted_iota(jnp.int32, head.shape, 1)
    head = jnp.where((col >= 2) & (col < 6), jnp.exp(head), head)
    head_ref[...] = head.astype(head_ref.dtype)


def fused_backbone_fcos(patches_rows, d_rows, packed, *, emb, C_bb):
    """patches_rows:(M, r*r*3) f32, d_rows:(M,1) resized gt_density per pixel.
    Returns src:(M, emb) and heads:(M, 7) = [cls(2) | exp(box)(4) | ctr(1)]."""
    M, Kin = patches_rows.shape
    Kinp = packed["wbb"].shape[0]
    Ns = Nt = Nh = 128  # lane-dense padded widths

    x = jnp.pad(patches_rows, ((0, 0), (0, Kinp - Kin))).astype(jnp.bfloat16)

    # repeated-density half of the 7168-ch concat: contribution is
    # d * column_sum(W_tower[:C_bb]) -> rank-1 per-row bias (colsum pre-done in f32)
    tower_rows = (d_rows * packed["tower_colsum"][None, :]
                  + packed["tower_b"][None, :])
    towb = jnp.pad(tower_rows,
                   ((0, 0), (0, Nt - tower_rows.shape[1]))).astype(jnp.float32)

    # 2-way M split only on multi-TC parts (v7x); one full-M step on v5e/v6e so
    # the MXU is better filled and the 3.5 MiB of weights are DMA'd once.
    num_tiles = 2 if (_is_multi_tc() and M >= 16 and M % 16 == 0) else 1
    tm = M // num_tiles

    src_p, head_p = pl.pallas_call(
        _backbone_fcos_kernel,
        out_shape=(jax.ShapeDtypeStruct((M, Ns), jnp.float32),
                   jax.ShapeDtypeStruct((M, Nh), jnp.float32)),
        grid_spec=pltpu.PrefetchScalarGridSpec(
            num_scalar_prefetch=0,
            grid=(num_tiles,),
            in_specs=[
                pl.BlockSpec((tm, Kinp), lambda i: (i, 0)),
                pl.BlockSpec((Kinp, C_bb), lambda i: (0, 0)),
                pl.BlockSpec((1, C_bb), lambda i: (0, 0)),
                pl.BlockSpec((C_bb, Ns), lambda i: (0, 0)),
                pl.BlockSpec((1, Ns), lambda i: (0, 0)),
                pl.BlockSpec((C_bb, Nt), lambda i: (0, 0)),
                pl.BlockSpec((tm, Nt), lambda i: (i, 0)),
                pl.BlockSpec((Nt, Nh), lambda i: (0, 0)),
                pl.BlockSpec((1, Nh), lambda i: (0, 0)),
            ],
            out_specs=[pl.BlockSpec((tm, Ns), lambda i: (i, 0)),
                       pl.BlockSpec((tm, Nh), lambda i: (i, 0))],
        ),
        compiler_params=pltpu.CompilerParams(dimension_semantics=("parallel",)),
    )(x, packed["wbb"], packed["bbb"], packed["wproj"], packed["bproj"],
      packed["wtow"], towb, packed["whead"], packed["bhead"])
    return src_p[:, :emb], head_p[:, :7]


# ---------------------------------------------------------------------------
# Pallas kernel 3: fused depthwise correlation + softmax(objects)-weighted sum
#   Lane-dense layout: taps (k*k, bs*H*W*C flattened, c fastest).  The NC axis
#   is tiled across a parallel grid (bounds VMEM, both v7x cores work).  The
#   object kernels are replicated only to one lane-tile width (tn), never to
#   bs*H*W.  The KK taps are unrolled so no (O,KK,NC) temporary exists, and the
#   softmax normalization uses EUP reciprocal.
#   Equivalent to the grouped F.conv2d / softmax(dim=1) / mul / sum(dim=1).
# ---------------------------------------------------------------------------
def _corr_softmax_kernel(feat_ref, ker_ref, o_ref):
    kk = feat_ref.shape[0]
    corr = feat_ref[pl.ds(0, 1), :] * ker_ref[0]          # (1,TN)*(O,TN)->(O,TN)
    for t in range(1, kk):                                # unrolled, no 3-D temp
        corr = corr + feat_ref[pl.ds(t, 1), :] * ker_ref[t]
    m = jnp.max(corr, axis=0, keepdims=True)
    e = jnp.exp(corr - m)
    s0 = jnp.sum(e, axis=0, keepdims=True)
    s1 = jnp.sum(e * corr, axis=0, keepdims=True)
    o_ref[...] = s1 * pl.reciprocal(s0, approx=True)


def correlation_softmax_fuse(feat_nhwc, ker128, ksize):
    # feat_nhwc: (bs,H,W,C); ker128: (O, k*k, 128) = obj kernels tiled 128//C.
    bs, H, W, C = feat_nhwc.shape
    O, KK, _ = ker128.shape
    pad = ksize // 2
    fp = jnp.pad(feat_nhwc, ((0, 0), (pad, pad), (pad, pad), (0, 0)))
    taps = jnp.stack([fp[:, dy:dy + H, dx:dx + W, :]
                      for dy in range(ksize) for dx in range(ksize)], axis=0)
    NC = bs * H * W * C
    NCp = _round_up(NC, 128)
    taps2 = jnp.pad(taps.reshape(KK, NC), ((0, 0), (0, NCp - NC)))

    tn = _pick_tile(NCp, 4096)
    # replicate the tiny per-channel kernel only to one lane-tile (tn), tap-major
    ker_t = jnp.transpose(jnp.tile(ker128, (1, 1, tn // 128)), (1, 0, 2))  # (KK,O,tn)

    out = pl.pallas_call(
        _corr_softmax_kernel,
        out_shape=jax.ShapeDtypeStruct((1, NCp), jnp.float32),
        grid_spec=pltpu.PrefetchScalarGridSpec(
            num_scalar_prefetch=0,
            grid=(NCp // tn,),
            in_specs=[pl.BlockSpec((KK, tn), lambda i: (0, i)),
                      pl.BlockSpec((KK, O, tn), lambda i: (0, 0, 0))],
            out_specs=pl.BlockSpec((1, tn), lambda i: (0, i)),
        ),
        compiler_params=pltpu.CompilerParams(dimension_semantics=("parallel",)),
    )(taps2, ker_t)
    return out[0, :NC].reshape(bs, H, W, C)


# ---------------------------------------------------------------------------
# Plain-JAX glue (sub-module stand-ins, reshapes, resize, locations)
# ---------------------------------------------------------------------------
def _patchify(x, r):
    B, H, W, C = x.shape
    x = x.reshape(B, H // r, r, W // r, r, C)
    x = x.transpose(0, 1, 3, 2, 4, 5)
    return x.reshape(B, H // r, W // r, r * r * C)


def compute_location_per_level(height, width, stride=1):
    shift_x = jnp.arange(0, width * stride, stride, dtype=jnp.float32)
    shift_y = jnp.arange(0, height * stride, stride, dtype=jnp.float32)
    shift_y, shift_x = jnp.meshgrid(shift_y, shift_x, indexing="ij")
    return jnp.stack((shift_x.reshape(-1), shift_y.reshape(-1)), axis=1) + stride // 2


def density_regressor(x, packed, cfg):
    # Stand-in DensityMapRegressor: (conv3x3 + LeakyReLU + 2x bilinear up) x
    # log2(reduction), then 1x1 conv -> single density channel.  Intermediate
    # layers stay bf16 end-to-end; final density is f32.
    assert cfg["reduction"] == 8
    c1, c2, c3, c4 = cfg["reg_channels"]

    def up2(h):
        B, H, W, C = h.shape
        return jax.image.resize(h, (B, H * 2, W * 2, C), "bilinear")

    h = conv3x3_nhwc(x, packed["reg1"], c1, "leaky_relu", jnp.bfloat16)
    h = up2(h)
    h = conv3x3_nhwc(h, packed["reg2"], c2, "leaky_relu", jnp.bfloat16)
    h = up2(h)
    h = conv3x3_nhwc(h, packed["reg3"], c3, "leaky_relu", jnp.bfloat16)
    h = up2(h)
    h = conv1x1_nhwc(h, packed["reg4"], c4, "leaky_relu", jnp.float32)
    return h  # (B, image_size, image_size, 1)


# ---------------------------------------------------------------------------
# COTR forward
# ---------------------------------------------------------------------------
def cotr_forward(packed, x, bboxes, gt_density, targets, *, cfg):
    del bboxes, targets  # unused under zero_shot=True / use_appearance=False
    r, emb = cfg["reduction"], cfg["emb_dim"]
    k = cfg["kernel_dim"]
    C_bb = cfg["backbone_channels"]
    bs = x.shape[0]

    x_nhwc = jnp.transpose(x, (0, 2, 3, 1))
    patches = _patchify(x_nhwc, r)                     # (bs, bh, bw, r*r*3)
    bh, bw = patches.shape[1], patches.shape[2]
    M = bs * bh * bw

    # resized GT density (first 3584 channels of the FCOS concat are this value
    # repeated -> folded into a rank-1 per-row bias inside the fused kernel).
    d_small = jax.image.resize(gt_density, (bs, 1, bh, bw), method="bilinear")
    d_rows = jnp.transpose(d_small, (0, 2, 3, 1)).reshape(M, 1)

    # backbone + input_proj + full FCOS branch in one Pallas call
    src_rows, head_rows = fused_backbone_fcos(
        patches.reshape(M, -1), d_rows, packed, emb=emb, C_bb=C_bb)

    # num_encoder_layers == 0 -> memory = src (positional encodings are dead code)
    memory = src_rows.reshape(bs, bh, bw, emb)

    # zero-shot objectness prototypes (shared over batch) -> fused correlation
    correlation = correlation_softmax_fuse(memory, packed["objectness128"], k)

    # density regression head (single output level since num_decoder_layers == 0)
    density = density_regressor(correlation, packed, cfg)   # (bs, H, W, 1)

    heads = head_rows.reshape(bs, bh, bw, 7)
    cls_pred = heads[..., 0:2]
    box_pred = heads[..., 2:6]        # exp already applied inside the kernel
    center_pred = heads[..., 6:7]

    location = [compute_location_per_level(bh, bw, 1)]

    to_nchw = lambda t: jnp.transpose(t, (0, 3, 1, 2))
    return (to_nchw(cls_pred), to_nchw(box_pred), to_nchw(center_pred),
            location, to_nchw(density), [])  # outputs[:-1] is empty (1 level)


# ---------------------------------------------------------------------------
# Deterministic parameter init + one-time packing (outside the jitted forward)
# ---------------------------------------------------------------------------
def init_params(key, cfg):
    emb, r = cfg["emb_dim"], cfg["reduction"]
    k, O = cfg["kernel_dim"], cfg["num_objects"]
    C_bb = cfg["backbone_channels"]
    c1, c2, c3, c4 = cfg["reg_channels"]
    ks = jax.random.split(key, 12)

    def dense(kk, fan_in, fan_out):
        return (jax.random.normal(kk, (fan_in, fan_out), jnp.float32)
                / jnp.sqrt(jnp.float32(fan_in)))

    prior = 0.01
    return {
        "backbone_w": dense(ks[0], r * r * 3, C_bb),
        "backbone_b": jnp.zeros((C_bb,), jnp.float32),
        "proj_w": dense(ks[1], C_bb, emb),
        "proj_b": jnp.zeros((emb,), jnp.float32),
        # nn.Parameter((num_objects, kernel_dim**2, emb_dim)) with nn.init.normal_
        "objectness": jax.random.normal(ks[2], (O, k * k, emb), jnp.float32),
        "reg_w1": dense(ks[3], 9 * emb, c1), "reg_b1": jnp.zeros((c1,), jnp.float32),
        "reg_w2": dense(ks[4], 9 * c1, c2),  "reg_b2": jnp.zeros((c2,), jnp.float32),
        "reg_w3": dense(ks[5], 9 * c2, c3),  "reg_b3": jnp.zeros((c3,), jnp.float32),
        "reg_w4": dense(ks[6], c3, c4),      "reg_b4": jnp.zeros((c4,), jnp.float32),
        "fcos_tower_w": dense(ks[7], 2 * C_bb, 64),
        "fcos_tower_b": jnp.zeros((64,), jnp.float32),
        "fcos_cls_w": dense(ks[8], 64, 2),
        "fcos_cls_b": jnp.full((2,), -math.log((1.0 - prior) / prior), jnp.float32),
        "fcos_box_w": dense(ks[9], 64, 4),  "fcos_box_b": jnp.zeros((4,), jnp.float32),
        "fcos_ctr_w": dense(ks[10], 64, 1), "fcos_ctr_b": jnp.zeros((1,), jnp.float32),
    }


def pack_params(params, cfg):
    """Pad / cast weights once, outside the hot path."""
    emb, r = cfg["emb_dim"], cfg["reduction"]
    C_bb = cfg["backbone_channels"]
    assert 128 % emb == 0  # lane-tiling of the objectness kernels relies on this
    Kin = r * r * 3
    Kinp = _round_up(Kin, 128)
    Ns = Nt = Nh = 128

    w_tower = params["fcos_tower_w"]
    w_d, w_bb2 = w_tower[:C_bb], w_tower[C_bb:]
    whead = jnp.concatenate(
        [params["fcos_cls_w"], params["fcos_box_w"], params["fcos_ctr_w"]], axis=1)
    bhead = jnp.concatenate(
        [params["fcos_cls_b"], params["fcos_box_b"], params["fcos_ctr_b"]])

    return {
        # fused backbone / input_proj / FCOS kernel weights
        "wbb": jnp.pad(params["backbone_w"],
                       ((0, Kinp - Kin), (0, 0))).astype(jnp.bfloat16),
        "bbb": params["backbone_b"].reshape(1, C_bb).astype(jnp.float32),
        "wproj": jnp.pad(params["proj_w"],
                         ((0, 0), (0, Ns - emb))).astype(jnp.bfloat16),
        "bproj": jnp.pad(params["proj_b"],
                         (0, Ns - emb)).reshape(1, Ns).astype(jnp.float32),
        "wtow": jnp.pad(w_bb2,
                        ((0, 0), (0, Nt - w_bb2.shape[1]))).astype(jnp.bfloat16),
        "tower_colsum": jnp.sum(w_d, axis=0).astype(jnp.float32),  # f32 fold
        "tower_b": params["fcos_tower_b"].astype(jnp.float32),
        "whead": jnp.pad(whead, ((0, Nt - whead.shape[0]),
                                 (0, Nh - whead.shape[1]))).astype(jnp.float32),
        "bhead": jnp.pad(bhead, (0, Nh - bhead.shape[0])
                         ).reshape(1, Nh).astype(jnp.float32),
        # objectness kernels replicated only to one 128-lane group
        "objectness128": jnp.tile(params["objectness"],
                                  (1, 1, 128 // emb)).astype(jnp.float32),
        # density-regressor convs (pre-padded bf16)
        "reg1": pack_dense(params["reg_w1"], params["reg_b1"]),
        "reg2": pack_dense(params["reg_w2"], params["reg_b2"]),
        "reg3": pack_dense(params["reg_w3"], params["reg_b3"]),
        "reg4": pack_dense(params["reg_w4"], params["reg_b4"]),
    }


if __name__ == "__main__":
    cfg = dict(
        image_size=32, reduction=8, emb_dim=32, kernel_dim=3, num_objects=3,
        backbone_channels=3584,  # matches the hardcoded 3584 / FCOSHead(7168) in forward
        reg_channels=(64, 32, 16, 1),
        num_encoder_layers=0, num_decoder_layers=0,
        zero_shot=True, use_objectness=True, use_appearance=False,
        use_query_pos_emb=False,
    )
    key = jax.random.PRNGKey(0)
    kx, kb, kd, kp = jax.random.split(key, 4)
    bs = 2
    x = jax.random.normal(kx, (bs, 3, cfg["image_size"], cfg["image_size"]), jnp.float32)
    bboxes = jax.random.uniform(kb, (bs, cfg["num_objects"], 4), jnp.float32) * cfg["image_size"]
    gt_density = jax.random.uniform(kd, (bs, 1, cfg["image_size"], cfg["image_size"]), jnp.float32)
    targets = None
    params = init_params(kp, cfg)
    packed = pack_params(params, cfg)   # one-time pad/cast, outside the jit

    fwd = jax.jit(functools.partial(cotr_forward, cfg=cfg))
    outs = fwd(packed, x, bboxes, gt_density, targets)
    jax.block_until_ready(outs)
    print("KERNEL_OK")
</pallas_src>

<mosaic_0001>
module attributes {stable_mosaic.version = 11 : i64} {
  func.func @_backbone_fcos_kernel(%arg0: i32, %arg1: memref<32x256xbf16, #tpu.memory_space<vmem>>, %arg2: memref<256x3584xbf16, #tpu.memory_space<vmem>>, %arg3: memref<1x3584xf32, #tpu.memory_space<vmem>>, %arg4: memref<3584x128xbf16, #tpu.memory_space<vmem>>, %arg5: memref<1x128xf32, #tpu.memory_space<vmem>>, %arg6: memref<3584x128xbf16, #tpu.memory_space<vmem>>, %arg7: memref<32x128xf32, #tpu.memory_space<vmem>>, %arg8: memref<128x128xf32, #tpu.memory_space<vmem>>, %arg9: memref<1x128xf32, #tpu.memory_space<vmem>>, %arg10: memref<32x128xf32, #tpu.memory_space<vmem>>, %arg11: memref<32x128xf32, #tpu.memory_space<vmem>>) attributes {dimension_semantics = [#tpu.dimension_semantics<parallel>], iteration_bounds = array<i64: 1>, scalar_prefetch = 0 : i64, scratch_operands = 0 : i64, tpu.core_type = #tpu.core_type<tc>, window_params = [{transform_indices = @transform_0, window_bounds = array<i64: 32, 256>}, {pipeline_mode = #tpu.pipeline_mode<synchronous>, transform_indices = @transform_1, window_bounds = array<i64: 256, 3584>}, {pipeline_mode = #tpu.pipeline_mode<synchronous>, transform_indices = @transform_2, window_bounds = array<i64: 1, 3584>}, {pipeline_mode = #tpu.pipeline_mode<synchronous>, transform_indices = @transform_3, window_bounds = array<i64: 3584, 128>}, {pipeline_mode = #tpu.pipeline_mode<synchronous>, transform_indices = @transform_4, window_bounds = array<i64: 1, 128>}, {pipeline_mode = #tpu.pipeline_mode<synchronous>, transform_indices = @transform_5, window_bounds = array<i64: 3584, 128>}, {transform_indices = @transform_6, window_bounds = array<i64: 32, 128>}, {pipeline_mode = #tpu.pipeline_mode<synchronous>, transform_indices = @transform_7, window_bounds = array<i64: 128, 128>}, {pipeline_mode = #tpu.pipeline_mode<synchronous>, transform_indices = @transform_8, window_bounds = array<i64: 1, 128>}, {transform_indices = @transform_9, window_bounds = array<i64: 32, 128>}, {transform_indices = @transform_10, window_bounds = array<i64: 32, 128>}]} {
    %c0 = arith.constant 0 : index
    %c0_0 = arith.constant 0 : index
    %0 = vector.load %arg1[%c0, %c0_0] : memref<32x256xbf16, #tpu.memory_space<vmem>>, vector<32x256xbf16>
    %c0_1 = arith.constant 0 : index
    %c0_2 = arith.constant 0 : index
    %1 = vector.load %arg2[%c0_1, %c0_2] : memref<256x3584xbf16, #tpu.memory_space<vmem>>, vector<256x3584xbf16>
    %cst = arith.constant dense<0.000000e+00> : vector<32x3584xf32>
    %2 = tpu.matmul %0, %1, %cst {dimension_numbers = #tpu.dot_dimension_numbers<[1], [0], [0], [1], [0, 0, 1, 1], [], []>} : vector<32x256xbf16>, vector<256x3584xbf16>, vector<32x3584xf32> -> vector<32x3584xf32>
    %c0_3 = arith.constant 0 : index
    %c0_4 = arith.constant 0 : index
    %3 = vector.load %arg3[%c0_3, %c0_4] : memref<1x3584xf32, #tpu.memory_space<vmem>>, vector<1x3584xf32>
    %4 = vector.broadcast %3 : vector<1x3584xf32> to vector<32x3584xf32>
    %5 = arith.addf %2, %4 : vector<32x3584xf32>
    %cst_5 = arith.constant 0.000000e+00 : f32
    %6 = vector.broadcast %cst_5 : f32 to vector<32x3584xf32>
    %7 = arith.maximumf %5, %6 : vector<32x3584xf32>
    %8 = arith.truncf %7 : vector<32x3584xf32> to vector<32x3584xbf16>
    %c0_6 = arith.constant 0 : index
    %c0_7 = arith.constant 0 : index
    %9 = vector.load %arg4[%c0_6, %c0_7] : memref<3584x128xbf16, #tpu.memory_space<vmem>>, vector<3584x128xbf16>
    %cst_8 = arith.constant dense<0.000000e+00> : vector<32x128xf32>
    %10 = tpu.matmul %8, %9, %cst_8 {dimension_numbers = #tpu.dot_dimension_numbers<[1], [0], [0], [1], [0, 0, 1, 1], [], []>} : vector<32x3584xbf16>, vector<3584x128xbf16>, vector<32x128xf32> -> vector<32x128xf32>
    %c0_9 = arith.constant 0 : index
    %c0_10 = arith.constant 0 : index
    %11 = vector.load %arg5[%c0_9, %c0_10] : memref<1x128xf32, #tpu.memory_space<vmem>>, vector<1x128xf32>
    %12 = vector.broadcast %11 : vector<1x128xf32> to vector<32x128xf32>
    %13 = arith.addf %10, %12 : vector<32x128xf32>
    %c0_11 = arith.constant 0 : index
    %c0_12 = arith.constant 0 : index
    %14 = vector.load %arg10[%c0_11, %c0_12] : memref<32x128xf32, #tpu.memory_space<vmem>>, vector<32x128xf32>
    tpu.vector_store %arg10[%c0_11, %c0_12], %13 {strides = array<i32>} : memref<32x128xf32, #tpu.memory_space<vmem>>, vector<32x128xf32>,
    %c0_13 = arith.constant 0 : index
    %c0_14 = arith.constant 0 : index
    %15 = vector.load %arg6[%c0_13, %c0_14] : memref<3584x128xbf16, #tpu.memory_space<vmem>>, vector<3584x128xbf16>
    %cst_15 = arith.constant dense<0.000000e+00> : vector<32x128xf32>
    %16 = tpu.matmul %8, %15, %cst_15 {dimension_numbers = #tpu.dot_dimension_numbers<[1], [0], [0], [1], [0, 0, 1, 1], [], []>} : vector<32x3584xbf16>, vector<3584x128xbf16>, vector<32x128xf32> -> vector<32x128xf32>
    %c0_16 = arith.constant 0 : index
    %c0_17 = arith.constant 0 : index
    %17 = vector.load %arg7[%c0_16, %c0_17] : memref<32x128xf32, #tpu.memory_space<vmem>>, vector<32x128xf32>
    %18 = arith.addf %16, %17 : vector<32x128xf32>
    %cst_18 = arith.constant 0.000000e+00 : f32
    %19 = vector.broadcast %cst_18 : f32 to vector<32x128xf32>
    %20 = arith.maximumf %18, %19 : vector<32x128xf32>
    %c0_19 = arith.constant 0 : index
    %c0_20 = arith.constant 0 : index
    %21 = vector.load %arg8[%c0_19, %c0_20] : memref<128x128xf32, #tpu.memory_space<vmem>>, vector<128x128xf32>
    %cst_21 = arith.constant dense<0.000000e+00> : vector<32x128xf32>
    %22 = tpu.matmul %20, %21, %cst_21 {dimension_numbers = #tpu.dot_dimension_numbers<[1], [0], [0], [1], [0, 0, 1, 1], [], []>} : vector<32x128xf32>, vector<128x128xf32>, vector<32x128xf32> -> vector<32x128xf32>
    %c0_22 = arith.constant 0 : index
    %c0_23 = arith.constant 0 : index
    %23 = vector.load %arg9[%c0_22, %c0_23] : memref<1x128xf32, #tpu.memory_space<vmem>>, vector<1x128xf32>
    %24 = vector.broadcast %23 : vector<1x128xf32> to vector<32x128xf32>
    %25 = arith.addf %22, %24 : vector<32x128xf32>
    %26 = tpu.iota {dimensions = array<i32: 1>} : vector<32x128xi32>
    %c2_i32 = arith.constant 2 : i32
    %27 = vector.broadcast %c2_i32 : i32 to vector<32x128xi32>
    %28 = arith.cmpi sge, %26, %27 : vector<32x128xi32>
    %c6_i32 = arith.constant 6 : i32
    %29 = vector.broadcast %c6_i32 : i32 to vector<32x128xi32>
    %30 = arith.cmpi slt, %26, %29 : vector<32x128xi32>
    %31 = arith.andi %28, %30 : vector<32x128xi1>
    %32 = math.exp %25 : vector<32x128xf32>
    %33 = arith.select %31, %32, %25 : vector<32x128xi1>, vector<32x128xf32>
    %c0_24 = arith.constant 0 : index
    %c0_25 = arith.constant 0 : index
    %34 = vector.load %arg11[%c0_24, %c0_25] : memref<32x128xf32, #tpu.memory_space<vmem>>, vector<32x128xf32>
    tpu.vector_store %arg11[%c0_24, %c0_25], %33 {strides = array<i32>} : memref<32x128xf32, #tpu.memory_space<vmem>>, vector<32x128xf32>,
    return
  }
  func.func @transform_0(%arg0: i32) -> (i32, i32) {
    %c0_i32 = arith.constant 0 : i32
    %c0_i32_0 = arith.constant 0 : i32
    return %arg0, %c0_i32 : i32, i32
  }
  func.func @transform_1(%arg0: i32) -> (i32, i32) {
    %c0_i32 = arith.constant 0 : i32
    %c0_i32_0 = arith.constant 0 : i32
    %c0_i32_1 = arith.constant 0 : i32
    return %c0_i32, %c0_i32_0 : i32, i32
  }
  func.func @transform_2(%arg0: i32) -> (i32, i32) {
    %c0_i32 = arith.constant 0 : i32
    %c0_i32_0 = arith.constant 0 : i32
    %c0_i32_1 = arith.constant 0 : i32
    return %c0_i32, %c0_i32_0 : i32, i32
  }
  func.func @transform_3(%arg0: i32) -> (i32, i32) {
    %c0_i32 = arith.constant 0 : i32
    %c0_i32_0 = arith.constant 0 : i32
    %c0_i32_1 = arith.constant 0 : i32
    return %c0_i32, %c0_i32_0 : i32, i32
  }
  func.func @transform_4(%arg0: i32) -> (i32, i32) {
    %c0_i32 = arith.constant 0 : i32
    %c0_i32_0 = arith.constant 0 : i32
    %c0_i32_1 = arith.constant 0 : i32
    return %c0_i32, %c0_i32_0 : i32, i32
  }
  func.func @transform_5(%arg0: i32) -> (i32, i32) {
    %c0_i32 = arith.constant 0 : i32
    %c0_i32_0 = arith.constant 0 : i32
    %c0_i32_1 = arith.constant 0 : i32
    return %c0_i32, %c0_i32_0 : i32, i32
  }
  func.func @transform_6(%arg0: i32) -> (i32, i32) {
    %c0_i32 = arith.constant 0 : i32
    %c0_i32_0 = arith.constant 0 : i32
    return %arg0, %c0_i32 : i32, i32
  }
  func.func @transform_7(%arg0: i32) -> (i32, i32) {
    %c0_i32 = arith.constant 0 : i32
    %c0_i32_0 = arith.constant 0 : i32
    %c0_i32_1 = arith.constant 0 : i32
    return %c0_i32, %c0_i32_0 : i32, i32
  }
  func.func @transform_8(%arg0: i32) -> (i32, i32) {
    %c0_i32 = arith.constant 0 : i32
    %c0_i32_0 = arith.constant 0 : i32
    %c0_i32_1 = arith.constant 0 : i32
    return %c0_i32, %c0_i32_0 : i32, i32
  }
  func.func @transform_9(%arg0: i32) -> (i32, i32) {
    %c0_i32 = arith.constant 0 : i32
    %c0_i32_0 = arith.constant 0 : i32
    return %arg0, %c0_i32 : i32, i32
  }
  func.func @transform_10(%arg0: i32) -> (i32, i32) {
    %c0_i32 = arith.constant 0 : i32
    %c0_i32_0 = arith.constant 0 : i32
    return %arg0, %c0_i32 : i32, i32
  }
}

module attributes {stable_mosaic.version = 11 : i64} {
  func.func @_corr_softmax_kernel(%arg0: i32, %arg1: memref<9x1024xf32, #tpu.memory_space<vmem>>, %arg2: memref<9x3x1024xf32, #tpu.memory_space<vmem>>, %arg3: memref<1x1024xf32, #tpu.memory_space<vmem>>) attributes {dimension_semantics = [#tpu.dimension_semantics<parallel>], iteration_bounds = array<i64: 1>, scalar_prefetch = 0 : i64, scratch_operands = 0 : i64, tpu.core_type = #tpu.core_type<tc>, window_params = [{transform_indices = @transform_0, window_bounds = array<i64: 9, 1024>}, {pipeline_mode = #tpu.pipeline_mode<synchronous>, transform_indices = @transform_1, window_bounds = array<i64: 9, 3, 1024>}, {transform_indices = @transform_2, window_bounds = array<i64: 1, 1024>}]} {
    %c0 = arith.constant 0 : index
    %c0_0 = arith.constant 0 : index
    %0 = vector.load %arg1[%c0, %c0_0] : memref<9x1024xf32, #tpu.memory_space<vmem>>, vector<1x1024xf32>
    %c0_1 = arith.constant 0 : index
    %c0_2 = arith.constant 0 : index
    %c0_3 = arith.constant 0 : index
    %1 = vector.load %arg2[%c0_1, %c0_2, %c0_3] : memref<9x3x1024xf32, #tpu.memory_space<vmem>>, vector<1x3x1024xf32>
    %2 = vector.shape_cast %1 : vector<1x3x1024xf32> to vector<3x1024xf32>
    %3 = vector.broadcast %0 : vector<1x1024xf32> to vector<3x1024xf32>
    %4 = arith.mulf %3, %2 : vector<3x1024xf32>
    %c1 = arith.constant 1 : index
    %c0_4 = arith.constant 0 : index
    %5 = vector.load %arg1[%c1, %c0_4] : memref<9x1024xf32, #tpu.memory_space<vmem>>, vector<1x1024xf32>
    %c1_5 = arith.constant 1 : index
    %c0_6 = arith.constant 0 : index
    %c0_7 = arith.constant 0 : index
    %6 = vector.load %arg2[%c1_5, %c0_6, %c0_7] : memref<9x3x1024xf32, #tpu.memory_space<vmem>>, vector<1x3x1024xf32>
    %7 = vector.shape_cast %6 : vector<1x3x1024xf32> to vector<3x1024xf32>
    %8 = vector.broadcast %5 : vector<1x1024xf32> to vector<3x1024xf32>
    %9 = arith.mulf %8, %7 : vector<3x1024xf32>
    %10 = arith.addf %4, %9 : vector<3x1024xf32>
    %c2 = arith.constant 2 : index
    %c0_8 = arith.constant 0 : index
    %11 = vector.load %arg1[%c2, %c0_8] : memref<9x1024xf32, #tpu.memory_space<vmem>>, vector<1x1024xf32>
    %c2_9 = arith.constant 2 : index
    %c0_10 = arith.constant 0 : index
    %c0_11 = arith.constant 0 : index
    %12 = vector.load %arg2[%c2_9, %c0_10, %c0_11] : memref<9x3x1024xf32, #tpu.memory_space<vmem>>, vector<1x3x1024xf32>
    %13 = vector.shape_cast %12 : vector<1x3x1024xf32> to vector<3x1024xf32>
    %14 = vector.broadcast %11 : vector<1x1024xf32> to vector<3x1024xf32>
    %15 = arith.mulf %14, %13 : vector<3x1024xf32>
    %16 = arith.addf %10, %15 : vector<3x1024xf32>
    %c3 = arith.constant 3 : index
    %c0_12 = arith.constant 0 : index
    %17 = vector.load %arg1[%c3, %c0_12] : memref<9x1024xf32, #tpu.memory_space<vmem>>, vector<1x1024xf32>
    %c3_13 = arith.constant 3 : index
    %c0_14 = arith.constant 0 : index
    %c0_15 = arith.constant 0 : index
    %18 = vector.load %arg2[%c3_13, %c0_14, %c0_15] : memref<9x3x1024xf32, #tpu.memory_space<vmem>>, vector<1x3x1024xf32>
    %19 = vector.shape_cast %18 : vector<1x3x1024xf32> to vector<3x1024xf32>
    %20 = vector.broadcast %17 : vector<1x1024xf32> to vector<3x1024xf32>
    %21 = arith.mulf %20, %19 : vector<3x1024xf32>
    %22 = arith.addf %16, %21 : vector<3x1024xf32>
    %c4 = arith.constant 4 : index
    %c0_16 = arith.constant 0 : index
    %23 = vector.load %arg1[%c4, %c0_16] : memref<9x1024xf32, #tpu.memory_space<vmem>>, vector<1x1024xf32>
    %c4_17 = arith.constant 4 : index
    %c0_18 = arith.constant 0 : index
    %c0_19 = arith.constant 0 : index
    %24 = vector.load %arg2[%c4_17, %c0_18, %c0_19] : memref<9x3x1024xf32, #tpu.memory_space<vmem>>, vector<1x3x1024xf32>
    %25 = vector.shape_cast %24 : vector<1x3x1024xf32> to vector<3x1024xf32>
    %26 = vector.broadcast %23 : vector<1x1024xf32> to vector<3x1024xf32>
    %27 = arith.mulf %26, %25 : vector<3x1024xf32>
    %28 = arith.addf %22, %27 : vector<3x1024xf32>
    %c5 = arith.constant 5 : index
    %c0_20 = arith.constant 0 : index
    %29 = vector.load %arg1[%c5, %c0_20] : memref<9x1024xf32, #tpu.memory_space<vmem>>, vector<1x1024xf32>
    %c5_21 = arith.constant 5 : index
    %c0_22 = arith.constant 0 : index
    %c0_23 = arith.constant 0 : index
    %30 = vector.load %arg2[%c5_21, %c0_22, %c0_23] : memref<9x3x1024xf32, #tpu.memory_space<vmem>>, vector<1x3x1024xf32>
    %31 = vector.shape_cast %30 : vector<1x3x1024xf32> to vector<3x1024xf32>
    %32 = vector.broadcast %29 : vector<1x1024xf32> to vector<3x1024xf32>
    %33 = arith.mulf %32, %31 : vector<3x1024xf32>
    %34 = arith.addf %28, %33 : vector<3x1024xf32>
    %c6 = arith.constant 6 : index
    %c0_24 = arith.constant 0 : index
    %35 = vector.load %arg1[%c6, %c0_24] : memref<9x1024xf32, #tpu.memory_space<vmem>>, vector<1x1024xf32>
    %c6_25 = arith.constant 6 : index
    %c0_26 = arith.constant 0 : index
    %c0_27 = arith.constant 0 : index
    %36 = vector.load %arg2[%c6_25, %c0_26, %c0_27] : memref<9x3x1024xf32, #tpu.memory_space<vmem>>, vector<1x3x1024xf32>
    %37 = vector.shape_cast %36 : vector<1x3x1024xf32> to vector<3x1024xf32>
    %38 = vector.broadcast %35 : vector<1x1024xf32> to vector<3x1024xf32>
    %39 = arith.mulf %38, %37 : vector<3x1024xf32>
    %40 = arith.addf %34, %39 : vector<3x1024xf32>
    %c7 = arith.constant 7 : index
    %c0_28 = arith.constant 0 : index
    %41 = vector.load %arg1[%c7, %c0_28] : memref<9x1024xf32, #tpu.memory_space<vmem>>, vector<1x1024xf32>
    %c7_29 = arith.constant 7 : index
    %c0_30 = arith.constant 0 : index
    %c0_31 = arith.constant 0 : index
    %42 = vector.load %arg2[%c7_29, %c0_30, %c0_31] : memref<9x3x1024xf32, #tpu.memory_space<vmem>>, vector<1x3x1024xf32>
    %43 = vector.shape_cast %42 : vector<1x3x1024xf32> to vector<3x1024xf32>
    %44 = vector.broadcast %41 : vector<1x1024xf32> to vector<3x1024xf32>
    %45 = arith.mulf %44, %43 : vector<3x1024xf32>
    %46 = arith.addf %40, %45 : vector<3x1024xf32>
    %c8 = arith.constant 8 : index
    %c0_32 = arith.constant 0 : index
    %47 = vector.load %arg1[%c8, %c0_32] : memref<9x1024xf32, #tpu.memory_space<vmem>>, vector<1x1024xf32>
    %c8_33 = arith.constant 8 : index
    %c0_34 = arith.constant 0 : index
    %c0_35 = arith.constant 0 : index
    %48 = vector.load %arg2[%c8_33, %c0_34, %c0_35] : memref<9x3x1024xf32, #tpu.memory_space<vmem>>, vector<1x3x1024xf32>
    %49 = vector.shape_cast %48 : vector<1x3x1024xf32> to vector<3x1024xf32>
    %50 = vector.broadcast %47 : vector<1x1024xf32> to vector<3x1024xf32>
    %51 = arith.mulf %50, %49 : vector<3x1024xf32>
    %52 = arith.addf %46, %51 : vector<3x1024xf32>
    %cst = arith.constant dense<0xFF800000> : vector<1024xf32>
    %53 = vector.multi_reduction <maximumf>, %52, %cst [0] : vector<3x1024xf32> to vector<1024xf32>
    %54 = vector.shape_cast %53 : vector<1024xf32> to vector<1x1024xf32>
    %55 = vector.broadcast %54 : vector<1x1024xf32> to vector<3x1024xf32>
    %56 = arith.subf %52, %55 : vector<3x1024xf32>
    %57 = math.exp %56 : vector<3x1024xf32>
    %cst_36 = arith.constant dense<0.000000e+00> : vector<1024xf32>
    %58 = vector.multi_reduction <add>, %57, %cst_36 [0] : vector<3x1024xf32> to vector<1024xf32>
    %59 = vector.shape_cast %58 : vector<1024xf32> to vector<1x1024xf32>
    %60 = arith.mulf %57, %52 : vector<3x1024xf32>
    %cst_37 = arith.constant dense<0.000000e+00> : vector<1024xf32>
    %61 = vector.multi_reduction <add>, %60, %cst_37 [0] : vector<3x1024xf32> to vector<1024xf32>
    %62 = vector.shape_cast %61 : vector<1024xf32> to vector<1x1024xf32>
    %63 = tpu.reciprocal %59 {approx = true} : vector<1x1024xf32> -> vector<1x1024xf32>
    %64 = arith.mulf %62, %63 : vector<1x1024xf32>
    %c0_38 = arith.constant 0 : index
    %c0_39 = arith.constant 0 : index
    %65 = vector.load %arg3[%c0_38, %c0_39] : memref<1x1024xf32, #tpu.memory_space<vmem>>, vector<1x1024xf32>
    tpu.vector_store %arg3[%c0_38, %c0_39], %64 {strides = array<i32>} : memref<1x1024xf32, #tpu.memory_space<vmem>>, vector<1x1024xf32>,
    return
  }
  func.func @transform_0(%arg0: i32) -> (i32, i32) {
    %c0_i32 = arith.constant 0 : i32
    %c0_i32_0 = arith.constant 0 : i32
    return %c0_i32, %arg0 : i32, i32
  }
  func.func @transform_1(%arg0: i32) -> (i32, i32, i32) {
    %c0_i32 = arith.constant 0 : i32
    %c0_i32_0 = arith.constant 0 : i32
    %c0_i32_1 = arith.constant 0 : i32
    %c0_i32_2 = arith.constant 0 : i32
    return %c0_i32, %c0_i32_0, %c0_i32_1 : i32, i32, i32
  }
  func.func @transform_2(%arg0: i32) -> (i32, i32) {
    %c0_i32 = arith.constant 0 : i32
    %c0_i32_0 = arith.constant 0 : i32
    return %c0_i32, %arg0 : i32, i32
  }
}

module attributes {stable_mosaic.version = 11 : i64} {
  func.func @_mm_single_kernel(%arg0: i32, %arg1: i32, %arg2: memref<32x384xbf16, #tpu.memory_space<vmem>>, %arg3: memref<384x128xbf16, #tpu.memory_space<vmem>>, %arg4: memref<1x128xf32, #tpu.memory_space<vmem>>, %arg5: memref<32x128xbf16, #tpu.memory_space<vmem>>) attributes {dimension_semantics = [#tpu.dimension_semantics<parallel>, #tpu.dimension_semantics<parallel>], iteration_bounds = array<i64: 1, 1>, scalar_prefetch = 0 : i64, scratch_operands = 0 : i64, tpu.core_type = #tpu.core_type<tc>, window_params = [{transform_indices = @transform_0, window_bounds = array<i64: 32, 384>}, {transform_indices = @transform_1, window_bounds = array<i64: 384, 128>}, {transform_indices = @transform_2, window_bounds = array<i64: 1, 128>}, {transform_indices = @transform_3, window_bounds = array<i64: 32, 128>}]} {
    %c0 = arith.constant 0 : index
    %c0_0 = arith.constant 0 : index
    %0 = vector.load %arg2[%c0, %c0_0] : memref<32x384xbf16, #tpu.memory_space<vmem>>, vector<32x384xbf16>
    %c0_1 = arith.constant 0 : index
    %c0_2 = arith.constant 0 : index
    %1 = vector.load %arg3[%c0_1, %c0_2] : memref<384x128xbf16, #tpu.memory_space<vmem>>, vector<384x128xbf16>
    %cst = arith.constant dense<0.000000e+00> : vector<32x128xf32>
    %2 = tpu.matmul %0, %1, %cst {dimension_numbers = #tpu.dot_dimension_numbers<[1], [0], [0], [1], [0, 0, 1, 1], [], []>} : vector<32x384xbf16>, vector<384x128xbf16>, vector<32x128xf32> -> vector<32x128xf32>
    %c0_3 = arith.constant 0 : index
    %c0_4 = arith.constant 0 : index
    %3 = vector.load %arg4[%c0_3, %c0_4] : memref<1x128xf32, #tpu.memory_space<vmem>>, vector<1x128xf32>
    %4 = vector.broadcast %3 : vector<1x128xf32> to vector<32x128xf32>
    %5 = arith.addf %2, %4 : vector<32x128xf32>
    %cst_5 = arith.constant 0.000000e+00 : f32
    %6 = vector.broadcast %cst_5 : f32 to vector<32x128xf32>
    %7 = arith.cmpf oge, %5, %6 : vector<32x128xf32>
    %cst_6 = arith.constant 0.00999999977 : f32
    %8 = vector.broadcast %cst_6 : f32 to vector<32x128xf32>
    %9 = arith.mulf %8, %5 : vector<32x128xf32>
    %10 = arith.select %7, %5, %9 : vector<32x128xi1>, vector<32x128xf32>
    %11 = arith.truncf %10 : vector<32x128xf32> to vector<32x128xbf16>
    %c0_7 = arith.constant 0 : index
    %c0_8 = arith.constant 0 : index
    %12 = vector.load %arg5[%c0_7, %c0_8] : memref<32x128xbf16, #tpu.memory_space<vmem>>, vector<32x128xbf16>
    tpu.vector_store %arg5[%c0_7, %c0_8], %11 {strides = array<i32>} : memref<32x128xbf16, #tpu.memory_space<vmem>>, vector<32x128xbf16>,
    return
  }
  func.func @transform_0(%arg0: i32, %arg1: i32) -> (i32, i32) {
    %c0_i32 = arith.constant 0 : i32
    %c0_i32_0 = arith.constant 0 : i32
    return %arg0, %c0_i32 : i32, i32
  }
  func.func @transform_1(%arg0: i32, %arg1: i32) -> (i32, i32) {
    %c0_i32 = arith.constant 0 : i32
    %c0_i32_0 = arith.constant 0 : i32
    return %c0_i32, %arg1 : i32, i32
  }
  func.func @transform_2(%arg0: i32, %arg1: i32) -> (i32, i32) {
    %c0_i32 = arith.constant 0 : i32
    %c0_i32_0 = arith.constant 0 : i32
    return %c0_i32, %arg1 : i32, i32
  }
  func.func @transform_3(%arg0: i32, %arg1: i32) -> (i32, i32) {
    %c0_i32 = arith.constant 0 : i32
    return %arg0, %arg1 : i32, i32
  }
}

module attributes {stable_mosaic.version = 11 : i64} {
  func.func @_mm_single_kernel(%arg0: i32, %arg1: i32, %arg2: memref<128x640xbf16, #tpu.memory_space<vmem>>, %arg3: memref<640x128xbf16, #tpu.memory_space<vmem>>, %arg4: memref<1x128xf32, #tpu.memory_space<vmem>>, %arg5: memref<128x128xbf16, #tpu.memory_space<vmem>>) attributes {dimension_semantics = [#tpu.dimension_semantics<parallel>, #tpu.dimension_semantics<parallel>], iteration_bounds = array<i64: 1, 1>, scalar_prefetch = 0 : i64, scratch_operands = 0 : i64, tpu.core_type = #tpu.core_type<tc>, window_params = [{transform_indices = @transform_0, window_bounds = array<i64: 128, 640>}, {transform_indices = @transform_1, window_bounds = array<i64: 640, 128>}, {transform_indices = @transform_2, window_bounds = array<i64: 1, 128>}, {transform_indices = @transform_3, window_bounds = array<i64: 128, 128>}]} {
    %c0 = arith.constant 0 : index
    %c0_0 = arith.constant 0 : index
    %0 = vector.load %arg2[%c0, %c0_0] : memref<128x640xbf16, #tpu.memory_space<vmem>>, vector<128x640xbf16>
    %c0_1 = arith.constant 0 : index
    %c0_2 = arith.constant 0 : index
    %1 = vector.load %arg3[%c0_1, %c0_2] : memref<640x128xbf16, #tpu.memory_space<vmem>>, vector<640x128xbf16>
    %cst = arith.constant dense<0.000000e+00> : vector<128x128xf32>
    %2 = tpu.matmul %0, %1, %cst {dimension_numbers = #tpu.dot_dimension_numbers<[1], [0], [0], [1], [0, 0, 1, 1], [], []>} : vector<128x640xbf16>, vector<640x128xbf16>, vector<128x128xf32> -> vector<128x128xf32>
    %c0_3 = arith.constant 0 : index
    %c0_4 = arith.constant 0 : index
    %3 = vector.load %arg4[%c0_3, %c0_4] : memref<1x128xf32, #tpu.memory_space<vmem>>, vector<1x128xf32>
    %4 = vector.broadcast %3 : vector<1x128xf32> to vector<128x128xf32>
    %5 = arith.addf %2, %4 : vector<128x128xf32>
    %cst_5 = arith.constant 0.000000e+00 : f32
    %6 = vector.broadcast %cst_5 : f32 to vector<128x128xf32>
    %7 = arith.cmpf oge, %5, %6 : vector<128x128xf32>
    %cst_6 = arith.constant 0.00999999977 : f32
    %8 = vector.broadcast %cst_6 : f32 to vector<128x128xf32>
    %9 = arith.mulf %8, %5 : vector<128x128xf32>
    %10 = arith.select %7, %5, %9 : vector<128x128xi1>, vector<128x128xf32>
    %11 = arith.truncf %10 : vector<128x128xf32> to vector<128x128xbf16>
    %c0_7 = arith.constant 0 : index
    %c0_8 = arith.constant 0 : index
    %12 = vector.load %arg5[%c0_7, %c0_8] : memref<128x128xbf16, #tpu.memory_space<vmem>>, vector<128x128xbf16>
    tpu.vector_store %arg5[%c0_7, %c0_8], %11 {strides = array<i32>} : memref<128x128xbf16, #tpu.memory_space<vmem>>, vector<128x128xbf16>,
    return
  }
  func.func @transform_0(%arg0: i32, %arg1: i32) -> (i32, i32) {
    %c0_i32 = arith.constant 0 : i32
    %c0_i32_0 = arith.constant 0 : i32
    return %arg0, %c0_i32 : i32, i32
  }
  func.func @transform_1(%arg0: i32, %arg1: i32) -> (i32, i32) {
    %c0_i32 = arith.constant 0 : i32
    %c0_i32_0 = arith.constant 0 : i32
    return %c0_i32, %arg1 : i32, i32
  }
  func.func @transform_2(%arg0: i32, %arg1: i32) -> (i32, i32) {
    %c0_i32 = arith.constant 0 : i32
    %c0_i32_0 = arith.constant 0 : i32
    return %c0_i32, %arg1 : i32, i32
  }
  func.func @transform_3(%arg0: i32, %arg1: i32) -> (i32, i32) {
    %c0_i32 = arith.constant 0 : i32
    return %arg0, %arg1 : i32, i32
  }
}

module attributes {stable_mosaic.version = 11 : i64} {
  func.func @_mm_single_kernel(%arg0: i32, %arg1: i32, %arg2: memref<256x384xbf16, #tpu.memory_space<vmem>>, %arg3: memref<384x128xbf16, #tpu.memory_space<vmem>>, %arg4: memref<1x128xf32, #tpu.memory_space<vmem>>, %arg5: memref<256x128xbf16, #tpu.memory_space<vmem>>) attributes {dimension_semantics = [#tpu.dimension_semantics<parallel>, #tpu.dimension_semantics<parallel>], iteration_bounds = array<i64: 2, 1>, scalar_prefetch = 0 : i64, scratch_operands = 0 : i64, tpu.core_type = #tpu.core_type<tc>, window_params = [{transform_indices = @transform_0, window_bounds = array<i64: 256, 384>}, {transform_indices = @transform_1, window_bounds = array<i64: 384, 128>}, {transform_indices = @transform_2, window_bounds = array<i64: 1, 128>}, {transform_indices = @transform_3, window_bounds = array<i64: 256, 128>}]} {
    %c0 = arith.constant 0 : index
    %c0_0 = arith.constant 0 : index
    %0 = vector.load %arg2[%c0, %c0_0] : memref<256x384xbf16, #tpu.memory_space<vmem>>, vector<256x384xbf16>
    %c0_1 = arith.constant 0 : index
    %c0_2 = arith.constant 0 : index
    %1 = vector.load %arg3[%c0_1, %c0_2] : memref<384x128xbf16, #tpu.memory_space<vmem>>, vector<384x128xbf16>
    %cst = arith.constant dense<0.000000e+00> : vector<256x128xf32>
    %2 = tpu.matmul %0, %1, %cst {dimension_numbers = #tpu.dot_dimension_numbers<[1], [0], [0], [1], [0, 0, 1, 1], [], []>} : vector<256x384xbf16>, vector<384x128xbf16>, vector<256x128xf32> -> vector<256x128xf32>
    %c0_3 = arith.constant 0 : index
    %c0_4 = arith.constant 0 : index
    %3 = vector.load %arg4[%c0_3, %c0_4] : memref<1x128xf32, #tpu.memory_space<vmem>>, vector<1x128xf32>
    %4 = vector.broadcast %3 : vector<1x128xf32> to vector<256x128xf32>
    %5 = arith.addf %2, %4 : vector<256x128xf32>
    %cst_5 = arith.constant 0.000000e+00 : f32
    %6 = vector.broadcast %cst_5 : f32 to vector<256x128xf32>
    %7 = arith.cmpf oge, %5, %6 : vector<256x128xf32>
    %cst_6 = arith.constant 0.00999999977 : f32
    %8 = vector.broadcast %cst_6 : f32 to vector<256x128xf32>
    %9 = arith.mulf %8, %5 : vector<256x128xf32>
    %10 = arith.select %7, %5, %9 : vector<256x128xi1>, vector<256x128xf32>
    %11 = arith.truncf %10 : vector<256x128xf32> to vector<256x128xbf16>
    %c0_7 = arith.constant 0 : index
    %c0_8 = arith.constant 0 : index
    %12 = vector.load %arg5[%c0_7, %c0_8] : memref<256x128xbf16, #tpu.memory_space<vmem>>, vector<256x128xbf16>
    tpu.vector_store %arg5[%c0_7, %c0_8], %11 {strides = array<i32>} : memref<256x128xbf16, #tpu.memory_space<vmem>>, vector<256x128xbf16>,
    return
  }
  func.func @transform_0(%arg0: i32, %arg1: i32) -> (i32, i32) {
    %c0_i32 = arith.constant 0 : i32
    %c0_i32_0 = arith.constant 0 : i32
    return %arg0, %c0_i32 : i32, i32
  }
  func.func @transform_1(%arg0: i32, %arg1: i32) -> (i32, i32) {
    %c0_i32 = arith.constant 0 : i32
    %c0_i32_0 = arith.constant 0 : i32
    return %c0_i32, %arg1 : i32, i32
  }
  func.func @transform_2(%arg0: i32, %arg1: i32) -> (i32, i32) {
    %c0_i32 = arith.constant 0 : i32
    %c0_i32_0 = arith.constant 0 : i32
    return %c0_i32, %arg1 : i32, i32
  }
  func.func @transform_3(%arg0: i32, %arg1: i32) -> (i32, i32) {
    %c0_i32 = arith.constant 0 : i32
    return %arg0, %arg1 : i32, i32
  }
}

module attributes {stable_mosaic.version = 11 : i64} {
  func.func @_mm_single_kernel(%arg0: i32, %arg1: i32, %arg2: memref<256x128xbf16, #tpu.memory_space<vmem>>, %arg3: memref<128x128xbf16, #tpu.memory_space<vmem>>, %arg4: memref<1x128xf32, #tpu.memory_space<vmem>>, %arg5: memref<256x128xf32, #tpu.memory_space<vmem>>) attributes {dimension_semantics = [#tpu.dimension_semantics<parallel>, #tpu.dimension_semantics<parallel>], iteration_bounds = array<i64: 8, 1>, scalar_prefetch = 0 : i64, scratch_operands = 0 : i64, tpu.core_type = #tpu.core_type<tc>, window_params = [{transform_indices = @transform_0, window_bounds = array<i64: 256, 128>}, {transform_indices = @transform_1, window_bounds = array<i64: 128, 128>}, {transform_indices = @transform_2, window_bounds = array<i64: 1, 128>}, {transform_indices = @transform_3, window_bounds = array<i64: 256, 128>}]} {
    %c0 = arith.constant 0 : index
    %c0_0 = arith.constant 0 : index
    %0 = vector.load %arg2[%c0, %c0_0] : memref<256x128xbf16, #tpu.memory_space<vmem>>, vector<256x128xbf16>
    %c0_1 = arith.constant 0 : index
    %c0_2 = arith.constant 0 : index
    %1 = vector.load %arg3[%c0_1, %c0_2] : memref<128x128xbf16, #tpu.memory_space<vmem>>, vector<128x128xbf16>
    %cst = arith.constant dense<0.000000e+00> : vector<256x128xf32>
    %2 = tpu.matmul %0, %1, %cst {dimension_numbers = #tpu.dot_dimension_numbers<[1], [0], [0], [1], [0, 0, 1, 1], [], []>} : vector<256x128xbf16>, vector<128x128xbf16>, vector<256x128xf32> -> vector<256x128xf32>
    %c0_3 = arith.constant 0 : index
    %c0_4 = arith.constant 0 : index
    %3 = vector.load %arg4[%c0_3, %c0_4] : memref<1x128xf32, #tpu.memory_space<vmem>>, vector<1x128xf32>
    %4 = vector.broadcast %3 : vector<1x128xf32> to vector<256x128xf32>
    %5 = arith.addf %2, %4 : vector<256x128xf32>
    %cst_5 = arith.constant 0.000000e+00 : f32
    %6 = vector.broadcast %cst_5 : f32 to vector<256x128xf32>
    %7 = arith.cmpf oge, %5, %6 : vector<256x128xf32>
    %cst_6 = arith.constant 0.00999999977 : f32
    %8 = vector.broadcast %cst_6 : f32 to vector<256x128xf32>
    %9 = arith.mulf %8, %5 : vector<256x128xf32>
    %10 = arith.select %7, %5, %9 : vector<256x128xi1>, vector<256x128xf32>
    %c0_7 = arith.constant 0 : index
    %c0_8 = arith.constant 0 : index
    %11 = vector.load %arg5[%c0_7, %c0_8] : memref<256x128xf32, #tpu.memory_space<vmem>>, vector<256x128xf32>
    tpu.vector_store %arg5[%c0_7, %c0_8], %10 {strides = array<i32>} : memref<256x128xf32, #tpu.memory_space<vmem>>, vector<256x128xf32>,
    return
  }
  func.func @transform_0(%arg0: i32, %arg1: i32) -> (i32, i32) {
    %c0_i32 = arith.constant 0 : i32
    %c0_i32_0 = arith.constant 0 : i32
    return %arg0, %c0_i32 : i32, i32
  }
  func.func @transform_1(%arg0: i32, %arg1: i32) -> (i32, i32) {
    %c0_i32 = arith.constant 0 : i32
    %c0_i32_0 = arith.constant 0 : i32
    return %c0_i32, %arg1 : i32, i32
  }
  func.func @transform_2(%arg0: i32, %arg1: i32) -> (i32, i32) {
    %c0_i32 = arith.constant 0 : i32
    %c0_i32_0 = arith.constant 0 : i32
    return %c0_i32, %arg1 : i32, i32
  }
  func.func @transform_3(%arg0: i32, %arg1: i32) -> (i32, i32) {
    %c0_i32 = arith.constant 0 : i32
    return %arg0, %arg1 : i32, i32
  }
}

</mosaic_0001>

<bundles_post_ra>
// kernel: mul.24
= control target key start
LH: loop header
LB: loop body
LE: loop exit
PB: predicated region body
PF: predicated region fallthrough
CT: control target
= control target key end

     0   :  { %vm11_vm0 = vcmask 31744   ;;  %s70_s10 = smov 20   ;;  %s71_s11 = smov 12   ;;  %vm17_vm1 = vcmask 261344   ;;  %vm23_vm2 = vcmask 228544   ;;  %vm29_vm3 = vcmask 195744   ;;  %s95_s0 = inlined_call_operand.vmem [shape: f32[2,1,4,4], index: 0, kind: input, shape index: {}]   ;;  %s96_s1 = inlined_call_operand.vmem [shape: f32[32], index: 1, kind: output, shape index: {}]  }
   0x1   :  { %v61_v0 = vld [vmem:[%s95_s0 + $0x4] sm:$0xf]  ;;  %v8_v1 = vld [vmem:[%s95_s0] sm:$0xf]  ;;  %s69_s0 = smov 28   ;;  %s72_s12 = smov 24  }
   0x2   :  { %7 = vst [vmem:[#allocation1 + $0x8] sm:$0xf] %v61_v0  ;;  %s73_s13 = smov 16   ;;  %s74_s14 = smov 8   ;;  %vm35_vm4 = vcmask 162944   ;;  %vm41_vm5 = vcmask 130144  }
   0x3   :  { %9 = vst [vmem:[#allocation1] sm:$0xf] %v8_v1  ;;  %s75_s15 = smov 4   ;;  %vm47_vm6 = vcmask 97344   ;;  %vm53_vm7 = vcmask 64544  }
   0x9   :  { %v14_v2 = vld [vmem:[#allocation1 + $0xb] sm:$0x1]   ;;  %v26_v3 = vld [vmem:[#allocation1 + $0x9] sm:$0x1]   ;;  %v20_v6 = vld [vmem:[#allocation1 + $0xa] sm:$0x1]  }
   0xa   :  { %15 = vrot.lane.b32.xlu0 %v14_v2, %s69_s0  ;;  %27 = vrot.lane.b32.xlu1 %v26_v3, %s70_s10  ;;  %v38_v4 = vld [vmem:[#allocation1 + $0x3] sm:$0x1]   ;;  %v10_v5 = vld [vmem:[#allocation1] sm:$0x1]   ;;  %v32_v7 = vld [vmem:[#allocation1 + $0x8] sm:$0x1]  }
   0xb   :  { %39 = vrot.lane.b32.xlu2 %v38_v4, %s71_s11  ;;  %12 = vst.msk [vmem:[#allocation0] sm:$0x1] %vm11_vm0, %v10_v5   ;;  %v44_v8 = vld [vmem:[#allocation1 + $0x2] sm:$0x1]   ;;  %v50_v9 = vld [vmem:[#allocation1 + $0x1] sm:$0x1]  }
  0x12   :  { %21 = vrot.lane.b32.xlu0 %v20_v6, %s72_s12  ;;  %33 = vrot.lane.b32.xlu1 %v32_v7, %s73_s13 }
  0x13   :  { %45 = vrot.lane.b32.xlu2 %v44_v8, %s74_s14 }
  0x1a   :  { %51 = vrot.lane.b32.xlu0 %v50_v9, %s75_s15 }
  0x65   :  { %v40_v10 = vpop.permute.xlu2 %39  }
  0x6d   :  { %v46_v11 = vpop.permute.xlu2 %45  }
  0x7c   :  { %v16_v12 = vpop.permute.xlu0 %15   ;;  %v28_v13 = vpop.permute.xlu1 %27  }
  0x7d   :  { %18 = vst.msk [vmem:[#allocation0] sm:$0x1] %vm17_vm1, %v16_v12  }
  0x84   :  { %v22_v14 = vpop.permute.xlu0 %21   ;;  %v34_v15 = vpop.permute.xlu1 %33  }
  0x85   :  { %24 = vst.msk [vmem:[#allocation0] sm:$0x1] %vm23_vm2, %v22_v14  }
  0x86   :  { %30 = vst.msk [vmem:[#allocation0] sm:$0x1] %vm29_vm3, %v28_v13  }
  0x87   :  { %36 = vst.msk [vmem:[#allocation0] sm:$0x1] %vm35_vm4, %v34_v15  }
  0x88   :  { %42 = vst.msk [vmem:[#allocation0] sm:$0x1] %vm41_vm5, %v40_v10  }
  0x89   :  { %48 = vst.msk [vmem:[#allocation0] sm:$0x1] %vm47_vm6, %v46_v11  }
  0x8c   :  { %v52_v16 = vpop.permute.xlu0 %51  }
  0x8d   :  { %54 = vst.msk [vmem:[#allocation0] sm:$0x1] %vm53_vm7, %v52_v16  }
  0x94   :  { %v57_v17 = vld [vmem:[#allocation0] sm:$0x1] }
  0x95   :  { %60 = vst [vmem:[%s96_s1] sm:$0x1] %v57_v17 }

// kernel: tile.9
= control target key start
LH: loop header
LB: loop body
LE: loop exit
PB: predicated region body
PF: predicated region fallthrough
CT: control target
= control target key end

     0   :  { %s997_s0 = inlined_call_operand.vmem [shape: f32[3,9,8,128], index: 0, kind: input, shape index: {}]   ;;  %s998_s1 = inlined_call_operand.vmem [shape: f32[3,9,1024], index: 1, kind: output, shape index: {}]  }
   0x1   :  { %v2_v0 = vld [vmem:[%s997_s0] sm:$0xff]   ;;  %v593_v1 = vld [vmem:[%s997_s0 + $0x8] sm:$0xff]   ;;  %v594_v2 = vld [vmem:[%s997_s0 + $0x10] sm:$0xff]  }
   0x2   :  { %3 = vst [vmem:[#allocation0] ss:$8 sm:$0xf] %v2_v0   ;;  %v595_v3 = vld [vmem:[%s997_s0 + $0x18] sm:$0xff]   ;;  %v596_v4 = vld [vmem:[%s997_s0 + $0x20] sm:$0xff]   ;;  %v597_v5 = vld [vmem:[%s997_s0 + $0x28] sm:$0xff]  }
   0x3   :  { %4 = vst [vmem:[#allocation0] ss:$8 sm:$0xf0] %v2_v0   ;;  %v598_v6 = vld [vmem:[%s997_s0 + $0x30] sm:$0xff]   ;;  %v599_v7 = vld [vmem:[%s997_s0 + $0x38] sm:$0xff]   ;;  %v600_v8 = vld [vmem:[%s997_s0 + $0x40] sm:$0xff]  }
   0x4   :  { %8 = vst [vmem:[#allocation0 + $0x1] ss:$8 sm:$0xf] %v593_v1   ;;  %v601_v9 = vld [vmem:[%s997_s0 + $0x48] sm:$0xff]   ;;  %v602_v10 = vld [vmem:[%s997_s0 + $0x50] sm:$0xff]   ;;  %v603_v11 = vld [vmem:[%s997_s0 + $0x58] sm:$0xff]  }
   0x5   :  { %10 = vst [vmem:[#allocation0 + $0x1] ss:$8 sm:$0xf0] %v593_v1   ;;  %v604_v12 = vld [vmem:[%s997_s0 + $0x60] sm:$0xff]   ;;  %v605_v13 = vld [vmem:[%s997_s0 + $0x68] sm:$0xff]   ;;  %v606_v14 = vld [vmem:[%s997_s0 + $0x70] sm:$0xff]  }
   0x6   :  { %14 = vst [vmem:[#allocation0 + $0x2] ss:$8 sm:$0xf] %v594_v2   ;;  %v607_v15 = vld [vmem:[%s997_s0 + $0x78] sm:$0xff]   ;;  %v608_v16 = vld [vmem:[%s997_s0 + $0x80] sm:$0xff]   ;;  %v609_v17 = vld [vmem:[%s997_s0 + $0x88] sm:$0xff]  }
   0x7   :  { %16 = vst [vmem:[#allocation0 + $0x2] ss:$8 sm:$0xf0] %v594_v2   ;;  %v610_v18 = vld [vmem:[%s997_s0 + $0x90] sm:$0xff]   ;;  %v611_v19 = vld [vmem:[%s997_s0 + $0x98] sm:$0xff]   ;;  %v612_v20 = vld [vmem:[%s997_s0 + $0xa0] sm:$0xff]  }
   0x8   :  { %20 = vst [vmem:[#allocation0 + $0x40] ss:$8 sm:$0xf] %v595_v3   ;;  %v613_v21 = vld [vmem:[%s997_s0 + $0xa8] sm:$0xff]   ;;  %v614_v22 = vld [vmem:[%s997_s0 + $0xb0] sm:$0xff]   ;;  %v615_v23 = vld [vmem:[%s997_s0 + $0xb8] sm:$0xff]  }
   0x9   :  { %22 = vst [vmem:[#allocation0 + $0x40] ss:$8 sm:$0xf0] %v595_v3   ;;  %v616_v24 = vld [vmem:[%s997_s0 + $0xc0] sm:$0xff]   ;;  %v617_v25 = vld [vmem:[%s997_s0 + $0xc8] sm:$0xff]   ;;  %v618_v26 = vld [vmem:[%s997_s0 + $0xd0] sm:$0xff]  }
   0xa   :  { %26 = vst [vmem:[#allocation0 + $0x41] ss:$8 sm:$0xf] %v596_v4  }
   0xb   :  { %28 = vst [vmem:[#allocation0 + $0x41] ss:$8 sm:$0xf0] %v596_v4  }
   0xc   :  { %32 = vst [vmem:[#allocation0 + $0x42] ss:$8 sm:$0xf] %v597_v5  }
   0xd   :  { %34 = vst [vmem:[#allocation0 + $0x42] ss:$8 sm:$0xf0] %v597_v5   ;;  %v163_v27 = vld [vmem:[#allocation0] sm:$0xf] }
   0xe   :  { %38 = vst [vmem:[#allocation0 + $0x80] ss:$8 sm:$0xf] %v598_v6   ;;  %v168_v28 = vld [vmem:[#allocation0 + $0x8] sm:$0xf] }
   0xf   :  { %40 = vst [vmem:[#allocation0 + $0x80] ss:$8 sm:$0xf0] %v598_v6   ;;  %v174_v29 = vld [vmem:[#allocation0 + $0x10] sm:$0xf] }
  0x10   :  { %44 = vst [vmem:[#allocation0 + $0x81] ss:$8 sm:$0xf] %v599_v7   ;;  %v180_v30 = vld [vmem:[#allocation0 + $0x18] sm:$0xf] }
  0x11   :  { %46 = vst [vmem:[#allocation0 + $0x81] ss:$8 sm:$0xf0] %v599_v7   ;;  %v186_v31 = vld [vmem:[#allocation0 + $0x20] sm:$0xf] }
  0x12   :  { %50 = vst [vmem:[#allocation0 + $0x82] ss:$8 sm:$0xf] %v600_v8   ;;  %v192_v32 = vld [vmem:[#allocation0 + $0x28] sm:$0xf] }
  0x13   :  { %52 = vst [vmem:[#allocation0 + $0x82] ss:$8 sm:$0xf0] %v600_v8   ;;  %v198_v33 = vld [vmem:[#allocation0 + $0x30] sm:$0xf] }
  0x14   :  { %56 = vst [vmem:[#allocation0 + $0xc0] ss:$8 sm:$0xf] %v601_v9   ;;  %v204_v34 = vld [vmem:[#allocation0 + $0x38] sm:$0xf] }
  0x15   :  { %58 = vst [vmem:[#allocation0 + $0xc0] ss:$8 sm:$0xf0] %v601_v9   ;;  %v210_v35 = vld [vmem:[#allocation0 + $0x40] sm:$0xf] }
  0x16   :  { %62 = vst [vmem:[#allocation0 + $0xc1] ss:$8 sm:$0xf] %v602_v10   ;;  %v216_v36 = vld [vmem:[#allocation0 + $0x48] sm:$0xf] }
  0x17   :  { %64 = vst [vmem:[#allocation0 + $0xc1] ss:$8 sm:$0xf0] %v602_v10   ;;  %v222_v37 = vld [vmem:[#allocation0 + $0x50] sm:$0xf] }
  0x18   :  { %68 = vst [vmem:[#allocation0 + $0xc2] ss:$8 sm:$0xf] %v603_v11   ;;  %v228_v38 = vld [vmem:[#allocation0 + $0x58] sm:$0xf] }
  0x19   :  { %70 = vst [vmem:[#allocation0 + $0xc2] ss:$8 sm:$0xf0] %v603_v11   ;;  %v234_v39 = vld [vmem:[#allocation0 + $0x60] sm:$0xf] }
  0x1a   :  { %74 = vst [vmem:[#allocation0 + $0x100] ss:$8 sm:$0xf] %v604_v12   ;;  %v240_v40 = vld [vmem:[#allocation0 + $0x68] sm:$0xf] }
  0x1b   :  { %76 = vst [vmem:[#allocation0 + $0x100] ss:$8 sm:$0xf0] %v604_v12   ;;  %v246_v41 = vld [vmem:[#allocation0 + $0x70] sm:$0xf] }
  0x1c   :  { %80 = vst [vmem:[#allocation0 + $0x101] ss:$8 sm:$0xf] %v605_v13   ;;  %v252_v42 = vld [vmem:[#allocation0 + $0x78] sm:$0xf] }
  0x1d   :  { %82 = vst [vmem:[#allocation0 + $0x101] ss:$8 sm:$0xf0] %v605_v13   ;;  %v258_v43 = vld [vmem:[#allocation0 + $0x80] sm:$0xf] }
  0x1e   :  { %86 = vst [vmem:[#allocation0 + $0x102] ss:$8 sm:$0xf] %v606_v14   ;;  %v264_v44 = vld [vmem:[#allocation0 + $0x88] sm:$0xf] }
  0x1f   :  { %88 = vst [vmem:[#allocation0 + $0x102] ss:$8 sm:$0xf0] %v606_v14   ;;  %v270_v45 = vld [vmem:[#allocation0 + $0x90] sm:$0xf] }
  0x20   :  { %92 = vst [vmem:[#allocation0 + $0x140] ss:$8 sm:$0xf] %v607_v15   ;;  %v276_v46 = vld [vmem:[#allocation0 + $0x98] sm:$0xf] }
  0x21   :  { %94 = vst [vmem:[#allocation0 + $0x140] ss:$8 sm:$0xf0] %v607_v15   ;;  %v282_v47 = vld [vmem:[#allocation0 + $0xa0] sm:$0xf] }
  0x22   :  { %98 = vst [vmem:[#allocation0 + $0x141] ss:$8 sm:$0xf] %v608_v16   ;;  %v288_v48 = vld [vmem:[#allocation0 + $0xa8] sm:$0xf] }
  0x23   :  { %100 = vst [vmem:[#allocation0 + $0x141] ss:$8 sm:$0xf0] %v608_v16   ;;  %v294_v49 = vld [vmem:[#allocation0 + $0xb0] sm:$0xf] }
  0x24   :  { %104 = vst [vmem:[#allocation0 + $0x142] ss:$8 sm:$0xf] %v609_v17   ;;  %v300_v50 = vld [vmem:[#allocation0 + $0xb8] sm:$0xf] }
  0x25   :  { %106 = vst [vmem:[#allocation0 + $0x142] ss:$8 sm:$0xf0] %v609_v17   ;;  %v306_v51 = vld [vmem:[#allocation0 + $0xc0] sm:$0xf] }
  0x26   :  { %110 = vst [vmem:[#allocation0 + $0x180] ss:$8 sm:$0xf] %v610_v18   ;;  %v312_v52 = vld [vmem:[#allocation0 + $0xc8] sm:$0xf] }
  0x27   :  { %112 = vst [vmem:[#allocation0 + $0x180] ss:$8 sm:$0xf0] %v610_v18   ;;  %v318_v53 = vld [vmem:[#allocation0 + $0xd0] sm:$0xf] }
  0x28   :  { %116 = vst [vmem:[#allocation0 + $0x181] ss:$8 sm:$0xf] %v611_v19   ;;  %v324_v54 = vld [vmem:[#allocation0 + $0xd8] sm:$0xf] }
  0x29   :  { %118 = vst [vmem:[#allocation0 + $0x181] ss:$8 sm:$0xf0] %v611_v19   ;;  %v330_v55 = vld [vmem:[#allocation0 + $0xe0] sm:$0xf] }
  0x2a   :  { %122 = vst [vmem:[#allocation0 + $0x182] ss:$8 sm:$0xf] %v612_v20   ;;  %v336_v56 = vld [vmem:[#allocation0 + $0xe8] sm:$0xf] }
  0x2b   :  { %124 = vst [vmem:[#allocation0 + $0x182] ss:$8 sm:$0xf0] %v612_v20   ;;  %v342_v57 = vld [vmem:[#allocation0 + $0xf0] sm:$0xf] }
  0x2c   :  { %128 = vst [vmem:[#allocation0 + $0x1c0] ss:$8 sm:$0xf] %v613_v21   ;;  %v348_v58 = vld [vmem:[#allocation0 + $0xf8] sm:$0xf] }
  0x2d   :  { %130 = vst [vmem:[#allocation0 + $0x1c0] ss:$8 sm:$0xf0] %v613_v21   ;;  %v354_v59 = vld [vmem:[#allocation0 + $0x100] sm:$0xf] }
  0x2e   :  { %134 = vst [vmem:[#allocation0 + $0x1c1] ss:$8 sm:$0xf] %v614_v22   ;;  %v360_v60 = vld [vmem:[#allocation0 + $0x108] sm:$0xf] }
  0x2f   :  { %136 = vst [vmem:[#allocation0 + $0x1c1] ss:$8 sm:$0xf0] %v614_v22   ;;  %v366_v61 = vld [vmem:[#allocation0 + $0x110] sm:$0xf] }
  0x30   :  { %140 = vst [vmem:[#allocation0 + $0x1c2] ss:$8 sm:$0xf] %v615_v23   ;;  %v372_v62 = vld [vmem:[#allocation0 + $0x118] sm:$0xf] }
  0x31   :  { %142 = vst [vmem:[#allocation0 + $0x1c2] ss:$8 sm:$0xf0] %v615_v23   ;;  %v378_v63 = vld [vmem:[#allocation0 + $0x120] sm:$0xf] }
  0x32   :  { %146 = vst [vmem:[#allocation0 + $0x200] ss:$8 sm:$0xf] %v616_v24   ;;  %v384_v0 = vld [vmem:[#allocation0 + $0x128] sm:$0xf] }
  0x33   :  { %148 = vst [vmem:[#allocation0 + $0x200] ss:$8 sm:$0xf0] %v616_v24   ;;  %v390_v1 = vld [vmem:[#allocation0 + $0x130] sm:$0xf] }
  0x34   :  { %152 = vst [vmem:[#allocation0 + $0x201] ss:$8 sm:$0xf] %v617_v25   ;;  %v396_v2 = vld [vmem:[#allocation0 + $0x138] sm:$0xf] }
  0x35   :  { %154 = vst [vmem:[#allocation0 + $0x201] ss:$8 sm:$0xf0] %v617_v25   ;;  %v402_v3 = vld [vmem:[#allocation0 + $0x140] sm:$0xf] }
  0x36   :  { %158 = vst [vmem:[#allocation0 + $0x202] ss:$8 sm:$0xf] %v618_v26   ;;  %v408_v4 = vld [vmem:[#allocation0 + $0x148] sm:$0xf] }
  0x37   :  { %160 = vst [vmem:[#allocation0 + $0x202] ss:$8 sm:$0xf0] %v618_v26   ;;  %v414_v5 = vld [vmem:[#allocation0 + $0x150] sm:$0xf] }
  0x38   :  { %166 = vst [vmem:[%s998_s1] sm:$0xf] %v163_v27  ;;  %v420_v6 = vld [vmem:[#allocation0 + $0x158] sm:$0xf]  ;;  %v426_v7 = vld [vmem:[#allocation0 + $0x160] sm:$0xf] }
  0x39   :  { %619 = vst [vmem:[%s998_s1 + $0x4] sm:$0xf] %v168_v28  ;;  %v432_v8 = vld [vmem:[#allocation0 + $0x168] sm:$0xf]  ;;  %v438_v9 = vld [vmem:[#allocation0 + $0x170] sm:$0xf] }
  0x3a   :  { %620 = vst [vmem:[%s998_s1 + $0x8] sm:$0xf] %v174_v29  ;;  %v444_v10 = vld [vmem:[#allocation0 + $0x178] sm:$0xf]  ;;  %v450_v11 = vld [vmem:[#allocation0 + $0x180] sm:$0xf] }
  0x3b   :  { %621 = vst [vmem:[%s998_s1 + $0xc] sm:$0xf] %v180_v30  ;;  %v456_v12 = vld [vmem:[#allocation0 + $0x188] sm:$0xf]  ;;  %v462_v13 = vld [vmem:[#allocation0 + $0x190] sm:$0xf] }
  0x3c   :  { %622 = vst [vmem:[%s998_s1 + $0x10] sm:$0xf] %v186_v31  ;;  %v468_v14 = vld [vmem:[#allocation0 + $0x198] sm:$0xf]  ;;  %v474_v15 = vld [vmem:[#allocation0 + $0x1a0] sm:$0xf] }
  0x3d   :  { %623 = vst [vmem:[%s998_s1 + $0x14] sm:$0xf] %v192_v32  ;;  %v480_v16 = vld [vmem:[#allocation0 + $0x1a8] sm:$0xf]  ;;  %v486_v17 = vld [vmem:[#allocation0 + $0x1b0] sm:$0xf] }
  0x3e   :  { %624 = vst [vmem:[%s998_s1 + $0x18] sm:$0xf] %v198_v33  ;;  %v492_v18 = vld [vmem:[#allocation0 + $0x1b8] sm:$0xf]  ;;  %v498_v19 = vld [vmem:[#allocation0 + $0x1c0] sm:$0xf] }
  0x3f   :  { %625 = vst [vmem:[%s998_s1 + $0x1c] sm:$0xf] %v204_v34  ;;  %v504_v20 = vld [vmem:[#allocation0 + $0x1c8] sm:$0xf]  ;;  %v510_v21 = vld [vmem:[#allocation0 + $0x1d0] sm:$0xf] }
  0x40   :  { %626 = vst [vmem:[%s998_s1 + $0x20] sm:$0xf] %v210_v35  ;;  %v516_v22 = vld [vmem:[#allocation0 + $0x1d8] sm:$0xf]  ;;  %v522_v23 = vld [vmem:[#allocation0 + $0x1e0] sm:$0xf] }
  0x41   :  { %627 = vst [vmem:[%s998_s1 + $0x24] sm:$0xf] %v216_v36  ;;  %v528_v24 = vld [vmem:[#allocation0 + $0x1e8] sm:$0xf]  ;;  %v534_v25 = vld [vmem:[#allocation0 + $0x1f0] sm:$0xf] }
  0x42   :  { %628 = vst [vmem:[%s998_s1 + $0x28] sm:$0xf] %v222_v37  ;;  %v540_v26 = vld [vmem:[#allocation0 + $0x1f8] sm:$0xf]  ;;  %v546_v27 = vld [vmem:[#allocation0 + $0x200] sm:$0xf] }
  0x43   :  { %629 = vst [vmem:[%s998_s1 + $0x2c] sm:$0xf] %v228_v38  ;;  %v552_v28 = vld [vmem:[#allocation0 + $0x208] sm:$0xf]  ;;  %v558_v29 = vld [vmem:[#allocation0 + $0x210] sm:$0xf] }
  0x44   :  { %630 = vst [vmem:[%s998_s1 + $0x30] sm:$0xf] %v234_v39  ;;  %v564_v30 = vld [vmem:[#allocation0 + $0x218] sm:$0xf]  ;;  %v570_v31 = vld [vmem:[#allocation0 + $0x220] sm:$0xf] }
  0x45   :  { %631 = vst [vmem:[%s998_s1 + $0x34] sm:$0xf] %v240_v40  ;;  %v576_v32 = vld [vmem:[#allocation0 + $0x228] sm:$0xf]  ;;  %v582_v33 = vld [vmem:[#allocation0 + $0x230] sm:$0xf] }
  0x46   :  { %632 = vst [vmem:[%s998_s1 + $0x38] sm:$0xf] %v246_v41  ;;  %v588_v34 = vld [vmem:[#allocation0 + $0x238] sm:$0xf] }
  0x47   :  { %633 = vst [vmem:[%s998_s1 + $0x3c] sm:$0xf] %v252_v42 }
  0x48   :  { %634 = vst [vmem:[%s998_s1 + $0x40] sm:$0xf] %v258_v43 }
  0x49   :  { %635 = vst [vmem:[%s998_s1 + $0x44] sm:$0xf] %v264_v44 }
  0x4a   :  { %636 = vst [vmem:[%s998_s1 + $0x48] sm:$0xf] %v270_v45 }
  0x4b   :  { %637 = vst [vmem:[%s998_s1 + $0x4c] sm:$0xf] %v276_v46 }
  0x4c   :  { %638 = vst [vmem:[%s998_s1 + $0x50] sm:$0xf] %v282_v47 }
  0x4d   :  { %639 = vst [vmem:[%s998_s1 + $0x54] sm:$0xf] %v288_v48 }
  0x4e   :  { %640 = vst [vmem:[%s998_s1 + $0x58] sm:$0xf] %v294_v49 }
  0x4f   :  { %641 = vst [vmem:[%s998_s1 + $0x5c] sm:$0xf] %v300_v50 }
  0x50   :  { %642 = vst [vmem:[%s998_s1 + $0x60] sm:$0xf] %v306_v51 }
  0x51   :  { %643 = vst [vmem:[%s998_s1 + $0x64] sm:$0xf] %v312_v52 }
  0x52   :  { %644 = vst [vmem:[%s998_s1 + $0x68] sm:$0xf] %v318_v53 }
  0x53   :  { %645 = vst [vmem:[%s998_s1 + $0x6c] sm:$0xf] %v324_v54 }
  0x54   :  { %646 = vst [vmem:[%s998_s1 + $0x70] sm:$0xf] %v330_v55 }
  0x55   :  { %647 = vst [vmem:[%s998_s1 + $0x74] sm:$0xf] %v336_v56 }
  0x56   :  { %648 = vst [vmem:[%s998_s1 + $0x78] sm:$0xf] %v342_v57 }
  0x57   :  { %649 = vst [vmem:[%s998_s1 + $0x7c] sm:$0xf] %v348_v58 }
  0x58   :  { %650 = vst [vmem:[%s998_s1 + $0x80] sm:$0xf] %v354_v59 }
  0x59   :  { %651 = vst [vmem:[%s998_s1 + $0x84] sm:$0xf] %v360_v60 }
  0x5a   :  { %652 = vst [vmem:[%s998_s1 + $0x88] sm:$0xf] %v366_v61 }
  0x5b   :  { %653 = vst [vmem:[%s998_s1 + $0x8c] sm:$0xf] %v372_v62 }
  0x5c   :  { %654 = vst [vmem:[%s998_s1 + $0x90] sm:$0xf] %v378_v63 }
  0x5d   :  { %655 = vst [vmem:[%s998_s1 + $0x94] sm:$0xf] %v384_v0 }
  0x5e   :  { %656 = vst [vmem:[%s998_s1 + $0x98] sm:$0xf] %v390_v1 }
  0x5f   :  { %657 = vst [vmem:[%s998_s1 + $0x9c] sm:$0xf] %v396_v2 }
  0x60   :  { %658 = vst [vmem:[%s998_s1 + $0xa0] sm:$0xf] %v402_v3 }
  0x61   :  { %659 = vst [vmem:[%s998_s1 + $0xa4] sm:$0xf] %v408_v4 }
  0x62   :  { %660 = vst [vmem:[%s998_s1 + $0xa8] sm:$0xf] %v414_v5 }
  0x63   :  { %661 = vst [vmem:[%s998_s1 + $0xac] sm:$0xf] %v420_v6 }
  0x64   :  { %662 = vst [vmem:[%s998_s1 + $0xb0] sm:$0xf] %v426_v7 }
  0x65   :  { %663 = vst [vmem:[%s998_s1 + $0xb4] sm:$0xf] %v432_v8 }
  0x66   :  { %664 = vst [vmem:[%s998_s1 + $0xb8] sm:$0xf] %v438_v9 }
  0x67   :  { %665 = vst [vmem:[%s998_s1 + $0xbc] sm:$0xf] %v444_v10 }
  0x68   :  { %666 = vst [vmem:[%s998_s1 + $0xc0] sm:$0xf] %v450_v11 }
  0x69   :  { %667 = vst [vmem:[%s998_s1 + $0xc4] sm:$0xf] %v456_v12 }
  0x6a   :  { %668 = vst [vmem:[%s998_s1 + $0xc8] sm:$0xf] %v462_v13 }
  0x6b   :  { %669 = vst [vmem:[%s998_s1 + $0xcc] sm:$0xf] %v468_v14 }
  0x6c   :  { %670 = vst [vmem:[%s998_s1 + $0xd0] sm:$0xf] %v474_v15 }
  0x6d   :  { %671 = vst [vmem:[%s998_s1 + $0xd4] sm:$0xf] %v480_v16 }
  0x6e   :  { %672 = vst [vmem:[%s998_s1 + $0xd8] sm:$0xf] %v486_v17 }
  0x6f   :  { %673 = vst [vmem:[%s998_s1 + $0xdc] sm:$0xf] %v492_v18 }
  0x70   :  { %674 = vst [vmem:[%s998_s1 + $0xe0] sm:$0xf] %v498_v19 }
  0x71   :  { %675 = vst [vmem:[%s998_s1 + $0xe4] sm:$0xf] %v504_v20 }
  0x72   :  { %676 = vst [vmem:[%s998_s1 + $0xe8] sm:$0xf] %v510_v21 }
  0x73   :  { %677 = vst [vmem:[%s998_s1 + $0xec] sm:$0xf] %v516_v22 }
  0x74   :  { %678 = vst [vmem:[%s998_s1 + $0xf0] sm:$0xf] %v522_v23 }
  0x75   :  { %679 = vst [vmem:[%s998_s1 + $0xf4] sm:$0xf] %v528_v24 }
  0x76   :  { %680 = vst [vmem:[%s998_s1 + $0xf8] sm:$0xf] %v534_v25 }
  0x77   :  { %681 = vst [vmem:[%s998_s1 + $0xfc] sm:$0xf] %v540_v26 }
  0x78   :  { %682 = vst [vmem:[%s998_s1 + $0x100] sm:$0xf] %v546_v27 }
  0x79   :  { %683 = vst [vmem:[%s998_s1 + $0x104] sm:$0xf] %v552_v28 }
  0x7a   :  { %684 = vst [vmem:[%s998_s1 + $0x108] sm:$0xf] %v558_v29 }
  0x7b   :  { %685 = vst [vmem:[%s998_s1 + $0x10c] sm:$0xf] %v564_v30 }
  0x7c   :  { %686 = vst [vmem:[%s998_s1 + $0x110] sm:$0xf] %v570_v31 }
  0x7d   :  { %687 = vst [vmem:[%s998_s1 + $0x114] sm:$0xf] %v576_v32 }
  0x7e   :  { %688 = vst [vmem:[%s998_s1 + $0x118] sm:$0xf] %v582_v33 }
  0x7f   :  { %689 = vst [vmem:[%s998_s1 + $0x11c] sm:$0xf] %v588_v34 }

// kernel: cotr_forward.7
= control target key start
LH: loop header
LB: loop body
LE: loop exit
PB: predicated region body
PF: predicated region fallthrough
CT: control target
= control target key end

     0   :  { %vm622_vm0 = vcmask 1042432   ;;  %vm854_vm1 = vcmask 1040384   ;;  %vm856_vm2 = vcmask 1042434   ;;  %vm858_vm3 = vcmask 1041408   ;;  %s1355_s1 = inlined_call_operand.vmem [shape: f32[9,3,1024], index: 1, kind: input, shape index: {}]   ;;  %s1356_s0 = inlined_call_operand.vmem [shape: f32[9,1024], index: 0, kind: input, shape index: {}]   ;;  %s1357_s2 = inlined_call_operand.vmem [shape: f32[1,1024], index: 2, kind: output, shape index: {}]  }
   0x1   :  { %v14_v0 = vld [vmem:[%s1355_s1] sm:$0x77]  ;;  %v15_v1 = vld [vmem:[%s1355_s1 + $0x8] sm:$0x77]  ;;  %v16_v2 = vld [vmem:[%s1355_s1 + $0x10] sm:$0x77] }
   0x2   :  { %39 = vst [vmem:[#allocation1] ss:$2 sm:$0xff] %v14_v0  ;;  %v17_v3 = vld [vmem:[%s1355_s1 + $0x18] sm:$0x77]  ;;  %v876_v6 = vld [vmem:[%s1355_s1 + $0x20] sm:$0x77] }
   0x3   :  { %41 = vst [vmem:[#allocation1 + $0x10] ss:$2 sm:$0xff] %v15_v1  ;;  %v874_v4 = vld [vmem:[%s1356_s0 + $0x1] ss:$8 sm:$0xf]  ;;  %vm860_vm4 = vcmask 1044484  }
   0x4   :  { %43 = vst [vmem:[#allocation1 + $0x20] ss:$2 sm:$0xff] %v16_v2  ;;  %v875_v5 = vld [vmem:[%s1356_s0 + $0x1] ss:$8 sm:$0xf0]  ;;  %vm862_vm5 = vcmask 1046534  }
   0x5   :  { %45 = vst [vmem:[#allocation1 + $0x30] ss:$2 sm:$0xff] %v17_v3  ;;  %v877_v7 = vld [vmem:[%s1355_s1 + $0x28] sm:$0x77]  ;;  %v878_v8 = vld [vmem:[%s1355_s1 + $0x30] sm:$0x77]  ;;  %v1002_v13 = vor.u32 %v875_v5, %v874_v4 }
   0x6   :  { %v11_v9 = vld [vmem:[%s1356_s0] ss:$8 sm:$0xf]  ;;  %v880_v32 = vld [vmem:[%s1356_s0 + $0x2] ss:$8 sm:$0xf] }
   0x7   :  { %v12_v10 = vld [vmem:[%s1356_s0] ss:$8 sm:$0xf0]  ;;  %v80_v21 = vperm.slane %v1002_v13, 0  ;;  %v81_v24 = vperm.slane %v1002_v13, 1  ;;  %v82_v25 = vperm.slane %v1002_v13, 2 }
   0x8   :  { %v879_v15 = vld [vmem:[%s1355_s1 + $0x38] sm:$0x77]  ;;  %v1009_v18 = vor.u32 %v12_v10, %v11_v9  ;;  %v882_v22 = vld [vmem:[%s1355_s1 + $0x40] sm:$0x77]  ;;  %v83_v26 = vperm.slane %v1002_v13, 3  ;;  %v84_v28 = vperm.slane %v1002_v13, 4 }
   0x9   :  { %v46_v11 = vld.sshfl [vmem:[#allocation1] sm:$0xff pattern:$0x75316420]  ;;  %v47_v12 = vld.sshfl [vmem:[#allocation1 + $0x8] sm:$0xff pattern:$0x75316420] }
   0xa   :  { %100 = vst [vmem:[#allocation1] ss:$2 sm:$0xff] %v876_v6  ;;  %v48_v14 = vld.sshfl [vmem:[#allocation1 + $0x10] sm:$0xff pattern:$0x75316420]  ;;  %v85_v29 = vperm.slane %v1002_v13, 5 }
   0xb   :  { %v49_v16 = vld.sshfl [vmem:[#allocation1 + $0x18] sm:$0xff pattern:$0x75316420]  ;;  %v1007_v17 = vld.sshfl [vmem:[#allocation1 + $0x20] sm:$0xff pattern:$0x75316420] }
   0xc   :  { %102 = vst [vmem:[#allocation1 + $0x10] ss:$2 sm:$0xff] %v877_v7  ;;  %v1011_v19 = vld.sshfl [vmem:[#allocation1 + $0x28] sm:$0xff pattern:$0x75316420]  ;;  %v19_v30 = vperm.slane %v1009_v18, 0 }
   0xd   :  { %104 = vst [vmem:[#allocation1 + $0x20] ss:$2 sm:$0xff] %v878_v8  ;;  %v1013_v20 = vld.sshfl [vmem:[#allocation1 + $0x30] sm:$0xff pattern:$0x75316420]  ;;  %v20_v31 = vperm.slane %v1009_v18, 1 }
   0xe   :  { %v1019_v23 = vld.sshfl [vmem:[#allocation1 + $0x38] sm:$0xff pattern:$0x75316420]  ;;  %v883_v27 = vld [vmem:[%s1355_s1 + $0x48] sm:$0x77]  ;;  %v62_v36 = vmul.f32 %v46_v11, %v19_v30  ;;  %v21_v42 = vperm.slane %v1009_v18, 2 }
   0xf   :  { %106 = vst [vmem:[#allocation1 + $0x30] ss:$2 sm:$0xff] %v879_v15  ;;  %v881_v33 = vld [vmem:[%s1356_s0 + $0x2] ss:$8 sm:$0xf0]  ;;  %v63_v37 = vmul.f32 %v47_v12, %v20_v31  ;;  %v22_v43 = vperm.slane %v1009_v18, 3 }
  0x10   :  { %v1037_v38 = vor.u32 %v881_v33, %v880_v32  ;;  %v884_v41 = vld [vmem:[%s1355_s1 + $0x50] sm:$0x77]  ;;  %v885_v46 = vld [vmem:[%s1355_s1 + $0x58] sm:$0x77]  ;;  %v86_v53 = vperm.slane %v1002_v13, 6  ;;  %v87_v54 = vperm.slane %v1002_v13, 7  ;;  %v64_v57 = vmul.f32 %v48_v14, %v21_v42 }
  0x11   :  { %v107_v34 = vld.sshfl [vmem:[#allocation1] sm:$0xff pattern:$0x75316420]  ;;  %v108_v35 = vld.sshfl [vmem:[#allocation1 + $0x8] sm:$0xff pattern:$0x75316420]  ;;  %v65_v60 = vmul.f32 %v49_v16, %v22_v43 }
  0x12   :  { %v123_v39 = vmul.f32 %v107_v34, %v80_v21  ;;  %v124_v40 = vmul.f32 %v108_v35, %v81_v24  ;;  %169 = vst [vmem:[#allocation1] ss:$2 sm:$0xff] %v882_v22  ;;  %v149_v55 = vperm.slane %v1037_v38, 0  ;;  %v888_v56 = vld [vmem:[%s1355_s1 + $0x60] sm:$0x77]  ;;  %v150_v59 = vperm.slane %v1037_v38, 1 }
  0x13   :  { %v109_v44 = vld.sshfl [vmem:[#allocation1 + $0x10] sm:$0xff pattern:$0x75316420]  ;;  %v110_v45 = vld.sshfl [vmem:[#allocation1 + $0x18] sm:$0xff pattern:$0x75316420] }
  0x14   :  { %v125_v47 = vmul.f32 %v109_v44, %v82_v25  ;;  %v126_v48 = vmul.f32 %v110_v45, %v83_v26  ;;  %171 = vst [vmem:[#allocation1 + $0x10] ss:$2 sm:$0xff] %v883_v27  ;;  %v111_v49 = vld.sshfl [vmem:[#allocation1 + $0x20] sm:$0xff pattern:$0x75316420]  ;;  %v131_v50 = vadd.f32 %v123_v39, %v62_v36  ;;  %v132_v51 = vadd.f32 %v124_v40, %v63_v37 }
  0x15   :  { %v112_v52 = vld.sshfl [vmem:[#allocation1 + $0x28] sm:$0xff pattern:$0x75316420]  ;;  %v127_v61 = vmul.f32 %v111_v49, %v84_v28  ;;  %v23_v1 = vperm.slane %v1009_v18, 4  ;;  %v151_v3 = vperm.slane %v1037_v38, 2  ;;  %v152_v4 = vperm.slane %v1037_v38, 3 }
  0x16   :  { %173 = vst [vmem:[#allocation1 + $0x20] ss:$2 sm:$0xff] %v884_v41  ;;  %v113_v58 = vld.sshfl [vmem:[#allocation1 + $0x30] sm:$0xff pattern:$0x75316420]  ;;  %v133_v63 = vadd.f32 %v125_v47, %v64_v57  ;;  %v134_v2 = vadd.f32 %v126_v48, %v65_v60  ;;  %v24_v5 = vperm.slane %v1009_v18, 5  ;;  %v128_v6 = vmul.f32 %v112_v52, %v85_v29 }
  0x17   :  { %v114_v62 = vld.sshfl [vmem:[#allocation1 + $0x38] sm:$0xff pattern:$0x75316420]  ;;  %v889_v0 = vld [vmem:[%s1355_s1 + $0x68] sm:$0x77]  ;;  %v66_v9 = vmul.f32 %v1007_v17, %v23_v1  ;;  %v153_v12 = vperm.slane %v1037_v38, 4  ;;  %v129_v29 = vmul.f32 %v113_v58, %v86_v53 }
  0x18   :  { %175 = vst [vmem:[#allocation1 + $0x30] ss:$2 sm:$0xff] %v885_v46  ;;  %v154_v13 = vperm.slane %v1037_v38, 5  ;;  %v890_v14 = vld [vmem:[%s1355_s1 + $0x70] sm:$0x77]  ;;  %v67_v21 = vmul.f32 %v1011_v19, %v24_v5  ;;  %v130_v30 = vmul.f32 %v114_v62, %v87_v54  ;;  %v25_v39 = vperm.slane %v1009_v18, 6 }
  0x19   :  { %v176_v7 = vld.sshfl [vmem:[#allocation1] sm:$0xff pattern:$0x75316420]  ;;  %v177_v8 = vld.sshfl [vmem:[#allocation1 + $0x8] sm:$0xff pattern:$0x75316420]  ;;  %v135_v22 = vadd.f32 %v127_v61, %v66_v9 }
  0x1a   :  { %v192_v10 = vmul.f32 %v176_v7, %v149_v55  ;;  %v193_v11 = vmul.f32 %v177_v8, %v150_v59  ;;  %238 = vst [vmem:[#allocation1] ss:$2 sm:$0xff] %v888_v56  ;;  %v891_v27 = vld [vmem:[%s1355_s1 + $0x78] sm:$0x77]  ;;  %v136_v31 = vadd.f32 %v128_v6, %v67_v21  ;;  %v26_v40 = vperm.slane %v1009_v18, 7 }
  0x1b   :  { %v178_v15 = vld.sshfl [vmem:[#allocation1 + $0x10] sm:$0xff pattern:$0x75316420]  ;;  %v179_v16 = vld.sshfl [vmem:[#allocation1 + $0x18] sm:$0xff pattern:$0x75316420]  ;;  %v68_v49 = vmul.f32 %v1013_v20, %v25_v39 }
  0x1c   :  { %v200_v24 = vadd.f32 %v192_v10, %v131_v50  ;;  %v201_v25 = vadd.f32 %v193_v11, %v132_v51  ;;  %v194_v26 = vmul.f32 %v178_v15, %v151_v3  ;;  %v195_v17 = vmul.f32 %v179_v16, %v152_v4  ;;  %240 = vst [vmem:[#allocation1 + $0x10] ss:$2 sm:$0xff] %v889_v0  ;;  %v886_v28 = vld [vmem:[%s1356_s0 + $0x3] ss:$8 sm:$0xf] }
  0x1d   :  { %v180_v32 = vld.sshfl [vmem:[#allocation1 + $0x20] sm:$0xff pattern:$0x75316420]  ;;  %v181_v33 = vld.sshfl [vmem:[#allocation1 + $0x28] sm:$0xff pattern:$0x75316420]  ;;  %v69_v50 = vmul.f32 %v1019_v23, %v26_v40  ;;  %v137_v56 = vadd.f32 %v129_v29, %v68_v49 }
  0x1e   :  { %v202_v19 = vadd.f32 %v194_v26, %v133_v63  ;;  %v203_v34 = vadd.f32 %v195_v17, %v134_v2  ;;  %v196_v35 = vmul.f32 %v180_v32, %v153_v12  ;;  %v197_v36 = vmul.f32 %v181_v33, %v154_v13  ;;  %242 = vst [vmem:[#allocation1 + $0x20] ss:$2 sm:$0xff] %v890_v14  ;;  %v887_v37 = vld [vmem:[%s1356_s0 + $0x3] ss:$8 sm:$0xf0] }
  0x1f   :  { %v155_v41 = vperm.slane %v1037_v38, 6  ;;  %v156_v42 = vperm.slane %v1037_v38, 7  ;;  %v894_v43 = vld [vmem:[%s1355_s1 + $0x80] sm:$0x77]  ;;  %v211_v48 = vor.u32 %v887_v37, %v886_v28  ;;  %v138_v57 = vadd.f32 %v130_v30, %v69_v50  ;;  %v895_v20 = vld [vmem:[%s1355_s1 + $0x88] sm:$0x77] }
  0x20   :  { %v204_v44 = vadd.f32 %v196_v35, %v135_v22  ;;  %v205_v45 = vadd.f32 %v197_v36, %v136_v31  ;;  %v182_v46 = vld.sshfl [vmem:[#allocation1 + $0x30] sm:$0xff pattern:$0x75316420]  ;;  %v183_v47 = vld.sshfl [vmem:[#allocation1 + $0x38] sm:$0xff pattern:$0x75316420] }
  0x21   :  { %v198_v51 = vmul.f32 %v182_v46, %v155_v41  ;;  %v199_v52 = vmul.f32 %v183_v47, %v156_v42  ;;  %244 = vst [vmem:[#allocation1 + $0x30] ss:$2 sm:$0xff] %v891_v27  ;;  %v245_v18 = vld.sshfl [vmem:[#allocation1] sm:$0xff pattern:$0x75316420]  ;;  %v218_v53 = vperm.slane %v211_v48, 0 }
  0x22   :  { %v219_v54 = vperm.slane %v211_v48, 1  ;;  %v246_v38 = vld.sshfl [vmem:[#allocation1 + $0x8] sm:$0xff pattern:$0x75316420]  ;;  %v220_v55 = vperm.slane %v211_v48, 2  ;;  %v221_v58 = vperm.slane %v211_v48, 3 }
  0x23   :  { %307 = vst [vmem:[#allocation1] ss:$2 sm:$0xff] %v894_v43  ;;  %v247_v59 = vld.sshfl [vmem:[#allocation1 + $0x10] sm:$0xff pattern:$0x75316420]  ;;  %v261_v60 = vmul.f32 %v245_v18, %v218_v53  ;;  %v222_v23 = vperm.slane %v211_v48, 4  ;;  %v206_v0 = vadd.f32 %v198_v51, %v137_v56  ;;  %v207_v1 = vadd.f32 %v199_v52, %v138_v57 }
  0x24   :  { %v262_v61 = vmul.f32 %v246_v38, %v219_v54  ;;  %v248_v62 = vld.sshfl [vmem:[#allocation1 + $0x18] sm:$0xff pattern:$0x75316420]  ;;  %v263_v63 = vmul.f32 %v247_v59, %v220_v55  ;;  %v223_v3 = vperm.slane %v211_v48, 5  ;;  %v896_v7 = vld [vmem:[%s1355_s1 + $0x90] sm:$0x77] }
  0x25   :  { %v264_v2 = vmul.f32 %v248_v62, %v221_v58  ;;  %309 = vst [vmem:[#allocation1 + $0x10] ss:$2 sm:$0xff] %v895_v20  ;;  %v249_v4 = vld.sshfl [vmem:[#allocation1 + $0x20] sm:$0xff pattern:$0x75316420]  ;;  %v224_v8 = vperm.slane %v211_v48, 6  ;;  %v1092_v9 = vadd.f32 %v261_v60, %v200_v24 }
  0x26   :  { %v250_v5 = vld.sshfl [vmem:[#allocation1 + $0x28] sm:$0xff pattern:$0x75316420]  ;;  %v265_v6 = vmul.f32 %v249_v4, %v222_v23  ;;  %v1094_v10 = vadd.f32 %v262_v61, %v201_v25  ;;  %v225_v12 = vperm.slane %v211_v48, 7  ;;  %v897_v13 = vld [vmem:[%s1355_s1 + $0x98] sm:$0x77]  ;;  %v1099_v14 = vadd.f32 %v263_v63, %v202_v19 }
  0x27   :  { %v266_v11 = vmul.f32 %v250_v5, %v223_v3  ;;  %311 = vst [vmem:[#allocation1 + $0x20] ss:$2 sm:$0xff] %v896_v7  ;;  %v1101_v15 = vadd.f32 %v264_v2, %v203_v34  ;;  %v900_v25 = vld [vmem:[%s1355_s1 + $0xa0] sm:$0x77]  ;;  %v901_v17 = vld [vmem:[%s1355_s1 + $0xa8] sm:$0x77] }
  0x28   :  { %v251_v16 = vld.sshfl [vmem:[#allocation1 + $0x30] sm:$0xff pattern:$0x75316420]  ;;  %v252_v21 = vld.sshfl [vmem:[#allocation1 + $0x38] sm:$0xff pattern:$0x75316420]  ;;  %v1103_v22 = vadd.f32 %v265_v6, %v204_v44 }
  0x29   :  { %v267_v26 = vmul.f32 %v251_v16, %v224_v8  ;;  %v268_v24 = vmul.f32 %v252_v21, %v225_v12  ;;  %313 = vst [vmem:[#allocation1 + $0x30] ss:$2 sm:$0xff] %v897_v13  ;;  %v1111_v27 = vadd.f32 %v266_v11, %v205_v45  ;;  %v902_v30 = vld [vmem:[%s1355_s1 + $0xb0] sm:$0x77]  ;;  %v903_v34 = vld [vmem:[%s1355_s1 + $0xb8] sm:$0x77] }
  0x2a   :  { %v1113_v28 = vld.sshfl [vmem:[#allocation1] sm:$0xff pattern:$0x75316420]  ;;  %v1115_v29 = vld.sshfl [vmem:[#allocation1 + $0x8] sm:$0xff pattern:$0x75316420] }
  0x2b   :  { %376 = vst [vmem:[#allocation1] ss:$2 sm:$0xff] %v900_v25  ;;  %v1120_v31 = vadd.f32 %v267_v26, %v206_v0  ;;  %v1122_v32 = vadd.f32 %v268_v24, %v207_v1  ;;  %v906_v37 = vld [vmem:[%s1355_s1 + $0xc0] sm:$0x77]  ;;  %v907_v41 = vld [vmem:[%s1355_s1 + $0xc8] sm:$0x77] }
  0x2c   :  { %v316_v33 = vld.sshfl [vmem:[#allocation1 + $0x10] sm:$0xff pattern:$0x75316420]  ;;  %v317_v19 = vld.sshfl [vmem:[#allocation1 + $0x18] sm:$0xff pattern:$0x75316420] }
  0x2d   :  { %378 = vst [vmem:[#allocation1 + $0x10] ss:$2 sm:$0xff] %v901_v17  ;;  %v908_v44 = vld [vmem:[%s1355_s1 + $0xd0] sm:$0x77]  ;;  %v909_v47 = vld [vmem:[%s1355_s1 + $0xd8] sm:$0x77] }
  0x2e   :  { %v1127_v35 = vld.sshfl [vmem:[#allocation1 + $0x20] sm:$0xff pattern:$0x75316420]  ;;  %v1129_v36 = vld.sshfl [vmem:[#allocation1 + $0x28] sm:$0xff pattern:$0x75316420] }
  0x2f   :  { %380 = vst [vmem:[#allocation1 + $0x20] ss:$2 sm:$0xff] %v902_v30  ;;  %v912_v50 = vld [vmem:[%s1355_s1 + $0xe0] sm:$0x77]  ;;  %v913_v18 = vld [vmem:[%s1355_s1 + $0xe8] sm:$0x77] }
  0x30   :  { %v1134_v39 = vld.sshfl [vmem:[#allocation1 + $0x30] sm:$0xff pattern:$0x75316420]  ;;  %v1136_v40 = vld.sshfl [vmem:[#allocation1 + $0x38] sm:$0xff pattern:$0x75316420] }
  0x31   :  { %382 = vst [vmem:[#allocation1 + $0x30] ss:$2 sm:$0xff] %v903_v34  ;;  %v892_v53 = vld [vmem:[%s1356_s0 + $0x4] ss:$8 sm:$0xf]  ;;  %vm864_vm6 = vcmask 1045508  }
  0x32   :  { %v1141_v42 = vld.sshfl [vmem:[#allocation1] sm:$0xff pattern:$0x75316420]  ;;  %v1143_v43 = vld.sshfl [vmem:[#allocation1 + $0x8] sm:$0xff pattern:$0x75316420] }
  0x33   :  { %445 = vst [vmem:[#allocation1] ss:$2 sm:$0xff] %v906_v37  ;;  %v914_v55 = vld [vmem:[%s1355_s1 + $0xf0] sm:$0x77]  ;;  %v915_v60 = vld [vmem:[%s1355_s1 + $0xf8] sm:$0x77] }
  0x34   :  { %v1148_v45 = vld.sshfl [vmem:[#allocation1 + $0x10] sm:$0xff pattern:$0x75316420]  ;;  %v1150_v46 = vld.sshfl [vmem:[#allocation1 + $0x18] sm:$0xff pattern:$0x75316420] }
  0x35   :  { %447 = vst [vmem:[#allocation1 + $0x10] ss:$2 sm:$0xff] %v907_v41  ;;  %v893_v56 = vld [vmem:[%s1356_s0 + $0x4] ss:$8 sm:$0xf0]  ;;  %vm866_vm7 = vcmask 1043456  }
  0x36   :  { %v1155_v48 = vld.sshfl [vmem:[#allocation1 + $0x20] sm:$0xff pattern:$0x75316420]  ;;  %v1157_v49 = vld.sshfl [vmem:[#allocation1 + $0x28] sm:$0xff pattern:$0x75316420]  ;;  %v280_v59 = vor.u32 %v893_v56, %v892_v53 }
  0x37   :  { %449 = vst [vmem:[#allocation1 + $0x20] ss:$2 sm:$0xff] %v908_v44  ;;  %v918_v63 = vld [vmem:[%s1355_s1 + $0x100] sm:$0x77]  ;;  %v919_v4 = vld [vmem:[%s1355_s1 + $0x108] sm:$0x77] }
  0x38   :  { %v1162_v51 = vld.sshfl [vmem:[#allocation1 + $0x30] sm:$0xff pattern:$0x75316420]  ;;  %v1164_v52 = vld.sshfl [vmem:[#allocation1 + $0x38] sm:$0xff pattern:$0x75316420] }
  0x39   :  { %451 = vst [vmem:[#allocation1 + $0x30] ss:$2 sm:$0xff] %v909_v47  ;;  %v287_v20 = vperm.slane %v280_v59, 0  ;;  %v288_v23 = vperm.slane %v280_v59, 1  ;;  %v289_v0 = vperm.slane %v280_v59, 2  ;;  %v290_v1 = vperm.slane %v280_v59, 3 }
  0x3a   :  { %v1172_v54 = vld.sshfl [vmem:[#allocation1] sm:$0xff pattern:$0x75316420]  ;;  %v1174_v38 = vld.sshfl [vmem:[#allocation1 + $0x8] sm:$0xff pattern:$0x75316420] }
  0x3b   :  { %514 = vst [vmem:[#allocation1] ss:$2 sm:$0xff] %v912_v50  ;;  %v291_v5 = vperm.slane %v280_v59, 4  ;;  %v292_v6 = vperm.slane %v280_v59, 5  ;;  %v293_v7 = vperm.slane %v280_v59, 6  ;;  %v330_v16 = vmul.f32 %v1113_v28, %v287_v20 }
  0x3c   :  { %v1182_v57 = vld.sshfl [vmem:[#allocation1 + $0x10] sm:$0xff pattern:$0x75316420]  ;;  %v1184_v58 = vld.sshfl [vmem:[#allocation1 + $0x18] sm:$0xff pattern:$0x75316420]  ;;  %v331_v21 = vmul.f32 %v1115_v29, %v288_v23  ;;  %v332_v26 = vmul.f32 %v316_v33, %v289_v0  ;;  %v333_v24 = vmul.f32 %v317_v19, %v290_v1 }
  0x3d   :  { %516 = vst [vmem:[#allocation1 + $0x10] ss:$2 sm:$0xff] %v913_v18  ;;  %v898_v8 = vld [vmem:[%s1356_s0 + $0x5] ss:$8 sm:$0xf]  ;;  %v294_v25 = vperm.slane %v280_v59, 7  ;;  %v338_v37 = vadd.f32 %v330_v16, %v1092_v9  ;;  %v334_v50 = vmul.f32 %v1127_v35, %v291_v5  ;;  %v335_v18 = vmul.f32 %v1129_v36, %v292_v6 }
  0x3e   :  { %v1189_v61 = vld.sshfl [vmem:[#allocation1 + $0x20] sm:$0xff pattern:$0x75316420]  ;;  %v1191_v62 = vld.sshfl [vmem:[#allocation1 + $0x28] sm:$0xff pattern:$0x75316420]  ;;  %v339_v41 = vadd.f32 %v331_v21, %v1094_v10  ;;  %v340_v28 = vadd.f32 %v332_v26, %v1099_v14  ;;  %v341_v29 = vadd.f32 %v333_v24, %v1101_v15  ;;  %v336_v53 = vmul.f32 %v1134_v39, %v293_v7 }
  0x3f   :  { %518 = vst [vmem:[#allocation1 + $0x20] ss:$2 sm:$0xff] %v914_v55  ;;  %v920_v13 = vld [vmem:[%s1355_s1 + $0x110] sm:$0x77]  ;;  %v921_v33 = vld [vmem:[%s1355_s1 + $0x118] sm:$0x77]  ;;  %v337_v55 = vmul.f32 %v1136_v40, %v294_v25  ;;  %v342_v36 = vadd.f32 %v334_v50, %v1103_v22  ;;  %v343_v39 = vadd.f32 %v335_v18, %v1111_v27 }
  0x40   :  { %v1196_v2 = vld.sshfl [vmem:[#allocation1 + $0x30] sm:$0xff pattern:$0x75316420]  ;;  %v1198_v3 = vld.sshfl [vmem:[#allocation1 + $0x38] sm:$0xff pattern:$0x75316420]  ;;  %v344_v40 = vadd.f32 %v336_v53, %v1120_v31 }
  0x41   :  { %520 = vst [vmem:[#allocation1 + $0x30] ss:$2 sm:$0xff] %v915_v60  ;;  %v899_v17 = vld [vmem:[%s1356_s0 + $0x5] ss:$8 sm:$0xf0]  ;;  %v345_v5 = vadd.f32 %v337_v55, %v1122_v32 }
  0x42   :  { %v1206_v11 = vld.sshfl [vmem:[#allocation1] sm:$0xff pattern:$0x75316420]  ;;  %v1208_v12 = vld.sshfl [vmem:[#allocation1 + $0x8] sm:$0xff pattern:$0x75316420]  ;;  %v349_v47 = vor.u32 %v899_v17, %v898_v8 }
  0x43   :  { %583 = vst [vmem:[#allocation1] ss:$2 sm:$0xff] %v918_v63  ;;  %v904_v9 = vld [vmem:[%s1356_s0 + $0x6] ss:$8 sm:$0xf] }
  0x44   :  { %v1218_v30 = vld.sshfl [vmem:[#allocation1 + $0x10] sm:$0xff pattern:$0x75316420]  ;;  %v1220_v34 = vld.sshfl [vmem:[#allocation1 + $0x18] sm:$0xff pattern:$0x75316420] }
  0x45   :  { %585 = vst [vmem:[#allocation1 + $0x10] ss:$2 sm:$0xff] %v919_v4  ;;  %v905_v10 = vld [vmem:[%s1356_s0 + $0x6] ss:$8 sm:$0xf0]  ;;  %v356_v56 = vperm.slane %v349_v47, 0 }
  0x46   :  { %v1229_v19 = vld.sshfl [vmem:[#allocation1 + $0x20] sm:$0xff pattern:$0x75316420]  ;;  %v1231_v44 = vld.sshfl [vmem:[#allocation1 + $0x28] sm:$0xff pattern:$0x75316420]  ;;  %v418_v35 = vor.u32 %v905_v10, %v904_v9 }
  0x47   :  { %587 = vst [vmem:[#allocation1 + $0x20] ss:$2 sm:$0xff] %v920_v13  ;;  %v357_v59 = vperm.slane %v349_v47, 1  ;;  %v358_v60 = vperm.slane %v349_v47, 2  ;;  %v359_v63 = vperm.slane %v349_v47, 3  ;;  %v360_v20 = vperm.slane %v349_v47, 4 }
  0x48   :  { %v1239_v14 = vld.sshfl [vmem:[#allocation1 + $0x30] sm:$0xff pattern:$0x75316420]  ;;  %v1241_v15 = vld.sshfl [vmem:[#allocation1 + $0x38] sm:$0xff pattern:$0x75316420]  ;;  %v399_v4 = vmul.f32 %v1141_v42, %v356_v56 }
  0x49   :  { %589 = vst [vmem:[#allocation1 + $0x30] ss:$2 sm:$0xff] %v921_v33  ;;  %v361_v23 = vperm.slane %v349_v47, 5  ;;  %v362_v0 = vperm.slane %v349_v47, 6  ;;  %v363_v1 = vperm.slane %v349_v47, 7  ;;  %v400_v8 = vmul.f32 %v1143_v43, %v357_v59 }
  0x4a   :  { %v401_v6 = vmul.f32 %v1148_v45, %v358_v60  ;;  %v402_v7 = vmul.f32 %v1150_v46, %v359_v63  ;;  %v403_v13 = vmul.f32 %v1155_v48, %v360_v20  ;;  %v407_v21 = vadd.f32 %v399_v4, %v338_v37  ;;  %v910_v47 = vld [vmem:[%s1356_s0 + $0x7] ss:$8 sm:$0xf] }
  0x4b   :  { %v404_v16 = vmul.f32 %v1157_v49, %v361_v23  ;;  %v405_v42 = vmul.f32 %v1162_v51, %v362_v0  ;;  %v406_v43 = vmul.f32 %v1164_v52, %v363_v1  ;;  %v408_v22 = vadd.f32 %v400_v8, %v339_v41 }
  0x4c   :  { %v425_v26 = vperm.slane %v418_v35, 0  ;;  %v426_v27 = vperm.slane %v418_v35, 1  ;;  %v427_v24 = vperm.slane %v418_v35, 2  ;;  %v428_v31 = vperm.slane %v418_v35, 3 }
  0x4d   :  { %v429_v25 = vperm.slane %v418_v35, 4  ;;  %v430_v32 = vperm.slane %v418_v35, 5  ;;  %v431_v17 = vperm.slane %v418_v35, 6  ;;  %v432_v45 = vperm.slane %v418_v35, 7 }
  0x4e   :  { %v468_v46 = vmul.f32 %v1172_v54, %v425_v26  ;;  %v469_v48 = vmul.f32 %v1174_v38, %v426_v27  ;;  %v470_v49 = vmul.f32 %v1182_v57, %v427_v24  ;;  %v471_v51 = vmul.f32 %v1184_v58, %v428_v31  ;;  %v911_v54 = vld [vmem:[%s1356_s0 + $0x7] ss:$8 sm:$0xf0] }
  0x4f   :  { %v472_v52 = vmul.f32 %v1189_v61, %v429_v25  ;;  %v473_v37 = vmul.f32 %v1191_v62, %v430_v32  ;;  %v474_v41 = vmul.f32 %v1196_v2, %v431_v17  ;;  %v475_v33 = vmul.f32 %v1198_v3, %v432_v45  ;;  %v916_v61 = vld [vmem:[%s1356_s0 + $0x40] ss:$8 sm:$0xf] }
  0x50   :  { %v409_v38 = vadd.f32 %v401_v6, %v340_v28  ;;  %v410_v57 = vadd.f32 %v402_v7, %v341_v29  ;;  %v411_v9 = vadd.f32 %v403_v13, %v342_v36  ;;  %v412_v58 = vadd.f32 %v404_v16, %v343_v39  ;;  %v917_v62 = vld [vmem:[%s1356_s0 + $0x40] ss:$8 sm:$0xf0] }
  0x51   :  { %v413_v2 = vadd.f32 %v405_v42, %v344_v40  ;;  %v414_v3 = vadd.f32 %v406_v43, %v345_v5  ;;  %v476_v10 = vadd.f32 %v468_v46, %v407_v21  ;;  %v477_v50 = vadd.f32 %v469_v48, %v408_v22  ;;  %v590_v42 = vld.sshfl [vmem:[#allocation1] sm:$0xff pattern:$0x75316420]  ;;  %v591_v43 = vld.sshfl [vmem:[#allocation1 + $0x8] sm:$0xff pattern:$0x75316420] }
  0x52   :  { %v478_v18 = vadd.f32 %v470_v49, %v409_v38  ;;  %v479_v53 = vadd.f32 %v471_v51, %v410_v57  ;;  %v480_v55 = vadd.f32 %v472_v52, %v411_v9  ;;  %v487_v56 = vor.u32 %v911_v54, %v910_v47  ;;  %v592_v21 = vld.sshfl [vmem:[#allocation1 + $0x10] sm:$0xff pattern:$0x75316420]  ;;  %v593_v22 = vld.sshfl [vmem:[#allocation1 + $0x18] sm:$0xff pattern:$0x75316420] }
  0x53   :  { %v481_v28 = vadd.f32 %v473_v37, %v412_v58  ;;  %v482_v29 = vadd.f32 %v474_v41, %v413_v2  ;;  %v483_v59 = vadd.f32 %v475_v33, %v414_v3  ;;  %v556_v60 = vor.u32 %v917_v62, %v916_v61  ;;  %v594_v24 = vld.sshfl [vmem:[#allocation1 + $0x20] sm:$0xff pattern:$0x75316420]  ;;  %v596_v32 = vld.sshfl [vmem:[#allocation1 + $0x30] sm:$0xff pattern:$0x75316420] }
  0x54   :  { %v494_v63 = vperm.slane %v487_v56, 0  ;;  %v495_v20 = vperm.slane %v487_v56, 1  ;;  %v496_v23 = vperm.slane %v487_v56, 2  ;;  %v497_v0 = vperm.slane %v487_v56, 3 }
  0x55   :  { %v498_v1 = vperm.slane %v487_v56, 4  ;;  %v499_v4 = vperm.slane %v487_v56, 5  ;;  %v500_v8 = vperm.slane %v487_v56, 6  ;;  %v501_v35 = vperm.slane %v487_v56, 7 }
  0x56   :  { %v537_v36 = vmul.f32 %v1206_v11, %v494_v63  ;;  %v538_v39 = vmul.f32 %v1208_v12, %v495_v20  ;;  %v539_v40 = vmul.f32 %v1218_v30, %v496_v23  ;;  %v540_v5 = vmul.f32 %v1220_v34, %v497_v0  ;;  %v595_v30 = vld.sshfl [vmem:[#allocation1 + $0x28] sm:$0xff pattern:$0x75316420] }
  0x57   :  { %v541_v6 = vmul.f32 %v1229_v19, %v498_v1  ;;  %v542_v7 = vmul.f32 %v1231_v44, %v499_v4  ;;  %v543_v13 = vmul.f32 %v1239_v14, %v500_v8  ;;  %v544_v16 = vmul.f32 %v1241_v15, %v501_v35  ;;  %v597_v44 = vld.sshfl [vmem:[#allocation1 + $0x38] sm:$0xff pattern:$0x75316420] }
  0x58   :  { %v545_v26 = vadd.f32 %v537_v36, %v476_v10  ;;  %v546_v11 = vadd.f32 %v538_v39, %v477_v50  ;;  %v547_v27 = vadd.f32 %v539_v40, %v478_v18  ;;  %v548_v12 = vadd.f32 %v540_v5, %v479_v53 }
  0x59   :  { %v549_v31 = vadd.f32 %v541_v6, %v480_v55  ;;  %v550_v34 = vadd.f32 %v542_v7, %v481_v28  ;;  %v551_v25 = vadd.f32 %v543_v13, %v482_v29  ;;  %v552_v19 = vadd.f32 %v544_v16, %v483_v59 }
  0x5a   :  { %v563_v17 = vperm.slane %v556_v60, 0  ;;  %v564_v14 = vperm.slane %v556_v60, 1  ;;  %v565_v45 = vperm.slane %v556_v60, 2  ;;  %v566_v15 = vperm.slane %v556_v60, 3 }
  0x5b   :  { %v567_v46 = vperm.slane %v556_v60, 4  ;;  %v568_v48 = vperm.slane %v556_v60, 5  ;;  %v569_v49 = vperm.slane %v556_v60, 6  ;;  %v570_v51 = vperm.slane %v556_v60, 7 }
  0x5c   :  { %v606_v52 = vmul.f32 %v590_v42, %v563_v17  ;;  %v607_v37 = vmul.f32 %v591_v43, %v564_v14  ;;  %v608_v41 = vmul.f32 %v592_v21, %v565_v45  ;;  %v609_v33 = vmul.f32 %v593_v22, %v566_v15 }
  0x5d   :  { %v610_v47 = vmul.f32 %v594_v24, %v567_v46  ;;  %v611_v54 = vmul.f32 %v595_v30, %v568_v48  ;;  %v612_v38 = vmul.f32 %v596_v32, %v569_v49  ;;  %v613_v57 = vmul.f32 %v597_v44, %v570_v51 }
  0x5e   :  { %v1287_v9 = vadd.f32 %v606_v52, %v545_v26  ;;  %v1289_v58 = vadd.f32 %v607_v37, %v546_v11  ;;  %v1291_v61 = vadd.f32 %v608_v41, %v547_v27  ;;  %v1293_v62 = vadd.f32 %v609_v33, %v548_v12 }
  0x5f   :  { %v1295_v2 = vadd.f32 %v610_v47, %v549_v31  ;;  %v1297_v3 = vadd.f32 %v611_v54, %v550_v34  ;;  %v1299_v10 = vadd.f32 %v612_v38, %v551_v25  ;;  %v1301_v50 = vadd.f32 %v613_v57, %v552_v19 }
  0x60   :  { %v623_v18 = vsel %vm622_vm0, %v1287_v9, -inf  ;;  %v630_v53 = vsel %vm622_vm0, %v1289_v58, -inf  ;;  %v637_v55 = vsel %vm622_vm0, %v1291_v61, -inf  ;;  %v644_v56 = vsel %vm622_vm0, %v1293_v62, -inf }
  0x61   :  { %v624_v28 = vrot.slane %v623_v18, 4  ;;  %v631_v29 = vrot.slane %v630_v53, 4  ;;  %v638_v59 = vrot.slane %v637_v55, 4  ;;  %v645_v60 = vrot.slane %v644_v56, 4 }
  0x62   :  { %v651_v63 = vsel %vm622_vm0, %v1295_v2, -inf  ;;  %v658_v20 = vsel %vm622_vm0, %v1297_v3, -inf  ;;  %v665_v23 = vsel %vm622_vm0, %v1299_v10, -inf  ;;  %v672_v0 = vsel %vm622_vm0, %v1301_v50, -inf }
  0x63   :  { %v625_v1 = vmax.f32 %v623_v18, %v624_v28  ;;  %v632_v4 = vmax.f32 %v630_v53, %v631_v29  ;;  %v639_v8 = vmax.f32 %v637_v55, %v638_v59  ;;  %v646_v35 = vmax.f32 %v644_v56, %v645_v60 }
  0x64   :  { %v652_v36 = vrot.slane %v651_v63, 4  ;;  %v659_v39 = vrot.slane %v658_v20, 4  ;;  %v666_v40 = vrot.slane %v665_v23, 4  ;;  %v673_v5 = vrot.slane %v672_v0, 4 }
  0x65   :  { %v626_v6 = vrot.slane %v625_v1, 2  ;;  %v633_v7 = vrot.slane %v632_v4, 2  ;;  %v640_v13 = vrot.slane %v639_v8, 2  ;;  %v647_v16 = vrot.slane %v646_v35, 2 }
  0x66   :  { %v653_v42 = vmax.f32 %v651_v63, %v652_v36  ;;  %v660_v43 = vmax.f32 %v658_v20, %v659_v39  ;;  %v667_v21 = vmax.f32 %v665_v23, %v666_v40  ;;  %v674_v22 = vmax.f32 %v672_v0, %v673_v5 }
  0x67   :  { %v627_v26 = vmax.f32 %v625_v1, %v626_v6  ;;  %v634_v11 = vmax.f32 %v632_v4, %v633_v7  ;;  %v641_v27 = vmax.f32 %v639_v8, %v640_v13  ;;  %v648_v12 = vmax.f32 %v646_v35, %v647_v16 }
  0x68   :  { %v654_v24 = vrot.slane %v653_v42, 2  ;;  %v661_v30 = vrot.slane %v660_v43, 2  ;;  %v668_v31 = vrot.slane %v667_v21, 2  ;;  %v675_v34 = vrot.slane %v674_v22, 2 }
  0x69   :  { %v628_v25 = vrot.slane %v627_v26, 1  ;;  %v635_v19 = vrot.slane %v634_v11, 1  ;;  %v642_v32 = vrot.slane %v641_v27, 1  ;;  %v649_v44 = vrot.slane %v648_v12, 1 }
  0x6a   :  { %v655_v17 = vmax.f32 %v653_v42, %v654_v24  ;;  %v662_v14 = vmax.f32 %v660_v43, %v661_v30  ;;  %v669_v45 = vmax.f32 %v667_v21, %v668_v31  ;;  %v676_v15 = vmax.f32 %v674_v22, %v675_v34 }
  0x6b   :  { %v629_v46 = vmax.f32 %v627_v26, %v628_v25  ;;  %v636_v48 = vmax.f32 %v634_v11, %v635_v19  ;;  %v643_v49 = vmax.f32 %v641_v27, %v642_v32  ;;  %v650_v51 = vmax.f32 %v648_v12, %v649_v44 }
  0x6c   :  { %v656_v52 = vrot.slane %v655_v17, 1  ;;  %v663_v37 = vrot.slane %v662_v14, 1  ;;  %v670_v41 = vrot.slane %v669_v45, 1  ;;  %v677_v33 = vrot.slane %v676_v15, 1 }
  0x6d   :  { %v679_v47 = vsub.f32 %v1287_v9, %v629_v46  ;;  %v680_v54 = vsub.f32 %v1289_v58, %v636_v48  ;;  %v681_v38 = vsub.f32 %v1291_v61, %v643_v49  ;;  %v682_v57 = vsub.f32 %v1293_v62, %v650_v51 }
  0x6e   :  { %v657_v18 = vmax.f32 %v655_v17, %v656_v52  ;;  %v664_v53 = vmax.f32 %v662_v14, %v663_v37  ;;  %v671_v55 = vmax.f32 %v669_v45, %v670_v41  ;;  %v678_v56 = vmax.f32 %v676_v15, %v677_v33 }
  0x6f   :  { %v687_v28 = vmul.f32 1.442695, %v679_v47  ;;  %v689_v29 = vmul.f32 1.442695, %v680_v54  ;;  %v691_v59 = vmul.f32 1.442695, %v681_v38 }
  0x70   :  { %v683_v60 = vsub.f32 %v1295_v2, %v657_v18  ;;  %v684_v63 = vsub.f32 %v1297_v3, %v664_v53  ;;  %v685_v20 = vsub.f32 %v1299_v10, %v671_v55  ;;  %v686_v23 = vsub.f32 %v1301_v50, %v678_v56 }
  0x71   :  { %922 = vpow2.f32 %v687_v28  ;;  %v693_v0 = vmul.f32 1.442695, %v682_v57 }
  0x72   :  { %924 = vpow2.f32 %v689_v29  ;;  %v695_v1 = vmul.f32 1.442695, %v683_v60  ;;  %v697_v4 = vmul.f32 1.442695, %v684_v63  ;;  %v699_v8 = vmul.f32 1.442695, %v685_v20 }
  0x73   :  { %926 = vpow2.f32 %v691_v59  ;;  %v701_v35 = vmul.f32 1.442695, %v686_v23 }
  0x74   :  { %928 = vpow2.f32 %v693_v0 }
  0x75   :  { %930 = vpow2.f32 %v695_v1 }
  0x76   :  { %932 = vpow2.f32 %v697_v4 }
  0x77   :  { %v923_v36 = vpop.eup %922  ;;  %934 = vpow2.f32 %v699_v8 }
  0x78   :  { %v925_v39 = vpop.eup %924  ;;  %936 = vpow2.f32 %v701_v35  ;;  %v703_v40 = vsel %vm622_vm0, %v923_v36, 0.0  ;;  %v759_v46 = vmul.f32 %v923_v36, %v1287_v9 }
  0x79   :  { %v927_v5 = vpop.eup %926  ;;  %v704_v6 = vrot.slane %v703_v40, 4  ;;  %v710_v7 = vsel %vm622_vm0, %v925_v39, 0.0  ;;  %v760_v54 = vmul.f32 %v925_v39, %v1289_v58 }
  0x7a   :  { %v929_v13 = vpop.eup %928  ;;  %v711_v16 = vrot.slane %v710_v7, 4  ;;  %v717_v42 = vsel %vm622_vm0, %v927_v5, 0.0  ;;  %v761_v38 = vmul.f32 %v927_v5, %v1291_v61  ;;  %v767_v57 = vsel %vm622_vm0, %v759_v46, 0.0 }
  0x7b   :  { %v931_v43 = vpop.eup %930  ;;  %v705_v21 = vadd.f32 %v704_v6, %v703_v40  ;;  %v718_v22 = vrot.slane %v717_v42, 4  ;;  %v724_v26 = vsel %vm622_vm0, %v929_v13, 0.0  ;;  %v762_v55 = vmul.f32 %v929_v13, %v1293_v62 }
  0x7c   :  { %v933_v11 = vpop.eup %932  ;;  %v712_v27 = vadd.f32 %v711_v16, %v710_v7  ;;  %v725_v12 = vrot.slane %v724_v26, 4  ;;  %v731_v24 = vsel %vm622_vm0, %v931_v43, 0.0  ;;  %v763_v28 = vmul.f32 %v931_v43, %v1295_v2 }
  0x7d   :  { %v935_v30 = vpop.eup %934  ;;  %v706_v31 = vrot.slane %v705_v21, 2  ;;  %v738_v34 = vsel %vm622_vm0, %v933_v11, 0.0  ;;  %v719_v19 = vadd.f32 %v718_v22, %v717_v42  ;;  %v732_v32 = vrot.slane %v731_v24, 4 }
  0x7e   :  { %v937_v25 = vpop.eup %936  ;;  %v745_v44 = vsel %vm622_vm0, %v935_v30, 0.0  ;;  %v713_v17 = vrot.slane %v712_v27, 2  ;;  %v726_v14 = vadd.f32 %v725_v12, %v724_v26  ;;  %v739_v45 = vrot.slane %v738_v34, 4 }
  0x7f   :  { %v752_v15 = vsel %vm622_vm0, %v937_v25, 0.0  ;;  %v707_v48 = vadd.f32 %v706_v31, %v705_v21  ;;  %v746_v49 = vrot.slane %v745_v44, 4  ;;  %v720_v51 = vrot.slane %v719_v19, 2 }
  0x80   :  { %v733_v52 = vadd.f32 %v732_v32, %v731_v24  ;;  %v714_v37 = vadd.f32 %v713_v17, %v712_v27  ;;  %v727_v41 = vrot.slane %v726_v14, 2  ;;  %v753_v33 = vrot.slane %v752_v15, 4 }
  0x81   :  { %v740_v47 = vadd.f32 %v739_v45, %v738_v34  ;;  %v708_v18 = vrot.slane %v707_v48, 1  ;;  %v747_v53 = vadd.f32 %v746_v49, %v745_v44  ;;  %v721_v56 = vadd.f32 %v720_v51, %v719_v19 }
  0x82   :  { %v734_v9 = vrot.slane %v733_v52, 2  ;;  %v764_v29 = vmul.f32 %v933_v11, %v1297_v3  ;;  %v715_v59 = vrot.slane %v714_v37, 1  ;;  %v728_v60 = vadd.f32 %v727_v41, %v726_v14 }
  0x83   :  { %v754_v63 = vadd.f32 %v753_v33, %v752_v15  ;;  %v768_v20 = vrot.slane %v767_v57, 4  ;;  %v741_v23 = vrot.slane %v740_v47, 2  ;;  %v765_v58 = vmul.f32 %v935_v30, %v1299_v10 }
  0x84   :  { %v774_v61 = vsel %vm622_vm0, %v760_v54, 0.0  ;;  %v781_v0 = vsel %vm622_vm0, %v761_v38, 0.0  ;;  %v709_v1 = vadd.f32 %v708_v18, %v707_v48  ;;  %v748_v4 = vrot.slane %v747_v53, 2 }
  0x85   :  { %v775_v62 = vrot.slane %v774_v61, 4  ;;  %v782_v8 = vrot.slane %v781_v0, 4  ;;  %v766_v35 = vmul.f32 %v937_v25, %v1301_v50  ;;  %v788_v2 = vsel %vm622_vm0, %v762_v55, 0.0 }
  0x86   :  { %v795_v3 = vsel %vm622_vm0, %v763_v28, 0.0  ;;  %v802_v36 = vsel %vm622_vm0, %v764_v29, 0.0  ;;  %v755_v39 = vrot.slane %v754_v63, 2  ;;  %v769_v40 = vadd.f32 %v768_v20, %v767_v57 }
  0x87   :  { %v776_v5 = vadd.f32 %v775_v62, %v774_v61  ;;  %v789_v10 = vrot.slane %v788_v2, 4  ;;  %v783_v6 = vadd.f32 %v782_v8, %v781_v0  ;;  %v796_v7 = vrot.slane %v795_v3, 4 }
  0x88   :  { %v803_v13 = vrot.slane %v802_v36, 4  ;;  %v809_v16 = vsel %vm622_vm0, %v765_v58, 0.0  ;;  %v722_v42 = vrot.slane %v721_v56, 1  ;;  %v735_v43 = vadd.f32 %v734_v9, %v733_v52 }
  0x89   :  { %v742_v21 = vadd.f32 %v741_v23, %v740_v47  ;;  %v790_v22 = vadd.f32 %v789_v10, %v788_v2  ;;  %v777_v50 = vrot.slane %v776_v5, 2  ;;  %v797_v26 = vadd.f32 %v796_v7, %v795_v3 }
  0x8a   :  { %v810_v11 = vrot.slane %v809_v16, 4  ;;  %v816_v27 = vsel %vm622_vm0, %v766_v35, 0.0  ;;  %v729_v12 = vrot.slane %v728_v60, 1  ;;  %v749_v24 = vadd.f32 %v748_v4, %v747_v53 }
  0x8b   :  { %v770_v30 = vrot.slane %v769_v40, 2  ;;  %v804_v31 = vadd.f32 %v803_v13, %v802_v36  ;;  %v756_v34 = vadd.f32 %v755_v39, %v754_v63  ;;  %v784_v25 = vrot.slane %v783_v6, 2 }
  0x8c   :  { %v811_v19 = vadd.f32 %v810_v11, %v809_v16  ;;  %v817_v32 = vrot.slane %v816_v27, 4  ;;  %v716_v44 = vadd.f32 %v715_v59, %v714_v37  ;;  %v723_v17 = vadd.f32 %v722_v42, %v721_v56 }
  0x8d   :  { %v736_v14 = vrot.slane %v735_v43, 1  ;;  %v791_v45 = vrot.slane %v790_v22, 2  ;;  %v743_v15 = vrot.slane %v742_v21, 1  ;;  %v778_v46 = vadd.f32 %v777_v50, %v776_v5 }
  0x8e   :  { %v798_v48 = vrot.slane %v797_v26, 2  ;;  %v818_v49 = vadd.f32 %v817_v32, %v816_v27  ;;  %v730_v51 = vadd.f32 %v729_v12, %v728_v60  ;;  %v750_v52 = vrot.slane %v749_v24, 1 }
  0x8f   :  { %v771_v41 = vadd.f32 %v770_v30, %v769_v40  ;;  %v805_v33 = vrot.slane %v804_v31, 2  ;;  %v757_v47 = vrot.slane %v756_v34, 1  ;;  %v785_v54 = vadd.f32 %v784_v25, %v783_v6 }
  0x90   :  { %v812_v38 = vrot.slane %v811_v19, 2  ;;  %938 = vrcp.f32 %v709_v1  ;;  %v737_v57 = vadd.f32 %v736_v14, %v735_v43  ;;  %v792_v18 = vadd.f32 %v791_v45, %v790_v22 }
  0x91   :  { %v819_v53 = vrot.slane %v818_v49, 2  ;;  %940 = vrcp.f32 %v716_v44  ;;  %v744_v37 = vadd.f32 %v743_v15, %v742_v21  ;;  %v779_v55 = vrot.slane %v778_v46, 1 }
  0x92   :  { %v799_v56 = vadd.f32 %v798_v48, %v797_v26  ;;  %v751_v9 = vadd.f32 %v750_v52, %v749_v24  ;;  %v772_v28 = vrot.slane %v771_v41, 1  ;;  %v806_v29 = vadd.f32 %v805_v33, %v804_v31 }
  0x93   :  { %942 = vrcp.f32 %v723_v17  ;;  %v758_v59 = vadd.f32 %v757_v47, %v756_v34  ;;  %v786_v60 = vrot.slane %v785_v54, 1  ;;  %v813_v63 = vadd.f32 %v812_v38, %v811_v19 }
  0x94   :  { %944 = vrcp.f32 %v730_v51  ;;  %v793_v20 = vrot.slane %v792_v18, 1  ;;  %v820_v23 = vadd.f32 %v819_v53, %v818_v49  ;;  %v780_v61 = vadd.f32 %v779_v55, %v778_v46 }
  0x95   :  { %946 = vrcp.f32 %v737_v57  ;;  %v800_v0 = vrot.slane %v799_v56, 1  ;;  %v773_v4 = vadd.f32 %v772_v28, %v771_v41  ;;  %v807_v62 = vrot.slane %v806_v29, 1 }
  0x96   :  { %v939_v58 = vpop.eup %938  ;;  %948 = vrcp.f32 %v744_v37  ;;  %v787_v8 = vadd.f32 %v786_v60, %v785_v54  ;;  %v814_v35 = vrot.slane %v813_v63, 1  ;;  %v794_v36 = vadd.f32 %v793_v20, %v792_v18 }
  0x97   :  { %v941_v1 = vpop.eup %940  ;;  %950 = vrcp.f32 %v751_v9  ;;  %v821_v39 = vrot.slane %v820_v23, 1  ;;  %v801_v5 = vadd.f32 %v800_v0, %v799_v56  ;;  %v831_v10 = vmul.f32 %v939_v58, %v773_v4 }
  0x98   :  { %952 = vrcp.f32 %v758_v59  ;;  %v832_v2 = vmul.f32 %v941_v1, %v780_v61  ;;  %v808_v16 = vadd.f32 %v807_v62, %v806_v29  ;;  %v815_v21 = vadd.f32 %v814_v35, %v813_v63 }
  0x99   :  { %v943_v3 = vpop.eup %942  ;;  %v822_v27 = vadd.f32 %v821_v39, %v820_v23 }
  0x9a   :  { %v945_v40 = vpop.eup %944  ;;  %v833_v6 = vmul.f32 %v943_v3, %v787_v8  ;;  %v847_v7 = vrot.slane %v832_v2, 7 }
  0x9b   :  { %v947_v13 = vpop.eup %946  ;;  %v834_v42 = vmul.f32 %v945_v40, %v794_v36 }
  0x9c   :  { %v949_v43 = vpop.eup %948  ;;  %v835_v22 = vmul.f32 %v947_v13, %v801_v5  ;;  %v848_v50 = vrot.slane %v833_v6, 6  ;;  %v855_v26 = vsel %vm854_vm1, %v831_v10, %v847_v7 }
  0x9d   :  { %v951_v11 = vpop.eup %950  ;;  %v836_v12 = vmul.f32 %v949_v43, %v808_v16  ;;  %v849_v24 = vrot.slane %v834_v42, 5 }
  0x9e   :  { %v953_v30 = vpop.eup %952  ;;  %v837_v31 = vmul.f32 %v951_v11, %v815_v21  ;;  %v850_v34 = vrot.slane %v835_v22, 4 }
  0x9f   :  { %v838_v25 = vmul.f32 %v953_v30, %v822_v27  ;;  %v851_v19 = vrot.slane %v836_v12, 3  ;;  %v857_v32 = vsel %vm856_vm2, %v848_v50, %v849_v24 }
  0xa0   :  { %v852_v44 = vrot.slane %v837_v31, 2  ;;  %v859_v17 = vsel %vm858_vm3, %v855_v26, %v857_v32 }
  0xa1   :  { %v853_v14 = vrot.slane %v838_v25, 1  ;;  %v861_v45 = vsel %vm860_vm4, %v850_v34, %v851_v19 }
  0xa3   :  { %v863_v15 = vsel %vm862_vm5, %v852_v44, %v853_v14 }
  0xa4   :  { %v865_v46 = vsel %vm864_vm6, %v861_v45, %v863_v15 }
  0xa5   :  { %v867_v48 = vsel %vm866_vm7, %v859_v17, %v865_v46 }
  0xa6   :  { %869 = vst [vmem:[%s1357_s2] sm:$0xff] %v867_v48 }

// kernel: cotr_forward.8
= control target key start
LH: loop header
LB: loop body
LE: loop exit
PB: predicated region body
PF: predicated region fallthrough
CT: control target
= control target key end

     0   :  { %s638_s1 = inlined_call_operand.vmem [shape: bf16[384,128], index: 1, kind: input, shape index: {}]   ;;  %s639_s2 = inlined_call_operand.vmem [shape: f32[1,128], index: 2, kind: input, shape index: {}]   ;;  %s640_s0 = inlined_call_operand.vmem [shape: bf16[32,384], index: 0, kind: input, shape index: {}]   ;;  %s641_s3 = inlined_call_operand.vmem [shape: bf16[32,128], index: 3, kind: output, shape index: {}]  }
   0x1   :  { %v464_v0 = vld [vmem:[%s638_s1 + $0x38] sm:$0xff]  ;;  %v463_v3 = vld [vmem:[%s638_s1 + $0x30] sm:$0xff]  ;;  %v462_v6 = vld [vmem:[%s638_s1 + $0x28] sm:$0xff] }
   0x2   :  { %v472_v1 = vld [vmem:[%s638_s1 + $0x78] sm:$0xff]  ;;  %250 = vmatpush.bf16.msra.mxu0 %v464_v0  ;;  %v471_v4 = vld [vmem:[%s638_s1 + $0x70] sm:$0xff]  ;;  %492 = vmatpush.bf16.msra.mxu3 %v464_v0  ;;  %v470_v7 = vld [vmem:[%s638_s1 + $0x68] sm:$0xff] }
   0x3   :  { %v480_v2 = vld [vmem:[%s638_s1 + $0xb8] sm:$0xff]  ;;  %269 = vmatpush.bf16.msra.mxu1 %v472_v1  ;;  %v479_v5 = vld [vmem:[%s638_s1 + $0xb0] sm:$0xff]  ;;  %v478_v8 = vld [vmem:[%s638_s1 + $0xa8] sm:$0xff] }
   0x4   :  { %288 = vmatpush.bf16.msra.mxu2 %v480_v2  ;;  %v461_v9 = vld [vmem:[%s638_s1 + $0x20] sm:$0xff]  ;;  %v460_v12 = vld [vmem:[%s638_s1 + $0x18] sm:$0xff]  ;;  %v459_v15 = vld [vmem:[%s638_s1 + $0x10] sm:$0xff] }
   0x5   :  { %v469_v10 = vld [vmem:[%s638_s1 + $0x60] sm:$0xff]  ;;  %v468_v13 = vld [vmem:[%s638_s1 + $0x58] sm:$0xff]  ;;  %v467_v16 = vld [vmem:[%s638_s1 + $0x50] sm:$0xff] }
   0x6   :  { %251 = vmatpush.bf16.msra.mxu0 %v463_v3  ;;  %493 = vmatpush.bf16.msra.mxu3 %v463_v3  ;;  %v477_v11 = vld [vmem:[%s638_s1 + $0xa0] sm:$0xff]  ;;  %v476_v14 = vld [vmem:[%s638_s1 + $0x98] sm:$0xff]  ;;  %v475_v17 = vld [vmem:[%s638_s1 + $0x90] sm:$0xff] }
   0x7   :  { %270 = vmatpush.bf16.msra.mxu1 %v471_v4  ;;  %v458_v18 = vld [vmem:[%s638_s1 + $0x8] sm:$0xff]  ;;  %v457_v21 = vld [vmem:[%s638_s1] sm:$0xff]  ;;  %v335_v27 = vld [vmem:[%s640_s0 + $0xc] sm:$0xf0] }
   0x8   :  { %289 = vmatpush.bf16.msra.mxu2 %v479_v5  ;;  %v466_v19 = vld [vmem:[%s638_s1 + $0x48] sm:$0xff]  ;;  %v465_v22 = vld [vmem:[%s638_s1 + $0x40] sm:$0xff]  ;;  %v453_v29 = vld [vmem:[%s640_s0 + $0x10] sm:$0xf0] }
   0x9   :  { %v474_v20 = vld [vmem:[%s638_s1 + $0x88] sm:$0xff]  ;;  %v473_v23 = vld [vmem:[%s638_s1 + $0x80] sm:$0xff]  ;;  %v345_v30 = vld [vmem:[%s640_s0 + $0x18] sm:$0xf] }
   0xa   :  { %252 = vmatpush.bf16.msra.mxu0 %v462_v6  ;;  %494 = vmatpush.bf16.msra.mxu3 %v462_v6  ;;  %v333_v24 = vld [vmem:[%s640_s0] sm:$0xf]  ;;  %v452_v25 = vld [vmem:[%s640_s0 + $0x8] sm:$0xf0]  ;;  %v451_v26 = vld [vmem:[%s640_s0 + $0x4] sm:$0xf] }
   0xb   :  { %271 = vmatpush.bf16.msra.mxu1 %v470_v7  ;;  %v341_v28 = vld [vmem:[%s640_s0 + $0x8] sm:$0xf]  ;;  %v455_v31 = vld [vmem:[%s640_s0 + $0x20] sm:$0xf0]  ;;  %v334_v32 = vor.u32 %v452_v25, %v333_v24  ;;  %v338_v33 = vor.u32 %v451_v26, %v335_v27  ;;  %v454_v36 = vld [vmem:[%s640_s0 + $0x1c] sm:$0xf] }
   0xc   :  { %290 = vmatpush.bf16.msra.mxu2 %v478_v8  ;;  %v342_v34 = vor.u32 %v453_v29, %v341_v28  ;;  %v346_v35 = vor.u32 %v455_v31, %v345_v30  ;;  %v347_v37 = vld [vmem:[%s640_s0 + $0x24] sm:$0xf0]  ;;  %v353_v38 = vld [vmem:[%s640_s0 + $0x20] sm:$0xf]  ;;  %v456_v39 = vld [vmem:[%s640_s0 + $0x28] sm:$0xf0] }
   0xd   :  { %v350_v40 = vor.u32 %v454_v36, %v347_v37  ;;  %v354_v41 = vor.u32 %v456_v39, %v353_v38  ;;  %v500_v42 = vld [vmem:[%s639_s2] ss:$0 sm:$0xff] }
   0xe   :  { %253 = vmatpush.bf16.msra.mxu0 %v461_v9  ;;  %495 = vmatpush.bf16.msra.mxu3 %v461_v9 }
   0xf   :  { %272 = vmatpush.bf16.msra.mxu1 %v469_v10 }
  0x10   :  { %291 = vmatpush.bf16.msra.mxu2 %v477_v11 }
  0x12   :  { %254 = vmatpush.bf16.msra.mxu0 %v460_v12  ;;  %496 = vmatpush.bf16.msra.mxu3 %v460_v12 }
  0x13   :  { %273 = vmatpush.bf16.msra.mxu1 %v468_v13 }
  0x14   :  { %292 = vmatpush.bf16.msra.mxu2 %v476_v14 }
  0x16   :  { %255 = vmatpush.bf16.msra.mxu0 %v459_v15  ;;  %497 = vmatpush.bf16.msra.mxu3 %v459_v15 }
  0x17   :  { %274 = vmatpush.bf16.msra.mxu1 %v467_v16 }
  0x18   :  { %293 = vmatpush.bf16.msra.mxu2 %v475_v17 }
  0x1a   :  { %256 = vmatpush.bf16.msra.mxu0 %v458_v18  ;;  %498 = vmatpush.bf16.msra.mxu3 %v458_v18 }
  0x1b   :  { %275 = vmatpush.bf16.msra.mxu1 %v466_v19 }
  0x1c   :  { %294 = vmatpush.bf16.msra.mxu2 %v474_v20 }
  0x1e   :  { %257 = vmatpush.bf16.msra.mxu0 %v457_v21  ;;  %499 = vmatpush.bf16.msra.mxu3 %v457_v21 }
  0x1f   :  { %276 = vmatpush.bf16.msra.mxu1 %v465_v22 }
  0x20   :  { %295 = vmatpush.bf16.msra.mxu2 %v473_v23 }
  0x21   :  { %258 = vmatmul.bf16.vlgmr.msra.gmra.mxu0 %v334_v32  ;;  %263 = vmatmul.bf16.vlgmr.msra.gmra.mxu3 %v346_v35 }
  0x22   :  { %277 = vmatmul.bf16.vlgmr.msra.gmra.mxu1 %v338_v33 }
  0x23   :  { %296 = vmatmul.bf16.vlgmr.msra.gmra.mxu2 %v342_v34 }
  0x32   :  { %282 = vmatmul.bf16.gmra.mxu1 %v350_v40 }
  0x33   :  { %301 = vmatmul.bf16.gmra.mxu2 %v354_v41 }
  0x9e   :  { %v259_v43 = vpop.f32.mrf.mxu0 }
  0x9f   :  { %v278_v44 = vpop.f32.mrf.mxu1  ;;  %v260_v45 = vadd.f32 %v500_v42, %v259_v43 }
  0xa1   :  { %v279_v47 = vadd.f32 %v278_v44, %v260_v45 }
  0xa4   :  { %v264_v53 = vpop.f32.mrf.mxu3 }
  0xa5   :  { %v265_v60 = vadd.f32 %v500_v42, %v264_v53 }
  0xa6   :  { %v297_v46 = vpop.f32.mrf.mxu2  ;;  %v261_v48 = vpop.f32.mrf.mxu0 }
  0xa7   :  { %v280_v49 = vpop.f32.mrf.mxu1  ;;  %v262_v50 = vadd.f32 %v500_v42, %v261_v48  ;;  %v298_v51 = vadd.f32 %v297_v46, %v279_v47 }
  0xa9   :  { %v281_v52 = vadd.f32 %v280_v49, %v262_v50  ;;  %v311_v55 = vmul.f32 0.01, %v298_v51  ;;  %vm307_vm0 = vcmp.ge.f32.partialorder %v298_v51, 0.0 }
  0xab   :  { %v315_v59 = vsel %vm307_vm0, %v298_v51, %v311_v55 }
  0xac   :  { %v266_v1 = vpop.f32.mrf.mxu3 }
  0xad   :  { %v267_v3 = vadd.f32 %v500_v42, %v266_v1 }
  0xae   :  { %v299_v54 = vpop.f32.mrf.mxu2 }
  0xaf   :  { %v300_v56 = vadd.f32 %v299_v54, %v281_v52  ;;  %v283_v57 = vpop.f32.mrf.mxu1 }
  0xb0   :  { %v284_v0 = vadd.f32 %v283_v57, %v265_v60 }
  0xb1   :  { %vm308_vm1 = vcmp.ge.f32.partialorder %v300_v56, 0.0  ;;  %v312_v58 = vmul.f32 0.01, %v300_v56 }
  0xb3   :  { %v316_v61 = vsel %vm308_vm1, %v300_v56, %v312_v58 }
  0xb4   :  { %v484_v62 = vpack.c.bf16 %v316_v61, %v315_v59 }
  0xb6   :  { %485 = vst [vmem:[%s641_s3] sm:$0xff] %v484_v62   ;;  %v302_v63 = vpop.f32.mrf.mxu2 }
  0xb7   :  { %v285_v2 = vpop.f32.mrf.mxu1  ;;  %v303_v4 = vadd.f32 %v302_v63, %v284_v0 }
  0xb8   :  { %v286_v5 = vadd.f32 %v285_v2, %v267_v3 }
  0xb9   :  { %v313_v7 = vmul.f32 0.01, %v303_v4  ;;  %vm309_vm2 = vcmp.ge.f32.partialorder %v303_v4, 0.0 }
  0xbb   :  { %v317_v10 = vsel %vm309_vm2, %v303_v4, %v313_v7 }
  0xbe   :  { %v304_v6 = vpop.f32.mrf.mxu2 }
  0xbf   :  { %v305_v8 = vadd.f32 %v304_v6, %v286_v5 }
  0xc1   :  { %vm310_vm3 = vcmp.ge.f32.partialorder %v305_v8, 0.0  ;;  %v314_v9 = vmul.f32 0.01, %v305_v8 }
  0xc3   :  { %v318_v11 = vsel %vm310_vm3, %v305_v8, %v314_v9 }
  0xc4   :  { %v489_v12 = vpack.c.bf16 %v318_v11, %v317_v10 }
  0xc6   :  { %491 = vst [vmem:[%s641_s3 + $0x8] sm:$0xff] %v489_v12  }

// kernel: cotr_forward.9
= control target key start
LH: loop header
LB: loop body
LE: loop exit
PB: predicated region body
PF: predicated region fallthrough
CT: control target
= control target key end

     0   :  { %s1856_s1 = inlined_call_operand.vmem [shape: bf16[640,128], index: 1, kind: input, shape index: {}]   ;;  %s1857_s2 = inlined_call_operand.vmem [shape: f32[1,128], index: 2, kind: input, shape index: {}]   ;;  %s1858_s0 = inlined_call_operand.vmem [shape: bf16[128,640], index: 0, kind: input, shape index: {}]   ;;  %s1859_s3 = inlined_call_operand.vmem [shape: bf16[128,128], index: 3, kind: output, shape index: {}]  }
   0x1   :  { %v1290_v0 = vld [vmem:[%s1856_s1 + $0x38] sm:$0xff]  ;;  %v1289_v1 = vld [vmem:[%s1856_s1 + $0x30] sm:$0xff]  ;;  %v1288_v2 = vld [vmem:[%s1856_s1 + $0x28] sm:$0xff] }
   0x2   :  { %1370 = vmatpush.bf16.msra.mxu1 %v1290_v0  ;;  %1371 = vmatpush.bf16.msra.mxu2 %v1290_v0  ;;  %v1287_v3 = vld [vmem:[%s1856_s1 + $0x20] sm:$0xff]  ;;  %v1286_v4 = vld [vmem:[%s1856_s1 + $0x18] sm:$0xff]  ;;  %v1285_v5 = vld [vmem:[%s1856_s1 + $0x10] sm:$0xff] }
   0x3   :  { %1372 = vmatpush.bf16.msra.mxu3 %v1290_v0  ;;  %594 = vmatpush.bf16.msra.mxu0 %v1290_v0  ;;  %v1284_v6 = vld [vmem:[%s1856_s1 + $0x8] sm:$0xff]  ;;  %v1283_v7 = vld [vmem:[%s1856_s1] sm:$0xff]  ;;  %v965_v8 = vld [vmem:[%s1858_s0 + $0x50] sm:$0xf] }
   0x4   :  { %v1255_v9 = vld [vmem:[%s1858_s0 + $0x60] sm:$0xf0]  ;;  %v1005_v10 = vld [vmem:[%s1858_s0 + $0xa0] sm:$0xf]  ;;  %v1265_v11 = vld [vmem:[%s1858_s0 + $0xb0] sm:$0xf0] }
   0x5   :  { %v1045_v12 = vld [vmem:[%s1858_s0 + $0xf0] sm:$0xf]  ;;  %v1275_v13 = vld [vmem:[%s1858_s0 + $0x100] sm:$0xf0]  ;;  %v925_v14 = vld [vmem:[%s1858_s0] sm:$0xf]  ;;  %v966_v18 = vor.u32 %v1255_v9, %v965_v8  ;;  %v1006_v19 = vor.u32 %v1265_v11, %v1005_v10 }
   0x6   :  { %1373 = vmatpush.bf16.msra.mxu1 %v1289_v1  ;;  %1374 = vmatpush.bf16.msra.mxu2 %v1289_v1  ;;  %v1245_v15 = vld [vmem:[%s1858_s0 + $0x10] sm:$0xf0]  ;;  %v1306_v16 = vld [vmem:[%s1856_s1 + $0xb8] sm:$0xff]  ;;  %v1046_v20 = vor.u32 %v1275_v13, %v1045_v12  ;;  %v1304_v28 = vld [vmem:[%s1856_s1 + $0xa8] sm:$0xff] }
   0x7   :  { %1375 = vmatpush.bf16.msra.mxu3 %v1289_v1  ;;  %595 = vmatpush.bf16.msra.mxu0 %v1289_v1  ;;  %v1298_v17 = vld [vmem:[%s1856_s1 + $0x78] sm:$0xff]  ;;  %v926_v21 = vor.u32 %v1245_v15, %v925_v14  ;;  %v1305_v24 = vld [vmem:[%s1856_s1 + $0xb0] sm:$0xff]  ;;  %v1296_v29 = vld [vmem:[%s1856_s1 + $0x68] sm:$0xff] }
   0x8   :  { %v1314_v22 = vld [vmem:[%s1856_s1 + $0xf8] sm:$0xff]  ;;  %v1297_v25 = vld [vmem:[%s1856_s1 + $0x70] sm:$0xff]  ;;  %v1312_v30 = vld [vmem:[%s1856_s1 + $0xe8] sm:$0xff] }
   0x9   :  { %v1322_v23 = vld [vmem:[%s1856_s1 + $0x138] sm:$0xff]  ;;  %v1313_v26 = vld [vmem:[%s1856_s1 + $0xf0] sm:$0xff]  ;;  %v1320_v31 = vld [vmem:[%s1856_s1 + $0x128] sm:$0xff] }
   0xa   :  { %1376 = vmatpush.bf16.msra.mxu1 %v1288_v2  ;;  %1377 = vmatpush.bf16.msra.mxu2 %v1288_v2  ;;  %v1321_v27 = vld [vmem:[%s1856_s1 + $0x130] sm:$0xff]  ;;  %v1303_v32 = vld [vmem:[%s1856_s1 + $0xa0] sm:$0xff]  ;;  %v985_v36 = vld [vmem:[%s1858_s0 + $0x78] sm:$0xf] }
   0xb   :  { %1378 = vmatpush.bf16.msra.mxu3 %v1288_v2  ;;  %596 = vmatpush.bf16.msra.mxu0 %v1288_v2  ;;  %v1295_v33 = vld [vmem:[%s1856_s1 + $0x60] sm:$0xff]  ;;  %v1260_v37 = vld [vmem:[%s1858_s0 + $0x88] sm:$0xf0]  ;;  %v1025_v38 = vld [vmem:[%s1858_s0 + $0xc8] sm:$0xf] }
   0xc   :  { %v1311_v34 = vld [vmem:[%s1856_s1 + $0xe0] sm:$0xff]  ;;  %v1270_v39 = vld [vmem:[%s1858_s0 + $0xd8] sm:$0xf0]  ;;  %v1065_v40 = vld [vmem:[%s1858_s0 + $0x118] sm:$0xf]  ;;  %v986_v46 = vor.u32 %v1260_v37, %v985_v36 }
   0xd   :  { %v1319_v35 = vld [vmem:[%s1856_s1 + $0x120] sm:$0xff]  ;;  %v1280_v41 = vld [vmem:[%s1858_s0 + $0x128] sm:$0xf0]  ;;  %v945_v42 = vld [vmem:[%s1858_s0 + $0x28] sm:$0xf]  ;;  %v1026_v47 = vor.u32 %v1270_v39, %v1025_v38 }
   0xe   :  { %1379 = vmatpush.bf16.msra.mxu1 %v1287_v3  ;;  %1380 = vmatpush.bf16.msra.mxu2 %v1287_v3  ;;  %v1250_v43 = vld [vmem:[%s1858_s0 + $0x38] sm:$0xf0]  ;;  %v1066_v48 = vor.u32 %v1280_v41, %v1065_v40  ;;  %v1301_v52 = vld [vmem:[%s1856_s1 + $0x90] sm:$0xff]  ;;  %v1300_v56 = vld [vmem:[%s1856_s1 + $0x88] sm:$0xff] }
   0xf   :  { %1381 = vmatpush.bf16.msra.mxu3 %v1287_v3  ;;  %597 = vmatpush.bf16.msra.mxu0 %v1287_v3  ;;  %v1302_v44 = vld [vmem:[%s1856_s1 + $0x98] sm:$0xff]  ;;  %v946_v49 = vor.u32 %v1250_v43, %v945_v42  ;;  %v1293_v53 = vld [vmem:[%s1856_s1 + $0x50] sm:$0xff]  ;;  %v1292_v57 = vld [vmem:[%s1856_s1 + $0x48] sm:$0xff] }
  0x10   :  { %v1294_v45 = vld [vmem:[%s1856_s1 + $0x58] sm:$0xff]  ;;  %v1309_v54 = vld [vmem:[%s1856_s1 + $0xd0] sm:$0xff]  ;;  %v1308_v58 = vld [vmem:[%s1856_s1 + $0xc8] sm:$0xff] }
  0x11   :  { %v1310_v50 = vld [vmem:[%s1856_s1 + $0xd8] sm:$0xff]  ;;  %v1317_v55 = vld [vmem:[%s1856_s1 + $0x110] sm:$0xff]  ;;  %v1316_v59 = vld [vmem:[%s1856_s1 + $0x108] sm:$0xff] }
  0x12   :  { %1382 = vmatpush.bf16.msra.mxu1 %v1286_v4  ;;  %1383 = vmatpush.bf16.msra.mxu2 %v1286_v4  ;;  %v1318_v51 = vld [vmem:[%s1856_s1 + $0x118] sm:$0xff]  ;;  %v1299_v60 = vld [vmem:[%s1856_s1 + $0x80] sm:$0xff]  ;;  %v933_v2 = vld [vmem:[%s1858_s0 + $0x8] sm:$0xf] }
  0x13   :  { %1384 = vmatpush.bf16.msra.mxu3 %v1286_v4  ;;  %598 = vmatpush.bf16.msra.mxu0 %v1286_v4  ;;  %v1291_v61 = vld [vmem:[%s1856_s1 + $0x40] sm:$0xff]  ;;  %v927_v1 = vld [vmem:[%s1858_s0 + $0x14] sm:$0xf0]  ;;  %v1246_v3 = vld [vmem:[%s1858_s0 + $0x18] sm:$0xf0] }
  0x14   :  { %v1307_v62 = vld [vmem:[%s1856_s1 + $0xc0] sm:$0xff]  ;;  %v1244_v4 = vld [vmem:[%s1858_s0 + $0xc] sm:$0xf]  ;;  %v934_v9 = vor.u32 %v1246_v3, %v933_v2  ;;  %v953_v14 = vld [vmem:[%s1858_s0 + $0x30] sm:$0xf] }
  0x15   :  { %v1315_v63 = vld [vmem:[%s1856_s1 + $0x100] sm:$0xff]  ;;  %v1248_v12 = vld [vmem:[%s1858_s0 + $0x2c] sm:$0xf]  ;;  %v1258_v36 = vld [vmem:[%s1858_s0 + $0x7c] sm:$0xf] }
  0x16   :  { %1385 = vmatpush.bf16.msra.mxu1 %v1285_v5  ;;  %1386 = vmatpush.bf16.msra.mxu2 %v1285_v5  ;;  %v1243_v0 = vld [vmem:[%s1858_s0 + $0x4] sm:$0xf]  ;;  %v947_v13 = vld [vmem:[%s1858_s0 + $0x3c] sm:$0xf0]  ;;  %v987_v37 = vld [vmem:[%s1858_s0 + $0x8c] sm:$0xf0] }
  0x17   :  { %1387 = vmatpush.bf16.msra.mxu3 %v1285_v5  ;;  %599 = vmatpush.bf16.msra.mxu0 %v1285_v5  ;;  %v935_v5 = vld [vmem:[%s1858_s0 + $0x1c] sm:$0xf0]  ;;  %v930_v8 = vor.u32 %v1243_v0, %v927_v1  ;;  %v1251_v15 = vld [vmem:[%s1858_s0 + $0x40] sm:$0xf0]  ;;  %v1261_v39 = vld [vmem:[%s1858_s0 + $0x90] sm:$0xf0] }
  0x18   :  { %v938_v10 = vor.u32 %v1244_v4, %v935_v5  ;;  %v993_v38 = vld [vmem:[%s1858_s0 + $0x80] sm:$0xf]  ;;  %v1259_v40 = vld [vmem:[%s1858_s0 + $0x84] sm:$0xf]  ;;  %v995_v41 = vld [vmem:[%s1858_s0 + $0x94] sm:$0xf0] }
  0x19   :  { %v1001_v42 = vld [vmem:[%s1858_s0 + $0x88] sm:$0xf]  ;;  %v1262_v43 = vld [vmem:[%s1858_s0 + $0x98] sm:$0xf0]  ;;  %v1269_v0 = vld [vmem:[%s1858_s0 + $0xd4] sm:$0xf] }
  0x1a   :  { %1388 = vmatpush.bf16.msra.mxu1 %v1284_v6  ;;  %1389 = vmatpush.bf16.msra.mxu2 %v1284_v6  ;;  %v1035_v1 = vld [vmem:[%s1858_s0 + $0xe4] sm:$0xf0]  ;;  %v1041_v2 = vld [vmem:[%s1858_s0 + $0xd8] sm:$0xf]  ;;  %v1272_v3 = vld [vmem:[%s1858_s0 + $0xe8] sm:$0xf0] }
  0x1b   :  { %1390 = vmatpush.bf16.msra.mxu3 %v1284_v6  ;;  %600 = vmatpush.bf16.msra.mxu0 %v1284_v6  ;;  %v941_v6 = vld [vmem:[%s1858_s0 + $0x10] sm:$0xf] }
  0x1e   :  { %1391 = vmatpush.bf16.msra.mxu1 %v1283_v7  ;;  %1392 = vmatpush.bf16.msra.mxu2 %v1283_v7 }
  0x1f   :  { %1393 = vmatpush.bf16.msra.mxu3 %v1283_v7  ;;  %601 = vmatpush.bf16.msra.mxu0 %v1283_v7  ;;  %v1247_v7 = vld [vmem:[%s1858_s0 + $0x20] sm:$0xf0] }
  0x20   :  { %v942_v11 = vor.u32 %v1247_v7, %v941_v6  ;;  %v1038_v6 = vor.u32 %v1269_v0, %v1035_v1  ;;  %v1042_v7 = vor.u32 %v1272_v3, %v1041_v2 }
  0x21   :  { %612 = vmatmul.bf16.vlgmr.msra.gmra.mxu1 %v966_v18  ;;  %622 = vmatmul.bf16.vlgmr.msra.gmra.mxu2 %v1006_v19  ;;  %v961_v18 = vld [vmem:[%s1858_s0 + $0x38] sm:$0xf]  ;;  %v1252_v19 = vld [vmem:[%s1858_s0 + $0x48] sm:$0xf0] }
  0x22   :  { %692 = vmatpush.bf16.msrb.mxu2 %v1306_v16  ;;  %643 = vmatpush.bf16.msrb.mxu1 %v1298_v17  ;;  %v1249_v16 = vld [vmem:[%s1858_s0 + $0x34] sm:$0xf]  ;;  %v955_v17 = vld [vmem:[%s1858_s0 + $0x44] sm:$0xf0] }
  0x23   :  { %632 = vmatmul.bf16.vlgmr.msra.gmra.mxu3 %v1046_v20  ;;  %602 = vmatmul.bf16.vlgmr.msra.gmra.mxu0 %v926_v21  ;;  %v950_v20 = vor.u32 %v1248_v12, %v947_v13  ;;  %v954_v21 = vor.u32 %v1251_v15, %v953_v14  ;;  %v1274_v12 = vld [vmem:[%s1858_s0 + $0xfc] sm:$0xf]  ;;  %v1055_v13 = vld [vmem:[%s1858_s0 + $0x10c] sm:$0xf0]  ;;  %v1061_v14 = vld [vmem:[%s1858_s0 + $0x100] sm:$0xf] }
  0x24   :  { %741 = vmatpush.bf16.msrb.mxu3 %v1314_v22  ;;  %790 = vmatpush.bf16.msrb.mxu0 %v1322_v23  ;;  %v958_v22 = vor.u32 %v1249_v16, %v955_v17  ;;  %v962_v23 = vor.u32 %v1252_v19, %v961_v18  ;;  %v1277_v15 = vld [vmem:[%s1858_s0 + $0x110] sm:$0xf0]  ;;  %v1058_v19 = vor.u32 %v1274_v12, %v1055_v13 }
  0x26   :  { %693 = vmatpush.bf16.msrb.mxu2 %v1305_v24  ;;  %644 = vmatpush.bf16.msrb.mxu1 %v1297_v25  ;;  %v1253_v24 = vld [vmem:[%s1858_s0 + $0x54] sm:$0xf]  ;;  %v967_v25 = vld [vmem:[%s1858_s0 + $0x64] sm:$0xf0] }
  0x28   :  { %742 = vmatpush.bf16.msrb.mxu3 %v1313_v26  ;;  %791 = vmatpush.bf16.msrb.mxu0 %v1321_v27  ;;  %v973_v26 = vld [vmem:[%s1858_s0 + $0x58] sm:$0xf]  ;;  %v1256_v27 = vld [vmem:[%s1858_s0 + $0x68] sm:$0xf0] }
  0x2a   :  { %694 = vmatpush.bf16.msrb.mxu2 %v1304_v28  ;;  %645 = vmatpush.bf16.msrb.mxu1 %v1296_v29  ;;  %v1254_v28 = vld [vmem:[%s1858_s0 + $0x5c] sm:$0xf]  ;;  %v975_v29 = vld [vmem:[%s1858_s0 + $0x6c] sm:$0xf0] }
  0x2c   :  { %743 = vmatpush.bf16.msrb.mxu3 %v1312_v30  ;;  %792 = vmatpush.bf16.msrb.mxu0 %v1320_v31  ;;  %v981_v30 = vld [vmem:[%s1858_s0 + $0x60] sm:$0xf]  ;;  %v1257_v31 = vld [vmem:[%s1858_s0 + $0x70] sm:$0xf0] }
  0x2e   :  { %695 = vmatpush.bf16.msrb.mxu2 %v1303_v32  ;;  %646 = vmatpush.bf16.msrb.mxu1 %v1295_v33  ;;  %v970_v32 = vor.u32 %v1253_v24, %v967_v25  ;;  %v974_v33 = vor.u32 %v1256_v27, %v973_v26 }
  0x30   :  { %744 = vmatpush.bf16.msrb.mxu3 %v1311_v34  ;;  %793 = vmatpush.bf16.msrb.mxu0 %v1319_v35  ;;  %v978_v34 = vor.u32 %v1254_v28, %v975_v29  ;;  %v982_v35 = vor.u32 %v1257_v31, %v981_v30  ;;  %v1278_v29 = vld [vmem:[%s1858_s0 + $0x11c] sm:$0xf]  ;;  %v1067_v30 = vld [vmem:[%s1858_s0 + $0x12c] sm:$0xf0]  ;;  %v1073_v31 = vld [vmem:[%s1858_s0 + $0x120] sm:$0xf] }
  0x31   :  { %617 = vmatmul.bf16.gmra.mxu1 %v986_v46  ;;  %627 = vmatmul.bf16.gmra.mxu2 %v1026_v47  ;;  %v998_v46 = vor.u32 %v1259_v40, %v995_v41  ;;  %v1002_v47 = vor.u32 %v1262_v43, %v1001_v42  ;;  %v1070_v40 = vor.u32 %v1278_v29, %v1067_v30 }
  0x32   :  { %696 = vmatpush.bf16.msrb.mxu2 %v1302_v44  ;;  %647 = vmatpush.bf16.msrb.mxu1 %v1294_v45  ;;  %v990_v44 = vor.u32 %v1258_v36, %v987_v37  ;;  %v994_v45 = vor.u32 %v1261_v39, %v993_v38  ;;  %v1282_v36 = vld [vmem:[%s1858_s0 + $0x138] sm:$0xf0] }
  0x33   :  { %637 = vmatmul.bf16.gmra.mxu3 %v1066_v48  ;;  %607 = vmatmul.bf16.gmra.mxu0 %v946_v49  ;;  %v1263_v48 = vld [vmem:[%s1858_s0 + $0xa4] sm:$0xf]  ;;  %v1007_v49 = vld [vmem:[%s1858_s0 + $0xb4] sm:$0xf0] }
  0x34   :  { %745 = vmatpush.bf16.msrb.mxu3 %v1310_v50  ;;  %794 = vmatpush.bf16.msrb.mxu0 %v1318_v51  ;;  %v1013_v50 = vld [vmem:[%s1858_s0 + $0xa8] sm:$0xf]  ;;  %v1266_v51 = vld [vmem:[%s1858_s0 + $0xb8] sm:$0xf0] }
  0x36   :  { %697 = vmatpush.bf16.msrb.mxu2 %v1301_v52  ;;  %648 = vmatpush.bf16.msrb.mxu1 %v1293_v53  ;;  %v1264_v52 = vld [vmem:[%s1858_s0 + $0xac] sm:$0xf]  ;;  %v1015_v53 = vld [vmem:[%s1858_s0 + $0xbc] sm:$0xf0] }
  0x38   :  { %746 = vmatpush.bf16.msrb.mxu3 %v1309_v54  ;;  %795 = vmatpush.bf16.msrb.mxu0 %v1317_v55  ;;  %v1021_v54 = vld [vmem:[%s1858_s0 + $0xb0] sm:$0xf]  ;;  %v1267_v55 = vld [vmem:[%s1858_s0 + $0xc0] sm:$0xf0] }
  0x3a   :  { %698 = vmatpush.bf16.msrb.mxu2 %v1300_v56  ;;  %649 = vmatpush.bf16.msrb.mxu1 %v1292_v57  ;;  %v1010_v56 = vor.u32 %v1263_v48, %v1007_v49  ;;  %v1014_v57 = vor.u32 %v1266_v51, %v1013_v50 }
  0x3c   :  { %747 = vmatpush.bf16.msrb.mxu3 %v1308_v58  ;;  %796 = vmatpush.bf16.msrb.mxu0 %v1316_v59  ;;  %v1018_v58 = vor.u32 %v1264_v52, %v1015_v53  ;;  %v1022_v59 = vor.u32 %v1267_v55, %v1021_v54 }
  0x3e   :  { %699 = vmatpush.bf16.msrb.mxu2 %v1299_v60  ;;  %650 = vmatpush.bf16.msrb.mxu1 %v1291_v61  ;;  %v1268_v60 = vld [vmem:[%s1858_s0 + $0xcc] sm:$0xf]  ;;  %v1027_v61 = vld [vmem:[%s1858_s0 + $0xdc] sm:$0xf0] }
  0x3f   :  { %v1030_v4 = vor.u32 %v1268_v60, %v1027_v61 }
  0x40   :  { %748 = vmatpush.bf16.msrb.mxu3 %v1307_v62  ;;  %797 = vmatpush.bf16.msrb.mxu0 %v1315_v63  ;;  %v1033_v62 = vld [vmem:[%s1858_s0 + $0xd0] sm:$0xf]  ;;  %v1271_v63 = vld [vmem:[%s1858_s0 + $0xe0] sm:$0xf0] }
  0x41   :  { %651 = vmatmul.bf16.vlgmr.msrb.gmra.mxu1 %v930_v8  ;;  %700 = vmatmul.bf16.vlgmr.msrb.gmra.mxu2 %v934_v9  ;;  %v1034_v5 = vor.u32 %v1271_v63, %v1033_v62  ;;  %v1273_v8 = vld [vmem:[%s1858_s0 + $0xf4] sm:$0xf]  ;;  %v1047_v9 = vld [vmem:[%s1858_s0 + $0x104] sm:$0xf0] }
  0x42   :  { %v1050_v16 = vor.u32 %v1273_v8, %v1047_v9 }
  0x43   :  { %749 = vmatmul.bf16.vlgmr.msrb.gmra.mxu3 %v938_v10  ;;  %798 = vmatmul.bf16.vlgmr.msrb.gmra.mxu0 %v942_v11  ;;  %v1053_v10 = vld [vmem:[%s1858_s0 + $0xf8] sm:$0xf]  ;;  %v1276_v11 = vld [vmem:[%s1858_s0 + $0x108] sm:$0xf0] }
  0x44   :  { %v1054_v17 = vor.u32 %v1276_v11, %v1053_v10 }
  0x51   :  { %656 = vmatmul.bf16.gmra.mxu1 %v950_v20  ;;  %705 = vmatmul.bf16.gmra.mxu2 %v954_v21  ;;  %v1062_v20 = vor.u32 %v1277_v15, %v1061_v14 }
  0x53   :  { %754 = vmatmul.bf16.gmra.mxu3 %v958_v22  ;;  %803 = vmatmul.bf16.gmra.mxu0 %v962_v23  ;;  %v1756_v22 = vld [vmem:[%s1857_s2] ss:$0 sm:$0xff] }
  0x61   :  { %661 = vmatmul.bf16.gmra.mxu1 %v970_v32  ;;  %710 = vmatmul.bf16.gmra.mxu2 %v974_v33  ;;  %v1281_v32 = vld [vmem:[%s1858_s0 + $0x130] sm:$0xf0]  ;;  %v1279_v33 = vld [vmem:[%s1858_s0 + $0x124] sm:$0xf] }
  0x62   :  { %v1074_v41 = vor.u32 %v1281_v32, %v1073_v31 }
  0x63   :  { %759 = vmatmul.bf16.gmra.mxu3 %v978_v34  ;;  %808 = vmatmul.bf16.gmra.mxu0 %v982_v35  ;;  %v1075_v34 = vld [vmem:[%s1858_s0 + $0x134] sm:$0xf0]  ;;  %v1081_v35 = vld [vmem:[%s1858_s0 + $0x128] sm:$0xf] }
  0x71   :  { %666 = vmatmul.bf16.gmra.mxu1 %v990_v44  ;;  %715 = vmatmul.bf16.gmra.mxu2 %v994_v45  ;;  %v1078_v44 = vor.u32 %v1279_v33, %v1075_v34  ;;  %v1082_v45 = vor.u32 %v1282_v36, %v1081_v35 }
  0x73   :  { %764 = vmatmul.bf16.gmra.mxu3 %v998_v46  ;;  %813 = vmatmul.bf16.gmra.mxu0 %v1002_v47 }
  0x81   :  { %671 = vmatmul.bf16.gmra.mxu1 %v1010_v56  ;;  %720 = vmatmul.bf16.gmra.mxu2 %v1014_v57 }
  0x83   :  { %769 = vmatmul.bf16.gmra.mxu3 %v1018_v58  ;;  %818 = vmatmul.bf16.gmra.mxu0 %v1022_v59 }
  0x91   :  { %676 = vmatmul.bf16.gmra.mxu1 %v1030_v4  ;;  %725 = vmatmul.bf16.gmra.mxu2 %v1034_v5 }
  0x93   :  { %774 = vmatmul.bf16.gmra.mxu3 %v1038_v6  ;;  %823 = vmatmul.bf16.gmra.mxu0 %v1042_v7 }
  0x9e   :  { %v1751_v18 = vpop.f32.mrf.mxu1 }
  0xa0   :  { %v603_v21 = vpop.f32.mrf.mxu0 }
  0xa1   :  { %681 = vmatmul.bf16.gmra.mxu1 %v1050_v16  ;;  %730 = vmatmul.bf16.gmra.mxu2 %v1054_v17  ;;  %v604_v59 = vadd.f32 %v1756_v22, %v603_v21 }
  0xa3   :  { %779 = vmatmul.bf16.gmra.mxu3 %v1058_v19  ;;  %828 = vmatmul.bf16.gmra.mxu0 %v1062_v20 }
  0xa4   :  { %v623_v23 = vpop.f32.mrf.mxu2 }
  0xa5   :  { %v1759_v24 = vadd.f32 %v1756_v22, %v623_v23 }
  0xa6   :  { %v633_v25 = vpop.f32.mrf.mxu3  ;;  %v1764_v27 = vpop.f32.mrf.mxu1 }
  0xa7   :  { %v1762_v26 = vadd.f32 %v1756_v22, %v633_v25 }
  0xa8   :  { %v605_v28 = vpop.f32.mrf.mxu0 }
  0xa9   :  { %v606_v2 = vadd.f32 %v1756_v22, %v605_v28 }
  0xac   :  { %v625_v37 = vpop.f32.mrf.mxu2 }
  0xad   :  { %v1791_v38 = vadd.f32 %v1756_v22, %v625_v37 }
  0xae   :  { %v635_v39 = vpop.f32.mrf.mxu3  ;;  %v1796_v43 = vpop.f32.mrf.mxu1 }
  0xaf   :  { %v1794_v42 = vadd.f32 %v1756_v22, %v635_v39 }
  0xb0   :  { %v608_v46 = vpop.f32.mrf.mxu0 }
  0xb1   :  { %686 = vmatmul.bf16.gmra.mxu1 %v1070_v40  ;;  %735 = vmatmul.bf16.gmra.mxu2 %v1074_v41  ;;  %v609_v12 = vadd.f32 %v1756_v22, %v608_v46  ;;  %v614_v41 = vadd.f32 %v1756_v22, %v1751_v18  ;;  %v616_v18 = vadd.f32 %v1756_v22, %v1764_v27 }
  0xb3   :  { %784 = vmatmul.bf16.gmra.mxu3 %v1078_v44  ;;  %833 = vmatmul.bf16.gmra.mxu0 %v1082_v45 }
  0xb4   :  { %v628_v47 = vpop.f32.mrf.mxu2 }
  0xb5   :  { %v1799_v48 = vadd.f32 %v1756_v22, %v628_v47 }
  0xb6   :  { %v638_v49 = vpop.f32.mrf.mxu3  ;;  %v1804_v51 = vpop.f32.mrf.mxu1 }
  0xb7   :  { %v1802_v50 = vadd.f32 %v1756_v22, %v638_v49 }
  0xb8   :  { %v610_v52 = vpop.f32.mrf.mxu0 }
  0xb9   :  { %v611_v30 = vadd.f32 %v1756_v22, %v610_v52 }
  0xbc   :  { %v630_v53 = vpop.f32.mrf.mxu2 }
  0xbd   :  { %v1807_v54 = vadd.f32 %v1756_v22, %v630_v53 }
  0xbe   :  { %v640_v55 = vpop.f32.mrf.mxu3  ;;  %v652_v57 = vpop.f32.mrf.mxu1 }
  0xbf   :  { %v1810_v56 = vadd.f32 %v1756_v22, %v640_v55  ;;  %v653_v60 = vadd.f32 %v652_v57, %v604_v59 }
  0xc0   :  { %v799_v58 = vpop.f32.mrf.mxu0 }
  0xc4   :  { %v701_v61 = vpop.f32.mrf.mxu2 }
  0xc5   :  { %v702_v62 = vadd.f32 %v701_v61, %v653_v60 }
  0xc6   :  { %v750_v63 = vpop.f32.mrf.mxu3  ;;  %v654_v0 = vpop.f32.mrf.mxu1 }
  0xc7   :  { %v751_v3 = vadd.f32 %v750_v63, %v702_v62  ;;  %v655_v4 = vadd.f32 %v654_v0, %v606_v2 }
  0xc8   :  { %v801_v1 = vpop.f32.mrf.mxu0 }
  0xc9   :  { %v800_v6 = vadd.f32 %v799_v58, %v751_v3 }
  0xcb   :  { %v855_v13 = vmul.f32 0.01, %v800_v6  ;;  %vm839_vm0 = vcmp.ge.f32.partialorder %v800_v6, 0.0 }
  0xcc   :  { %v703_v5 = vpop.f32.mrf.mxu2 }
  0xcd   :  { %v704_v7 = vadd.f32 %v703_v5, %v655_v4  ;;  %v871_v19 = vsel %vm839_vm0, %v800_v6, %v855_v13  ;;  %v619_v6 = vadd.f32 %v1756_v22, %v1796_v43  ;;  %v621_v43 = vadd.f32 %v1756_v22, %v1804_v51 }
  0xce   :  { %v752_v8 = vpop.f32.mrf.mxu3  ;;  %v657_v9 = vpop.f32.mrf.mxu1 }
  0xcf   :  { %v753_v10 = vadd.f32 %v752_v8, %v704_v7  ;;  %v658_v16 = vadd.f32 %v657_v9, %v609_v12 }
  0xd0   :  { %v804_v11 = vpop.f32.mrf.mxu0 }
  0xd1   :  { %v802_v14 = vadd.f32 %v801_v1, %v753_v10 }
  0xd3   :  { %vm840_vm1 = vcmp.ge.f32.partialorder %v802_v14, 0.0  ;;  %v856_v15 = vmul.f32 0.01, %v802_v14 }
  0xd4   :  { %v706_v17 = vpop.f32.mrf.mxu2 }
  0xd5   :  { %v872_v20 = vsel %vm840_vm1, %v802_v14, %v856_v15  ;;  %v707_v21 = vadd.f32 %v706_v17, %v658_v16 }
  0xd6   :  { %v755_v23 = vpop.f32.mrf.mxu3  ;;  %v1326_v25 = vpack.c.bf16 %v872_v20, %v871_v19  ;;  %v659_v28 = vpop.f32.mrf.mxu1 }
  0xd7   :  { %v756_v31 = vadd.f32 %v755_v23, %v707_v21  ;;  %v660_v32 = vadd.f32 %v659_v28, %v611_v30 }
  0xd8   :  { %v806_v29 = vpop.f32.mrf.mxu0  ;;  %1327 = vst [vmem:[%s1859_s3] sm:$0xff] %v1326_v25  }
  0xd9   :  { %v805_v34 = vadd.f32 %v804_v11, %v756_v31 }
  0xdb   :  { %v857_v44 = vmul.f32 0.01, %v805_v34  ;;  %vm841_vm2 = vcmp.ge.f32.partialorder %v805_v34, 0.0 }
  0xdc   :  { %v708_v33 = vpop.f32.mrf.mxu2 }
  0xdd   :  { %v709_v35 = vadd.f32 %v708_v33, %v660_v32  ;;  %v873_v52 = vsel %vm841_vm2, %v805_v34, %v857_v44 }
  0xde   :  { %v757_v36 = vpop.f32.mrf.mxu3  ;;  %v662_v37 = vpop.f32.mrf.mxu1 }
  0xdf   :  { %v758_v39 = vadd.f32 %v757_v36, %v709_v35  ;;  %v663_v47 = vadd.f32 %v662_v37, %v614_v41 }
  0xe0   :  { %v809_v40 = vpop.f32.mrf.mxu0 }
  0xe1   :  { %v807_v45 = vadd.f32 %v806_v29, %v758_v39 }
  0xe3   :  { %vm842_vm3 = vcmp.ge.f32.partialorder %v807_v45, 0.0  ;;  %v858_v46 = vmul.f32 0.01, %v807_v45 }
  0xe4   :  { %v711_v49 = vpop.f32.mrf.mxu2 }
  0xe5   :  { %v874_v53 = vsel %vm842_vm3, %v807_v45, %v858_v46  ;;  %v712_v55 = vadd.f32 %v711_v49, %v663_v47 }
  0xe6   :  { %v760_v57 = vpop.f32.mrf.mxu3  ;;  %v1331_v58 = vpack.c.bf16 %v874_v53, %v873_v52  ;;  %v664_v59 = vpop.f32.mrf.mxu1 }
  0xe7   :  { %v761_v61 = vadd.f32 %v760_v57, %v712_v55  ;;  %v665_v62 = vadd.f32 %v664_v59, %v616_v18 }
  0xe8   :  { %v811_v60 = vpop.f32.mrf.mxu0  ;;  %1363 = vst [vmem:[%s1859_s3 + $0x8] sm:$0xff] %v1331_v58  }
  0xe9   :  { %v810_v0 = vadd.f32 %v809_v40, %v761_v61 }
  0xeb   :  { %v859_v7 = vmul.f32 0.01, %v810_v0  ;;  %vm843_vm4 = vcmp.ge.f32.partialorder %v810_v0, 0.0 }
  0xec   :  { %v713_v63 = vpop.f32.mrf.mxu2 }
  0xed   :  { %v714_v1 = vadd.f32 %v713_v63, %v665_v62  ;;  %v875_v27 = vsel %vm843_vm4, %v810_v0, %v859_v7 }
  0xee   :  { %v762_v2 = vpop.f32.mrf.mxu3  ;;  %v667_v3 = vpop.f32.mrf.mxu1 }
  0xef   :  { %v763_v4 = vadd.f32 %v762_v2, %v714_v1  ;;  %v668_v10 = vadd.f32 %v667_v3, %v619_v6 }
  0xf0   :  { %v814_v5 = vpop.f32.mrf.mxu0 }
  0xf1   :  { %v812_v8 = vadd.f32 %v811_v60, %v763_v4 }
  0xf3   :  { %vm844_vm5 = vcmp.ge.f32.partialorder %v812_v8, 0.0  ;;  %v860_v9 = vmul.f32 0.01, %v812_v8 }
  0xf4   :  { %v716_v11 = vpop.f32.mrf.mxu2 }
  0xf5   :  { %v876_v12 = vsel %vm844_vm5, %v812_v8, %v860_v9  ;;  %v717_v13 = vadd.f32 %v716_v11, %v668_v10 }
  0xf6   :  { %v765_v14 = vpop.f32.mrf.mxu3  ;;  %v1336_v15 = vpack.c.bf16 %v876_v12, %v875_v27  ;;  %v669_v16 = vpop.f32.mrf.mxu1 }
  0xf7   :  { %v766_v19 = vadd.f32 %v765_v14, %v717_v13  ;;  %v670_v20 = vadd.f32 %v669_v16, %v621_v43 }
  0xf8   :  { %v816_v17 = vpop.f32.mrf.mxu0  ;;  %1364 = vst [vmem:[%s1859_s3 + $0x10] sm:$0xff] %v1336_v15  }
  0xf9   :  { %v815_v23 = vadd.f32 %v814_v5, %v766_v19 }
  0xfb   :  { %v861_v32 = vmul.f32 0.01, %v815_v23  ;;  %vm845_vm6 = vcmp.ge.f32.partialorder %v815_v23, 0.0 }
  0xfc   :  { %v718_v21 = vpop.f32.mrf.mxu2 }
  0xfd   :  { %v719_v25 = vadd.f32 %v718_v21, %v670_v20  ;;  %v877_v37 = vsel %vm845_vm6, %v815_v23, %v861_v32 }
  0xfe   :  { %v767_v28 = vpop.f32.mrf.mxu3  ;;  %v672_v29 = vpop.f32.mrf.mxu1 }
  0xff   :  { %v768_v30 = vadd.f32 %v767_v28, %v719_v25  ;;  %v673_v35 = vadd.f32 %v672_v29, %v1759_v24 }
 0x100   :  { %v819_v31 = vpop.f32.mrf.mxu0 }
 0x101   :  { %v817_v33 = vadd.f32 %v816_v17, %v768_v30 }
 0x103   :  { %vm846_vm7 = vcmp.ge.f32.partialorder %v817_v33, 0.0  ;;  %v862_v34 = vmul.f32 0.01, %v817_v33 }
 0x104   :  { %v721_v36 = vpop.f32.mrf.mxu2 }
 0x105   :  { %v878_v39 = vsel %vm846_vm7, %v817_v33, %v862_v34  ;;  %v722_v22 = vadd.f32 %v721_v36, %v673_v35 }
 0x106   :  { %v770_v51 = vpop.f32.mrf.mxu3  ;;  %v1341_v40 = vpack.c.bf16 %v878_v39, %v877_v37  ;;  %v674_v41 = vpop.f32.mrf.mxu1 }
 0x107   :  { %v771_v45 = vadd.f32 %v770_v51, %v722_v22  ;;  %v675_v46 = vadd.f32 %v674_v41, %v1791_v38 }
 0x108   :  { %v821_v44 = vpop.f32.mrf.mxu0  ;;  %1365 = vst [vmem:[%s1859_s3 + $0x18] sm:$0xff] %v1341_v40  }
 0x109   :  { %v820_v49 = vadd.f32 %v819_v31, %v771_v45 }
 0x10b   :  { %v863_v58 = vmul.f32 0.01, %v820_v49  ;;  %vm847_vm8 = vcmp.ge.f32.partialorder %v820_v49, 0.0 }
 0x10c   :  { %v723_v47 = vpop.f32.mrf.mxu2 }
 0x10d   :  { %v724_v52 = vadd.f32 %v723_v47, %v675_v46  ;;  %v879_v62 = vsel %vm847_vm8, %v820_v49, %v863_v58 }
 0x10e   :  { %v772_v53 = vpop.f32.mrf.mxu3  ;;  %v677_v24 = vpop.f32.mrf.mxu1 }
 0x10f   :  { %v773_v55 = vadd.f32 %v772_v53, %v724_v52  ;;  %v678_v18 = vadd.f32 %v677_v24, %v1799_v48 }
 0x110   :  { %v824_v57 = vpop.f32.mrf.mxu0 }
 0x111   :  { %v822_v59 = vadd.f32 %v821_v44, %v773_v55 }
 0x113   :  { %vm848_vm9 = vcmp.ge.f32.partialorder %v822_v59, 0.0  ;;  %v864_v60 = vmul.f32 0.01, %v822_v59 }
 0x114   :  { %v726_v61 = vpop.f32.mrf.mxu2 }
 0x115   :  { %v880_v63 = vsel %vm848_vm9, %v822_v59, %v864_v60  ;;  %v727_v0 = vadd.f32 %v726_v61, %v678_v18 }
 0x116   :  { %v775_v1 = vpop.f32.mrf.mxu3  ;;  %v1346_v38 = vpack.c.bf16 %v880_v63, %v879_v62  ;;  %v679_v2 = vpop.f32.mrf.mxu1 }
 0x117   :  { %v776_v4 = vadd.f32 %v775_v1, %v727_v0  ;;  %v680_v5 = vadd.f32 %v679_v2, %v1807_v54 }
 0x118   :  { %1366 = vst [vmem:[%s1859_s3 + $0x20] sm:$0xff] %v1346_v38   ;;  %v826_v3 = vpop.f32.mrf.mxu0 }
 0x119   :  { %v825_v7 = vadd.f32 %v824_v57, %v776_v4 }
 0x11b   :  { %v865_v11 = vmul.f32 0.01, %v825_v7  ;;  %vm849_vm10 = vcmp.ge.f32.partialorder %v825_v7, 0.0 }
 0x11c   :  { %v728_v6 = vpop.f32.mrf.mxu2 }
 0x11d   :  { %v729_v8 = vadd.f32 %v728_v6, %v680_v5  ;;  %v881_v16 = vsel %vm849_vm10, %v825_v7, %v865_v11 }
 0x11e   :  { %v777_v9 = vpop.f32.mrf.mxu3  ;;  %v682_v48 = vpop.f32.mrf.mxu1 }
 0x11f   :  { %v778_v10 = vadd.f32 %v777_v9, %v729_v8  ;;  %v683_v14 = vadd.f32 %v682_v48, %v1762_v26 }
 0x120   :  { %v829_v12 = vpop.f32.mrf.mxu0 }
 0x121   :  { %v827_v27 = vadd.f32 %v826_v3, %v778_v10 }
 0x123   :  { %vm850_vm11 = vcmp.ge.f32.partialorder %v827_v27, 0.0  ;;  %v866_v13 = vmul.f32 0.01, %v827_v27 }
 0x124   :  { %v731_v15 = vpop.f32.mrf.mxu2 }
 0x125   :  { %v882_v17 = vsel %vm850_vm11, %v827_v27, %v866_v13  ;;  %v732_v43 = vadd.f32 %v731_v15, %v683_v14 }
 0x126   :  { %v780_v19 = vpop.f32.mrf.mxu3  ;;  %v1351_v54 = vpack.c.bf16 %v882_v17, %v881_v16  ;;  %v684_v20 = vpop.f32.mrf.mxu1 }
 0x127   :  { %v781_v21 = vadd.f32 %v780_v19, %v732_v43  ;;  %v685_v23 = vadd.f32 %v684_v20, %v1794_v42 }
 0x128   :  { %1367 = vst [vmem:[%s1859_s3 + $0x28] sm:$0xff] %v1351_v54   ;;  %v831_v25 = vpop.f32.mrf.mxu0 }
 0x129   :  { %v830_v29 = vadd.f32 %v829_v12, %v781_v21 }
 0x12b   :  { %v867_v33 = vmul.f32 0.01, %v830_v29  ;;  %vm851_vm12 = vcmp.ge.f32.partialorder %v830_v29, 0.0 }
 0x12c   :  { %v733_v28 = vpop.f32.mrf.mxu2 }
 0x12d   :  { %v734_v30 = vadd.f32 %v733_v28, %v685_v23  ;;  %v883_v39 = vsel %vm851_vm12, %v830_v29, %v867_v33 }
 0x12e   :  { %v782_v31 = vpop.f32.mrf.mxu3  ;;  %v687_v26 = vpop.f32.mrf.mxu1 }
 0x12f   :  { %v783_v32 = vadd.f32 %v782_v31, %v734_v30  ;;  %v688_v36 = vadd.f32 %v687_v26, %v1802_v50 }
 0x130   :  { %v834_v41 = vpop.f32.mrf.mxu0 }
 0x131   :  { %v832_v34 = vadd.f32 %v831_v25, %v783_v32 }
 0x133   :  { %vm852_vm13 = vcmp.ge.f32.partialorder %v832_v34, 0.0  ;;  %v868_v35 = vmul.f32 0.01, %v832_v34 }
 0x134   :  { %v736_v37 = vpop.f32.mrf.mxu2 }
 0x135   :  { %v884_v22 = vsel %vm852_vm13, %v832_v34, %v868_v35  ;;  %v737_v51 = vadd.f32 %v736_v37, %v688_v36 }
 0x136   :  { %v785_v40 = vpop.f32.mrf.mxu3  ;;  %v1356_v42 = vpack.c.bf16 %v884_v22, %v883_v39  ;;  %v689_v44 = vpop.f32.mrf.mxu1 }
 0x137   :  { %v786_v45 = vadd.f32 %v785_v40, %v737_v51  ;;  %v690_v46 = vadd.f32 %v689_v44, %v1810_v56 }
 0x138   :  { %1368 = vst [vmem:[%s1859_s3 + $0x30] sm:$0xff] %v1356_v42   ;;  %v836_v24 = vpop.f32.mrf.mxu0 }
 0x139   :  { %v835_v49 = vadd.f32 %v834_v41, %v786_v45 }
 0x13b   :  { %v869_v55 = vmul.f32 0.01, %v835_v49  ;;  %vm853_vm14 = vcmp.ge.f32.partialorder %v835_v49, 0.0 }
 0x13c   :  { %v738_v47 = vpop.f32.mrf.mxu2 }
 0x13d   :  { %v739_v52 = vadd.f32 %v738_v47, %v690_v46  ;;  %v885_v59 = vsel %vm853_vm14, %v835_v49, %v869_v55 }
 0x13e   :  { %v787_v53 = vpop.f32.mrf.mxu3 }
 0x13f   :  { %v788_v50 = vadd.f32 %v787_v53, %v739_v52 }
 0x141   :  { %v837_v57 = vadd.f32 %v836_v24, %v788_v50 }
 0x143   :  { %vm854_vm15 = vcmp.ge.f32.partialorder %v837_v57, 0.0  ;;  %v870_v58 = vmul.f32 0.01, %v837_v57 }
 0x145   :  { %v886_v60 = vsel %vm854_vm15, %v837_v57, %v870_v58 }
 0x146   :  { %v1361_v18 = vpack.c.bf16 %v886_v60, %v885_v59 }
 0x148   :  { %1369 = vst [vmem:[%s1859_s3 + $0x38] sm:$0xff] %v1361_v18  }

// kernel: cotr_forward.6
= control target key start
LH: loop header
LB: loop body
LE: loop exit
PB: predicated region body
PF: predicated region fallthrough
CT: control target
= control target key end

     0   :  { %16 = vsyncpa [#allocation3], 0  ;;  %s14678_s0 = inlined_call_operand.vmem [shape: bf16[32,256], index: 0, kind: input, shape index: {}]   ;;  %s14679_s1 = inlined_call_operand.hbm [shape: bf16[256,3584], index: 1, kind: input, shape index: {}]   ;;  %s14680_s2 = inlined_call_operand.hbm [shape: f32[1,3584], index: 2, kind: input, shape index: {}]   ;;  %s14681_s3 = inlined_call_operand.hbm [shape: bf16[3584,128], index: 3, kind: input, shape index: {}]   ;;  %s14682_s4 = inlined_call_operand.hbm [shape: f32[1,128], index: 4, kind: input, shape index: {}]   ;;  %s14683_s5 = inlined_call_operand.hbm [shape: bf16[3584,128], index: 5, kind: input, shape index: {}]   ;;  %s14684_s6 = inlined_call_operand.vmem [shape: f32[32,128], index: 6, kind: input, shape index: {}]   ;;  %s14685_s7 = inlined_call_operand.hbm [shape: f32[128,128], index: 7, kind: input, shape index: {}]   ;;  %s14686_s8 = inlined_call_operand.hbm [shape: f32[1,128], index: 8, kind: input, shape index: {}]   ;;  %s14687_s9 = inlined_call_operand.vmem [shape: f32[32,128], index: 9, kind: output, shape index: {0}]   ;;  %s14688_s10 = inlined_call_operand.vmem [shape: f32[32,128], index: 10, kind: output, shape index: {1}]  }
   0x1   :  { %17 = vsyncpa [#allocation5], 0 }
   0x2   :  { %18 = vsyncpa [#allocation8], 0  ;;  %s40_s15 = sshll.u32 %s14680_s2, 4  ;;  %s41_s15 = int_to_ptr.hbm [resolvable:$true] %s40_s15 }
   0x3   :  { %19 = vsyncpa [#allocation11], 0  ;;  %s13640_s16 = smov [#allocation4]   ;;  %s64_s20 = sshll.u32 %s14682_s4, 4  ;;  %s65_s20 = int_to_ptr.hbm [resolvable:$true] %s64_s20 }
   0x4   :  { %s42_s17 = sshll.u32 %s13640_s16, 4  ;;  %s13641_s21 = smov [#allocation7]   ;;  %s43_s17 = int_to_ptr.vmem [resolvable:$true] %s42_s17 }
   0x5   :  { %45 = dma.hbm_to_vmem [thread:$0]  %s41_s15, 448, %s43_s17, [#allocation5]  }
   0x6   :  { %s66_s22 = sshll.u32 %s13641_s21, 4  ;;  %s89_s25 = sshll.u32 %s14685_s7, 4  ;;  %s67_s22 = int_to_ptr.vmem [resolvable:$true] %s66_s22  ;;  %s90_s25 = int_to_ptr.hbm [resolvable:$true] %s89_s25 }
   0x7   :  { %69 = dma.hbm_to_vmem [thread:$0]  %s65_s20, 16, %s67_s22, [#allocation8]  }
   0x8   :  { %s13642_s2 = smov [#allocation10]   ;;  %s26_s29 = sshll.u32 %s14679_s1, 4  ;;  %s27_s29 = int_to_ptr.hbm [resolvable:$true] %s26_s29 }
   0x9   :  { %s91_s26 = sshll.u32 %s13642_s2, 4  ;;  %s13643_s30 = smov 128   ;;  %s92_s26 = int_to_ptr.vmem [resolvable:$true] %s91_s26 }
   0xa   :  { %s13644_s4 = smov 8   ;;  %s13645_s11 = smov [#allocation2]  }
   0xb   :  { %97 = dma.hbm_to_vmem [thread:$0]  %s90_s25, 2048, %s92_s26, [#allocation11], %s13643_s30, %s13643_s30, %s13644_s4  }
   0xc   :  { %s28_s12 = sshll.u32 %s13645_s11, 4  ;;  %s13646_s13 = smov 1792   ;;  %s29_s12 = int_to_ptr.vmem [resolvable:$true] %s28_s12 }
   0xd   :  { %s13647_s14 = smov 112   ;;  %s50_s16 = sshll.u32 %s14681_s3, 4  ;;  %s51_s16 = int_to_ptr.hbm [resolvable:$true] %s50_s16 }
   0xe   :  { %34 = dma.hbm_to_vmem [thread:$0]  %s27_s29, 57344, %s29_s12, [#allocation3], %s13646_s13, %s13646_s13, %s13647_s14  }
   0xf   :  { %s13648_s17 = smov [#allocation6]   ;;  %s74_s20 = sshll.u32 %s14683_s5, 4  ;;  %s75_s20 = int_to_ptr.hbm [resolvable:$true] %s74_s20 }
  0x10   :  { %s52_s18 = sshll.u32 %s13648_s17, 4  ;;  %s13649_s21 = smov 64   ;;  %s53_s18 = int_to_ptr.vmem [resolvable:$true] %s52_s18 }
  0x11   :  { %s13650_s22 = smov 4   ;;  %s13651_s23 = smov [#allocation9]  }
  0x12   :  { %58 = dma.hbm_to_vmem [thread:$0]  %s51_s16, 28672, %s53_s18, [#allocation5], %s13649_s21, %s13649_s21, %s13650_s22  }
  0x13   :  { %s76_s24 = sshll.u32 %s13651_s23, 4  ;;  %s103_s26 = sshll.u32 %s14686_s8, 4  ;;  %s77_s24 = int_to_ptr.vmem [resolvable:$true] %s76_s24  ;;  %s104_s26 = int_to_ptr.hbm [resolvable:$true] %s103_s26 }
  0x14   :  { %82 = dma.hbm_to_vmem [thread:$0]  %s75_s20, 28672, %s77_s24, [#allocation8], %s13649_s21, %s13649_s21, %s13650_s22  }
  0x15   :  { %s13652_s3 = smov [#allocation12]  }
  0x16   :  { %s105_s27 = sshll.u32 %s13652_s3, 4  ;;  %s106_s27 = int_to_ptr.vmem [resolvable:$true] %s105_s27 }
  0x17   :  { %108 = dma.hbm_to_vmem [thread:$0]  %s104_s26, 16, %s106_s27, [#allocation11]  }
  0x18   :  { %13632 = dma.done.wait [#allocation3], 57344  }
  0x19   :  { %13633 = vsyncadd [#allocation3], 4294909952 }
  0x1a   :  { %13634 = dma.done.wait [#allocation5], 29120  }
  0x1b   :  { %13635 = vsyncadd [#allocation5], 4294938176 }
  0x1c   :  { %13636 = dma.done.wait [#allocation8], 28688  }
  0x1d   :  { %13637 = vsyncadd [#allocation8], 4294938608 }
  0x1e   :  { %13638 = dma.done.wait [#allocation11], 2064  }
  0x1f   :  { %13639 = vsyncadd [#allocation11], 4294965232  ;;  %v9693_v0 = vld [vmem:[#allocation2 + $0x620] sm:$0xf]  ;;  %v12705_v1 = vld [vmem:[#allocation2 + $0x68c] sm:$0xf0] }
  0x20   :  { %v10589_v2 = vld [vmem:[#allocation2 + $0xd20] sm:$0xf]  ;;  %v9694_v3 = vor.u32 %v12705_v1, %v9693_v0  ;;  %v12929_v4 = vld [vmem:[#allocation2 + $0xd8c] sm:$0xf0]  ;;  %v12691_v5 = vld [vmem:[#allocation2 + $0x624] sm:$0xf] }
  0x21   :  { %v9695_v6 = vld [vmem:[#allocation2 + $0x690] sm:$0xf0]  ;;  %v10590_v7 = vor.u32 %v12929_v4, %v10589_v2  ;;  %v12915_v9 = vld [vmem:[#allocation2 + $0xd24] sm:$0xf]  ;;  %v9581_v11 = vld [vmem:[#allocation2 + $0x540] sm:$0xf] }
  0x22   :  { %v9698_v8 = vor.u32 %v12691_v5, %v9695_v6  ;;  %v10591_v10 = vld [vmem:[#allocation2 + $0xd90] sm:$0xf0]  ;;  %2913 = vmatpush.bf16.msra.mxu0 %v9694_v3  ;;  %v12677_v13 = vld [vmem:[#allocation2 + $0x5ac] sm:$0xf0]  ;;  %v10477_v14 = vld [vmem:[#allocation2 + $0xc40] sm:$0xf] }
  0x23   :  { %v10594_v12 = vor.u32 %v12915_v9, %v10591_v10  ;;  %v12901_v15 = vld [vmem:[#allocation2 + $0xcac] sm:$0xf0]  ;;  %2932 = vmatpush.bf16.msra.mxu1 %v10590_v7  ;;  %v9582_v16 = vor.u32 %v12677_v13, %v9581_v11  ;;  %v12663_v18 = vld [vmem:[#allocation2 + $0x544] sm:$0xf]  ;;  %v9583_v19 = vld [vmem:[#allocation2 + $0x5b0] sm:$0xf0] }
  0x24   :  { %2951 = vmatpush.bf16.msra.mxu2 %v9698_v8  ;;  %v10478_v17 = vor.u32 %v12901_v15, %v10477_v14  ;;  %v12887_v20 = vld [vmem:[#allocation2 + $0xc44] sm:$0xf]  ;;  %v9586_v21 = vor.u32 %v12663_v18, %v9583_v19  ;;  %v10479_v22 = vld [vmem:[#allocation2 + $0xcb0] sm:$0xf0]  ;;  %v9469_v23 = vld [vmem:[#allocation2 + $0x460] sm:$0xf] }
  0x25   :  { %2970 = vmatpush.bf16.msra.mxu3 %v10594_v12  ;;  %v12649_v24 = vld [vmem:[#allocation2 + $0x4cc] sm:$0xf0]  ;;  %v10482_v25 = vor.u32 %v12887_v20, %v10479_v22  ;;  %v10365_v26 = vld [vmem:[#allocation2 + $0xb60] sm:$0xf]  ;;  %v12635_v28 = vld [vmem:[#allocation2 + $0x464] sm:$0xf] }
  0x26   :  { %v12873_v27 = vld [vmem:[#allocation2 + $0xbcc] sm:$0xf0]  ;;  %2914 = vmatpush.bf16.msra.mxu0 %v9582_v16  ;;  %v9470_v29 = vor.u32 %v12649_v24, %v9469_v23  ;;  %v9471_v30 = vld [vmem:[#allocation2 + $0x4d0] sm:$0xf0]  ;;  %v12859_v31 = vld [vmem:[#allocation2 + $0xb64] sm:$0xf] }
  0x27   :  { %v10367_v32 = vld [vmem:[#allocation2 + $0xbd0] sm:$0xf0]  ;;  %2933 = vmatpush.bf16.msra.mxu1 %v10478_v17  ;;  %v10366_v33 = vor.u32 %v12873_v27, %v10365_v26  ;;  %v9474_v34 = vor.u32 %v12635_v28, %v9471_v30  ;;  %v9357_v35 = vld [vmem:[#allocation2 + $0x380] sm:$0xf]  ;;  %v12621_v36 = vld [vmem:[#allocation2 + $0x3ec] sm:$0xf0] }
  0x28   :  { %2952 = vmatpush.bf16.msra.mxu2 %v9586_v21  ;;  %v10253_v37 = vld [vmem:[#allocation2 + $0xa80] sm:$0xf]  ;;  %v10370_v38 = vor.u32 %v12859_v31, %v10367_v32  ;;  %v12845_v39 = vld [vmem:[#allocation2 + $0xaec] sm:$0xf0]  ;;  %v12607_v40 = vld [vmem:[#allocation2 + $0x384] sm:$0xf]  ;;  %v9358_v44 = vor.u32 %v12621_v36, %v9357_v35 }
  0x29   :  { %2971 = vmatpush.bf16.msra.mxu3 %v10482_v25  ;;  %v9359_v41 = vld [vmem:[#allocation2 + $0x3f0] sm:$0xf0]  ;;  %v12831_v42 = vld [vmem:[#allocation2 + $0xa84] sm:$0xf]  ;;  %v10254_v45 = vor.u32 %v12845_v39, %v10253_v37  ;;  %v9245_v47 = vld [vmem:[#allocation2 + $0x2a0] sm:$0xf] }
  0x2a   :  { %v10255_v43 = vld [vmem:[#allocation2 + $0xaf0] sm:$0xf0]  ;;  %2915 = vmatpush.bf16.msra.mxu0 %v9470_v29  ;;  %v9362_v46 = vor.u32 %v12607_v40, %v9359_v41  ;;  %v12593_v48 = vld [vmem:[#allocation2 + $0x30c] sm:$0xf0]  ;;  %v10141_v49 = vld [vmem:[#allocation2 + $0x9a0] sm:$0xf] }
  0x2b   :  { %2934 = vmatpush.bf16.msra.mxu1 %v10366_v33  ;;  %v10258_v50 = vor.u32 %v12831_v42, %v10255_v43  ;;  %v12817_v51 = vld [vmem:[#allocation2 + $0xa0c] sm:$0xf0]  ;;  %v12579_v52 = vld [vmem:[#allocation2 + $0x2a4] sm:$0xf]  ;;  %v9247_v53 = vld [vmem:[#allocation2 + $0x310] sm:$0xf0]  ;;  %v9246_v56 = vor.u32 %v12593_v48, %v9245_v47 }
  0x2c   :  { %2953 = vmatpush.bf16.msra.mxu2 %v9474_v34  ;;  %v12803_v54 = vld [vmem:[#allocation2 + $0x9a4] sm:$0xf]  ;;  %v10143_v55 = vld [vmem:[#allocation2 + $0xa10] sm:$0xf0]  ;;  %v10142_v57 = vor.u32 %v12817_v51, %v10141_v49  ;;  %v9250_v58 = vor.u32 %v12579_v52, %v9247_v53  ;;  %v9133_v59 = vld [vmem:[#allocation2 + $0x1c0] sm:$0xf] }
  0x2d   :  { %2972 = vmatpush.bf16.msra.mxu3 %v10370_v38  ;;  %v12565_v60 = vld [vmem:[#allocation2 + $0x22c] sm:$0xf0]  ;;  %v10029_v61 = vld [vmem:[#allocation2 + $0x8c0] sm:$0xf]  ;;  %v10146_v62 = vor.u32 %v12803_v54, %v10143_v55  ;;  %v12551_v0 = vld [vmem:[#allocation2 + $0x1c4] sm:$0xf] }
  0x2e   :  { %2916 = vmatpush.bf16.msra.mxu0 %v9358_v44  ;;  %v12789_v63 = vld [vmem:[#allocation2 + $0x92c] sm:$0xf0]  ;;  %v9135_v1 = vld [vmem:[#allocation2 + $0x230] sm:$0xf0]  ;;  %v12775_v2 = vld [vmem:[#allocation2 + $0x8c4] sm:$0xf]  ;;  %v9134_v4 = vor.u32 %v12565_v60, %v9133_v59 }
  0x2f   :  { %2935 = vmatpush.bf16.msra.mxu1 %v10254_v45  ;;  %v10031_v3 = vld [vmem:[#allocation2 + $0x930] sm:$0xf0]  ;;  %v10030_v5 = vor.u32 %v12789_v63, %v10029_v61  ;;  %v9138_v6 = vor.u32 %v12551_v0, %v9135_v1  ;;  %v9021_v7 = vld [vmem:[#allocation2 + $0xe0] sm:$0xf]  ;;  %v12537_v8 = vld [vmem:[#allocation2 + $0x14c] sm:$0xf0] }
  0x30   :  { %2954 = vmatpush.bf16.msra.mxu2 %v9362_v46  ;;  %v9917_v9 = vld [vmem:[#allocation2 + $0x7e0] sm:$0xf]  ;;  %v10034_v10 = vor.u32 %v12775_v2, %v10031_v3  ;;  %v12761_v11 = vld [vmem:[#allocation2 + $0x84c] sm:$0xf0]  ;;  %v12523_v12 = vld [vmem:[#allocation2 + $0xe4] sm:$0xf]  ;;  %v9022_v16 = vor.u32 %v12537_v8, %v9021_v7 }
  0x31   :  { %2973 = vmatpush.bf16.msra.mxu3 %v10258_v50  ;;  %v9023_v13 = vld [vmem:[#allocation2 + $0x150] sm:$0xf0]  ;;  %v12747_v14 = vld [vmem:[#allocation2 + $0x7e4] sm:$0xf]  ;;  %v8909_v17 = vld [vmem:[#allocation2] sm:$0xf]  ;;  %v9918_v19 = vor.u32 %v12761_v11, %v9917_v9 }
  0x32   :  { %2917 = vmatpush.bf16.msra.mxu0 %v9246_v56  ;;  %v9919_v15 = vld [vmem:[#allocation2 + $0x850] sm:$0xf0]  ;;  %v12509_v18 = vld [vmem:[#allocation2 + $0x6c] sm:$0xf0]  ;;  %v9026_v20 = vor.u32 %v12523_v12, %v9023_v13  ;;  %v9805_v21 = vld [vmem:[#allocation2 + $0x700] sm:$0xf] }
  0x33   :  { %2936 = vmatpush.bf16.msra.mxu1 %v10142_v57  ;;  %v12733_v22 = vld [vmem:[#allocation2 + $0x76c] sm:$0xf0]  ;;  %v12495_v23 = vld [vmem:[#allocation2 + $0x4] sm:$0xf]  ;;  %v9922_v24 = vor.u32 %v12747_v14, %v9919_v15  ;;  %v8911_v25 = vld [vmem:[#allocation2 + $0x70] sm:$0xf0]  ;;  %v8910_v31 = vor.u32 %v12509_v18, %v8909_v17 }
  0x34   :  { %2955 = vmatpush.bf16.msra.mxu2 %v9250_v58  ;;  %v12719_v26 = vld [vmem:[#allocation2 + $0x704] sm:$0xf]  ;;  %v9807_v27 = vld [vmem:[#allocation2 + $0x770] sm:$0xf0]  ;;  %v8893_v28 = vld [vmem:[%s14678_s0] sm:$0xf]  ;;  %v9806_v35 = vor.u32 %v12733_v22, %v9805_v21  ;;  %v8914_v36 = vor.u32 %v12495_v23, %v8911_v25 }
  0x35   :  { %2974 = vmatpush.bf16.msra.mxu3 %v10146_v62  ;;  %v12692_v29 = vld [vmem:[#allocation2 + $0x62c] sm:$0xf]  ;;  %v9703_v30 = vld [vmem:[#allocation2 + $0x698] sm:$0xf0]  ;;  %v12492_v32 = vld [vmem:[%s14678_s0 + $0x4] sm:$0xf0]  ;;  %v9810_v39 = vor.u32 %v12719_v26, %v9807_v27 }
  0x36   :  { %2918 = vmatpush.bf16.msra.mxu0 %v9134_v4  ;;  %v10597_v33 = vld [vmem:[#allocation2 + $0xd28] sm:$0xf]  ;;  %v12930_v34 = vld [vmem:[#allocation2 + $0xd94] sm:$0xf0]  ;;  %v12491_v37 = vld [vmem:[%s14678_s0 + $0x4] sm:$0xf]  ;;  %v9706_v40 = vor.u32 %v12692_v29, %v9703_v30  ;;  %v13741_v44 = vor.u32 %v12492_v32, %v8893_v28 }
  0x37   :  { %2937 = vmatpush.bf16.msra.mxu1 %v10030_v5  ;;  %v8895_v38 = vld [vmem:[%s14678_s0 + $0x8] sm:$0xf0]  ;;  %v9701_v41 = vld [vmem:[#allocation2 + $0x628] sm:$0xf]  ;;  %v12706_v42 = vld [vmem:[#allocation2 + $0x694] sm:$0xf0]  ;;  %v10598_v45 = vor.u32 %v12930_v34, %v10597_v33 }
  0x38   :  { %2956 = vmatpush.bf16.msra.mxu2 %v9138_v6  ;;  %v12916_v43 = vld [vmem:[#allocation2 + $0xd2c] sm:$0xf]  ;;  %v10599_v46 = vld [vmem:[#allocation2 + $0xd98] sm:$0xf0]  ;;  %v13743_v49 = vor.u32 %v12491_v37, %v8895_v38  ;;  %v10485_v50 = vld [vmem:[#allocation2 + $0xc48] sm:$0xf]  ;;  %v9702_v52 = vor.u32 %v12706_v42, %v9701_v41 }
  0x39   :  { %2975 = vmatpush.bf16.msra.mxu3 %v10034_v10  ;;  %v12664_v47 = vld [vmem:[#allocation2 + $0x54c] sm:$0xf]  ;;  %v9591_v48 = vld [vmem:[#allocation2 + $0x5b8] sm:$0xf0]  ;;  %v12902_v51 = vld [vmem:[#allocation2 + $0xcb4] sm:$0xf0]  ;;  %v10602_v53 = vor.u32 %v12916_v43, %v10599_v46 }
  0x3a   :  { %2919 = vmatpush.bf16.msra.mxu0 %v9022_v16  ;;  %v9594_v54 = vor.u32 %v12664_v47, %v9591_v48  ;;  %v9589_v55 = vld [vmem:[#allocation2 + $0x548] sm:$0xf]  ;;  %v12678_v56 = vld [vmem:[#allocation2 + $0x5b4] sm:$0xf0]  ;;  %v12888_v57 = vld [vmem:[#allocation2 + $0xc4c] sm:$0xf]  ;;  %v10486_v58 = vor.u32 %v12902_v51, %v10485_v50 }
  0x3b   :  { %2938 = vmatpush.bf16.msra.mxu1 %v9918_v19  ;;  %v10487_v59 = vld [vmem:[#allocation2 + $0xcb8] sm:$0xf0]  ;;  %v12636_v60 = vld [vmem:[#allocation2 + $0x46c] sm:$0xf]  ;;  %v10373_v62 = vld [vmem:[#allocation2 + $0xb68] sm:$0xf]  ;;  %v9590_v0 = vor.u32 %v12678_v56, %v9589_v55 }
  0x3c   :  { %2957 = vmatpush.bf16.msra.mxu2 %v9026_v20  ;;  %v9479_v61 = vld [vmem:[#allocation2 + $0x4d8] sm:$0xf0]  ;;  %v12874_v63 = vld [vmem:[#allocation2 + $0xbd4] sm:$0xf0]  ;;  %v10490_v1 = vor.u32 %v12888_v57, %v10487_v59  ;;  %v9477_v3 = vld [vmem:[#allocation2 + $0x468] sm:$0xf] }
  0x3d   :  { %2976 = vmatpush.bf16.msra.mxu3 %v9922_v24  ;;  %v9482_v2 = vor.u32 %v12636_v60, %v9479_v61  ;;  %v12650_v4 = vld [vmem:[#allocation2 + $0x4d4] sm:$0xf0]  ;;  %v12860_v5 = vld [vmem:[#allocation2 + $0xb6c] sm:$0xf]  ;;  %v10374_v6 = vor.u32 %v12874_v63, %v10373_v62  ;;  %v10375_v7 = vld [vmem:[#allocation2 + $0xbd8] sm:$0xf0] }
  0x3e   :  { %2920 = vmatpush.bf16.msra.mxu0 %v8910_v31  ;;  %v12608_v8 = vld [vmem:[#allocation2 + $0x38c] sm:$0xf]  ;;  %v9367_v9 = vld [vmem:[#allocation2 + $0x3f8] sm:$0xf0]  ;;  %v10261_v10 = vld [vmem:[#allocation2 + $0xa88] sm:$0xf]  ;;  %v9478_v12 = vor.u32 %v12650_v4, %v9477_v3  ;;  %v10378_v14 = vor.u32 %v12860_v5, %v10375_v7 }
  0x3f   :  { %2939 = vmatpush.bf16.msra.mxu1 %v9806_v35  ;;  %v12846_v11 = vld [vmem:[#allocation2 + $0xaf4] sm:$0xf0]  ;;  %v9365_v13 = vld [vmem:[#allocation2 + $0x388] sm:$0xf]  ;;  %v9370_v15 = vor.u32 %v12608_v8, %v9367_v9  ;;  %v12832_v17 = vld [vmem:[#allocation2 + $0xa8c] sm:$0xf] }
  0x40   :  { %2958 = vmatpush.bf16.msra.mxu2 %v8914_v36  ;;  %v12622_v16 = vld [vmem:[#allocation2 + $0x3f4] sm:$0xf0]  ;;  %v10263_v18 = vld [vmem:[#allocation2 + $0xaf8] sm:$0xf0]  ;;  %v10262_v19 = vor.u32 %v12846_v11, %v10261_v10  ;;  %v8901_v20 = vld [vmem:[%s14678_s0 + $0x10] sm:$0xf] }
  0x41   :  { %2977 = vmatpush.bf16.msra.mxu3 %v9810_v39  ;;  %2921 = vmatmul.bf16.vlgmr.msra.gmra.mxu0 %v13741_v44  ;;  %v12580_v21 = vld [vmem:[#allocation2 + $0x2ac] sm:$0xf]  ;;  %v9255_v22 = vld [vmem:[#allocation2 + $0x318] sm:$0xf0]  ;;  %v12494_v23 = vld [vmem:[%s14678_s0 + $0x14] sm:$0xf0]  ;;  %v9366_v26 = vor.u32 %v12622_v16, %v9365_v13  ;;  %v10266_v29 = vor.u32 %v12832_v17, %v10263_v18 }
  0x42   :  { %2940 = vmatmul.bf16.vlgmr.msra.gmra.mxu1 %v13743_v49  ;;  %2989 = vmatpush.bf16.msrb.mxu0 %v9702_v52  ;;  %v10149_v24 = vld [vmem:[#allocation2 + $0x9a8] sm:$0xf]  ;;  %v12818_v25 = vld [vmem:[#allocation2 + $0xa14] sm:$0xf0]  ;;  %v12493_v27 = vld [vmem:[%s14678_s0 + $0x14] sm:$0xf]  ;;  %v9258_v30 = vor.u32 %v12580_v21, %v9255_v22  ;;  %v13761_v34 = vor.u32 %v12494_v23, %v8901_v20 }
  0x43   :  { %3008 = vmatpush.bf16.msrb.mxu1 %v10598_v45  ;;  %2959 = vmatmul.bf16.vlgmr.msra.gmra.mxu2 %v13741_v44  ;;  %v8903_v28 = vld [vmem:[%s14678_s0 + $0x18] sm:$0xf0]  ;;  %v9253_v31 = vld [vmem:[#allocation2 + $0x2a8] sm:$0xf]  ;;  %v12594_v32 = vld [vmem:[#allocation2 + $0x314] sm:$0xf0]  ;;  %v10150_v35 = vor.u32 %v12818_v25, %v10149_v24 }
  0x44   :  { %3027 = vmatpush.bf16.msrb.mxu2 %v9706_v40  ;;  %2978 = vmatmul.bf16.vlgmr.msra.gmra.mxu3 %v13743_v49  ;;  %v12804_v33 = vld [vmem:[#allocation2 + $0x9ac] sm:$0xf]  ;;  %v10151_v36 = vld [vmem:[#allocation2 + $0xa18] sm:$0xf0]  ;;  %v13763_v39 = vor.u32 %v12493_v27, %v8903_v28  ;;  %v10037_v40 = vld [vmem:[#allocation2 + $0x8c8] sm:$0xf]  ;;  %v9254_v42 = vor.u32 %v12594_v32, %v9253_v31 }
  0x45   :  { %3046 = vmatpush.bf16.msrb.mxu3 %v10602_v53  ;;  %v12552_v37 = vld [vmem:[#allocation2 + $0x1cc] sm:$0xf]  ;;  %v9143_v38 = vld [vmem:[#allocation2 + $0x238] sm:$0xf0]  ;;  %v12790_v41 = vld [vmem:[#allocation2 + $0x934] sm:$0xf0]  ;;  %v10154_v43 = vor.u32 %v12804_v33, %v10151_v36 }
  0x46   :  { %2990 = vmatpush.bf16.msrb.mxu0 %v9590_v0  ;;  %v9146_v45 = vor.u32 %v12552_v37, %v9143_v38  ;;  %v9141_v46 = vld [vmem:[#allocation2 + $0x1c8] sm:$0xf]  ;;  %v12566_v47 = vld [vmem:[#allocation2 + $0x234] sm:$0xf0]  ;;  %v12776_v48 = vld [vmem:[#allocation2 + $0x8cc] sm:$0xf]  ;;  %v10038_v50 = vor.u32 %v12790_v41, %v10037_v40 }
  0x47   :  { %3009 = vmatpush.bf16.msrb.mxu1 %v10486_v58  ;;  %v10039_v51 = vld [vmem:[#allocation2 + $0x938] sm:$0xf0]  ;;  %v12524_v52 = vld [vmem:[#allocation2 + $0xec] sm:$0xf]  ;;  %v12762_v55 = vld [vmem:[#allocation2 + $0x854] sm:$0xf0]  ;;  %v9142_v56 = vor.u32 %v12566_v47, %v9141_v46 }
  0x48   :  { %3028 = vmatpush.bf16.msrb.mxu2 %v9594_v54  ;;  %v9031_v53 = vld [vmem:[#allocation2 + $0x158] sm:$0xf0]  ;;  %v9925_v54 = vld [vmem:[#allocation2 + $0x7e8] sm:$0xf]  ;;  %v10042_v58 = vor.u32 %v12776_v48, %v10039_v51  ;;  %v12538_v60 = vld [vmem:[#allocation2 + $0x154] sm:$0xf0] }
  0x49   :  { %3047 = vmatpush.bf16.msrb.mxu3 %v10490_v1  ;;  %v9029_v57 = vld [vmem:[#allocation2 + $0xe8] sm:$0xf]  ;;  %v9034_v59 = vor.u32 %v12524_v52, %v9031_v53  ;;  %v12748_v61 = vld [vmem:[#allocation2 + $0x7ec] sm:$0xf]  ;;  %v9927_v62 = vld [vmem:[#allocation2 + $0x858] sm:$0xf0]  ;;  %v9926_v63 = vor.u32 %v12762_v55, %v9925_v54 }
  0x4a   :  { %2991 = vmatpush.bf16.msrb.mxu0 %v9478_v12  ;;  %v12496_v0 = vld [vmem:[#allocation2 + $0xc] sm:$0xf]  ;;  %v8919_v1 = vld [vmem:[#allocation2 + $0x78] sm:$0xf0]  ;;  %v12734_v3 = vld [vmem:[#allocation2 + $0x774] sm:$0xf0]  ;;  %v9930_v10 = vor.u32 %v12748_v61, %v9927_v62 }
  0x4b   :  { %3010 = vmatpush.bf16.msrb.mxu1 %v10374_v6  ;;  %v12693_v4 = vld [vmem:[#allocation2 + $0x634] sm:$0xf]  ;;  %v9711_v5 = vld [vmem:[#allocation2 + $0x6a0] sm:$0xf0]  ;;  %v9030_v6 = vor.u32 %v12538_v60, %v9029_v57  ;;  %v8917_v7 = vld [vmem:[#allocation2 + $0x8] sm:$0xf]  ;;  %v8922_v11 = vor.u32 %v12496_v0, %v8919_v1 }
  0x4c   :  { %3029 = vmatpush.bf16.msrb.mxu2 %v9482_v2  ;;  %v9813_v2 = vld [vmem:[#allocation2 + $0x708] sm:$0xf]  ;;  %v10605_v8 = vld [vmem:[#allocation2 + $0xd30] sm:$0xf]  ;;  %v12931_v9 = vld [vmem:[#allocation2 + $0xd9c] sm:$0xf0]  ;;  %v9714_v16 = vor.u32 %v12693_v4, %v9711_v5 }
  0x4d   :  { %3048 = vmatpush.bf16.msrb.mxu3 %v10378_v14  ;;  %v12510_v12 = vld [vmem:[#allocation2 + $0x74] sm:$0xf0]  ;;  %v12720_v13 = vld [vmem:[#allocation2 + $0x70c] sm:$0xf]  ;;  %v9815_v14 = vld [vmem:[#allocation2 + $0x778] sm:$0xf0]  ;;  %v10606_v20 = vor.u32 %v12931_v9, %v10605_v8 }
  0x4e   :  { %2992 = vmatpush.bf16.msrb.mxu0 %v9366_v26  ;;  %v9709_v17 = vld [vmem:[#allocation2 + $0x630] sm:$0xf]  ;;  %v12707_v18 = vld [vmem:[#allocation2 + $0x69c] sm:$0xf0]  ;;  %v10607_v21 = vld [vmem:[#allocation2 + $0xda0] sm:$0xf0]  ;;  %v8918_v24 = vor.u32 %v12510_v12, %v8917_v7  ;;  %v9818_v25 = vor.u32 %v12720_v13, %v9815_v14 }
  0x4f   :  { %3011 = vmatpush.bf16.msrb.mxu1 %v10262_v19  ;;  %v12917_v19 = vld [vmem:[#allocation2 + $0xd34] sm:$0xf]  ;;  %v9599_v23 = vld [vmem:[#allocation2 + $0x5c0] sm:$0xf0]  ;;  %v9710_v26 = vor.u32 %v12707_v18, %v9709_v17  ;;  %v9597_v27 = vld [vmem:[#allocation2 + $0x550] sm:$0xf] }
  0x50   :  { %3030 = vmatpush.bf16.msrb.mxu2 %v9370_v15  ;;  %v9814_v15 = vor.u32 %v12734_v3, %v9813_v2  ;;  %v12665_v22 = vld [vmem:[#allocation2 + $0x554] sm:$0xf]  ;;  %v12679_v28 = vld [vmem:[#allocation2 + $0x5bc] sm:$0xf0]  ;;  %v10493_v31 = vld [vmem:[#allocation2 + $0xc50] sm:$0xf] }
  0x51   :  { %3049 = vmatpush.bf16.msrb.mxu3 %v10266_v29  ;;  %2926 = vmatmul.bf16.gmra.mxu0 %v13761_v34  ;;  %v10610_v29 = vor.u32 %v12917_v19, %v10607_v21  ;;  %v12903_v32 = vld [vmem:[#allocation2 + $0xcbc] sm:$0xf0]  ;;  %v12889_v33 = vld [vmem:[#allocation2 + $0xc54] sm:$0xf]  ;;  %v9487_v37 = vld [vmem:[#allocation2 + $0x4e0] sm:$0xf0]  ;;  %v9598_v38 = vor.u32 %v12679_v28, %v9597_v27 }
  0x52   :  { %2945 = vmatmul.bf16.gmra.mxu1 %v13763_v39  ;;  %2993 = vmatpush.bf16.msrb.mxu0 %v9254_v42  ;;  %v12637_v36 = vld [vmem:[#allocation2 + $0x474] sm:$0xf]  ;;  %v10494_v40 = vor.u32 %v12903_v32, %v10493_v31  ;;  %v9485_v41 = vld [vmem:[#allocation2 + $0x470] sm:$0xf]  ;;  %v12651_v42 = vld [vmem:[#allocation2 + $0x4dc] sm:$0xf0] }
  0x53   :  { %3012 = vmatpush.bf16.msrb.mxu1 %v10150_v35  ;;  %2964 = vmatmul.bf16.gmra.mxu2 %v13761_v34  ;;  %v10495_v35 = vld [vmem:[#allocation2 + $0xcc0] sm:$0xf0]  ;;  %v10381_v46 = vld [vmem:[#allocation2 + $0xb70] sm:$0xf]  ;;  %v12875_v47 = vld [vmem:[#allocation2 + $0xbdc] sm:$0xf0]  ;;  %v9486_v53 = vor.u32 %v12651_v42, %v9485_v41 }
  0x54   :  { %3031 = vmatpush.bf16.msrb.mxu2 %v9258_v30  ;;  %2983 = vmatmul.bf16.gmra.mxu3 %v13763_v39  ;;  %v9602_v30 = vor.u32 %v12665_v22, %v9599_v23  ;;  %v12861_v48 = vld [vmem:[#allocation2 + $0xb74] sm:$0xf]  ;;  %v9375_v52 = vld [vmem:[#allocation2 + $0x400] sm:$0xf0]  ;;  %v10382_v54 = vor.u32 %v12875_v47, %v10381_v46  ;;  %v9373_v55 = vld [vmem:[#allocation2 + $0x390] sm:$0xf] }
  0x55   :  { %3050 = vmatpush.bf16.msrb.mxu3 %v10154_v43  ;;  %v10498_v43 = vor.u32 %v12889_v33, %v10495_v35  ;;  %v12609_v51 = vld [vmem:[#allocation2 + $0x394] sm:$0xf]  ;;  %v12847_v60 = vld [vmem:[#allocation2 + $0xafc] sm:$0xf0]  ;;  %v10271_v62 = vld [vmem:[#allocation2 + $0xb00] sm:$0xf0] }
  0x56   :  { %2994 = vmatpush.bf16.msrb.mxu0 %v9142_v56  ;;  %v12623_v56 = vld [vmem:[#allocation2 + $0x3fc] sm:$0xf0]  ;;  %v12833_v61 = vld [vmem:[#allocation2 + $0xa94] sm:$0xf]  ;;  %v9263_v0 = vld [vmem:[#allocation2 + $0x320] sm:$0xf0] }
  0x57   :  { %3013 = vmatpush.bf16.msrb.mxu1 %v10038_v50  ;;  %v10383_v50 = vld [vmem:[#allocation2 + $0xbe0] sm:$0xf0]  ;;  %v9374_v1 = vor.u32 %v12623_v56, %v9373_v55  ;;  %v9261_v3 = vld [vmem:[#allocation2 + $0x2b0] sm:$0xf]  ;;  %v12595_v4 = vld [vmem:[#allocation2 + $0x31c] sm:$0xf0]  ;;  %v10274_v5 = vor.u32 %v12833_v61, %v10271_v62 }
  0x58   :  { %3032 = vmatpush.bf16.msrb.mxu2 %v9146_v45  ;;  %v9490_v45 = vor.u32 %v12637_v36, %v9487_v37  ;;  %v10386_v57 = vor.u32 %v12861_v48, %v10383_v50  ;;  %v10157_v7 = vld [vmem:[#allocation2 + $0x9b0] sm:$0xf]  ;;  %v12819_v8 = vld [vmem:[#allocation2 + $0xa1c] sm:$0xf0]  ;;  %v12805_v9 = vld [vmem:[#allocation2 + $0x9b4] sm:$0xf]  ;;  %v9262_v13 = vor.u32 %v12595_v4, %v9261_v3 }
  0x59   :  { %3051 = vmatpush.bf16.msrb.mxu3 %v10042_v58  ;;  %v9378_v58 = vor.u32 %v12609_v51, %v9375_v52  ;;  %v9151_v12 = vld [vmem:[#allocation2 + $0x240] sm:$0xf0]  ;;  %v10158_v14 = vor.u32 %v12819_v8, %v10157_v7  ;;  %v10045_v19 = vld [vmem:[#allocation2 + $0x8d0] sm:$0xf]  ;;  %v12777_v21 = vld [vmem:[#allocation2 + $0x8d4] sm:$0xf] }
  0x5a   :  { %2995 = vmatpush.bf16.msrb.mxu0 %v9030_v6  ;;  %v10047_v22 = vld [vmem:[#allocation2 + $0x940] sm:$0xf0]  ;;  %v12525_v23 = vld [vmem:[#allocation2 + $0xf4] sm:$0xf]  ;;  %v9037_v27 = vld [vmem:[#allocation2 + $0xf0] sm:$0xf] }
  0x5b   :  { %3014 = vmatpush.bf16.msrb.mxu1 %v9926_v63  ;;  %v12581_v63 = vld [vmem:[#allocation2 + $0x2b4] sm:$0xf]  ;;  %v12539_v28 = vld [vmem:[#allocation2 + $0x15c] sm:$0xf0]  ;;  %v9933_v31 = vld [vmem:[#allocation2 + $0x7f0] sm:$0xf] }
  0x5c   :  { %3033 = vmatpush.bf16.msrb.mxu2 %v9034_v59  ;;  %v10269_v59 = vld [vmem:[#allocation2 + $0xa90] sm:$0xf]  ;;  %v9266_v6 = vor.u32 %v12581_v63, %v9263_v0  ;;  %v12763_v32 = vld [vmem:[#allocation2 + $0x85c] sm:$0xf0]  ;;  %v12749_v33 = vld [vmem:[#allocation2 + $0x7f4] sm:$0xf]  ;;  %v9038_v41 = vor.u32 %v12539_v28, %v9037_v27 }
  0x5d   :  { %3052 = vmatpush.bf16.msrb.mxu3 %v9930_v10  ;;  %v10270_v2 = vor.u32 %v12847_v60, %v10269_v59  ;;  %v10159_v10 = vld [vmem:[#allocation2 + $0xa20] sm:$0xf0]  ;;  %v12497_v36 = vld [vmem:[#allocation2 + $0x14] sm:$0xf]  ;;  %v9934_v42 = vor.u32 %v12763_v32, %v9933_v31  ;;  %v9821_v46 = vld [vmem:[#allocation2 + $0x710] sm:$0xf] }
  0x5e   :  { %2996 = vmatpush.bf16.msrb.mxu0 %v8918_v24  ;;  %v10162_v17 = vor.u32 %v12805_v9, %v10159_v10  ;;  %v9039_v24 = vld [vmem:[#allocation2 + $0x160] sm:$0xf0]  ;;  %v12735_v50 = vld [vmem:[#allocation2 + $0x77c] sm:$0xf0]  ;;  %v12721_v51 = vld [vmem:[#allocation2 + $0x714] sm:$0xf] }
  0x5f   :  { %3015 = vmatpush.bf16.msrb.mxu1 %v9814_v15  ;;  %v9149_v15 = vld [vmem:[#allocation2 + $0x1d0] sm:$0xf]  ;;  %v9935_v35 = vld [vmem:[#allocation2 + $0x860] sm:$0xf0]  ;;  %v12708_v55 = vld [vmem:[#allocation2 + $0x6a4] sm:$0xf0]  ;;  %v9822_v61 = vor.u32 %v12735_v50, %v9821_v46 }
  0x60   :  { %3034 = vmatpush.bf16.msrb.mxu2 %v8922_v11  ;;  %v12553_v11 = vld [vmem:[#allocation2 + $0x1d4] sm:$0xf]  ;;  %v8927_v37 = vld [vmem:[#allocation2 + $0x80] sm:$0xf0]  ;;  %v9938_v47 = vor.u32 %v12749_v33, %v9935_v35  ;;  %v10613_v56 = vld [vmem:[#allocation2 + $0xd38] sm:$0xf] }
  0x61   :  { %3053 = vmatpush.bf16.msrb.mxu3 %v9818_v25  ;;  %2997 = vmatmul.bf16.vlgmr.msrb.gmra.mxu0 %v13741_v44  ;;  %v9154_v18 = vor.u32 %v12553_v11, %v9151_v12  ;;  %v8930_v48 = vor.u32 %v12497_v36, %v8927_v37  ;;  %v9823_v52 = vld [vmem:[#allocation2 + $0x780] sm:$0xf0]  ;;  %v10615_v59 = vld [vmem:[#allocation2 + $0xda8] sm:$0xf0]  ;;  %v12666_v62 = vld [vmem:[#allocation2 + $0x55c] sm:$0xf] }
  0x62   :  { %3065 = vmatpush.bf16.msra.mxu0 %v9710_v26  ;;  %3016 = vmatmul.bf16.vlgmr.msrb.gmra.mxu1 %v13743_v49  ;;  %v9607_v63 = vld [vmem:[#allocation2 + $0x5c8] sm:$0xf0]  ;;  %v9826_v0 = vor.u32 %v12721_v51, %v9823_v52  ;;  %v9605_v4 = vld [vmem:[#allocation2 + $0x558] sm:$0xf]  ;;  %v12904_v8 = vld [vmem:[#allocation2 + $0xcc4] sm:$0xf0] }
  0x63   :  { %3084 = vmatpush.bf16.msra.mxu1 %v10606_v20  ;;  %3035 = vmatmul.bf16.vlgmr.msrb.gmra.mxu2 %v13741_v44  ;;  %v12791_v20 = vld [vmem:[#allocation2 + $0x93c] sm:$0xf0]  ;;  %v10501_v7 = vld [vmem:[#allocation2 + $0xc58] sm:$0xf]  ;;  %v12890_v10 = vld [vmem:[#allocation2 + $0xc5c] sm:$0xf] }
  0x64   :  { %3103 = vmatpush.bf16.msra.mxu2 %v9714_v16  ;;  %3054 = vmatmul.bf16.vlgmr.msrb.gmra.mxu3 %v13743_v49  ;;  %v12567_v16 = vld [vmem:[#allocation2 + $0x23c] sm:$0xf0]  ;;  %v10046_v26 = vor.u32 %v12791_v20, %v10045_v19  ;;  %v10503_v11 = vld [vmem:[#allocation2 + $0xcc8] sm:$0xf0]  ;;  %v12638_v12 = vld [vmem:[#allocation2 + $0x47c] sm:$0xf] }
  0x65   :  { %3122 = vmatpush.bf16.msra.mxu3 %v10610_v29  ;;  %v9150_v25 = vor.u32 %v12567_v16, %v9149_v15  ;;  %v10050_v29 = vor.u32 %v12777_v21, %v10047_v22  ;;  %v12652_v15 = vld [vmem:[#allocation2 + $0x4e4] sm:$0xf0]  ;;  %v10502_v16 = vor.u32 %v12904_v8, %v10501_v7  ;;  %v12862_v22 = vld [vmem:[#allocation2 + $0xb7c] sm:$0xf]  ;;  %v10279_v36 = vld [vmem:[#allocation2 + $0xb08] sm:$0xf0] }
  0x66   :  { %3066 = vmatpush.bf16.msra.mxu0 %v9598_v38  ;;  %v12694_v38 = vld [vmem:[#allocation2 + $0x63c] sm:$0xf]  ;;  %v12876_v19 = vld [vmem:[#allocation2 + $0xbe4] sm:$0xf0]  ;;  %v10167_v51 = vld [vmem:[#allocation2 + $0xa28] sm:$0xf0] }
  0x67   :  { %3085 = vmatpush.bf16.msra.mxu1 %v10494_v40  ;;  %v9719_v40 = vld [vmem:[#allocation2 + $0x6a8] sm:$0xf0]  ;;  %v12624_v27 = vld [vmem:[#allocation2 + $0x404] sm:$0xf0]  ;;  %v12834_v35 = vld [vmem:[#allocation2 + $0xa9c] sm:$0xf] }
  0x68   :  { %3104 = vmatpush.bf16.msra.mxu2 %v9602_v30  ;;  %v9042_v30 = vor.u32 %v12525_v23, %v9039_v24  ;;  %v10391_v23 = vld [vmem:[#allocation2 + $0xbe8] sm:$0xf0]  ;;  %v12610_v24 = vld [vmem:[#allocation2 + $0x39c] sm:$0xf]  ;;  %v12848_v31 = vld [vmem:[#allocation2 + $0xb04] sm:$0xf0] }
  0x69   :  { %3123 = vmatpush.bf16.msra.mxu3 %v10498_v43  ;;  %v8925_v43 = vld [vmem:[#allocation2 + $0x10] sm:$0xf]  ;;  %v12582_v37 = vld [vmem:[#allocation2 + $0x2bc] sm:$0xf]  ;;  %v12820_v46 = vld [vmem:[#allocation2 + $0xa24] sm:$0xf0] }
  0x6a   :  { %3067 = vmatpush.bf16.msra.mxu0 %v9486_v53  ;;  %v9722_v53 = vor.u32 %v12694_v38, %v9719_v40  ;;  %v9271_v38 = vld [vmem:[#allocation2 + $0x328] sm:$0xf0]  ;;  %v9269_v40 = vld [vmem:[#allocation2 + $0x2b8] sm:$0xf]  ;;  %v12806_v50 = vld [vmem:[#allocation2 + $0x9bc] sm:$0xf] }
  0x6b   :  { %3086 = vmatpush.bf16.msra.mxu1 %v10382_v54  ;;  %v9717_v54 = vld [vmem:[#allocation2 + $0x638] sm:$0xf]  ;;  %v12554_v52 = vld [vmem:[#allocation2 + $0x1dc] sm:$0xf]  ;;  %v12764_v7 = vld [vmem:[#allocation2 + $0x864] sm:$0xf0] }
  0x6c   :  { %3105 = vmatpush.bf16.msra.mxu2 %v9490_v45  ;;  %v12511_v45 = vld [vmem:[#allocation2 + $0x7c] sm:$0xf0]  ;;  %v12750_v8 = vld [vmem:[#allocation2 + $0x7fc] sm:$0xf] }
  0x6d   :  { %3124 = vmatpush.bf16.msra.mxu3 %v10386_v57  ;;  %v12932_v57 = vld [vmem:[#allocation2 + $0xda4] sm:$0xf0]  ;;  %v8926_v60 = vor.u32 %v12511_v45, %v8925_v43  ;;  %v10282_v43 = vor.u32 %v12834_v35, %v10279_v36  ;;  %v10165_v45 = vld [vmem:[#allocation2 + $0x9b8] sm:$0xf]  ;;  %v12667_v35 = vld [vmem:[#allocation2 + $0x564] sm:$0xf] }
  0x6e   :  { %3068 = vmatpush.bf16.msra.mxu0 %v9374_v1  ;;  %v9718_v1 = vor.u32 %v12708_v55, %v9717_v54  ;;  %v9157_v54 = vld [vmem:[#allocation2 + $0x1d8] sm:$0xf]  ;;  %v12568_v55 = vld [vmem:[#allocation2 + $0x244] sm:$0xf0]  ;;  %v9615_v36 = vld [vmem:[#allocation2 + $0x5d0] sm:$0xf0] }
  0x6f   :  { %3087 = vmatpush.bf16.msra.mxu1 %v10270_v2  ;;  %v10614_v2 = vor.u32 %v12932_v57, %v10613_v56  ;;  %v10166_v56 = vor.u32 %v12820_v46, %v10165_v45  ;;  %v10170_v57 = vor.u32 %v12806_v50, %v10167_v51  ;;  %v10509_v45 = vld [vmem:[#allocation2 + $0xc60] sm:$0xf]  ;;  %v9618_v46 = vor.u32 %v12667_v35, %v9615_v36  ;;  %v12891_v50 = vld [vmem:[#allocation2 + $0xc64] sm:$0xf]  ;;  %v10511_v51 = vld [vmem:[#allocation2 + $0xcd0] sm:$0xf0] }
  0x70   :  { %3106 = vmatpush.bf16.msra.mxu2 %v9378_v58  ;;  %v12918_v58 = vld [vmem:[#allocation2 + $0xd3c] sm:$0xf] }
  0x71   :  { %3125 = vmatpush.bf16.msra.mxu3 %v10274_v5  ;;  %3002 = vmatmul.bf16.gmra.mxu0 %v13761_v34  ;;  %v10618_v3 = vor.u32 %v12918_v58, %v10615_v59  ;;  %v12680_v5 = vld [vmem:[#allocation2 + $0x5c4] sm:$0xf0]  ;;  %v10053_v58 = vld [vmem:[#allocation2 + $0x8d8] sm:$0xf] }
  0x72   :  { %3069 = vmatpush.bf16.msra.mxu0 %v9262_v13  ;;  %3021 = vmatmul.bf16.gmra.mxu1 %v13763_v39  ;;  %v9606_v9 = vor.u32 %v12680_v5, %v9605_v4  ;;  %v9495_v13 = vld [vmem:[#allocation2 + $0x4e8] sm:$0xf0]  ;;  %v12792_v59 = vld [vmem:[#allocation2 + $0x944] sm:$0xf0] }
  0x73   :  { %3088 = vmatpush.bf16.msra.mxu1 %v10158_v14  ;;  %3040 = vmatmul.bf16.gmra.mxu2 %v13761_v34  ;;  %v9493_v14 = vld [vmem:[#allocation2 + $0x478] sm:$0xf]  ;;  %v9498_v20 = vor.u32 %v12638_v12, %v9495_v13  ;;  %v10054_v4 = vor.u32 %v12792_v59, %v10053_v58  ;;  %v12498_v12 = vld [vmem:[#allocation2 + $0x1c] sm:$0xf]  ;;  %v8935_v13 = vld [vmem:[#allocation2 + $0x88] sm:$0xf0] }
  0x74   :  { %3107 = vmatpush.bf16.msra.mxu2 %v9266_v6  ;;  %3059 = vmatmul.bf16.gmra.mxu3 %v13763_v39  ;;  %v9610_v6 = vor.u32 %v12666_v62, %v9607_v63  ;;  %v9494_v21 = vor.u32 %v12652_v15, %v9493_v14  ;;  %v12778_v62 = vld [vmem:[#allocation2 + $0x8dc] sm:$0xf]  ;;  %v10055_v63 = vld [vmem:[#allocation2 + $0x948] sm:$0xf0]  ;;  %v8933_v14 = vld [vmem:[#allocation2 + $0x18] sm:$0xf] }
  0x75   :  { %3126 = vmatpush.bf16.msra.mxu3 %v10162_v17  ;;  %v10506_v17 = vor.u32 %v12890_v10, %v10503_v11  ;;  %v10058_v5 = vor.u32 %v12778_v62, %v10055_v63  ;;  %v9943_v11 = vld [vmem:[#allocation2 + $0x868] sm:$0xf0]  ;;  %v12512_v15 = vld [vmem:[#allocation2 + $0x84] sm:$0xf0]  ;;  %v10397_v58 = vld [vmem:[#allocation2 + $0xb80] sm:$0xf] }
  0x76   :  { %3070 = vmatpush.bf16.msra.mxu0 %v9150_v25  ;;  %v9383_v25 = vld [vmem:[#allocation2 + $0x408] sm:$0xf0]  ;;  %v12877_v59 = vld [vmem:[#allocation2 + $0xbec] sm:$0xf0] }
  0x77   :  { %3089 = vmatpush.bf16.msra.mxu1 %v10046_v26  ;;  %v9381_v26 = vld [vmem:[#allocation2 + $0x398] sm:$0xf]  ;;  %v9386_v32 = vor.u32 %v12610_v24, %v9383_v25  ;;  %v12722_v24 = vld [vmem:[#allocation2 + $0x71c] sm:$0xf]  ;;  %v8938_v25 = vor.u32 %v12498_v12, %v8935_v13  ;;  %v12583_v12 = vld [vmem:[#allocation2 + $0x2c4] sm:$0xf] }
  0x78   :  { %3108 = vmatpush.bf16.msra.mxu2 %v9154_v18  ;;  %v10389_v18 = vld [vmem:[#allocation2 + $0xb78] sm:$0xf]  ;;  %v9382_v33 = vor.u32 %v12624_v27, %v9381_v26  ;;  %v8934_v26 = vor.u32 %v12512_v15, %v8933_v14  ;;  %v9831_v27 = vld [vmem:[#allocation2 + $0x788] sm:$0xf0]  ;;  %v9279_v13 = vld [vmem:[#allocation2 + $0x330] sm:$0xf0] }
  0x79   :  { %3127 = vmatpush.bf16.msra.mxu3 %v10050_v29  ;;  %v10390_v28 = vor.u32 %v12876_v19, %v10389_v18  ;;  %v10394_v29 = vor.u32 %v12862_v22, %v10391_v23  ;;  %v9725_v18 = vld [vmem:[#allocation2 + $0x640] sm:$0xf]  ;;  %v12709_v19 = vld [vmem:[#allocation2 + $0x6ac] sm:$0xf0]  ;;  %v9829_v22 = vld [vmem:[#allocation2 + $0x718] sm:$0xf] }
  0x7a   :  { %3071 = vmatpush.bf16.msra.mxu0 %v9038_v41  ;;  %v12596_v41 = vld [vmem:[#allocation2 + $0x324] sm:$0xf0] }
  0x7b   :  { %3090 = vmatpush.bf16.msra.mxu1 %v9934_v42  ;;  %v12736_v23 = vld [vmem:[#allocation2 + $0x784] sm:$0xf0] }
  0x7c   :  { %3109 = vmatpush.bf16.msra.mxu2 %v9042_v30  ;;  %v10277_v30 = vld [vmem:[#allocation2 + $0xa98] sm:$0xf] }
  0x7d   :  { %3128 = vmatpush.bf16.msra.mxu3 %v9938_v47  ;;  %v10278_v42 = vor.u32 %v12848_v31, %v10277_v30  ;;  %v9274_v47 = vor.u32 %v12582_v37, %v9271_v38  ;;  %v9726_v31 = vor.u32 %v12709_v19, %v9725_v18  ;;  %v9613_v37 = vld [vmem:[#allocation2 + $0x560] sm:$0xf]  ;;  %v12681_v38 = vld [vmem:[#allocation2 + $0x5cc] sm:$0xf0] }
  0x7e   :  { %3072 = vmatpush.bf16.msra.mxu0 %v8926_v60  ;;  %v10173_v18 = vld [vmem:[#allocation2 + $0x9c0] sm:$0xf]  ;;  %v12821_v19 = vld [vmem:[#allocation2 + $0xa2c] sm:$0xf0] }
  0x7f   :  { %3091 = vmatpush.bf16.msra.mxu1 %v9822_v61  ;;  %v9158_v61 = vor.u32 %v12568_v55, %v9157_v54  ;;  %v10514_v55 = vor.u32 %v12891_v50, %v10511_v51  ;;  %v12499_v50 = vld [vmem:[#allocation2 + $0x24] sm:$0xf] }
  0x80   :  { %3110 = vmatpush.bf16.msra.mxu2 %v8930_v48  ;;  %v9270_v48 = vor.u32 %v12596_v41, %v9269_v40  ;;  %v9830_v40 = vor.u32 %v12736_v23, %v9829_v22  ;;  %v9834_v41 = vor.u32 %v12722_v24, %v9831_v27  ;;  %v9282_v22 = vor.u32 %v12583_v12, %v9279_v13  ;;  %v12555_v24 = vld [vmem:[#allocation2 + $0x1e4] sm:$0xf]  ;;  %v12668_v13 = vld [vmem:[#allocation2 + $0x56c] sm:$0xf] }
  0x81   :  { %3129 = vmatpush.bf16.msra.mxu3 %v9826_v0  ;;  %3073 = vmatmul.bf16.vlgmr.msra.gmra.mxu0 %v13741_v44  ;;  %v12526_v0 = vld [vmem:[#allocation2 + $0xfc] sm:$0xf] }
  0x82   :  { %3141 = vmatpush.bf16.msrb.mxu0 %v9718_v1  ;;  %3092 = vmatmul.bf16.vlgmr.msra.gmra.mxu1 %v13743_v49  ;;  %v9047_v1 = vld [vmem:[#allocation2 + $0x168] sm:$0xf0] }
  0x83   :  { %3160 = vmatpush.bf16.msrb.mxu1 %v10614_v2  ;;  %3111 = vmatmul.bf16.vlgmr.msra.gmra.mxu2 %v13741_v44  ;;  %v9045_v2 = vld [vmem:[#allocation2 + $0xf8] sm:$0xf] }
  0x84   :  { %3179 = vmatpush.bf16.msrb.mxu2 %v9722_v53  ;;  %3130 = vmatmul.bf16.vlgmr.msra.gmra.mxu3 %v13743_v49  ;;  %v9159_v53 = vld [vmem:[#allocation2 + $0x248] sm:$0xf0] }
  0x85   :  { %3198 = vmatpush.bf16.msrb.mxu3 %v10618_v3  ;;  %v9162_v60 = vor.u32 %v12554_v52, %v9159_v53  ;;  %v12540_v3 = vld [vmem:[#allocation2 + $0x164] sm:$0xf0]  ;;  %v12639_v52 = vld [vmem:[#allocation2 + $0x484] sm:$0xf]  ;;  %v9503_v53 = vld [vmem:[#allocation2 + $0x4f0] sm:$0xf0] }
  0x86   :  { %3142 = vmatpush.bf16.msrb.mxu0 %v9606_v9  ;;  %v9050_v9 = vor.u32 %v12526_v0, %v9047_v1  ;;  %v9046_v10 = vor.u32 %v12540_v3, %v9045_v2  ;;  %v9506_v62 = vor.u32 %v12639_v52, %v9503_v53  ;;  %v12611_v0 = vld [vmem:[#allocation2 + $0x3a4] sm:$0xf]  ;;  %v9391_v1 = vld [vmem:[#allocation2 + $0x410] sm:$0xf0]  ;;  %v10398_v2 = vor.u32 %v12877_v59, %v10397_v58  ;;  %v9837_v58 = vld [vmem:[#allocation2 + $0x720] sm:$0xf] }
  0x87   :  { %3161 = vmatpush.bf16.msrb.mxu1 %v10502_v16  ;;  %v12695_v16 = vld [vmem:[#allocation2 + $0x644] sm:$0xf]  ;;  %v8943_v53 = vld [vmem:[#allocation2 + $0x90] sm:$0xf0]  ;;  %v12737_v59 = vld [vmem:[#allocation2 + $0x78c] sm:$0xf0] }
  0x88   :  { %3180 = vmatpush.bf16.msrb.mxu2 %v9610_v6  ;;  %v9941_v6 = vld [vmem:[#allocation2 + $0x7f8] sm:$0xf] }
  0x89   :  { %3199 = vmatpush.bf16.msrb.mxu3 %v10506_v17  ;;  %v9727_v17 = vld [vmem:[#allocation2 + $0x6b0] sm:$0xf0] }
  0x8a   :  { %3143 = vmatpush.bf16.msrb.mxu0 %v9494_v21  ;;  %v9946_v21 = vor.u32 %v12750_v8, %v9943_v11  ;;  %v9730_v30 = vor.u32 %v12695_v16, %v9727_v17  ;;  %v12835_v8 = vld [vmem:[#allocation2 + $0xaa4] sm:$0xf]  ;;  %v9277_v16 = vld [vmem:[#allocation2 + $0x2c0] sm:$0xf]  ;;  %v12597_v17 = vld [vmem:[#allocation2 + $0x32c] sm:$0xf0] }
  0x8b   :  { %3162 = vmatpush.bf16.msrb.mxu1 %v10390_v28  ;;  %v10621_v28 = vld [vmem:[#allocation2 + $0xd40] sm:$0xf]  ;;  %v9278_v23 = vor.u32 %v12597_v17, %v9277_v16  ;;  %v9621_v17 = vld [vmem:[#allocation2 + $0x568] sm:$0xf] }
  0x8c   :  { %3181 = vmatpush.bf16.msrb.mxu2 %v9498_v20  ;;  %v9942_v20 = vor.u32 %v12764_v7, %v9941_v6  ;;  %v10285_v6 = vld [vmem:[#allocation2 + $0xaa0] sm:$0xf]  ;;  %v12849_v7 = vld [vmem:[#allocation2 + $0xb0c] sm:$0xf0] }
  0x8d   :  { %3200 = vmatpush.bf16.msrb.mxu3 %v10394_v29  ;;  %v12933_v29 = vld [vmem:[#allocation2 + $0xdac] sm:$0xf0]  ;;  %v10286_v14 = vor.u32 %v12849_v7, %v10285_v6  ;;  %v12920_v6 = vld [vmem:[#allocation2 + $0xd4c] sm:$0xf]  ;;  %v10631_v7 = vld [vmem:[#allocation2 + $0xdb8] sm:$0xf0] }
  0x8e   :  { %3144 = vmatpush.bf16.msrb.mxu0 %v9382_v33  ;;  %v10623_v33 = vld [vmem:[#allocation2 + $0xdb0] sm:$0xf0]  ;;  %v10634_v16 = vor.u32 %v12920_v6, %v10631_v7  ;;  %v12822_v6 = vld [vmem:[#allocation2 + $0xa34] sm:$0xf0]  ;;  %v12808_v7 = vld [vmem:[#allocation2 + $0x9cc] sm:$0xf] }
  0x8f   :  { %3163 = vmatpush.bf16.msrb.mxu1 %v10278_v42  ;;  %v10622_v42 = vor.u32 %v12933_v29, %v10621_v28  ;;  %v9165_v28 = vld [vmem:[#allocation2 + $0x1e0] sm:$0xf]  ;;  %v12569_v29 = vld [vmem:[#allocation2 + $0x24c] sm:$0xf0] }
  0x90   :  { %3182 = vmatpush.bf16.msrb.mxu2 %v9386_v32  ;;  %v12919_v32 = vld [vmem:[#allocation2 + $0xd44] sm:$0xf]  ;;  %v9166_v36 = vor.u32 %v12569_v29, %v9165_v28  ;;  %v12640_v28 = vld [vmem:[#allocation2 + $0x48c] sm:$0xf]  ;;  %v9511_v29 = vld [vmem:[#allocation2 + $0x4f8] sm:$0xf0] }
  0x91   :  { %3201 = vmatpush.bf16.msrb.mxu3 %v10282_v43  ;;  %3078 = vmatmul.bf16.gmra.mxu0 %v13761_v34  ;;  %v10626_v43 = vor.u32 %v12919_v32, %v10623_v33  ;;  %v12779_v32 = vld [vmem:[#allocation2 + $0x8e4] sm:$0xf]  ;;  %v10063_v33 = vld [vmem:[#allocation2 + $0x950] sm:$0xf0] }
  0x92   :  { %3145 = vmatpush.bf16.msrb.mxu0 %v9270_v48  ;;  %3097 = vmatmul.bf16.gmra.mxu1 %v13763_v39  ;;  %v12905_v48 = vld [vmem:[#allocation2 + $0xccc] sm:$0xf0] }
  0x93   :  { %3164 = vmatpush.bf16.msrb.mxu1 %v10166_v56  ;;  %3116 = vmatmul.bf16.gmra.mxu2 %v13761_v34  ;;  %v10510_v54 = vor.u32 %v12905_v48, %v10509_v45  ;;  %v9501_v56 = vld [vmem:[#allocation2 + $0x480] sm:$0xf]  ;;  %v9951_v48 = vld [vmem:[#allocation2 + $0x870] sm:$0xf0] }
  0x94   :  { %3183 = vmatpush.bf16.msrb.mxu2 %v9274_v47  ;;  %3135 = vmatmul.bf16.gmra.mxu3 %v13763_v39  ;;  %v9614_v47 = vor.u32 %v12681_v38, %v9613_v37  ;;  %v12527_v37 = vld [vmem:[#allocation2 + $0x104] sm:$0xf]  ;;  %v9055_v38 = vld [vmem:[#allocation2 + $0x170] sm:$0xf0]  ;;  %v9949_v45 = vld [vmem:[#allocation2 + $0x800] sm:$0xf] }
  0x95   :  { %3202 = vmatpush.bf16.msrb.mxu3 %v10170_v57  ;;  %v12653_v57 = vld [vmem:[#allocation2 + $0x4ec] sm:$0xf0]  ;;  %v9058_v51 = vor.u32 %v12527_v37, %v9055_v38  ;;  %v10407_v37 = vld [vmem:[#allocation2 + $0xbf8] sm:$0xf0] }
  0x96   :  { %3146 = vmatpush.bf16.msrb.mxu0 %v9158_v61  ;;  %v10399_v61 = vld [vmem:[#allocation2 + $0xbf0] sm:$0xf0]  ;;  %v9502_v63 = vor.u32 %v12653_v57, %v9501_v56 }
  0x97   :  { %3165 = vmatpush.bf16.msrb.mxu1 %v10054_v4  ;;  %v9389_v4 = vld [vmem:[#allocation2 + $0x3a0] sm:$0xf] }
  0x98   :  { %3184 = vmatpush.bf16.msrb.mxu2 %v9162_v60  ;;  %v12863_v60 = vld [vmem:[#allocation2 + $0xb84] sm:$0xf] }
  0x99   :  { %3203 = vmatpush.bf16.msrb.mxu3 %v10058_v5  ;;  %v10402_v3 = vor.u32 %v12863_v60, %v10399_v61  ;;  %v12625_v5 = vld [vmem:[#allocation2 + $0x40c] sm:$0xf0]  ;;  %v12723_v60 = vld [vmem:[#allocation2 + $0x724] sm:$0xf]  ;;  %v9839_v61 = vld [vmem:[#allocation2 + $0x790] sm:$0xf0] }
  0x9a   :  { %3147 = vmatpush.bf16.msrb.mxu0 %v9046_v10  ;;  %v9394_v10 = vor.u32 %v12611_v0, %v9391_v1  ;;  %v9390_v11 = vor.u32 %v12625_v5, %v9389_v4  ;;  %v9733_v0 = vld [vmem:[#allocation2 + $0x648] sm:$0xf]  ;;  %v12710_v1 = vld [vmem:[#allocation2 + $0x6b4] sm:$0xf0] }
  0x9b   :  { %3166 = vmatpush.bf16.msrb.mxu1 %v9942_v20  ;;  %v12807_v20 = vld [vmem:[#allocation2 + $0x9c4] sm:$0xf]  ;;  %v12934_v5 = vld [vmem:[#allocation2 + $0xdb4] sm:$0xf0]  ;;  %v9734_v12 = vor.u32 %v12710_v1, %v9733_v0  ;;  %v9285_v0 = vld [vmem:[#allocation2 + $0x2c8] sm:$0xf] }
  0x9c   :  { %3185 = vmatpush.bf16.msrb.mxu2 %v9050_v9  ;;  %v10287_v9 = vld [vmem:[#allocation2 + $0xb10] sm:$0xf0]  ;;  %v12598_v1 = vld [vmem:[#allocation2 + $0x334] sm:$0xf0] }
  0x9d   :  { %3204 = vmatpush.bf16.msrb.mxu3 %v9946_v21  ;;  %v10290_v15 = vor.u32 %v12835_v8, %v10287_v9  ;;  %v10175_v21 = vld [vmem:[#allocation2 + $0xa30] sm:$0xf0]  ;;  %v9838_v8 = vor.u32 %v12737_v59, %v9837_v58  ;;  %v9842_v9 = vor.u32 %v12723_v60, %v9839_v61  ;;  %v12584_v59 = vld [vmem:[#allocation2 + $0x2cc] sm:$0xf]  ;;  %v9287_v60 = vld [vmem:[#allocation2 + $0x338] sm:$0xf0] }
  0x9e   :  { %3148 = vmatpush.bf16.msrb.mxu0 %v8934_v26  ;;  %v10174_v26 = vor.u32 %v12821_v19, %v10173_v18  ;;  %v10178_v27 = vor.u32 %v12807_v20, %v10175_v21  ;;  %v12682_v18 = vld [vmem:[#allocation2 + $0x5d4] sm:$0xf0]  ;;  %v10517_v19 = vld [vmem:[#allocation2 + $0xc68] sm:$0xf]  ;;  %v12892_v21 = vld [vmem:[#allocation2 + $0xc6c] sm:$0xf] }
  0x9f   :  { %3167 = vmatpush.bf16.msrb.mxu1 %v9830_v40  ;;  %v12906_v20 = vld [vmem:[#allocation2 + $0xcd4] sm:$0xf0] }
  0xa0   :  { %3186 = vmatpush.bf16.msrb.mxu2 %v8938_v25  ;;  %v9167_v25 = vld [vmem:[#allocation2 + $0x250] sm:$0xf0] }
  0xa1   :  { %3205 = vmatpush.bf16.msrb.mxu3 %v9834_v41  ;;  %3149 = vmatmul.bf16.vlgmr.msrb.gmra.mxu0 %v13741_v44  ;;  %v9170_v35 = vor.u32 %v12555_v24, %v9167_v25  ;;  %v10066_v41 = vor.u32 %v12779_v32, %v10063_v33  ;;  %v9622_v24 = vor.u32 %v12682_v18, %v9621_v17  ;;  %v10405_v32 = vld [vmem:[#allocation2 + $0xb88] sm:$0xf] }
  0xa2   :  { %3217 = vmatpush.bf16.msra.mxu0 %v9726_v31  ;;  %3168 = vmatmul.bf16.vlgmr.msrb.gmra.mxu1 %v13743_v49  ;;  %v12793_v31 = vld [vmem:[#allocation2 + $0x94c] sm:$0xf0] }
  0xa3   :  { %3236 = vmatpush.bf16.msra.mxu1 %v10622_v42  ;;  %3187 = vmatmul.bf16.vlgmr.msrb.gmra.mxu2 %v13741_v44  ;;  %v9053_v42 = vld [vmem:[#allocation2 + $0x100] sm:$0xf] }
  0xa4   :  { %3255 = vmatpush.bf16.msra.mxu2 %v9730_v30  ;;  %3206 = vmatmul.bf16.vlgmr.msrb.gmra.mxu3 %v13743_v49  ;;  %v10061_v30 = vld [vmem:[#allocation2 + $0x8e0] sm:$0xf] }
  0xa5   :  { %3274 = vmatpush.bf16.msra.mxu3 %v10626_v43  ;;  %v10062_v40 = vor.u32 %v12793_v31, %v10061_v30  ;;  %v12541_v43 = vld [vmem:[#allocation2 + $0x16c] sm:$0xf0]  ;;  %v9509_v30 = vld [vmem:[#allocation2 + $0x488] sm:$0xf]  ;;  %v12654_v31 = vld [vmem:[#allocation2 + $0x4f4] sm:$0xf0] }
  0xa6   :  { %3218 = vmatpush.bf16.msra.mxu0 %v9614_v47  ;;  %v12751_v47 = vld [vmem:[#allocation2 + $0x804] sm:$0xf]  ;;  %v9054_v52 = vor.u32 %v12541_v43, %v9053_v42  ;;  %v9514_v42 = vor.u32 %v12640_v28, %v9511_v29  ;;  %v9510_v43 = vor.u32 %v12654_v31, %v9509_v30  ;;  %v12528_v31 = vld [vmem:[#allocation2 + $0x10c] sm:$0xf] }
  0xa7   :  { %3237 = vmatpush.bf16.msra.mxu1 %v10510_v54  ;;  %v8941_v54 = vld [vmem:[#allocation2 + $0x20] sm:$0xf]  ;;  %v9954_v57 = vor.u32 %v12751_v47, %v9951_v48 }
  0xa8   :  { %3256 = vmatpush.bf16.msra.mxu2 %v9618_v46  ;;  %v12765_v46 = vld [vmem:[#allocation2 + $0x86c] sm:$0xf0] }
  0xa9   :  { %3275 = vmatpush.bf16.msra.mxu3 %v10514_v55  ;;  %v12513_v55 = vld [vmem:[#allocation2 + $0x8c] sm:$0xf0]  ;;  %v9950_v56 = vor.u32 %v12765_v46, %v9949_v45  ;;  %v12612_v45 = vld [vmem:[#allocation2 + $0x3ac] sm:$0xf]  ;;  %v9399_v46 = vld [vmem:[#allocation2 + $0x418] sm:$0xf0] }
  0xaa   :  { %3219 = vmatpush.bf16.msra.mxu0 %v9502_v63  ;;  %v9735_v63 = vld [vmem:[#allocation2 + $0x6b8] sm:$0xf0]  ;;  %v8942_v4 = vor.u32 %v12513_v55, %v8941_v54  ;;  %v12850_v54 = vld [vmem:[#allocation2 + $0xb14] sm:$0xf0]  ;;  %v12836_v55 = vld [vmem:[#allocation2 + $0xaac] sm:$0xf] }
  0xab   :  { %3238 = vmatpush.bf16.msra.mxu1 %v10398_v2  ;;  %v10629_v2 = vld [vmem:[#allocation2 + $0xd48] sm:$0xf] }
  0xac   :  { %3257 = vmatpush.bf16.msra.mxu2 %v9506_v62  ;;  %v12696_v62 = vld [vmem:[#allocation2 + $0x64c] sm:$0xf] }
  0xad   :  { %3276 = vmatpush.bf16.msra.mxu3 %v10402_v3  ;;  %v8946_v3 = vor.u32 %v12499_v50, %v8943_v53  ;;  %v10293_v53 = vld [vmem:[#allocation2 + $0xaa8] sm:$0xf] }
  0xae   :  { %3220 = vmatpush.bf16.msra.mxu0 %v9390_v11  ;;  %v9738_v11 = vor.u32 %v12696_v62, %v9735_v63  ;;  %v10294_v62 = vor.u32 %v12850_v54, %v10293_v53  ;;  %v12500_v53 = vld [vmem:[#allocation2 + $0x2c] sm:$0xf]  ;;  %v8951_v54 = vld [vmem:[#allocation2 + $0x98] sm:$0xf0] }
  0xaf   :  { %3239 = vmatpush.bf16.msra.mxu1 %v10286_v14  ;;  %v9623_v14 = vld [vmem:[#allocation2 + $0x5d8] sm:$0xf0] }
  0xb0   :  { %3258 = vmatpush.bf16.msra.mxu2 %v9394_v10  ;;  %v13793_v10 = vld [vmem:[#allocation4] sm:$0xff] }
  0xb1   :  { %3277 = vmatpush.bf16.msra.mxu3 %v10290_v15  ;;  %3154 = vmatmul.bf16.gmra.mxu0 %v13761_v34  ;;  %v10630_v15 = vor.u32 %v12934_v5, %v10629_v2  ;;  %v13796_v25 = vperm.slane %v13793_v10, 0  ;;  %v10181_v2 = vld [vmem:[#allocation2 + $0x9c8] sm:$0xf] }
  0xb2   :  { %3221 = vmatpush.bf16.msra.mxu0 %v9278_v23  ;;  %3173 = vmatmul.bf16.gmra.mxu1 %v13763_v39  ;;  %v9626_v23 = vor.u32 %v12668_v13, %v9623_v14  ;;  %v9290_v13 = vor.u32 %v12584_v59, %v9287_v60  ;;  %v9286_v14 = vor.u32 %v12598_v1, %v9285_v0  ;;  %v12514_v59 = vld [vmem:[#allocation2 + $0x94] sm:$0xf0]  ;;  %v9845_v60 = vld [vmem:[#allocation2 + $0x728] sm:$0xf]  ;;  %v12724_v1 = vld [vmem:[#allocation2 + $0x72c] sm:$0xf] }
  0xb3   :  { %3240 = vmatpush.bf16.msra.mxu1 %v10174_v26  ;;  %3192 = vmatmul.bf16.gmra.mxu2 %v13761_v34  ;;  %v10518_v26 = vor.u32 %v12906_v20, %v10517_v19  ;;  %v10182_v18 = vor.u32 %v12822_v6, %v10181_v2  ;;  %v9173_v20 = vld [vmem:[#allocation2 + $0x1e8] sm:$0xf]  ;;  %v12738_v0 = vld [vmem:[#allocation2 + $0x794] sm:$0xf0]  ;;  %v9847_v2 = vld [vmem:[#allocation2 + $0x798] sm:$0xf0] }
  0xb4   :  { %3259 = vmatpush.bf16.msra.mxu2 %v9282_v22  ;;  %3211 = vmatmul.bf16.gmra.mxu3 %v13763_v39  ;;  %v10519_v22 = vld [vmem:[#allocation2 + $0xcd8] sm:$0xf0]  ;;  %v9743_v6 = vld [vmem:[#allocation2 + $0x6c0] sm:$0xf0] }
  0xb5   :  { %3278 = vmatpush.bf16.msra.mxu3 %v10178_v27  ;;  %v10522_v27 = vor.u32 %v12892_v21, %v10519_v22  ;;  %v12570_v21 = vld [vmem:[#allocation2 + $0x254] sm:$0xf0]  ;;  %v10069_v22 = vld [vmem:[#allocation2 + $0x8e8] sm:$0xf] }
  0xb6   :  { %3222 = vmatpush.bf16.msra.mxu0 %v9166_v36  ;;  %v12864_v36 = vld [vmem:[#allocation2 + $0xb8c] sm:$0xf]  ;;  %v9174_v30 = vor.u32 %v12570_v21, %v9173_v20 }
  0xb7   :  { %3241 = vmatpush.bf16.msra.mxu1 %v10062_v40  ;;  %v10410_v50 = vor.u32 %v12864_v36, %v10407_v37 }
  0xb8   :  { %3260 = vmatpush.bf16.msra.mxu2 %v9170_v35  ;;  %v12878_v35 = vld [vmem:[#allocation2 + $0xbf4] sm:$0xf0] }
  0xb9   :  { %3279 = vmatpush.bf16.msra.mxu3 %v10066_v41  ;;  %v13800_v41 = vperm.slane %v13793_v10, 1  ;;  %v10406_v48 = vor.u32 %v12878_v35, %v10405_v32  ;;  %v9063_v32 = vld [vmem:[#allocation2 + $0x178] sm:$0xf0] }
  0xba   :  { %3223 = vmatpush.bf16.msra.mxu0 %v9054_v52  ;;  %v12626_v52 = vld [vmem:[#allocation2 + $0x414] sm:$0xf0] }
  0xbb   :  { %3242 = vmatpush.bf16.msra.mxu1 %v9950_v56  ;;  %v10295_v56 = vld [vmem:[#allocation2 + $0xb18] sm:$0xf0] }
  0xbc   :  { %3261 = vmatpush.bf16.msra.mxu2 %v9058_v51  ;;  %v9397_v51 = vld [vmem:[#allocation2 + $0x3a8] sm:$0xf]  ;;  %v10298_v63 = vor.u32 %v12836_v55, %v10295_v56  ;;  %v9066_v56 = vor.u32 %v12528_v31, %v9063_v32  ;;  %v9629_v32 = vld [vmem:[#allocation2 + $0x570] sm:$0xf] }
  0xbd   :  { %3280 = vmatpush.bf16.msra.mxu3 %v9954_v57  ;;  %v9402_v57 = vor.u32 %v12612_v45, %v9399_v46  ;;  %v9398_v58 = vor.u32 %v12626_v52, %v9397_v51 }
  0xbe   :  { %3224 = vmatpush.bf16.msra.mxu0 %v8942_v4  ;;  %v2922_v33 = vpop.f32.mrf.mxu0 }
  0xbf   :  { %3243 = vmatpush.bf16.msra.mxu1 %v9838_v8  ;;  %v2923_v38 = vadd.f32 %v2922_v33, %v13796_v25  ;;  %v2941_v40 = vpop.f32.mrf.mxu1  ;;  %v10183_v8 = vld [vmem:[#allocation2 + $0xa38] sm:$0xf0] }
  0xc0   :  { %3262 = vmatpush.bf16.msra.mxu2 %v8946_v3  ;;  %v10186_v19 = vor.u32 %v12808_v7, %v10183_v8  ;;  %v9741_v7 = vld [vmem:[#allocation2 + $0x650] sm:$0xf]  ;;  %v12711_v8 = vld [vmem:[#allocation2 + $0x6bc] sm:$0xf0] }
  0xc1   :  { %3281 = vmatpush.bf16.msra.mxu3 %v9842_v9  ;;  %v2942_v47 = vadd.f32 %v2941_v40, %v2923_v38  ;;  %3225 = vmatmul.bf16.vlgmr.msra.gmra.mxu0 %v13741_v44  ;;  %v9061_v38 = vld [vmem:[#allocation2 + $0x108] sm:$0xf]  ;;  %v12542_v40 = vld [vmem:[#allocation2 + $0x174] sm:$0xf0] }
  0xc2   :  { %3293 = vmatpush.bf16.msrb.mxu0 %v9734_v12  ;;  %3244 = vmatmul.bf16.vlgmr.msra.gmra.mxu1 %v13743_v49 }
  0xc3   :  { %3312 = vmatpush.bf16.msrb.mxu1 %v10630_v15  ;;  %3263 = vmatmul.bf16.vlgmr.msra.gmra.mxu2 %v13741_v44  ;;  %v12556_v15 = vld [vmem:[#allocation2 + $0x1ec] sm:$0xf] }
  0xc4   :  { %3331 = vmatpush.bf16.msrb.mxu2 %v9738_v11  ;;  %3282 = vmatmul.bf16.vlgmr.msra.gmra.mxu3 %v13743_v49 }
  0xc5   :  { %3350 = vmatpush.bf16.msrb.mxu3 %v10634_v16  ;;  %v9175_v16 = vld [vmem:[#allocation2 + $0x258] sm:$0xf0] }
  0xc6   :  { %3294 = vmatpush.bf16.msrb.mxu0 %v9622_v24  ;;  %v2960_v61 = vpop.f32.mrf.mxu2  ;;  %v2924_v5 = vpop.f32.mrf.mxu0  ;;  %v12780_v24 = vld [vmem:[#allocation2 + $0x8ec] sm:$0xf]  ;;  %v9178_v29 = vor.u32 %v12556_v15, %v9175_v16  ;;  %v12921_v15 = vld [vmem:[#allocation2 + $0xd54] sm:$0xf]  ;;  %v10639_v16 = vld [vmem:[#allocation2 + $0xdc0] sm:$0xf0] }
  0xc7   :  { %3313 = vmatpush.bf16.msrb.mxu1 %v10518_v26  ;;  %v2961_v3 = vadd.f32 %v2960_v61, %v13800_v41  ;;  %v2979_v4 = vpop.f32.mrf.mxu3  ;;  %v2925_v9 = vadd.f32 %v2924_v5, %v13796_v25  ;;  %v2943_v11 = vpop.f32.mrf.mxu1  ;;  %v10071_v26 = vld [vmem:[#allocation2 + $0x958] sm:$0xf0]  ;;  %v12697_v5 = vld [vmem:[#allocation2 + $0x654] sm:$0xf]  ;;  %v10642_v31 = vor.u32 %v12921_v15, %v10639_v16 }
  0xc8   :  { %3332 = vmatpush.bf16.msrb.mxu2 %v9626_v23  ;;  %v12794_v23 = vld [vmem:[#allocation2 + $0x954] sm:$0xf0]  ;;  %v10074_v37 = vor.u32 %v12780_v24, %v10071_v26  ;;  %v9742_v24 = vor.u32 %v12711_v8, %v9741_v7  ;;  %v12669_v26 = vld [vmem:[#allocation2 + $0x574] sm:$0xf]  ;;  %v9407_v7 = vld [vmem:[#allocation2 + $0x420] sm:$0xf0] }
  0xc9   :  { %3351 = vmatpush.bf16.msrb.mxu3 %v10522_v27  ;;  %v13808_v12 = vadd.f32 %v2979_v4, %v2961_v3  ;;  %v2944_v17 = vadd.f32 %v2943_v11, %v2925_v9  ;;  %v3977_v27 = vmax.f32 %v2942_v47, 0.0  ;;  %v10070_v36 = vor.u32 %v12794_v23, %v10069_v22  ;;  %v12766_v47 = vld [vmem:[#allocation2 + $0x874] sm:$0xf0]  ;;  %v10637_v9 = vld [vmem:[#allocation2 + $0xd50] sm:$0xf] }
  0xca   :  { %3295 = vmatpush.bf16.msrb.mxu0 %v9510_v43  ;;  %v9746_v23 = vor.u32 %v12697_v5, %v9743_v6  ;;  %v12613_v6 = vld [vmem:[#allocation2 + $0x3b4] sm:$0xf]  ;;  %v9405_v8 = vld [vmem:[#allocation2 + $0x3b0] sm:$0xf] }
  0xcb   :  { %3314 = vmatpush.bf16.msrb.mxu1 %v10406_v48  ;;  %v4005_v28 = vmax.f32 %v2944_v17, 0.0  ;;  %v12752_v48 = vld [vmem:[#allocation2 + $0x80c] sm:$0xf]  ;;  %v3978_v3 = vmax.f32 %v13808_v12, 0.0 }
  0xcc   :  { %3333 = vmatpush.bf16.msrb.mxu2 %v9514_v42  ;;  %v9957_v42 = vld [vmem:[#allocation2 + $0x808] sm:$0xf] }
  0xcd   :  { %3352 = vmatpush.bf16.msrb.mxu3 %v10410_v50  ;;  %v13810_v33 = vpack.c.bf16 %v4005_v28, %v3977_v27  ;;  %v9959_v50 = vld [vmem:[#allocation2 + $0x878] sm:$0xf0]  ;;  %v9631_v27 = vld [vmem:[#allocation2 + $0x5e0] sm:$0xf0] }
  0xce   :  { %3296 = vmatpush.bf16.msrb.mxu0 %v9398_v58  ;;  %v2962_v35 = vpop.f32.mrf.mxu2  ;;  %v2927_v46 = vpop.f32.mrf.mxu0  ;;  %v8949_v58 = vld [vmem:[#allocation2 + $0x28] sm:$0xf] }
  0xcf   :  { %3315 = vmatpush.bf16.msrb.mxu1 %v10294_v62  ;;  %v2963_v43 = vadd.f32 %v2962_v35, %v13800_v41  ;;  %v2981_v45 = vpop.f32.mrf.mxu3  ;;  %v2928_v51 = vadd.f32 %v2927_v46, %v13796_v25  ;;  %v2946_v52 = vpop.f32.mrf.mxu1  ;;  %v9958_v62 = vor.u32 %v12766_v47, %v9957_v42  ;;  %v8950_v12 = vor.u32 %v12514_v59, %v8949_v58  ;;  %v12683_v35 = vld [vmem:[#allocation2 + $0x5dc] sm:$0xf0]  ;;  %v10527_v42 = vld [vmem:[#allocation2 + $0xce0] sm:$0xf0] }
  0xd0   :  { %3334 = vmatpush.bf16.msrb.mxu2 %v9402_v57  ;;  %v9062_v57 = vor.u32 %v12542_v40, %v9061_v38  ;;  %v12907_v38 = vld [vmem:[#allocation2 + $0xcdc] sm:$0xf0]  ;;  %v12893_v40 = vld [vmem:[#allocation2 + $0xc74] sm:$0xf] }
  0xd1   :  { %3353 = vmatpush.bf16.msrb.mxu3 %v10298_v63  ;;  %v2982_v55 = vadd.f32 %v2981_v45, %v2963_v43  ;;  %v13814_v61 = vadd.f32 %v2946_v52, %v2928_v51  ;;  %v9962_v63 = vor.u32 %v12752_v48, %v9959_v50  ;;  %3230 = vmatmul.bf16.gmra.mxu0 %v13761_v34  ;;  %v13829_v51 = vperm.slane %v13793_v10, 2  ;;  %v12641_v52 = vld [vmem:[#allocation2 + $0x494] sm:$0xf] }
  0xd2   :  { %3297 = vmatpush.bf16.msrb.mxu0 %v9286_v14  ;;  %3249 = vmatmul.bf16.gmra.mxu1 %v13763_v39  ;;  %v12935_v14 = vld [vmem:[#allocation2 + $0xdbc] sm:$0xf0]  ;;  %v9634_v45 = vor.u32 %v12669_v26, %v9631_v27  ;;  %v10530_v50 = vor.u32 %v12893_v40, %v10527_v42 }
  0xd3   :  { %3316 = vmatpush.bf16.msrb.mxu1 %v10182_v18  ;;  %v4006_v4 = vmax.f32 %v2982_v55, 0.0  ;;  %3268 = vmatmul.bf16.gmra.mxu2 %v13761_v34  ;;  %v9846_v18 = vor.u32 %v12738_v0, %v9845_v60  ;;  %v4033_v46 = vmax.f32 %v13814_v61, 0.0  ;;  %v9517_v55 = vld [vmem:[#allocation2 + $0x490] sm:$0xf]  ;;  %v12879_v61 = vld [vmem:[#allocation2 + $0xbfc] sm:$0xf0] }
  0xd4   :  { %3335 = vmatpush.bf16.msrb.mxu2 %v9290_v13  ;;  %3287 = vmatmul.bf16.gmra.mxu3 %v13763_v39  ;;  %v8954_v13 = vor.u32 %v12500_v53, %v8951_v54  ;;  %v9519_v53 = vld [vmem:[#allocation2 + $0x500] sm:$0xf0] }
  0xd5   :  { %3354 = vmatpush.bf16.msrb.mxu3 %v10186_v19  ;;  %v13821_v11 = vpack.c.bf16 %v4006_v4, %v3978_v3  ;;  %v9850_v19 = vor.u32 %v12724_v1, %v9847_v2  ;;  %v9522_v4 = vor.u32 %v12641_v52, %v9519_v53 }
  0xd6   :  { %3298 = vmatpush.bf16.msrb.mxu0 %v9174_v30  ;;  %v2965_v17 = vpop.f32.mrf.mxu2  ;;  %v2929_v22 = vpop.f32.mrf.mxu0  ;;  %v10638_v30 = vor.u32 %v12935_v14, %v10637_v9  ;;  %v12851_v14 = vld [vmem:[#allocation2 + $0xb1c] sm:$0xf0] }
  0xd7   :  { %3317 = vmatpush.bf16.msrb.mxu1 %v10070_v36  ;;  %v2966_v20 = vadd.f32 %v2965_v17, %v13800_v41  ;;  %v2984_v21 = vpop.f32.mrf.mxu3  ;;  %v2930_v28 = vadd.f32 %v2929_v22, %v13796_v25  ;;  %v10525_v36 = vld [vmem:[#allocation2 + $0xc70] sm:$0xf]  ;;  %v9630_v25 = vor.u32 %v12683_v35, %v9629_v32 }
  0xd8   :  { %3336 = vmatpush.bf16.msrb.mxu2 %v9178_v29  ;;  %v2948_v29 = vpop.f32.mrf.mxu1  ;;  %v10526_v48 = vor.u32 %v12907_v38, %v10525_v36  ;;  %v12823_v36 = vld [vmem:[#allocation2 + $0xa3c] sm:$0xf0]  ;;  %v10191_v38 = vld [vmem:[#allocation2 + $0xa40] sm:$0xf0] }
  0xd9   :  { %3355 = vmatpush.bf16.msrb.mxu3 %v10074_v37  ;;  %v13825_v37 = vadd.f32 %v2984_v21, %v2966_v20  ;;  %v2949_v43 = vadd.f32 %v2948_v29, %v2930_v28  ;;  %v13843_v20 = vperm.slane %v13793_v10, 3  ;;  %v9410_v21 = vor.u32 %v12613_v6, %v9407_v7  ;;  %v9293_v29 = vld [vmem:[#allocation2 + $0x2d0] sm:$0xf]  ;;  %v12543_v7 = vld [vmem:[#allocation2 + $0x17c] sm:$0xf0] }
  0xda   :  { %3299 = vmatpush.bf16.msrb.mxu0 %v9062_v57  ;;  %v10413_v57 = vld [vmem:[#allocation2 + $0xb90] sm:$0xf] }
  0xdb   :  { %3318 = vmatpush.bf16.msrb.mxu1 %v9958_v62  ;;  %v4061_v47 = vmax.f32 %v2949_v43, 0.0  ;;  %v12865_v62 = vld [vmem:[#allocation2 + $0xb94] sm:$0xf]  ;;  %v10414_v9 = vor.u32 %v12879_v61, %v10413_v57  ;;  %v4034_v15 = vmax.f32 %v13825_v37, 0.0  ;;  %v10079_v61 = vld [vmem:[#allocation2 + $0x960] sm:$0xf0] }
  0xdc   :  { %3337 = vmatpush.bf16.msrb.mxu2 %v9066_v56  ;;  %v12655_v56 = vld [vmem:[#allocation2 + $0x4fc] sm:$0xf0]  ;;  %v12809_v37 = vld [vmem:[#allocation2 + $0x9d4] sm:$0xf]  ;;  %v9069_v6 = vld [vmem:[#allocation2 + $0x110] sm:$0xf] }
  0xdd   :  { %3356 = vmatpush.bf16.msrb.mxu3 %v9962_v63  ;;  %v13831_v58 = vpack.c.bf16 %v4061_v47, %v4033_v46  ;;  %v10415_v63 = vld [vmem:[#allocation2 + $0xc00] sm:$0xf0]  ;;  %v9518_v5 = vor.u32 %v12655_v56, %v9517_v55  ;;  %v12557_v47 = vld [vmem:[#allocation2 + $0x1f4] sm:$0xf]  ;;  %v10194_v53 = vor.u32 %v12809_v37, %v10191_v38  ;;  %v12571_v55 = vld [vmem:[#allocation2 + $0x25c] sm:$0xf0] }
  0xde   :  { %3300 = vmatpush.bf16.msrb.mxu0 %v8950_v12  ;;  %v2967_v54 = vpop.f32.mrf.mxu2  ;;  %v2998_v0 = vpop.f32.mrf.mxu0  ;;  %v10301_v12 = vld [vmem:[#allocation2 + $0xab0] sm:$0xf]  ;;  %v9855_v37 = vld [vmem:[#allocation2 + $0x7a0] sm:$0xf0] }
  0xdf   :  { %3319 = vmatpush.bf16.msrb.mxu1 %v9846_v18  ;;  %v2968_v59 = vadd.f32 %v2967_v54, %v13800_v41  ;;  %v2986_v60 = vpop.f32.mrf.mxu3  ;;  %v2999_v3 = vadd.f32 %v2998_v0, %v13829_v51  ;;  %v10418_v41 = vor.u32 %v12865_v62, %v10415_v63  ;;  %v12837_v18 = vld [vmem:[#allocation2 + $0xab4] sm:$0xf]  ;;  %v10302_v27 = vor.u32 %v12851_v14, %v10301_v12  ;;  %v9181_v54 = vld [vmem:[#allocation2 + $0x1f0] sm:$0xf]  ;;  %v12767_v12 = vld [vmem:[#allocation2 + $0x87c] sm:$0xf0] }
  0xe0   :  { %3338 = vmatpush.bf16.msrb.mxu2 %v8954_v13  ;;  %v3017_v1 = vpop.f32.mrf.mxu1  ;;  %v12627_v13 = vld [vmem:[#allocation2 + $0x41c] sm:$0xf0]  ;;  %v10077_v56 = vld [vmem:[#allocation2 + $0x8f0] sm:$0xf]  ;;  %v12753_v14 = vld [vmem:[#allocation2 + $0x814] sm:$0xf] }
  0xe1   :  { %3357 = vmatpush.bf16.msrb.mxu3 %v9850_v19  ;;  %v2987_v2 = vadd.f32 %v2986_v60, %v2968_v59  ;;  %v13836_v17 = vadd.f32 %v3017_v1, %v2999_v3  ;;  %3301 = vmatmul.bf16.vlgmr.msrb.gmra.mxu0 %v13741_v44  ;;  %v10303_v19 = vld [vmem:[#allocation2 + $0xb20] sm:$0xf0]  ;;  %v9406_v22 = vor.u32 %v12627_v13, %v9405_v8  ;;  %v12795_v59 = vld [vmem:[#allocation2 + $0x95c] sm:$0xf0]  ;;  %v12781_v60 = vld [vmem:[#allocation2 + $0x8f4] sm:$0xf] }
  0xe2   :  { %3369 = vmatpush.bf16.msra.mxu0 %v9742_v24  ;;  %3320 = vmatmul.bf16.vlgmr.msrb.gmra.mxu1 %v13743_v49  ;;  %v9295_v24 = vld [vmem:[#allocation2 + $0x340] sm:$0xf0]  ;;  %v10306_v28 = vor.u32 %v12837_v18, %v10303_v19  ;;  %v9182_v1 = vor.u32 %v12571_v55, %v9181_v54  ;;  %v9965_v8 = vld [vmem:[#allocation2 + $0x810] sm:$0xf]  ;;  %v12501_v19 = vld [vmem:[#allocation2 + $0x34] sm:$0xf] }
  0xe3   :  { %3388 = vmatpush.bf16.msra.mxu1 %v10638_v30  ;;  %v4062_v16 = vmax.f32 %v2987_v2, 0.0  ;;  %3339 = vmatmul.bf16.vlgmr.msrb.gmra.mxu2 %v13741_v44  ;;  %v12599_v30 = vld [vmem:[#allocation2 + $0x33c] sm:$0xf0]  ;;  %v3979_v62 = vmax.f32 %v13836_v17, 0.0  ;;  %v12529_v2 = vld [vmem:[#allocation2 + $0x114] sm:$0xf] }
  0xe4   :  { %3407 = vmatpush.bf16.msra.mxu2 %v9746_v23  ;;  %3358 = vmatmul.bf16.vlgmr.msrb.gmra.mxu3 %v13743_v49  ;;  %v12585_v23 = vld [vmem:[#allocation2 + $0x2d4] sm:$0xf]  ;;  %v9294_v46 = vor.u32 %v12599_v30, %v9293_v29  ;;  %v9071_v3 = vld [vmem:[#allocation2 + $0x180] sm:$0xf0]  ;;  %v9853_v29 = vld [vmem:[#allocation2 + $0x730] sm:$0xf] }
  0xe5   :  { %3426 = vmatpush.bf16.msra.mxu3 %v10642_v31  ;;  %v13845_v26 = vpack.c.bf16 %v4062_v16, %v4034_v15  ;;  %v10189_v31 = vld [vmem:[#allocation2 + $0x9d0] sm:$0xf]  ;;  %v9967_v15 = vld [vmem:[#allocation2 + $0x880] sm:$0xf0]  ;;  %v12922_v54 = vld [vmem:[#allocation2 + $0xd5c] sm:$0xf] }
  0xe6   :  { %3370 = vmatpush.bf16.msra.mxu0 %v9630_v25  ;;  %v3036_v32 = vpop.f32.mrf.mxu2  ;;  %v3000_v42 = vpop.f32.mrf.mxu0  ;;  %v9298_v25 = vor.u32 %v12585_v23, %v9295_v24  ;;  %v10190_v52 = vor.u32 %v12823_v36, %v10189_v31  ;;  %v9074_v23 = vor.u32 %v12529_v2, %v9071_v3  ;;  %v9070_v24 = vor.u32 %v12543_v7, %v9069_v6  ;;  %v12725_v36 = vld [vmem:[#allocation2 + $0x734] sm:$0xf]  ;;  %v10647_v55 = vld [vmem:[#allocation2 + $0xdc8] sm:$0xf0]  ;;  %v9637_v6 = vld [vmem:[#allocation2 + $0x578] sm:$0xf] }
  0xe7   :  { %3389 = vmatpush.bf16.msra.mxu1 %v10526_v48  ;;  %v3055_v35 = vpop.f32.mrf.mxu3  ;;  %v3037_v40 = vadd.f32 %v3036_v32, %v13843_v20  ;;  %v9183_v48 = vld [vmem:[#allocation2 + $0x260] sm:$0xf0]  ;;  %v9966_v31 = vor.u32 %v12767_v12, %v9965_v8  ;;  %v9970_v32 = vor.u32 %v12753_v14, %v9967_v15  ;;  %v12684_v7 = vld [vmem:[#allocation2 + $0x5e4] sm:$0xf0]  ;;  %v10533_v8 = vld [vmem:[#allocation2 + $0xc78] sm:$0xf] }
  0xe8   :  { %3408 = vmatpush.bf16.msra.mxu2 %v9634_v45  ;;  %v3019_v43 = vpop.f32.mrf.mxu1  ;;  %v3001_v45 = vadd.f32 %v3000_v42, %v13829_v51  ;;  %v9186_v0 = vor.u32 %v12557_v47, %v9183_v48  ;;  %v9751_v42 = vld [vmem:[#allocation2 + $0x6c8] sm:$0xf0]  ;;  %v10645_v47 = vld [vmem:[#allocation2 + $0xd58] sm:$0xf]  ;;  %v12894_v12 = vld [vmem:[#allocation2 + $0xc7c] sm:$0xf] }
  0xe9   :  { %3427 = vmatpush.bf16.msra.mxu3 %v10530_v50  ;;  %v13849_v50 = vadd.f32 %v3055_v35, %v3037_v40  ;;  %v12739_v35 = vld [vmem:[#allocation2 + $0x79c] sm:$0xf0]  ;;  %v12698_v40 = vld [vmem:[#allocation2 + $0x65c] sm:$0xf]  ;;  %v10535_v14 = vld [vmem:[#allocation2 + $0xce8] sm:$0xf0] }
  0xea   :  { %3371 = vmatpush.bf16.msra.mxu0 %v9518_v5  ;;  %v3020_v57 = vadd.f32 %v3019_v43, %v3001_v45  ;;  %v10082_v5 = vor.u32 %v12781_v60, %v10079_v61  ;;  %v9749_v43 = vld [vmem:[#allocation2 + $0x658] sm:$0xf]  ;;  %v9754_v61 = vor.u32 %v12698_v40, %v9751_v42 }
  0xeb   :  { %3390 = vmatpush.bf16.msra.mxu1 %v10414_v9  ;;  %v3980_v45 = vmax.f32 %v13849_v50, 0.0  ;;  %v9858_v50 = vor.u32 %v12725_v36, %v9855_v37  ;;  %v12866_v36 = vld [vmem:[#allocation2 + $0xb9c] sm:$0xf]  ;;  %v10423_v37 = vld [vmem:[#allocation2 + $0xc08] sm:$0xf0] }
  0xec   :  { %3409 = vmatpush.bf16.msra.mxu2 %v9522_v4  ;;  %v4007_v63 = vmax.f32 %v3020_v57, 0.0  ;;  %v10078_v4 = vor.u32 %v12795_v59, %v10077_v56  ;;  %v9854_v57 = vor.u32 %v12739_v35, %v9853_v29  ;;  %v12656_v29 = vld [vmem:[#allocation2 + $0x504] sm:$0xf0] }
  0xed   :  { %3428 = vmatpush.bf16.msra.mxu3 %v10418_v41  ;;  %v12880_v35 = vld [vmem:[#allocation2 + $0xc04] sm:$0xf0] }
  0xee   :  { %3372 = vmatpush.bf16.msra.mxu0 %v9406_v22  ;;  %v13852_v9 = vpack.c.bf16 %v4007_v63, %v3979_v62  ;;  %v3038_v41 = vpop.f32.mrf.mxu2  ;;  %v3003_v17 = vpop.f32.mrf.mxu0  ;;  %v12670_v63 = vld [vmem:[#allocation2 + $0x57c] sm:$0xf] }
  0xef   :  { %3391 = vmatpush.bf16.msra.mxu1 %v10302_v27  ;;  %v3057_v13 = vpop.f32.mrf.mxu3  ;;  %v3039_v16 = vadd.f32 %v3038_v41, %v13843_v20  ;;  %v3004_v22 = vadd.f32 %v3003_v17, %v13829_v51  ;;  %v8957_v27 = vld [vmem:[#allocation2 + $0x30] sm:$0xf] }
  0xf0   :  { %3410 = vmatpush.bf16.msra.mxu2 %v9410_v21  ;;  %v3022_v18 = vpop.f32.mrf.mxu1  ;;  %v8959_v21 = vld [vmem:[#allocation2 + $0xa0] sm:$0xf0] }
  0xf1   :  { %3429 = vmatpush.bf16.msra.mxu3 %v10306_v28  ;;  %v12515_v28 = vld [vmem:[#allocation2 + $0x9c] sm:$0xf0]  ;;  %v3058_v30 = vadd.f32 %v3057_v13, %v3039_v16  ;;  %v13856_v38 = vadd.f32 %v3022_v18, %v3004_v22  ;;  %3306 = vmatmul.bf16.gmra.mxu0 %v13761_v34  ;;  %v8962_v48 = vor.u32 %v12501_v19, %v8959_v21  ;;  %v12908_v13 = vld [vmem:[#allocation2 + $0xce4] sm:$0xf0]  ;;  %v13870_v19 = vperm.slane %v13793_v10, 4 }
  0xf2   :  { %3373 = vmatpush.bf16.msra.mxu0 %v9294_v46  ;;  %3325 = vmatmul.bf16.gmra.mxu1 %v13763_v39  ;;  %v12712_v46 = vld [vmem:[#allocation2 + $0x6c4] sm:$0xf0]  ;;  %v9638_v18 = vor.u32 %v12684_v7, %v9637_v6  ;;  %v10538_v21 = vor.u32 %v12894_v12, %v10535_v14  ;;  %v9301_v7 = vld [vmem:[#allocation2 + $0x2d8] sm:$0xf] }
  0xf3   :  { %3392 = vmatpush.bf16.msra.mxu1 %v10190_v52  ;;  %3344 = vmatmul.bf16.gmra.mxu2 %v13761_v34  ;;  %v8958_v52 = vor.u32 %v12515_v28, %v8957_v27  ;;  %v9750_v62 = vor.u32 %v12712_v46, %v9749_v43  ;;  %v4035_v22 = vmax.f32 %v13856_v38, 0.0  ;;  %v9527_v27 = vld [vmem:[#allocation2 + $0x508] sm:$0xf0]  ;;  %v9525_v28 = vld [vmem:[#allocation2 + $0x498] sm:$0xf] }
  0xf4   :  { %3411 = vmatpush.bf16.msra.mxu2 %v9298_v25  ;;  %v4008_v25 = vmax.f32 %v3058_v30, 0.0  ;;  %3363 = vmatmul.bf16.gmra.mxu3 %v13763_v39  ;;  %v10421_v30 = vld [vmem:[#allocation2 + $0xb98] sm:$0xf]  ;;  %v9526_v46 = vor.u32 %v12656_v29, %v9525_v28 }
  0xf5   :  { %3430 = vmatpush.bf16.msra.mxu3 %v10194_v53  ;;  %v12936_v53 = vld [vmem:[#allocation2 + $0xdc4] sm:$0xf0] }
  0xf6   :  { %3374 = vmatpush.bf16.msra.mxu0 %v9182_v1  ;;  %v13863_v56 = vpack.c.bf16 %v4008_v25, %v3980_v45  ;;  %v3041_v59 = vpop.f32.mrf.mxu2  ;;  %v3005_v2 = vpop.f32.mrf.mxu0 }
  0xf7   :  { %3393 = vmatpush.bf16.msra.mxu1 %v10078_v4  ;;  %v3060_v60 = vpop.f32.mrf.mxu3  ;;  %v3042_v1 = vadd.f32 %v3041_v59, %v13843_v20  ;;  %v10646_v4 = vor.u32 %v12936_v53, %v10645_v47  ;;  %v3006_v41 = vadd.f32 %v3005_v2, %v13829_v51  ;;  %v10534_v51 = vor.u32 %v12908_v13, %v10533_v8  ;;  %v12614_v47 = vld [vmem:[#allocation2 + $0x3bc] sm:$0xf]  ;;  %v12600_v8 = vld [vmem:[#allocation2 + $0x344] sm:$0xf0] }
  0xf8   :  { %3412 = vmatpush.bf16.msra.mxu2 %v9186_v0  ;;  %v9639_v0 = vld [vmem:[#allocation2 + $0x5e8] sm:$0xf0]  ;;  %v3024_v3 = vpop.f32.mrf.mxu1  ;;  %v10422_v53 = vor.u32 %v12880_v35, %v10421_v30  ;;  %v10085_v35 = vld [vmem:[#allocation2 + $0x8f8] sm:$0xf] }
  0xf9   :  { %3431 = vmatpush.bf16.msra.mxu3 %v10082_v5  ;;  %v10650_v5 = vor.u32 %v12922_v54, %v10647_v55  ;;  %v13867_v15 = vadd.f32 %v3060_v60, %v3042_v1  ;;  %v3025_v16 = vadd.f32 %v3024_v3, %v3006_v41  ;;  %v9642_v17 = vor.u32 %v12670_v63, %v9639_v0  ;;  %v9413_v55 = vld [vmem:[#allocation2 + $0x3b8] sm:$0xf]  ;;  %v12838_v60 = vld [vmem:[#allocation2 + $0xabc] sm:$0xf] }
  0xfa   :  { %3375 = vmatpush.bf16.msra.mxu0 %v9070_v24  ;;  %v12642_v24 = vld [vmem:[#allocation2 + $0x49c] sm:$0xf]  ;;  %v10426_v54 = vor.u32 %v12866_v36, %v10423_v37  ;;  %v13885_v0 = vperm.slane %v13793_v10, 5  ;;  %v10197_v41 = vld [vmem:[#allocation2 + $0x9d8] sm:$0xf] }
  0xfb   :  { %3394 = vmatpush.bf16.msra.mxu1 %v9966_v31  ;;  %v9530_v25 = vor.u32 %v12642_v24, %v9527_v27  ;;  %v12586_v3 = vld [vmem:[#allocation2 + $0x2dc] sm:$0xf]  ;;  %v9191_v27 = vld [vmem:[#allocation2 + $0x268] sm:$0xf0]  ;;  %v12796_v37 = vld [vmem:[#allocation2 + $0x964] sm:$0xf0] }
  0xfc   :  { %3413 = vmatpush.bf16.msra.mxu2 %v9074_v23  ;;  %v4063_v23 = vmax.f32 %v3025_v16, 0.0  ;;  %v12810_v10 = vld [vmem:[#allocation2 + $0x9dc] sm:$0xf]  ;;  %v10199_v16 = vld [vmem:[#allocation2 + $0xa48] sm:$0xf0] }
  0xfd   :  { %3432 = vmatpush.bf16.msra.mxu3 %v9970_v32  ;;  %v12558_v24 = vld [vmem:[#allocation2 + $0x1fc] sm:$0xf]  ;;  %v10202_v30 = vor.u32 %v12810_v10, %v10199_v16  ;;  %v12740_v16 = vld [vmem:[#allocation2 + $0x7a4] sm:$0xf0] }
  0xfe   :  { %3376 = vmatpush.bf16.msra.mxu0 %v8958_v52  ;;  %v3043_v31 = vpop.f32.mrf.mxu2  ;;  %v13873_v40 = vpack.c.bf16 %v4063_v23, %v4035_v22  ;;  %v3074_v43 = vpop.f32.mrf.mxu0  ;;  %v9302_v23 = vor.u32 %v12600_v8, %v9301_v7  ;;  %v8965_v8 = vld [vmem:[#allocation2 + $0x38] sm:$0xf] }
  0xff   :  { %3395 = vmatpush.bf16.msra.mxu1 %v9854_v57  ;;  %v3062_v32 = vpop.f32.mrf.mxu3  ;;  %v3044_v42 = vadd.f32 %v3043_v31, %v13843_v20  ;;  %v3075_v38 = vadd.f32 %v3074_v43, %v13870_v19  ;;  %v12628_v57 = vld [vmem:[#allocation2 + $0x424] sm:$0xf0]  ;;  %v9189_v31 = vld [vmem:[#allocation2 + $0x1f8] sm:$0xf]  ;;  %v10087_v43 = vld [vmem:[#allocation2 + $0x968] sm:$0xf0] }
 0x100   :  { %3414 = vmatpush.bf16.msra.mxu2 %v8962_v48  ;;  %v3093_v45 = vpop.f32.mrf.mxu1  ;;  %v9415_v48 = vld [vmem:[#allocation2 + $0x428] sm:$0xf0]  ;;  %v12852_v20 = vld [vmem:[#allocation2 + $0xb24] sm:$0xf0]  ;;  %v9414_v2 = vor.u32 %v12628_v57, %v9413_v55  ;;  %v9973_v57 = vld [vmem:[#allocation2 + $0x818] sm:$0xf] }
 0x101   :  { %3433 = vmatpush.bf16.msra.mxu3 %v9858_v50  ;;  %v3063_v52 = vadd.f32 %v3062_v32, %v3044_v42  ;;  %v10309_v50 = vld [vmem:[#allocation2 + $0xab8] sm:$0xf]  ;;  %v13877_v59 = vadd.f32 %v3093_v45, %v3075_v38  ;;  %3377 = vmatmul.bf16.vlgmr.msra.gmra.mxu0 %v13741_v44  ;;  %v9418_v1 = vor.u32 %v12614_v47, %v9415_v48  ;;  %v12572_v32 = vld [vmem:[#allocation2 + $0x264] sm:$0xf0]  ;;  %v12782_v42 = vld [vmem:[#allocation2 + $0x8fc] sm:$0xf] }
 0x102   :  { %3445 = vmatpush.bf16.msrb.mxu0 %v9750_v62  ;;  %3396 = vmatmul.bf16.vlgmr.msra.gmra.mxu1 %v13743_v49  ;;  %v4036_v62 = vmax.f32 %v13867_v15, 0.0  ;;  %v12824_v15 = vld [vmem:[#allocation2 + $0xa44] sm:$0xf0]  ;;  %v12530_v47 = vld [vmem:[#allocation2 + $0x11c] sm:$0xf] }
 0x103   :  { %3464 = vmatpush.bf16.msrb.mxu1 %v10646_v4  ;;  %v4064_v63 = vmax.f32 %v3063_v52, 0.0  ;;  %3415 = vmatmul.bf16.vlgmr.msra.gmra.mxu2 %v13741_v44  ;;  %v9303_v4 = vld [vmem:[#allocation2 + $0x348] sm:$0xf0]  ;;  %v10198_v29 = vor.u32 %v12824_v15, %v10197_v41  ;;  %v3981_v45 = vmax.f32 %v13877_v59, 0.0  ;;  %v10086_v52 = vor.u32 %v12796_v37, %v10085_v35  ;;  %v12544_v55 = vld [vmem:[#allocation2 + $0x184] sm:$0xf0] }
 0x104   :  { %3483 = vmatpush.bf16.msrb.mxu2 %v9754_v61  ;;  %v10311_v61 = vld [vmem:[#allocation2 + $0xb28] sm:$0xf0]  ;;  %3434 = vmatmul.bf16.vlgmr.msra.gmra.mxu3 %v13743_v49  ;;  %v9306_v22 = vor.u32 %v12586_v3, %v9303_v4  ;;  %v12754_v59 = vld [vmem:[#allocation2 + $0x81c] sm:$0xf]  ;;  %v12516_v41 = vld [vmem:[#allocation2 + $0xa4] sm:$0xf0] }
 0x105   :  { %3502 = vmatpush.bf16.msrb.mxu3 %v10650_v5  ;;  %v10310_v5 = vor.u32 %v12852_v20, %v10309_v50  ;;  %v10314_v6 = vor.u32 %v12838_v60, %v10311_v61  ;;  %v13887_v13 = vpack.c.bf16 %v4064_v63, %v4036_v62  ;;  %v9079_v48 = vld [vmem:[#allocation2 + $0x188] sm:$0xf0]  ;;  %v12768_v61 = vld [vmem:[#allocation2 + $0x884] sm:$0xf0]  ;;  %v12502_v3 = vld [vmem:[#allocation2 + $0x3c] sm:$0xf] }
 0x106   :  { %3446 = vmatpush.bf16.msrb.mxu0 %v9638_v18  ;;  %v3112_v12 = vpop.f32.mrf.mxu2  ;;  %v3076_v18 = vpop.f32.mrf.mxu0  ;;  %v9975_v62 = vld [vmem:[#allocation2 + $0x888] sm:$0xf0]  ;;  %v9974_v15 = vor.u32 %v12768_v61, %v9973_v57  ;;  %v12937_v35 = vld [vmem:[#allocation2 + $0xdcc] sm:$0xf0]  ;;  %v10655_v37 = vld [vmem:[#allocation2 + $0xdd0] sm:$0xf0] }
 0x107   :  { %3465 = vmatpush.bf16.msrb.mxu1 %v10534_v51  ;;  %v3131_v14 = vpop.f32.mrf.mxu3  ;;  %v8967_v4 = vld [vmem:[#allocation2 + $0xa8] sm:$0xf0]  ;;  %v9978_v10 = vor.u32 %v12754_v59, %v9975_v62  ;;  %v10541_v61 = vld [vmem:[#allocation2 + $0xc80] sm:$0xf]  ;;  %v12909_v62 = vld [vmem:[#allocation2 + $0xcec] sm:$0xf0] }
 0x108   :  { %3484 = vmatpush.bf16.msrb.mxu2 %v9642_v17  ;;  %v3113_v17 = vadd.f32 %v3112_v12, %v13885_v0  ;;  %v3095_v51 = vpop.f32.mrf.mxu1  ;;  %v9861_v12 = vld [vmem:[#allocation2 + $0x738] sm:$0xf] }
 0x109   :  { %3503 = vmatpush.bf16.msrb.mxu3 %v10538_v21  ;;  %v3077_v21 = vadd.f32 %v3076_v18, %v13870_v19  ;;  %v9863_v18 = vld [vmem:[#allocation2 + $0x7a8] sm:$0xf0] }
 0x10a   :  { %3447 = vmatpush.bf16.msrb.mxu0 %v9526_v46  ;;  %v13891_v28 = vadd.f32 %v3131_v14, %v3113_v17  ;;  %v9190_v46 = vor.u32 %v12572_v32, %v9189_v31  ;;  %v12726_v17 = vld [vmem:[#allocation2 + $0x73c] sm:$0xf]  ;;  %v8970_v31 = vor.u32 %v12502_v3, %v8967_v4  ;;  %v8966_v32 = vor.u32 %v12516_v41, %v8965_v8 }
 0x10b   :  { %3466 = vmatpush.bf16.msrb.mxu1 %v10422_v53  ;;  %v3096_v36 = vadd.f32 %v3095_v51, %v3077_v21  ;;  %v10090_v53 = vor.u32 %v12782_v42, %v10087_v43  ;;  %v12699_v21 = vld [vmem:[#allocation2 + $0x664] sm:$0xf]  ;;  %v9862_v43 = vor.u32 %v12740_v16, %v9861_v12  ;;  %v12657_v16 = vld [vmem:[#allocation2 + $0x50c] sm:$0xf0] }
 0x10c   :  { %3485 = vmatpush.bf16.msrb.mxu2 %v9530_v25  ;;  %v9194_v25 = vor.u32 %v12558_v24, %v9191_v27  ;;  %v3982_v24 = vmax.f32 %v13891_v28, 0.0  ;;  %v9866_v28 = vor.u32 %v12726_v17, %v9863_v18  ;;  %v10429_v17 = vld [vmem:[#allocation2 + $0xba0] sm:$0xf] }
 0x10d   :  { %3504 = vmatpush.bf16.msrb.mxu3 %v10426_v54  ;;  %v4009_v38 = vmax.f32 %v3096_v36, 0.0  ;;  %v9077_v54 = vld [vmem:[#allocation2 + $0x118] sm:$0xf]  ;;  %v12923_v36 = vld [vmem:[#allocation2 + $0xd64] sm:$0xf] }
 0x10e   :  { %3448 = vmatpush.bf16.msrb.mxu0 %v9414_v2  ;;  %v3114_v20 = vpop.f32.mrf.mxu2  ;;  %v9078_v7 = vor.u32 %v12544_v55, %v9077_v54  ;;  %v10658_v57 = vor.u32 %v12923_v36, %v10655_v37  ;;  %v12615_v36 = vld [vmem:[#allocation2 + $0x3c4] sm:$0xf]  ;;  %v9423_v37 = vld [vmem:[#allocation2 + $0x430] sm:$0xf0] }
 0x10f   :  { %3467 = vmatpush.bf16.msrb.mxu1 %v10310_v5  ;;  %v13894_v50 = vpack.c.bf16 %v4009_v38, %v3981_v45  ;;  %v3133_v60 = vpop.f32.mrf.mxu3  ;;  %v3115_v63 = vadd.f32 %v3114_v20, %v13885_v0  ;;  %v9645_v20 = vld [vmem:[#allocation2 + $0x580] sm:$0xf] }
 0x110   :  { %3486 = vmatpush.bf16.msrb.mxu2 %v9418_v1  ;;  %v3079_v1 = vpop.f32.mrf.mxu0  ;;  %v3098_v2 = vpop.f32.mrf.mxu1 }
 0x111   :  { %3505 = vmatpush.bf16.msrb.mxu3 %v10314_v6  ;;  %v3080_v5 = vadd.f32 %v3079_v1, %v13870_v19  ;;  %v9082_v6 = vor.u32 %v12530_v47, %v9079_v48  ;;  %v3134_v14 = vadd.f32 %v3133_v60, %v3115_v63  ;;  %3382 = vmatmul.bf16.gmra.mxu0 %v13761_v34  ;;  %v12671_v47 = vld [vmem:[#allocation2 + $0x584] sm:$0xf]  ;;  %v9647_v48 = vld [vmem:[#allocation2 + $0x5f0] sm:$0xf0]  ;;  %v12685_v60 = vld [vmem:[#allocation2 + $0x5ec] sm:$0xf0] }
 0x112   :  { %3449 = vmatpush.bf16.msrb.mxu0 %v9302_v23  ;;  %3401 = vmatmul.bf16.gmra.mxu1 %v13763_v39  ;;  %v9757_v23 = vld [vmem:[#allocation2 + $0x660] sm:$0xf]  ;;  %v12895_v63 = vld [vmem:[#allocation2 + $0xc84] sm:$0xf]  ;;  %v10543_v1 = vld [vmem:[#allocation2 + $0xcf0] sm:$0xf0]  ;;  %v9650_v4 = vor.u32 %v12671_v47, %v9647_v48 }
 0x113   :  { %3468 = vmatpush.bf16.msrb.mxu1 %v10198_v29  ;;  %v13898_v51 = vadd.f32 %v3098_v2, %v3080_v5  ;;  %v4010_v27 = vmax.f32 %v3134_v14, 0.0  ;;  %3420 = vmatmul.bf16.gmra.mxu2 %v13761_v34  ;;  %v12713_v29 = vld [vmem:[#allocation2 + $0x6cc] sm:$0xf0]  ;;  %v9646_v5 = vor.u32 %v12685_v60, %v9645_v20  ;;  %v10546_v8 = vor.u32 %v12895_v63, %v10543_v1  ;;  %v12643_v14 = vld [vmem:[#allocation2 + $0x4a4] sm:$0xf] }
 0x114   :  { %3487 = vmatpush.bf16.msrb.mxu2 %v9306_v22  ;;  %v9759_v22 = vld [vmem:[#allocation2 + $0x6d0] sm:$0xf0]  ;;  %3439 = vmatmul.bf16.gmra.mxu3 %v13763_v39  ;;  %v12839_v48 = vld [vmem:[#allocation2 + $0xac4] sm:$0xf]  ;;  %v9309_v63 = vld [vmem:[#allocation2 + $0x2e0] sm:$0xf] }
 0x115   :  { %3506 = vmatpush.bf16.msrb.mxu3 %v10202_v30  ;;  %v10653_v30 = vld [vmem:[#allocation2 + $0xd60] sm:$0xf]  ;;  %v13905_v42 = vpack.c.bf16 %v4010_v27, %v3982_v24  ;;  %v4037_v41 = vmax.f32 %v13898_v51, 0.0  ;;  %v10431_v24 = vld [vmem:[#allocation2 + $0xc10] sm:$0xf0] }
 0x116   :  { %3450 = vmatpush.bf16.msrb.mxu0 %v9190_v46  ;;  %v3117_v45 = vpop.f32.mrf.mxu2  ;;  %v9758_v46 = vor.u32 %v12713_v29, %v9757_v23  ;;  %v10654_v55 = vor.u32 %v12937_v35, %v10653_v30  ;;  %v12867_v23 = vld [vmem:[#allocation2 + $0xba4] sm:$0xf]  ;;  %v12601_v1 = vld [vmem:[#allocation2 + $0x34c] sm:$0xf0] }
 0x117   :  { %3469 = vmatpush.bf16.msrb.mxu1 %v10086_v52  ;;  %v3136_v38 = vpop.f32.mrf.mxu3  ;;  %v3118_v52 = vadd.f32 %v3117_v45, %v13885_v0  ;;  %v10434_v45 = vor.u32 %v12867_v23, %v10431_v24  ;;  %v12587_v60 = vld [vmem:[#allocation2 + $0x2e4] sm:$0xf]  ;;  %v9197_v24 = vld [vmem:[#allocation2 + $0x200] sm:$0xf] }
 0x118   :  { %3488 = vmatpush.bf16.msrb.mxu2 %v9194_v25  ;;  %v9762_v25 = vor.u32 %v12699_v21, %v9759_v22  ;;  %v3100_v54 = vpop.f32.mrf.mxu1  ;;  %v12881_v22 = vld [vmem:[#allocation2 + $0xc0c] sm:$0xf0] }
 0x119   :  { %3507 = vmatpush.bf16.msrb.mxu3 %v10090_v53  ;;  %v3081_v53 = vpop.f32.mrf.mxu0  ;;  %v13909_v2 = vadd.f32 %v3136_v38, %v3118_v52  ;;  %v9421_v38 = vld [vmem:[#allocation2 + $0x3c0] sm:$0xf]  ;;  %v10319_v52 = vld [vmem:[#allocation2 + $0xb30] sm:$0xf0] }
 0x11a   :  { %3451 = vmatpush.bf16.msrb.mxu0 %v9078_v7  ;;  %v3082_v59 = vadd.f32 %v3081_v53, %v13870_v19  ;;  %v10542_v19 = vor.u32 %v12909_v62, %v10541_v61  ;;  %v9311_v61 = vld [vmem:[#allocation2 + $0x350] sm:$0xf0]  ;;  %v10322_v62 = vor.u32 %v12839_v48, %v10319_v52  ;;  %v12545_v48 = vld [vmem:[#allocation2 + $0x18c] sm:$0xf0]  ;;  %v9981_v52 = vld [vmem:[#allocation2 + $0x820] sm:$0xf] }
 0x11b   :  { %3470 = vmatpush.bf16.msrb.mxu1 %v9974_v15  ;;  %v9535_v15 = vld [vmem:[#allocation2 + $0x510] sm:$0xf0]  ;;  %v4038_v53 = vmax.f32 %v13909_v2, 0.0  ;;  %v10205_v2 = vld [vmem:[#allocation2 + $0x9e0] sm:$0xf] }
 0x11c   :  { %3489 = vmatpush.bf16.msrb.mxu2 %v9082_v6  ;;  %v3101_v3 = vadd.f32 %v3100_v54, %v3082_v59  ;;  %v13462_v6 = vld [vmem:[#allocation4] sm:$0xff] }
 0x11d   :  { %3508 = vmatpush.bf16.msrb.mxu3 %v9978_v10  ;;  %v13911_v7 = vperm.slane %v13462_v6, 6  ;;  %v9533_v10 = vld [vmem:[#allocation2 + $0x4a0] sm:$0xf] }
 0x11e   :  { %3452 = vmatpush.bf16.msrb.mxu0 %v8966_v32  ;;  %v4065_v12 = vmax.f32 %v3101_v3, 0.0  ;;  %v3119_v18 = vpop.f32.mrf.mxu2  ;;  %v9538_v32 = vor.u32 %v12643_v14, %v9535_v15  ;;  %v9534_v35 = vor.u32 %v12657_v16, %v9533_v10  ;;  %v9314_v10 = vor.u32 %v12587_v60, %v9311_v61  ;;  %v9983_v60 = vld [vmem:[#allocation2 + $0x890] sm:$0xf0] }
 0x11f   :  { %3471 = vmatpush.bf16.msrb.mxu1 %v9862_v43  ;;  %v3138_v21 = vpop.f32.mrf.mxu3  ;;  %v3120_v29 = vadd.f32 %v3119_v18, %v13885_v0  ;;  %v12853_v0 = vld [vmem:[#allocation2 + $0xb2c] sm:$0xf0]  ;;  %v9310_v16 = vor.u32 %v12601_v1, %v9309_v63  ;;  %v9199_v18 = vld [vmem:[#allocation2 + $0x270] sm:$0xf0]  ;;  %v12503_v63 = vld [vmem:[#allocation2 + $0x44] sm:$0xf] }
 0x120   :  { %3490 = vmatpush.bf16.msrb.mxu2 %v8970_v31  ;;  %v13914_v27 = vpack.c.bf16 %v4065_v12, %v4037_v41  ;;  %v3169_v31 = vpop.f32.mrf.mxu1  ;;  %v8975_v1 = vld [vmem:[#allocation2 + $0xb0] sm:$0xf0] }
 0x121   :  { %3509 = vmatpush.bf16.msrb.mxu3 %v9866_v28  ;;  %v3150_v30 = vpop.f32.mrf.mxu0  ;;  %v3139_v43 = vadd.f32 %v3138_v21, %v3120_v29  ;;  %v10430_v28 = vor.u32 %v12881_v22, %v10429_v17  ;;  %3453 = vmatmul.bf16.vlgmr.msrb.gmra.mxu0 %v13741_v44  ;;  %v12559_v17 = vld [vmem:[#allocation2 + $0x204] sm:$0xf]  ;;  %v12573_v29 = vld [vmem:[#allocation2 + $0x26c] sm:$0xf0] }
 0x122   :  { %3521 = vmatpush.bf16.msra.mxu0 %v9758_v46  ;;  %v3151_v51 = vadd.f32 %v3150_v30, %v13911_v7  ;;  %v10317_v46 = vld [vmem:[#allocation2 + $0xac0] sm:$0xf]  ;;  %3472 = vmatmul.bf16.vlgmr.msrb.gmra.mxu1 %v13743_v49 }
 0x123   :  { %3540 = vmatpush.bf16.msra.mxu1 %v10654_v55  ;;  %v4066_v54 = vmax.f32 %v3139_v43, 0.0  ;;  %3491 = vmatmul.bf16.vlgmr.msrb.gmra.mxu2 %v13741_v44  ;;  %v13925_v55 = vperm.slane %v13462_v6, 7  ;;  %v10318_v59 = vor.u32 %v12853_v0, %v10317_v46  ;;  %v12811_v6 = vld [vmem:[#allocation2 + $0x9e4] sm:$0xf]  ;;  %v10093_v30 = vld [vmem:[#allocation2 + $0x900] sm:$0xf]  ;;  %v9202_v43 = vor.u32 %v12559_v17, %v9199_v18 }
 0x124   :  { %3559 = vmatpush.bf16.msra.mxu2 %v9762_v25  ;;  %v12629_v25 = vld [vmem:[#allocation2 + $0x42c] sm:$0xf0]  ;;  %v13918_v47 = vadd.f32 %v3169_v31, %v3151_v51  ;;  %3510 = vmatmul.bf16.vlgmr.msrb.gmra.mxu3 %v13743_v49  ;;  %v9085_v0 = vld [vmem:[#allocation2 + $0x120] sm:$0xf]  ;;  %v12700_v18 = vld [vmem:[#allocation2 + $0x66c] sm:$0xf] }
 0x125   :  { %3578 = vmatpush.bf16.msra.mxu3 %v10658_v57  ;;  %v9426_v57 = vor.u32 %v12615_v36, %v9423_v37  ;;  %v9422_v20 = vor.u32 %v12629_v25, %v9421_v38  ;;  %v13927_v3 = vpack.c.bf16 %v4066_v54, %v4038_v53  ;;  %v12797_v51 = vld [vmem:[#allocation2 + $0x96c] sm:$0xf0]  ;;  %v9087_v38 = vld [vmem:[#allocation2 + $0x190] sm:$0xf0] }
 0x126   :  { %3522 = vmatpush.bf16.msra.mxu0 %v9646_v5  ;;  %v3983_v36 = vmax.f32 %v13918_v47, 0.0  ;;  %v10094_v25 = vor.u32 %v12797_v51, %v10093_v30  ;;  %v12755_v47 = vld [vmem:[#allocation2 + $0x824] sm:$0xf]  ;;  %v12714_v30 = vld [vmem:[#allocation2 + $0x6d4] sm:$0xf0]  ;;  %v8978_v51 = vor.u32 %v12503_v63, %v8975_v1 }
 0x127   :  { %3541 = vmatpush.bf16.msra.mxu1 %v10542_v19  ;;  %v3207_v5 = vpop.f32.mrf.mxu3  ;;  %v12825_v19 = vld [vmem:[#allocation2 + $0xa4c] sm:$0xf0]  ;;  %v12910_v1 = vld [vmem:[#allocation2 + $0xcf4] sm:$0xf0] }
 0x128   :  { %3560 = vmatpush.bf16.msra.mxu2 %v9650_v4  ;;  %v3188_v4 = vpop.f32.mrf.mxu2  ;;  %v3171_v14 = vpop.f32.mrf.mxu1  ;;  %v10206_v22 = vor.u32 %v12825_v19, %v10205_v2  ;;  %v8973_v19 = vld [vmem:[#allocation2 + $0x40] sm:$0xf] }
 0x129   :  { %3579 = vmatpush.bf16.msra.mxu3 %v10546_v8  ;;  %v10207_v8 = vld [vmem:[#allocation2 + $0xa50] sm:$0xf0]  ;;  %v3189_v41 = vadd.f32 %v3188_v4, %v13925_v55  ;;  %v3152_v12 = vpop.f32.mrf.mxu0 }
 0x12a   :  { %3523 = vmatpush.bf16.msra.mxu0 %v9534_v35  ;;  %v3153_v15 = vadd.f32 %v3152_v12, %v13911_v7  ;;  %v10210_v23 = vor.u32 %v12811_v6, %v10207_v8  ;;  %v10095_v35 = vld [vmem:[#allocation2 + $0x970] sm:$0xf0]  ;;  %v12517_v6 = vld [vmem:[#allocation2 + $0xac] sm:$0xf0]  ;;  %v9869_v8 = vld [vmem:[#allocation2 + $0x740] sm:$0xf] }
 0x12b   :  { %3542 = vmatpush.bf16.msra.mxu1 %v10430_v28  ;;  %v13931_v21 = vadd.f32 %v3207_v5, %v3189_v41  ;;  %v9198_v28 = vor.u32 %v12573_v29, %v9197_v24  ;;  %v9086_v5 = vor.u32 %v12545_v48, %v9085_v0  ;;  %v12672_v48 = vld [vmem:[#allocation2 + $0x58c] sm:$0xf] }
 0x12c   :  { %3561 = vmatpush.bf16.msra.mxu2 %v9538_v32  ;;  %v3172_v31 = vadd.f32 %v3171_v14, %v3153_v15  ;;  %v12783_v32 = vld [vmem:[#allocation2 + $0x904] sm:$0xf]  ;;  %v9986_v14 = vor.u32 %v12755_v47, %v9983_v60  ;;  %v12741_v15 = vld [vmem:[#allocation2 + $0x7ac] sm:$0xf0] }
 0x12d   :  { %3580 = vmatpush.bf16.msra.mxu3 %v10434_v45  ;;  %v12531_v45 = vld [vmem:[#allocation2 + $0x124] sm:$0xf]  ;;  %v10098_v46 = vor.u32 %v12783_v32, %v10095_v35  ;;  %v3984_v24 = vmax.f32 %v13931_v21, 0.0  ;;  %v8974_v32 = vor.u32 %v12517_v6, %v8973_v19  ;;  %v12938_v35 = vld [vmem:[#allocation2 + $0xdd4] sm:$0xf0] }
 0x12e   :  { %3524 = vmatpush.bf16.msra.mxu0 %v9422_v20  ;;  %v4011_v37 = vmax.f32 %v3172_v31, 0.0  ;;  %v12769_v20 = vld [vmem:[#allocation2 + $0x88c] sm:$0xf0]  ;;  %v9090_v4 = vor.u32 %v12531_v45, %v9087_v38  ;;  %v10661_v31 = vld [vmem:[#allocation2 + $0xd68] sm:$0xf] }
 0x12f   :  { %3543 = vmatpush.bf16.msra.mxu1 %v10318_v59  ;;  %v9982_v12 = vor.u32 %v12769_v20, %v9981_v52  ;;  %v9655_v52 = vld [vmem:[#allocation2 + $0x5f8] sm:$0xf0]  ;;  %v10662_v47 = vor.u32 %v12938_v35, %v10661_v31  ;;  %v12868_v31 = vld [vmem:[#allocation2 + $0xbac] sm:$0xf] }
 0x130   :  { %3562 = vmatpush.bf16.msra.mxu2 %v9426_v57  ;;  %v13934_v53 = vpack.c.bf16 %v4011_v37, %v3983_v36  ;;  %v3190_v54 = vpop.f32.mrf.mxu2  ;;  %v3209_v57 = vpop.f32.mrf.mxu3  ;;  %v12924_v36 = vld [vmem:[#allocation2 + $0xd6c] sm:$0xf]  ;;  %v10663_v37 = vld [vmem:[#allocation2 + $0xdd8] sm:$0xf0]  ;;  %v9658_v6 = vor.u32 %v12672_v48, %v9655_v52  ;;  %v9429_v52 = vld [vmem:[#allocation2 + $0x3c8] sm:$0xf] }
 0x131   :  { %3581 = vmatpush.bf16.msra.mxu3 %v10322_v62  ;;  %v3191_v61 = vadd.f32 %v3190_v54, %v13925_v55  ;;  %v3155_v59 = vpop.f32.mrf.mxu0  ;;  %v3174_v62 = vpop.f32.mrf.mxu1  ;;  %3458 = vmatmul.bf16.gmra.mxu0 %v13761_v34  ;;  %v10666_v60 = vor.u32 %v12924_v36, %v10663_v37 }
 0x132   :  { %3525 = vmatpush.bf16.msra.mxu0 %v9310_v16  ;;  %v3156_v2 = vadd.f32 %v3155_v59, %v13911_v7  ;;  %v9871_v16 = vld [vmem:[#allocation2 + $0x7b0] sm:$0xf0]  ;;  %3477 = vmatmul.bf16.gmra.mxu1 %v13763_v39  ;;  %v12686_v59 = vld [vmem:[#allocation2 + $0x5f4] sm:$0xf0] }
 0x133   :  { %3544 = vmatpush.bf16.msra.mxu1 %v10206_v22  ;;  %v3210_v41 = vadd.f32 %v3209_v57, %v3191_v61  ;;  %v9767_v22 = vld [vmem:[#allocation2 + $0x6d8] sm:$0xf0]  ;;  %3496 = vmatmul.bf16.gmra.mxu2 %v13761_v34  ;;  %v9653_v61 = vld [vmem:[#allocation2 + $0x588] sm:$0xf] }
 0x134   :  { %3563 = vmatpush.bf16.msra.mxu2 %v9314_v10  ;;  %v12727_v10 = vld [vmem:[#allocation2 + $0x744] sm:$0xf]  ;;  %v13938_v17 = vadd.f32 %v3174_v62, %v3156_v2  ;;  %3515 = vmatmul.bf16.gmra.mxu3 %v13763_v39  ;;  %v10549_v62 = vld [vmem:[#allocation2 + $0xc88] sm:$0xf]  ;;  %v12896_v2 = vld [vmem:[#allocation2 + $0xc8c] sm:$0xf] }
 0x135   :  { %3582 = vmatpush.bf16.msra.mxu3 %v10210_v23  ;;  %v9765_v23 = vld [vmem:[#allocation2 + $0x668] sm:$0xf]  ;;  %v4012_v29 = vmax.f32 %v3210_v41, 0.0  ;;  %v9874_v21 = vor.u32 %v12727_v10, %v9871_v16  ;;  %v12644_v10 = vld [vmem:[#allocation2 + $0x4ac] sm:$0xf] }
 0x136   :  { %3526 = vmatpush.bf16.msra.mxu0 %v9198_v28  ;;  %v9870_v28 = vor.u32 %v12741_v15, %v9869_v8  ;;  %v9766_v0 = vor.u32 %v12714_v30, %v9765_v23  ;;  %v9654_v8 = vor.u32 %v12686_v59, %v9653_v61  ;;  %v9543_v16 = vld [vmem:[#allocation2 + $0x518] sm:$0xf0]  ;;  %v10437_v23 = vld [vmem:[#allocation2 + $0xba8] sm:$0xf]  ;;  %v12882_v30 = vld [vmem:[#allocation2 + $0xc14] sm:$0xf0] }
 0x137   :  { %3545 = vmatpush.bf16.msra.mxu1 %v10094_v25  ;;  %v13947_v25 = vld [vmem:[#allocation4 + $0x8] sm:$0xff] }
 0x138   :  { %3564 = vmatpush.bf16.msra.mxu2 %v9202_v43  ;;  %v13945_v43 = vpack.c.bf16 %v4012_v29, %v3984_v24  ;;  %v3193_v45 = vpop.f32.mrf.mxu2  ;;  %v3212_v38 = vpop.f32.mrf.mxu3  ;;  %v13954_v41 = vperm.slane %v13947_v25, 0 }
 0x139   :  { %3583 = vmatpush.bf16.msra.mxu3 %v10098_v46  ;;  %v9770_v46 = vor.u32 %v12700_v18, %v9767_v22  ;;  %v3194_v54 = vadd.f32 %v3193_v45, %v13925_v55  ;;  %v3157_v57 = vpop.f32.mrf.mxu0  ;;  %v3176_v20 = vpop.f32.mrf.mxu1  ;;  %v9541_v18 = vld [vmem:[#allocation2 + $0x4a8] sm:$0xf]  ;;  %v12658_v22 = vld [vmem:[#allocation2 + $0x514] sm:$0xf0]  ;;  %v12616_v45 = vld [vmem:[#allocation2 + $0x3cc] sm:$0xf] }
 0x13a   :  { %3527 = vmatpush.bf16.msra.mxu0 %v9086_v5  ;;  %v3158_v63 = vadd.f32 %v3157_v57, %v13911_v7  ;;  %v10550_v7 = vor.u32 %v12910_v1, %v10549_v62  ;;  %v10325_v57 = vld [vmem:[#allocation2 + $0xac8] sm:$0xf]  ;;  %v13969_v62 = vperm.slane %v13947_v25, 1 }
 0x13b   :  { %3546 = vmatpush.bf16.msra.mxu1 %v9982_v12  ;;  %v13951_v5 = vadd.f32 %v3212_v38, %v3194_v54  ;;  %v9431_v38 = vld [vmem:[#allocation2 + $0x438] sm:$0xf0]  ;;  %v12630_v54 = vld [vmem:[#allocation2 + $0x434] sm:$0xf0] }
 0x13c   :  { %3565 = vmatpush.bf16.msra.mxu2 %v9090_v4  ;;  %v10551_v4 = vld [vmem:[#allocation2 + $0xcf8] sm:$0xf0]  ;;  %v3177_v19 = vadd.f32 %v3176_v20, %v3158_v63  ;;  %v9434_v63 = vor.u32 %v12616_v45, %v9431_v38  ;;  %v9430_v1 = vor.u32 %v12630_v54, %v9429_v52  ;;  %v10101_v45 = vld [vmem:[#allocation2 + $0x908] sm:$0xf] }
 0x13d   :  { %3584 = vmatpush.bf16.msra.mxu3 %v9986_v14  ;;  %v10554_v12 = vor.u32 %v12896_v2, %v10551_v4  ;;  %v4039_v14 = vmax.f32 %v13938_v17, 0.0  ;;  %v4040_v61 = vmax.f32 %v13951_v5, 0.0  ;;  %v12588_v2 = vld [vmem:[#allocation2 + $0x2ec] sm:$0xf]  ;;  %v9319_v4 = vld [vmem:[#allocation2 + $0x358] sm:$0xf0] }
 0x13e   :  { %3528 = vmatpush.bf16.msra.mxu0 %v8974_v32  ;;  %v4067_v15 = vmax.f32 %v3177_v19, 0.0  ;;  %v12602_v5 = vld [vmem:[#allocation2 + $0x354] sm:$0xf0] }
 0x13f   :  { %3547 = vmatpush.bf16.msra.mxu1 %v9870_v28  ;;  %v9546_v28 = vor.u32 %v12644_v10, %v9543_v16  ;;  %v12826_v10 = vld [vmem:[#allocation2 + $0xa54] sm:$0xf0]  ;;  %v12812_v16 = vld [vmem:[#allocation2 + $0x9ec] sm:$0xf] }
 0x140   :  { %3566 = vmatpush.bf16.msra.mxu2 %v8978_v51  ;;  %v3195_v24 = vpop.f32.mrf.mxu2  ;;  %v3214_v29 = vpop.f32.mrf.mxu3  ;;  %v10439_v51 = vld [vmem:[#allocation2 + $0xc18] sm:$0xf0]  ;;  %v13957_v32 = vpack.c.bf16 %v4067_v15, %v4039_v14 }
 0x141   :  { %3585 = vmatpush.bf16.msra.mxu3 %v9874_v21  ;;  %v3196_v35 = vadd.f32 %v3195_v24, %v13925_v55  ;;  %v3226_v36 = vpop.f32.mrf.mxu0  ;;  %v3245_v37 = vpop.f32.mrf.mxu1  ;;  %v9542_v21 = vor.u32 %v12658_v22, %v9541_v18  ;;  %v10442_v48 = vor.u32 %v12868_v31, %v10439_v51  ;;  %3529 = vmatmul.bf16.vlgmr.msra.gmra.mxu0 %v13741_v44  ;;  %v12854_v55 = vld [vmem:[#allocation2 + $0xb34] sm:$0xf0]  ;;  %v10215_v18 = vld [vmem:[#allocation2 + $0xa58] sm:$0xf0]  ;;  %v12560_v51 = vld [vmem:[#allocation2 + $0x20c] sm:$0xf] }
 0x142   :  { %3597 = vmatpush.bf16.msrb.mxu0 %v9766_v0  ;;  %v3227_v17 = vadd.f32 %v3226_v36, %v13954_v41  ;;  %v10438_v0 = vor.u32 %v12882_v30, %v10437_v23  ;;  %3548 = vmatmul.bf16.vlgmr.msra.gmra.mxu1 %v13743_v49  ;;  %v10326_v19 = vor.u32 %v12854_v55, %v10325_v57 }
 0x143   :  { %3616 = vmatpush.bf16.msrb.mxu1 %v10662_v47  ;;  %v12840_v47 = vld [vmem:[#allocation2 + $0xacc] sm:$0xf]  ;;  %3567 = vmatmul.bf16.vlgmr.msra.gmra.mxu2 %v13741_v44  ;;  %v9322_v30 = vor.u32 %v12588_v2, %v9319_v4  ;;  %v9989_v2 = vld [vmem:[#allocation2 + $0x828] sm:$0xf] }
 0x144   :  { %3635 = vmatpush.bf16.msrb.mxu2 %v9770_v46  ;;  %v3215_v46 = vadd.f32 %v3214_v29, %v3196_v35  ;;  %v13961_v20 = vadd.f32 %v3245_v37, %v3227_v17  ;;  %3586 = vmatmul.bf16.vlgmr.msra.gmra.mxu3 %v13743_v49  ;;  %v9207_v35 = vld [vmem:[#allocation2 + $0x278] sm:$0xf0]  ;;  %v10218_v17 = vor.u32 %v12812_v16, %v10215_v18 }
 0x145   :  { %3654 = vmatpush.bf16.msrb.mxu3 %v10666_v60  ;;  %v10327_v60 = vld [vmem:[#allocation2 + $0xb38] sm:$0xf0]  ;;  %v9210_v57 = vor.u32 %v12560_v51, %v9207_v35 }
 0x146   :  { %3598 = vmatpush.bf16.msrb.mxu0 %v9654_v8  ;;  %v4068_v59 = vmax.f32 %v3215_v46, 0.0  ;;  %v9317_v8 = vld [vmem:[#allocation2 + $0x2e8] sm:$0xf]  ;;  %v12798_v46 = vld [vmem:[#allocation2 + $0x974] sm:$0xf0]  ;;  %v3985_v52 = vmax.f32 %v13961_v20, 0.0 }
 0x147   :  { %3617 = vmatpush.bf16.msrb.mxu1 %v10550_v7  ;;  %v10213_v7 = vld [vmem:[#allocation2 + $0x9e8] sm:$0xf]  ;;  %v9318_v31 = vor.u32 %v12602_v5, %v9317_v8  ;;  %v12770_v8 = vld [vmem:[#allocation2 + $0x894] sm:$0xf0]  ;;  %v12756_v20 = vld [vmem:[#allocation2 + $0x82c] sm:$0xf] }
 0x148   :  { %3636 = vmatpush.bf16.msrb.mxu2 %v9658_v6  ;;  %v10330_v6 = vor.u32 %v12840_v47, %v10327_v60  ;;  %v3264_v14 = vpop.f32.mrf.mxu2  ;;  %v3283_v15 = vpop.f32.mrf.mxu3  ;;  %v10214_v37 = vor.u32 %v12826_v10, %v10213_v7  ;;  %v12532_v47 = vld [vmem:[#allocation2 + $0x12c] sm:$0xf]  ;;  %v9095_v60 = vld [vmem:[#allocation2 + $0x198] sm:$0xf0]  ;;  %v9990_v51 = vor.u32 %v12770_v8, %v9989_v2  ;;  %v12673_v8 = vld [vmem:[#allocation2 + $0x594] sm:$0xf] }
 0x149   :  { %3655 = vmatpush.bf16.msrb.mxu3 %v10554_v12  ;;  %v13971_v12 = vpack.c.bf16 %v4068_v59, %v4040_v61  ;;  %v3265_v22 = vadd.f32 %v3264_v14, %v13969_v62  ;;  %v3228_v23 = vpop.f32.mrf.mxu0  ;;  %v3247_v24 = vpop.f32.mrf.mxu1  ;;  %v10102_v61 = vor.u32 %v12798_v46, %v10101_v45  ;;  %v9991_v5 = vld [vmem:[#allocation2 + $0x898] sm:$0xf0]  ;;  %v12504_v10 = vld [vmem:[#allocation2 + $0x4c] sm:$0xf]  ;;  %v12701_v45 = vld [vmem:[#allocation2 + $0x674] sm:$0xf] }
 0x14a   :  { %3599 = vmatpush.bf16.msrb.mxu0 %v9542_v21  ;;  %v3229_v29 = vadd.f32 %v3228_v23, %v13954_v41  ;;  %v12574_v21 = vld [vmem:[#allocation2 + $0x274] sm:$0xf0]  ;;  %v8983_v16 = vld [vmem:[#allocation2 + $0xb8] sm:$0xf0]  ;;  %v9994_v35 = vor.u32 %v12756_v20, %v9991_v5  ;;  %v9773_v46 = vld [vmem:[#allocation2 + $0x670] sm:$0xf] }
 0x14b   :  { %3618 = vmatpush.bf16.msrb.mxu1 %v10438_v0  ;;  %v13975_v36 = vadd.f32 %v3283_v15, %v3265_v22  ;;  %v12784_v0 = vld [vmem:[#allocation2 + $0x90c] sm:$0xf]  ;;  %v9098_v22 = vor.u32 %v12532_v47, %v9095_v60  ;;  %v12939_v47 = vld [vmem:[#allocation2 + $0xddc] sm:$0xf0]  ;;  %v12925_v60 = vld [vmem:[#allocation2 + $0xd74] sm:$0xf] }
 0x14c   :  { %3637 = vmatpush.bf16.msrb.mxu2 %v9546_v28  ;;  %v9205_v28 = vld [vmem:[#allocation2 + $0x208] sm:$0xf]  ;;  %v3248_v38 = vadd.f32 %v3247_v24, %v3229_v29  ;;  %v12518_v29 = vld [vmem:[#allocation2 + $0xb4] sm:$0xf0]  ;;  %v9663_v20 = vld [vmem:[#allocation2 + $0x600] sm:$0xf0] }
 0x14d   :  { %3656 = vmatpush.bf16.msrb.mxu3 %v10442_v48  ;;  %v10103_v48 = vld [vmem:[#allocation2 + $0x978] sm:$0xf0]  ;;  %v9206_v55 = vor.u32 %v12574_v21, %v9205_v28  ;;  %v8981_v24 = vld [vmem:[#allocation2 + $0x48] sm:$0xf] }
 0x14e   :  { %3600 = vmatpush.bf16.msrb.mxu0 %v9430_v1  ;;  %v4013_v54 = vmax.f32 %v3248_v38, 0.0  ;;  %v10106_v59 = vor.u32 %v12784_v0, %v10103_v48  ;;  %v12546_v1 = vld [vmem:[#allocation2 + $0x194] sm:$0xf0]  ;;  %v9879_v28 = vld [vmem:[#allocation2 + $0x7b8] sm:$0xf0]  ;;  %v3986_v0 = vmax.f32 %v13975_v36, 0.0 }
 0x14f   :  { %3619 = vmatpush.bf16.msrb.mxu1 %v10326_v19  ;;  %v9775_v38 = vld [vmem:[#allocation2 + $0x6e0] sm:$0xf0] }
 0x150   :  { %3638 = vmatpush.bf16.msrb.mxu2 %v9434_v63  ;;  %v9093_v63 = vld [vmem:[#allocation2 + $0x128] sm:$0xf]  ;;  %v13978_v4 = vpack.c.bf16 %v4013_v54, %v3985_v52  ;;  %v3266_v19 = vpop.f32.mrf.mxu2  ;;  %v12715_v52 = vld [vmem:[#allocation2 + $0x6dc] sm:$0xf0]  ;;  %v10669_v54 = vld [vmem:[#allocation2 + $0xd70] sm:$0xf] }
 0x151   :  { %3657 = vmatpush.bf16.msrb.mxu3 %v10330_v6  ;;  %v3285_v6 = vpop.f32.mrf.mxu3  ;;  %v3267_v7 = vadd.f32 %v3266_v19, %v13969_v62  ;;  %v3231_v14 = vpop.f32.mrf.mxu0  ;;  %v9094_v23 = vor.u32 %v12546_v1, %v9093_v63  ;;  %3534 = vmatmul.bf16.gmra.mxu0 %v13761_v34  ;;  %v9778_v19 = vor.u32 %v12701_v45, %v9775_v38 }
 0x152   :  { %3601 = vmatpush.bf16.msrb.mxu0 %v9318_v31  ;;  %14706 = vst [vmem:[#allocation17_spill] sm:$0xff] %v13978_v4  ;;  %v3250_v15 = vpop.f32.mrf.mxu1  ;;  %v3232_v18 = vadd.f32 %v3231_v14, %v13954_v41  ;;  %3553 = vmatmul.bf16.gmra.mxu1 %v13763_v39 }
 0x153   :  { %3620 = vmatpush.bf16.msrb.mxu1 %v10214_v37  ;;  %v3286_v31 = vadd.f32 %v3285_v6, %v3267_v7  ;;  %v12742_v37 = vld [vmem:[#allocation2 + $0x7b4] sm:$0xf0]  ;;  %3572 = vmatmul.bf16.gmra.mxu2 %v13761_v34  ;;  %v9774_v6 = vor.u32 %v12715_v52, %v9773_v46  ;;  %v12645_v46 = vld [vmem:[#allocation2 + $0x4b4] sm:$0xf]  ;;  %v12659_v52 = vld [vmem:[#allocation2 + $0x51c] sm:$0xf0] }
 0x154   :  { %3639 = vmatpush.bf16.msrb.mxu2 %v9322_v30  ;;  %v9877_v30 = vld [vmem:[#allocation2 + $0x748] sm:$0xf]  ;;  %v13982_v21 = vadd.f32 %v3250_v15, %v3232_v18  ;;  %3591 = vmatmul.bf16.gmra.mxu3 %v13763_v39  ;;  %v10670_v15 = vor.u32 %v12939_v47, %v10669_v54  ;;  %v12687_v18 = vld [vmem:[#allocation2 + $0x5fc] sm:$0xf0]  ;;  %v10445_v54 = vld [vmem:[#allocation2 + $0xbb0] sm:$0xf] }
 0x155   :  { %3658 = vmatpush.bf16.msrb.mxu3 %v10218_v17  ;;  %v12728_v17 = vld [vmem:[#allocation2 + $0x74c] sm:$0xf]  ;;  %v4014_v48 = vmax.f32 %v3286_v31, 0.0  ;;  %v9878_v63 = vor.u32 %v12742_v37, %v9877_v30  ;;  %v10559_v30 = vld [vmem:[#allocation2 + $0xd00] sm:$0xf0] }
 0x156   :  { %3602 = vmatpush.bf16.msrb.mxu0 %v9206_v55  ;;  %v8982_v55 = vor.u32 %v12518_v29, %v8981_v24  ;;  %v9882_v36 = vor.u32 %v12728_v17, %v9879_v28  ;;  %v12911_v24 = vld [vmem:[#allocation2 + $0xcfc] sm:$0xf0]  ;;  %v12897_v29 = vld [vmem:[#allocation2 + $0xc94] sm:$0xf]  ;;  %v13996_v17 = vperm.slane %v13947_v25, 2  ;;  %v4041_v45 = vmax.f32 %v13982_v21, 0.0 }
 0x157   :  { %3621 = vmatpush.bf16.msrb.mxu1 %v10102_v61  ;;  %v10671_v61 = vld [vmem:[#allocation2 + $0xde0] sm:$0xf0]  ;;  %v10562_v28 = vor.u32 %v12897_v29, %v10559_v30  ;;  %v12883_v47 = vld [vmem:[#allocation2 + $0xc1c] sm:$0xf0]  ;;  %v14011_v30 = vperm.slane %v13947_v25, 3 }
 0x158   :  { %3640 = vmatpush.bf16.msrb.mxu2 %v9210_v57  ;;  %v8986_v57 = vor.u32 %v12504_v10, %v8983_v16  ;;  %v3269_v1 = vpop.f32.mrf.mxu2  ;;  %v10674_v10 = vor.u32 %v12925_v60, %v10671_v61  ;;  %v9661_v16 = vld [vmem:[#allocation2 + $0x590] sm:$0xf]  ;;  %v12869_v60 = vld [vmem:[#allocation2 + $0xbb4] sm:$0xf]  ;;  %v10447_v61 = vld [vmem:[#allocation2 + $0xc20] sm:$0xf0] }
 0x159   :  { %3659 = vmatpush.bf16.msrb.mxu3 %v10106_v59  ;;  %v13989_v59 = vpack.c.bf16 %v4014_v48, %v3986_v0  ;;  %v3288_v2 = vpop.f32.mrf.mxu3  ;;  %v3270_v5 = vadd.f32 %v3269_v1, %v13969_v62  ;;  %v3233_v7 = vpop.f32.mrf.mxu0  ;;  %v9662_v37 = vor.u32 %v12687_v18, %v9661_v16  ;;  %v9551_v0 = vld [vmem:[#allocation2 + $0x520] sm:$0xf0]  ;;  %v9549_v48 = vld [vmem:[#allocation2 + $0x4b0] sm:$0xf] }
 0x15a   :  { %3603 = vmatpush.bf16.msrb.mxu0 %v9094_v23  ;;  %v3252_v14 = vpop.f32.mrf.mxu1  ;;  %v3234_v23 = vadd.f32 %v3233_v7, %v13954_v41  ;;  %v10446_v7 = vor.u32 %v12883_v47, %v10445_v54  ;;  %v10333_v16 = vld [vmem:[#allocation2 + $0xad0] sm:$0xf]  ;;  %v12827_v54 = vld [vmem:[#allocation2 + $0xa5c] sm:$0xf0] }
 0x15b   :  { %14707 = vst [vmem:[#allocation18_spill] sm:$0xff] %v13989_v59  ;;  %3622 = vmatpush.bf16.msrb.mxu1 %v9990_v51  ;;  %v13993_v31 = vadd.f32 %v3288_v2, %v3270_v5 }
 0x15c   :  { %3641 = vmatpush.bf16.msrb.mxu2 %v9098_v22  ;;  %v10557_v22 = vld [vmem:[#allocation2 + $0xc90] sm:$0xf]  ;;  %v3253_v51 = vadd.f32 %v3252_v14, %v3234_v23  ;;  %v10450_v14 = vor.u32 %v12869_v60, %v10447_v61  ;;  %v10335_v23 = vld [vmem:[#allocation2 + $0xb40] sm:$0xf0] }
 0x15d   :  { %3660 = vmatpush.bf16.msrb.mxu3 %v9994_v35  ;;  %v9666_v35 = vor.u32 %v12673_v8, %v9663_v20  ;;  %v10558_v41 = vor.u32 %v12911_v24, %v10557_v22  ;;  %v12617_v8 = vld [vmem:[#allocation2 + $0x3d4] sm:$0xf]  ;;  %v9439_v20 = vld [vmem:[#allocation2 + $0x440] sm:$0xf0]  ;;  %v4042_v24 = vmax.f32 %v13993_v31, 0.0 }
 0x15e   :  { %3604 = vmatpush.bf16.msrb.mxu0 %v8982_v55  ;;  %v4069_v38 = vmax.f32 %v3253_v51, 0.0  ;;  %v12841_v22 = vld [vmem:[#allocation2 + $0xad4] sm:$0xf]  ;;  %v9442_v51 = vor.u32 %v12617_v8, %v9439_v20  ;;  %v12603_v31 = vld [vmem:[#allocation2 + $0x35c] sm:$0xf0] }
 0x15f   :  { %3623 = vmatpush.bf16.msrb.mxu1 %v9878_v63 }
 0x160   :  { %3642 = vmatpush.bf16.msrb.mxu2 %v8986_v57  ;;  %v3271_v57 = vpop.f32.mrf.mxu2  ;;  %v13999_v63 = vpack.c.bf16 %v4069_v38, %v4041_v45  ;;  %v10338_v45 = vor.u32 %v12841_v22, %v10335_v23  ;;  %v9325_v38 = vld [vmem:[#allocation2 + $0x2f0] sm:$0xf] }
 0x161   :  { %3661 = vmatpush.bf16.msrb.mxu3 %v9882_v36  ;;  %v3290_v55 = vpop.f32.mrf.mxu3  ;;  %v3272_v36 = vadd.f32 %v3271_v57, %v13969_v62  ;;  %v3302_v1 = vpop.f32.mrf.mxu0  ;;  %3605 = vmatmul.bf16.vlgmr.msrb.gmra.mxu0 %v13741_v44  ;;  %v12855_v62 = vld [vmem:[#allocation2 + $0xb3c] sm:$0xf0]  ;;  %v12813_v57 = vld [vmem:[#allocation2 + $0x9f4] sm:$0xf] }
 0x162   :  { %3673 = vmatpush.bf16.msra.mxu0 %v9774_v6  ;;  %14708 = vst [vmem:[#allocation19_spill] sm:$0xff] %v13999_v63  ;;  %v3321_v2 = vpop.f32.mrf.mxu1  ;;  %v3303_v21 = vadd.f32 %v3302_v1, %v13996_v17  ;;  %v9550_v6 = vor.u32 %v12659_v52, %v9549_v48  ;;  %3624 = vmatmul.bf16.vlgmr.msrb.gmra.mxu1 %v13743_v49 }
 0x163   :  { %3692 = vmatpush.bf16.msra.mxu1 %v10670_v15  ;;  %v3291_v5 = vadd.f32 %v3290_v55, %v3272_v36  ;;  %v9437_v15 = vld [vmem:[#allocation2 + $0x3d0] sm:$0xf]  ;;  %3643 = vmatmul.bf16.vlgmr.msrb.gmra.mxu2 %v13741_v44  ;;  %v10223_v55 = vld [vmem:[#allocation2 + $0xa60] sm:$0xf0] }
 0x164   :  { %3711 = vmatpush.bf16.msra.mxu2 %v9778_v19  ;;  %v9554_v19 = vor.u32 %v12645_v46, %v9551_v0  ;;  %v14003_v18 = vadd.f32 %v3321_v2, %v3303_v21  ;;  %3662 = vmatmul.bf16.vlgmr.msrb.gmra.mxu3 %v13743_v49  ;;  %v10221_v46 = vld [vmem:[#allocation2 + $0x9f0] sm:$0xf]  ;;  %v9326_v2 = vor.u32 %v12603_v31, %v9325_v38  ;;  %v12561_v21 = vld [vmem:[#allocation2 + $0x214] sm:$0xf] }
 0x165   :  { %3730 = vmatpush.bf16.msra.mxu3 %v10674_v10  ;;  %v12631_v10 = vld [vmem:[#allocation2 + $0x43c] sm:$0xf0]  ;;  %v4070_v29 = vmax.f32 %v3291_v5, 0.0  ;;  %v10222_v8 = vor.u32 %v12827_v54, %v10221_v46  ;;  %v10226_v20 = vor.u32 %v12813_v57, %v10223_v55  ;;  %v9213_v5 = vld [vmem:[#allocation2 + $0x210] sm:$0xf] }
 0x166   :  { %3674 = vmatpush.bf16.msra.mxu0 %v9662_v37  ;;  %v12589_v37 = vld [vmem:[#allocation2 + $0x2f4] sm:$0xf]  ;;  %v3987_v22 = vmax.f32 %v14003_v18, 0.0  ;;  %v9997_v38 = vld [vmem:[#allocation2 + $0x830] sm:$0xf] }
 0x167   :  { %3693 = vmatpush.bf16.msra.mxu1 %v10558_v41  ;;  %v9327_v41 = vld [vmem:[#allocation2 + $0x360] sm:$0xf0]  ;;  %v14013_v0 = vpack.c.bf16 %v4070_v29, %v4042_v24  ;;  %v12757_v18 = vld [vmem:[#allocation2 + $0x834] sm:$0xf] }
 0x168   :  { %3712 = vmatpush.bf16.msra.mxu2 %v9666_v35  ;;  %v9438_v35 = vor.u32 %v12631_v10, %v9437_v15  ;;  %v3340_v48 = vpop.f32.mrf.mxu2  ;;  %v9330_v1 = vor.u32 %v12589_v37, %v9327_v41  ;;  %v12799_v10 = vld [vmem:[#allocation2 + $0x97c] sm:$0xf0]  ;;  %v9999_v54 = vld [vmem:[#allocation2 + $0x8a0] sm:$0xf0] }
 0x169   :  { %3731 = vmatpush.bf16.msra.mxu3 %v10562_v28  ;;  %v10334_v28 = vor.u32 %v12855_v62, %v10333_v16  ;;  %14709 = vst [vmem:[#allocation20_spill] sm:$0xff] %v14013_v0  ;;  %v3359_v52 = vpop.f32.mrf.mxu3  ;;  %v3341_v47 = vadd.f32 %v3340_v48, %v14011_v30  ;;  %v3304_v60 = vpop.f32.mrf.mxu0  ;;  %v12785_v16 = vld [vmem:[#allocation2 + $0x914] sm:$0xf]  ;;  %v10111_v62 = vld [vmem:[#allocation2 + $0x980] sm:$0xf0] }
 0x16a   :  { %3675 = vmatpush.bf16.msra.mxu0 %v9550_v6  ;;  %v3323_v61 = vpop.f32.mrf.mxu1  ;;  %v3305_v36 = vadd.f32 %v3304_v60, %v13996_v17  ;;  %v10114_v41 = vor.u32 %v12785_v16, %v10111_v62  ;;  %v12505_v60 = vld [vmem:[#allocation2 + $0x54] sm:$0xf]  ;;  %v12702_v62 = vld [vmem:[#allocation2 + $0x67c] sm:$0xf] }
 0x16b   :  { %3694 = vmatpush.bf16.msra.mxu1 %v10446_v7  ;;  %v14017_v6 = vadd.f32 %v3359_v52, %v3341_v47  ;;  %v12575_v7 = vld [vmem:[#allocation2 + $0x27c] sm:$0xf0] }
 0x16c   :  { %3713 = vmatpush.bf16.msra.mxu2 %v9554_v19  ;;  %v9215_v19 = vld [vmem:[#allocation2 + $0x280] sm:$0xf0]  ;;  %v3324_v15 = vadd.f32 %v3323_v61, %v3305_v36  ;;  %v9214_v29 = vor.u32 %v12575_v7, %v9213_v5  ;;  %v12771_v52 = vld [vmem:[#allocation2 + $0x89c] sm:$0xf0]  ;;  %v10002_v7 = vor.u32 %v12757_v18, %v9999_v54 }
 0x16d   :  { %3732 = vmatpush.bf16.msra.mxu3 %v10450_v14  ;;  %v10109_v14 = vld [vmem:[#allocation2 + $0x910] sm:$0xf]  ;;  %v9218_v24 = vor.u32 %v12561_v21, %v9215_v19  ;;  %v8991_v61 = vld [vmem:[#allocation2 + $0xc0] sm:$0xf0]  ;;  %v12519_v19 = vld [vmem:[#allocation2 + $0xbc] sm:$0xf0]  ;;  %v9998_v5 = vor.u32 %v12771_v52, %v9997_v38 }
 0x16e   :  { %3676 = vmatpush.bf16.msra.mxu0 %v9438_v35  ;;  %v4015_v23 = vmax.f32 %v3324_v15, 0.0  ;;  %v9103_v35 = vld [vmem:[#allocation2 + $0x1a0] sm:$0xf0]  ;;  %v10110_v37 = vor.u32 %v12799_v10, %v10109_v14  ;;  %v8989_v21 = vld [vmem:[#allocation2 + $0x50] sm:$0xf] }
 0x16f   :  { %3695 = vmatpush.bf16.msra.mxu1 %v10334_v28  ;;  %v9101_v28 = vld [vmem:[#allocation2 + $0x130] sm:$0xf]  ;;  %v12743_v14 = vld [vmem:[#allocation2 + $0x7bc] sm:$0xf0]  ;;  %v12729_v15 = vld [vmem:[#allocation2 + $0x754] sm:$0xf] }
 0x170   :  { %3714 = vmatpush.bf16.msra.mxu2 %v9442_v51  ;;  %v12533_v51 = vld [vmem:[#allocation2 + $0x134] sm:$0xf]  ;;  %v14020_v31 = vpack.c.bf16 %v4015_v23, %v3987_v22  ;;  %v3342_v46 = vpop.f32.mrf.mxu2  ;;  %v9887_v10 = vld [vmem:[#allocation2 + $0x7c0] sm:$0xf0]  ;;  %v9783_v22 = vld [vmem:[#allocation2 + $0x6e8] sm:$0xf0] }
 0x171   :  { %3733 = vmatpush.bf16.msra.mxu3 %v10338_v45  ;;  %v12547_v45 = vld [vmem:[#allocation2 + $0x19c] sm:$0xf0]  ;;  %v3361_v48 = vpop.f32.mrf.mxu3  ;;  %v3343_v57 = vadd.f32 %v3342_v46, %v14011_v30  ;;  %v3307_v55 = vpop.f32.mrf.mxu0  ;;  %3610 = vmatmul.bf16.gmra.mxu0 %v13761_v34  ;;  %v9781_v23 = vld [vmem:[#allocation2 + $0x678] sm:$0xf]  ;;  %v10679_v38 = vld [vmem:[#allocation2 + $0xde8] sm:$0xf0]  ;;  %v9786_v54 = vor.u32 %v12702_v62, %v9783_v22 }
 0x172   :  { %3677 = vmatpush.bf16.msra.mxu0 %v9326_v2  ;;  %14710 = vst [vmem:[#allocation21_spill] sm:$0xff] %v14020_v31  ;;  %v3326_v47 = vpop.f32.mrf.mxu1  ;;  %v3308_v36 = vadd.f32 %v3307_v55, %v13996_v17  ;;  %v9102_v2 = vor.u32 %v12547_v45, %v9101_v28  ;;  %3629 = vmatmul.bf16.gmra.mxu1 %v13763_v39  ;;  %v12940_v28 = vld [vmem:[#allocation2 + $0xde4] sm:$0xf0]  ;;  %v12926_v45 = vld [vmem:[#allocation2 + $0xd7c] sm:$0xf] }
 0x173   :  { %3696 = vmatpush.bf16.msra.mxu1 %v10222_v8  ;;  %v9885_v8 = vld [vmem:[#allocation2 + $0x750] sm:$0xf]  ;;  %3648 = vmatmul.bf16.gmra.mxu2 %v13761_v34  ;;  %v12674_v55 = vld [vmem:[#allocation2 + $0x59c] sm:$0xf] }
 0x174   :  { %3715 = vmatpush.bf16.msra.mxu2 %v9330_v1  ;;  %v9106_v1 = vor.u32 %v12533_v51, %v9103_v35  ;;  %v14024_v16 = vadd.f32 %v3326_v47, %v3308_v36  ;;  %3667 = vmatmul.bf16.gmra.mxu3 %v13763_v39  ;;  %v12716_v51 = vld [vmem:[#allocation2 + $0x6e4] sm:$0xf0]  ;;  %v10677_v35 = vld [vmem:[#allocation2 + $0xd78] sm:$0xf]  ;;  %v9671_v47 = vld [vmem:[#allocation2 + $0x608] sm:$0xf0] }
 0x175   :  { %3734 = vmatpush.bf16.msra.mxu3 %v10226_v20  ;;  %v3362_v20 = vadd.f32 %v3361_v48, %v3343_v57  ;;  %v9886_v48 = vor.u32 %v12743_v14, %v9885_v8  ;;  %v9782_v57 = vor.u32 %v12716_v51, %v9781_v23  ;;  %v12912_v8 = vld [vmem:[#allocation2 + $0xd04] sm:$0xf0]  ;;  %v10567_v14 = vld [vmem:[#allocation2 + $0xd08] sm:$0xf0]  ;;  %v9674_v62 = vor.u32 %v12674_v55, %v9671_v47 }
 0x176   :  { %3678 = vmatpush.bf16.msra.mxu0 %v9214_v29  ;;  %v14038_v23 = vperm.slane %v13947_v25, 4 }
 0x177   :  { %3697 = vmatpush.bf16.msra.mxu1 %v10110_v37  ;;  %v4016_v29 = vmax.f32 %v3362_v20, 0.0  ;;  %v8994_v37 = vor.u32 %v12505_v60, %v8991_v61  ;;  %v10678_v61 = vor.u32 %v12940_v28, %v10677_v35  ;;  %v10565_v20 = vld [vmem:[#allocation2 + $0xc98] sm:$0xf]  ;;  %v12646_v35 = vld [vmem:[#allocation2 + $0x4bc] sm:$0xf] }
 0x178   :  { %3716 = vmatpush.bf16.msra.mxu2 %v9218_v24  ;;  %v3988_v24 = vmax.f32 %v14017_v6, 0.0  ;;  %v9890_v6 = vor.u32 %v12729_v15, %v9887_v10  ;;  %v3345_v52 = vpop.f32.mrf.mxu2  ;;  %v12660_v28 = vld [vmem:[#allocation2 + $0x524] sm:$0xf0] }
 0x179   :  { %3735 = vmatpush.bf16.msra.mxu3 %v10114_v41  ;;  %v8990_v41 = vor.u32 %v12519_v19, %v8989_v21  ;;  %v3364_v18 = vpop.f32.mrf.mxu3  ;;  %v3346_v36 = vadd.f32 %v3345_v52, %v14011_v30  ;;  %v9669_v21 = vld [vmem:[#allocation2 + $0x598] sm:$0xf]  ;;  %v12688_v19 = vld [vmem:[#allocation2 + $0x604] sm:$0xf0]  ;;  %v12870_v52 = vld [vmem:[#allocation2 + $0xbbc] sm:$0xf] }
 0x17a   :  { %3679 = vmatpush.bf16.msra.mxu0 %v9102_v2  ;;  %v14031_v46 = vpack.c.bf16 %v4016_v29, %v3988_v24  ;;  %v3328_v60 = vpop.f32.mrf.mxu1  ;;  %v10682_v2 = vor.u32 %v12926_v45, %v10679_v38  ;;  %v9670_v22 = vor.u32 %v12688_v19, %v9669_v21  ;;  %v4043_v29 = vmax.f32 %v14024_v16, 0.0  ;;  %v10453_v45 = vld [vmem:[#allocation2 + $0xbb8] sm:$0xf] }
 0x17b   :  { %3698 = vmatpush.bf16.msra.mxu1 %v9998_v5  ;;  %v14035_v15 = vadd.f32 %v3364_v18, %v3346_v36  ;;  %v10455_v18 = vld [vmem:[#allocation2 + $0xc28] sm:$0xf0] }
 0x17c   :  { %3717 = vmatpush.bf16.msra.mxu2 %v9106_v1  ;;  %14711 = vst [vmem:[#allocation22_spill] sm:$0xff] %v14031_v46  ;;  %v3309_v1 = vpop.f32.mrf.mxu0  ;;  %v10458_v19 = vor.u32 %v12870_v52, %v10455_v18  ;;  %v12828_v52 = vld [vmem:[#allocation2 + $0xa64] sm:$0xf0]  ;;  %v10231_v18 = vld [vmem:[#allocation2 + $0xa68] sm:$0xf0] }
 0x17d   :  { %3736 = vmatpush.bf16.msra.mxu3 %v10002_v7  ;;  %v3310_v5 = vadd.f32 %v3309_v1, %v13996_v17  ;;  %v12898_v7 = vld [vmem:[#allocation2 + $0xc9c] sm:$0xf]  ;;  %v10566_v17 = vor.u32 %v12912_v8, %v10565_v20  ;;  %v9445_v20 = vld [vmem:[#allocation2 + $0x3d8] sm:$0xf] }
 0x17e   :  { %3680 = vmatpush.bf16.msra.mxu0 %v8990_v41  ;;  %v10570_v24 = vor.u32 %v12898_v7, %v10567_v14  ;;  %v9557_v41 = vld [vmem:[#allocation2 + $0x4b8] sm:$0xf]  ;;  %v12842_v14 = vld [vmem:[#allocation2 + $0xadc] sm:$0xf] }
 0x17f   :  { %3699 = vmatpush.bf16.msra.mxu1 %v9886_v48  ;;  %v3329_v10 = vadd.f32 %v3328_v60, %v3310_v5  ;;  %v9558_v1 = vor.u32 %v12660_v28, %v9557_v41  ;;  %v12618_v60 = vld [vmem:[#allocation2 + $0x3dc] sm:$0xf]  ;;  %v12632_v5 = vld [vmem:[#allocation2 + $0x444] sm:$0xf0]  ;;  %v10341_v8 = vld [vmem:[#allocation2 + $0xad8] sm:$0xf] }
 0x180   :  { %3718 = vmatpush.bf16.msra.mxu2 %v8994_v37  ;;  %v9559_v37 = vld [vmem:[#allocation2 + $0x528] sm:$0xf0]  ;;  %v3347_v38 = vpop.f32.mrf.mxu2  ;;  %v9333_v28 = vld [vmem:[#allocation2 + $0x2f8] sm:$0xf] }
 0x181   :  { %3737 = vmatpush.bf16.msra.mxu3 %v9890_v6  ;;  %v4071_v51 = vmax.f32 %v3329_v10, 0.0  ;;  %v3366_v48 = vpop.f32.mrf.mxu3  ;;  %v12884_v6 = vld [vmem:[#allocation2 + $0xc24] sm:$0xf0]  ;;  %v9562_v36 = vor.u32 %v12646_v35, %v9559_v37  ;;  %3681 = vmatmul.bf16.vlgmr.msra.gmra.mxu0 %v13741_v44  ;;  %v10343_v10 = vld [vmem:[#allocation2 + $0xb48] sm:$0xf0] }
 0x182   :  { %3749 = vmatpush.bf16.msrb.mxu0 %v9782_v57  ;;  %v3348_v57 = vadd.f32 %v3347_v38, %v14011_v30  ;;  %v3397_v47 = vpop.f32.mrf.mxu1  ;;  %v10454_v21 = vor.u32 %v12884_v6, %v10453_v45  ;;  %3700 = vmatmul.bf16.vlgmr.msra.gmra.mxu1 %v13743_v49  ;;  %v12856_v30 = vld [vmem:[#allocation2 + $0xb44] sm:$0xf0]  ;;  %v9335_v35 = vld [vmem:[#allocation2 + $0x368] sm:$0xf0]  ;;  %v10346_v41 = vor.u32 %v12842_v14, %v10343_v10  ;;  %v10229_v45 = vld [vmem:[#allocation2 + $0x9f8] sm:$0xf] }
 0x183   :  { %3768 = vmatpush.bf16.msrb.mxu1 %v10678_v61  ;;  %v9447_v61 = vld [vmem:[#allocation2 + $0x448] sm:$0xf0]  ;;  %3719 = vmatmul.bf16.vlgmr.msra.gmra.mxu2 %v13741_v44  ;;  %v10342_v37 = vor.u32 %v12856_v30, %v10341_v8  ;;  %v10117_v8 = vld [vmem:[#allocation2 + $0x918] sm:$0xf]  ;;  %v12800_v14 = vld [vmem:[#allocation2 + $0x984] sm:$0xf0] }
 0x184   :  { %3787 = vmatpush.bf16.msrb.mxu2 %v9786_v54  ;;  %v14041_v54 = vpack.c.bf16 %v4071_v51, %v4043_v29  ;;  %v3378_v55 = vpop.f32.mrf.mxu0  ;;  %3738 = vmatmul.bf16.vlgmr.msra.gmra.mxu3 %v13743_v49  ;;  %v9446_v29 = vor.u32 %v12632_v5, %v9445_v20  ;;  %v12590_v51 = vld [vmem:[#allocation2 + $0x2fc] sm:$0xf]  ;;  %v9221_v20 = vld [vmem:[#allocation2 + $0x218] sm:$0xf]  ;;  %v12576_v5 = vld [vmem:[#allocation2 + $0x284] sm:$0xf0] }
 0x185   :  { %3806 = vmatpush.bf16.msrb.mxu3 %v10682_v2  ;;  %v3379_v16 = vadd.f32 %v3378_v55, %v14038_v23  ;;  %v3367_v2 = vadd.f32 %v3366_v48, %v3348_v57  ;;  %v12786_v10 = vld [vmem:[#allocation2 + $0x91c] sm:$0xf] }
 0x186   :  { %3750 = vmatpush.bf16.msrb.mxu0 %v9670_v22  ;;  %14712 = vst [vmem:[#allocation23_spill] sm:$0xff] %v14041_v54 }
 0x187   :  { %3769 = vmatpush.bf16.msrb.mxu1 %v10566_v17  ;;  %v14045_v7 = vadd.f32 %v3397_v47, %v3379_v16  ;;  %v4072_v22 = vmax.f32 %v3367_v2, 0.0  ;;  %v14053_v17 = vperm.slane %v13947_v25, 5  ;;  %v12814_v25 = vld [vmem:[#allocation2 + $0x9fc] sm:$0xf] }
 0x188   :  { %3788 = vmatpush.bf16.msrb.mxu2 %v9674_v62  ;;  %v4044_v62 = vmax.f32 %v14035_v15, 0.0  ;;  %v12604_v15 = vld [vmem:[#allocation2 + $0x364] sm:$0xf0]  ;;  %v3416_v48 = vpop.f32.mrf.mxu2 }
 0x189   :  { %3807 = vmatpush.bf16.msrb.mxu3 %v10570_v24  ;;  %v9450_v24 = vor.u32 %v12618_v60, %v9447_v61  ;;  %v3435_v6 = vpop.f32.mrf.mxu3  ;;  %v3417_v57 = vadd.f32 %v3416_v48, %v14053_v17  ;;  %v12562_v60 = vld [vmem:[#allocation2 + $0x21c] sm:$0xf]  ;;  %v9223_v61 = vld [vmem:[#allocation2 + $0x288] sm:$0xf0]  ;;  %v10005_v48 = vld [vmem:[#allocation2 + $0x838] sm:$0xf] }
 0x18a   :  { %3751 = vmatpush.bf16.msrb.mxu0 %v9558_v1  ;;  %v14055_v38 = vpack.c.bf16 %v4072_v22, %v4044_v62  ;;  %v3399_v47 = vpop.f32.mrf.mxu1  ;;  %v9334_v1 = vor.u32 %v12604_v15, %v9333_v28  ;;  %v10119_v62 = vld [vmem:[#allocation2 + $0x988] sm:$0xf0]  ;;  %v3989_v22 = vmax.f32 %v14045_v7, 0.0  ;;  %v9109_v15 = vld [vmem:[#allocation2 + $0x138] sm:$0xf] }
 0x18b   :  { %3770 = vmatpush.bf16.msrb.mxu1 %v10454_v21  ;;  %v14059_v2 = vadd.f32 %v3435_v6, %v3417_v57  ;;  %v10230_v21 = vor.u32 %v12828_v52, %v10229_v45  ;;  %v9111_v28 = vld [vmem:[#allocation2 + $0x1a8] sm:$0xf0]  ;;  %v12548_v45 = vld [vmem:[#allocation2 + $0x1a4] sm:$0xf0]  ;;  %v12758_v7 = vld [vmem:[#allocation2 + $0x83c] sm:$0xf] }
 0x18c   :  { %3789 = vmatpush.bf16.msrb.mxu2 %v9562_v36  ;;  %14713 = vst [vmem:[#allocation24_spill] sm:$0xff] %v14055_v38  ;;  %v3380_v55 = vpop.f32.mrf.mxu0  ;;  %v9338_v36 = vor.u32 %v12590_v51, %v9335_v35  ;;  %v9222_v51 = vor.u32 %v12576_v5, %v9221_v20  ;;  %v12534_v35 = vld [vmem:[#allocation2 + $0x13c] sm:$0xf]  ;;  %v10007_v57 = vld [vmem:[#allocation2 + $0x8a8] sm:$0xf0] }
 0x18d   :  { %3808 = vmatpush.bf16.msrb.mxu3 %v10458_v19  ;;  %v3381_v16 = vadd.f32 %v3380_v55, %v14038_v23  ;;  %v10234_v19 = vor.u32 %v12814_v25, %v10231_v18  ;;  %v12772_v18 = vld [vmem:[#allocation2 + $0x8a4] sm:$0xf0]  ;;  %v9893_v5 = vld [vmem:[#allocation2 + $0x758] sm:$0xf]  ;;  %v12689_v38 = vld [vmem:[#allocation2 + $0x60c] sm:$0xf0] }
 0x18e   :  { %3752 = vmatpush.bf16.msrb.mxu0 %v9446_v29  ;;  %v9226_v29 = vor.u32 %v12562_v60, %v9223_v61  ;;  %v9114_v61 = vor.u32 %v12534_v35, %v9111_v28  ;;  %v12520_v20 = vld [vmem:[#allocation2 + $0xc4] sm:$0xf0]  ;;  %v9789_v35 = vld [vmem:[#allocation2 + $0x680] sm:$0xf]  ;;  %v3990_v28 = vmax.f32 %v14059_v2, 0.0 }
 0x18f   :  { %3771 = vmatpush.bf16.msrb.mxu1 %v10342_v37  ;;  %v3400_v30 = vadd.f32 %v3399_v47, %v3381_v16  ;;  %v10118_v37 = vor.u32 %v12800_v14, %v10117_v8  ;;  %v10010_v14 = vor.u32 %v12758_v7, %v10007_v57 }
 0x190   :  { %3790 = vmatpush.bf16.msrb.mxu2 %v9450_v24  ;;  %v3418_v52 = vpop.f32.mrf.mxu2 }
 0x191   :  { %3809 = vmatpush.bf16.msrb.mxu3 %v10346_v41  ;;  %v4017_v24 = vmax.f32 %v3400_v30, 0.0  ;;  %v10122_v41 = vor.u32 %v12786_v10, %v10119_v62  ;;  %v3437_v25 = vpop.f32.mrf.mxu3  ;;  %v3419_v55 = vadd.f32 %v3418_v52, %v14053_v17  ;;  %v10006_v30 = vor.u32 %v12772_v18, %v10005_v48  ;;  %v12744_v10 = vld [vmem:[#allocation2 + $0x7c4] sm:$0xf0]  ;;  %v12730_v62 = vld [vmem:[#allocation2 + $0x75c] sm:$0xf]  ;;  %3686 = vmatmul.bf16.gmra.mxu0 %v13761_v34 }
 0x192   :  { %3753 = vmatpush.bf16.msrb.mxu0 %v9334_v1  ;;  %v3402_v16 = vpop.f32.mrf.mxu1  ;;  %v8999_v1 = vld [vmem:[#allocation2 + $0xc8] sm:$0xf0]  ;;  %3705 = vmatmul.bf16.gmra.mxu1 %v13763_v39  ;;  %v12941_v52 = vld [vmem:[#allocation2 + $0xdec] sm:$0xf0]  ;;  %v10687_v18 = vld [vmem:[#allocation2 + $0xdf0] sm:$0xf0]  ;;  %v9894_v57 = vor.u32 %v12744_v10, %v9893_v5 }
 0x193   :  { %3772 = vmatpush.bf16.msrb.mxu1 %v10230_v21  ;;  %v14062_v6 = vpack.c.bf16 %v4017_v24, %v3989_v22  ;;  %v9110_v21 = vor.u32 %v12548_v45, %v9109_v15  ;;  %v3438_v8 = vadd.f32 %v3437_v25, %v3419_v55  ;;  %v9895_v22 = vld [vmem:[#allocation2 + $0x7c8] sm:$0xf0]  ;;  %3724 = vmatmul.bf16.gmra.mxu2 %v13761_v34  ;;  %v12927_v25 = vld [vmem:[#allocation2 + $0xd84] sm:$0xf]  ;;  %v12913_v5 = vld [vmem:[#allocation2 + $0xd0c] sm:$0xf0] }
 0x194   :  { %3791 = vmatpush.bf16.msrb.mxu2 %v9338_v36  ;;  %v3383_v47 = vpop.f32.mrf.mxu0  ;;  %v12506_v36 = vld [vmem:[#allocation2 + $0x5c] sm:$0xf]  ;;  %3743 = vmatmul.bf16.gmra.mxu3 %v13763_v39  ;;  %v9898_v2 = vor.u32 %v12730_v62, %v9895_v22  ;;  %v10575_v10 = vld [vmem:[#allocation2 + $0xd10] sm:$0xf0] }
 0x195   :  { %3810 = vmatpush.bf16.msrb.mxu3 %v10234_v19  ;;  %14714 = vst [vmem:[#allocation25_spill] sm:$0xff] %v14062_v6  ;;  %v3384_v60 = vadd.f32 %v3383_v47, %v14038_v23  ;;  %v8997_v19 = vld [vmem:[#allocation2 + $0x58] sm:$0xf]  ;;  %v4018_v15 = vmax.f32 %v3438_v8, 0.0  ;;  %v9002_v45 = vor.u32 %v12506_v36, %v8999_v1  ;;  %v12675_v8 = vld [vmem:[#allocation2 + $0x5a4] sm:$0xf] }
 0x196   :  { %3754 = vmatpush.bf16.msrb.mxu0 %v9222_v51  ;;  %v9791_v51 = vld [vmem:[#allocation2 + $0x6f0] sm:$0xf0]  ;;  %v8998_v48 = vor.u32 %v12520_v20, %v8997_v19  ;;  %v10690_v19 = vor.u32 %v12927_v25, %v10687_v18  ;;  %v9677_v20 = vld [vmem:[#allocation2 + $0x5a0] sm:$0xf]  ;;  %v12661_v18 = vld [vmem:[#allocation2 + $0x52c] sm:$0xf0] }
 0x197   :  { %3773 = vmatpush.bf16.msrb.mxu1 %v10118_v37  ;;  %v14066_v24 = vadd.f32 %v3402_v16, %v3384_v60  ;;  %v12717_v37 = vld [vmem:[#allocation2 + $0x6ec] sm:$0xf0]  ;;  %v14073_v7 = vpack.c.bf16 %v4018_v15, %v3990_v28  ;;  %v9679_v6 = vld [vmem:[#allocation2 + $0x610] sm:$0xf0]  ;;  %v10573_v28 = vld [vmem:[#allocation2 + $0xca0] sm:$0xf] }
 0x198   :  { %3792 = vmatpush.bf16.msrb.mxu2 %v9226_v29  ;;  %v12703_v29 = vld [vmem:[#allocation2 + $0x684] sm:$0xf]  ;;  %v3421_v55 = vpop.f32.mrf.mxu2  ;;  %v9790_v60 = vor.u32 %v12717_v37, %v9789_v35  ;;  %v13463_v35 = vld [vmem:[#allocation4 + $0x8] sm:$0xff]  ;;  %v9565_v25 = vld [vmem:[#allocation2 + $0x4c0] sm:$0xf] }
 0x199   :  { %3811 = vmatpush.bf16.msrb.mxu3 %v10122_v41  ;;  %v10685_v41 = vld [vmem:[#allocation2 + $0xd80] sm:$0xf]  ;;  %14715 = vst [vmem:[#allocation26_spill] sm:$0xff] %v14073_v7  ;;  %v3440_v47 = vpop.f32.mrf.mxu3  ;;  %v9794_v16 = vor.u32 %v12703_v29, %v9791_v51  ;;  %v9682_v29 = vor.u32 %v12675_v8, %v9679_v6  ;;  %v9678_v51 = vor.u32 %v12689_v38, %v9677_v20  ;;  %v14079_v15 = vperm.slane %v13463_v35, 6  ;;  %v12885_v38 = vld [vmem:[#allocation2 + $0xc2c] sm:$0xf0] }
 0x19a   :  { %3755 = vmatpush.bf16.msrb.mxu0 %v9110_v21  ;;  %v3404_v36 = vpop.f32.mrf.mxu1  ;;  %v10686_v1 = vor.u32 %v12941_v52, %v10685_v41  ;;  %v4045_v41 = vmax.f32 %v14066_v24, 0.0  ;;  %v9567_v52 = vld [vmem:[#allocation2 + $0x530] sm:$0xf0]  ;;  %v12871_v6 = vld [vmem:[#allocation2 + $0xbc4] sm:$0xf] }
 0x19b   :  { %3774 = vmatpush.bf16.msrb.mxu1 %v10006_v30 }
 0x19c   :  { %3793 = vmatpush.bf16.msrb.mxu2 %v9114_v61  ;;  %v3422_v61 = vadd.f32 %v3421_v55, %v14053_v17  ;;  %v3385_v21 = vpop.f32.mrf.mxu0 }
 0x19d   :  { %3812 = vmatpush.bf16.msrb.mxu3 %v10010_v14  ;;  %v3386_v30 = vadd.f32 %v3385_v21, %v14038_v23  ;;  %v12899_v14 = vld [vmem:[#allocation2 + $0xca4] sm:$0xf]  ;;  %v10574_v23 = vor.u32 %v12913_v5, %v10573_v28  ;;  %v9453_v5 = vld [vmem:[#allocation2 + $0x3e0] sm:$0xf] }
 0x19e   :  { %3756 = vmatpush.bf16.msrb.mxu0 %v8998_v48  ;;  %v14077_v62 = vadd.f32 %v3440_v47, %v3422_v61  ;;  %v10578_v37 = vor.u32 %v12899_v14, %v10575_v10  ;;  %v12647_v48 = vld [vmem:[#allocation2 + $0x4c4] sm:$0xf]  ;;  %v10463_v47 = vld [vmem:[#allocation2 + $0xc30] sm:$0xf0]  ;;  %v12633_v14 = vld [vmem:[#allocation2 + $0x44c] sm:$0xf0] }
 0x19f   :  { %3775 = vmatpush.bf16.msrb.mxu1 %v9894_v57  ;;  %v3405_v22 = vadd.f32 %v3404_v36, %v3386_v30  ;;  %v10461_v57 = vld [vmem:[#allocation2 + $0xbc0] sm:$0xf]  ;;  %v9570_v21 = vor.u32 %v12647_v48, %v9567_v52  ;;  %v9566_v36 = vor.u32 %v12661_v18, %v9565_v25  ;;  %v10466_v30 = vor.u32 %v12871_v6, %v10463_v47  ;;  %v12591_v52 = vld [vmem:[#allocation2 + $0x304] sm:$0xf]  ;;  %v9343_v25 = vld [vmem:[#allocation2 + $0x370] sm:$0xf0] }
 0x1a0   :  { %3794 = vmatpush.bf16.msrb.mxu2 %v9002_v45  ;;  %v10462_v28 = vor.u32 %v12885_v38, %v10461_v57  ;;  %v10349_v10 = vld [vmem:[#allocation2 + $0xae0] sm:$0xf]  ;;  %v9454_v48 = vor.u32 %v12633_v14, %v9453_v5 }
 0x1a1   :  { %3813 = vmatpush.bf16.msrb.mxu3 %v9898_v2  ;;  %v4073_v45 = vmax.f32 %v3405_v22, 0.0  ;;  %v3423_v2 = vpop.f32.mrf.mxu2  ;;  %v3442_v55 = vpop.f32.mrf.mxu3  ;;  %3757 = vmatmul.bf16.vlgmr.msrb.gmra.mxu0 %v13741_v44 }
 0x1a2   :  { %3825 = vmatpush.bf16.msra.mxu0 %v9790_v60  ;;  %v3424_v60 = vadd.f32 %v3423_v2, %v14053_v17  ;;  %v3473_v61 = vpop.f32.mrf.mxu1  ;;  %3776 = vmatmul.bf16.vlgmr.msrb.gmra.mxu1 %v13743_v49  ;;  %v12857_v17 = vld [vmem:[#allocation2 + $0xb4c] sm:$0xf0]  ;;  %v9341_v2 = vld [vmem:[#allocation2 + $0x300] sm:$0xf] }
 0x1a3   :  { %3844 = vmatpush.bf16.msra.mxu1 %v10686_v1  ;;  %v12619_v1 = vld [vmem:[#allocation2 + $0x3e4] sm:$0xf]  ;;  %3795 = vmatmul.bf16.vlgmr.msrb.gmra.mxu2 %v13741_v44  ;;  %v10350_v18 = vor.u32 %v12857_v17, %v10349_v10  ;;  %v9229_v10 = vld [vmem:[#allocation2 + $0x220] sm:$0xf]  ;;  %v12577_v17 = vld [vmem:[#allocation2 + $0x28c] sm:$0xf0] }
 0x1a4   :  { %3863 = vmatpush.bf16.msra.mxu2 %v9794_v16  ;;  %v14082_v16 = vpack.c.bf16 %v4073_v45, %v4045_v41  ;;  %v3454_v8 = vpop.f32.mrf.mxu0  ;;  %v3443_v20 = vadd.f32 %v3442_v55, %v3424_v60  ;;  %3814 = vmatmul.bf16.vlgmr.msrb.gmra.mxu3 %v13743_v49  ;;  %v14093_v41 = vperm.slane %v13463_v35, 7  ;;  %v12605_v55 = vld [vmem:[#allocation2 + $0x36c] sm:$0xf0]  ;;  %v12815_v35 = vld [vmem:[#allocation2 + $0xa04] sm:$0xf] }
 0x1a5   :  { %3882 = vmatpush.bf16.msra.mxu3 %v10690_v19  ;;  %v3455_v24 = vadd.f32 %v3454_v8, %v14079_v15  ;;  %v9455_v19 = vld [vmem:[#allocation2 + $0x450] sm:$0xf0]  ;;  %v12829_v60 = vld [vmem:[#allocation2 + $0xa6c] sm:$0xf0] }
 0x1a6   :  { %3826 = vmatpush.bf16.msra.mxu0 %v9678_v51  ;;  %14716 = vst [vmem:[#allocation27_spill] sm:$0xff] %v14082_v16  ;;  %v10351_v51 = vld [vmem:[#allocation2 + $0xb50] sm:$0xf0]  ;;  %v9458_v45 = vor.u32 %v12619_v1, %v9455_v19  ;;  %v9346_v1 = vor.u32 %v12591_v52, %v9343_v25  ;;  %v9342_v19 = vor.u32 %v12605_v55, %v9341_v2  ;;  %v12535_v2 = vld [vmem:[#allocation2 + $0x144] sm:$0xf] }
 0x1a7   :  { %3845 = vmatpush.bf16.msra.mxu1 %v10574_v23  ;;  %v14086_v22 = vadd.f32 %v3473_v61, %v3455_v24  ;;  %v4046_v23 = vmax.f32 %v14077_v62, 0.0  ;;  %v10237_v62 = vld [vmem:[#allocation2 + $0xa00] sm:$0xf]  ;;  %v10239_v8 = vld [vmem:[#allocation2 + $0xa70] sm:$0xf0]  ;;  %v9230_v25 = vor.u32 %v12577_v17, %v9229_v10 }
 0x1a8   :  { %3864 = vmatpush.bf16.msra.mxu2 %v9682_v29  ;;  %v12843_v29 = vld [vmem:[#allocation2 + $0xae4] sm:$0xf]  ;;  %v10238_v5 = vor.u32 %v12829_v60, %v10237_v62  ;;  %v10242_v14 = vor.u32 %v12815_v35, %v10239_v8  ;;  %v9119_v55 = vld [vmem:[#allocation2 + $0x1b0] sm:$0xf0]  ;;  %v9117_v62 = vld [vmem:[#allocation2 + $0x140] sm:$0xf] }
 0x1a9   :  { %3883 = vmatpush.bf16.msra.mxu3 %v10578_v37  ;;  %v4074_v37 = vmax.f32 %v3443_v20, 0.0  ;;  %v10354_v57 = vor.u32 %v12843_v29, %v10351_v51  ;;  %v3492_v6 = vpop.f32.mrf.mxu2  ;;  %v3511_v47 = vpop.f32.mrf.mxu3  ;;  %v12563_v20 = vld [vmem:[#allocation2 + $0x224] sm:$0xf]  ;;  %v10125_v29 = vld [vmem:[#allocation2 + $0x920] sm:$0xf] }
 0x1aa   :  { %3827 = vmatpush.bf16.msra.mxu0 %v9566_v36  ;;  %v3493_v61 = vadd.f32 %v3492_v6, %v14093_v41  ;;  %v10127_v6 = vld [vmem:[#allocation2 + $0x990] sm:$0xf0]  ;;  %v10013_v60 = vld [vmem:[#allocation2 + $0x840] sm:$0xf] }
 0x1ab   :  { %3846 = vmatpush.bf16.msra.mxu1 %v10462_v28  ;;  %v14095_v38 = vpack.c.bf16 %v4074_v37, %v4046_v23  ;;  %v9231_v28 = vld [vmem:[#allocation2 + $0x290] sm:$0xf0]  ;;  %v12801_v23 = vld [vmem:[#allocation2 + $0x98c] sm:$0xf0]  ;;  %v12787_v37 = vld [vmem:[#allocation2 + $0x924] sm:$0xf] }
 0x1ac   :  { %3865 = vmatpush.bf16.msra.mxu2 %v9570_v21  ;;  %v3456_v24 = vpop.f32.mrf.mxu0  ;;  %v3475_v21 = vpop.f32.mrf.mxu1  ;;  %v9234_v52 = vor.u32 %v12563_v20, %v9231_v28  ;;  %v12507_v20 = vld [vmem:[#allocation2 + $0x64] sm:$0xf]  ;;  %v9007_v28 = vld [vmem:[#allocation2 + $0xd0] sm:$0xf0]  ;;  %v9005_v17 = vld [vmem:[#allocation2 + $0x60] sm:$0xf] }
 0x1ad   :  { %3884 = vmatpush.bf16.msra.mxu3 %v10466_v30  ;;  %14717 = vst [vmem:[#allocation28_spill] sm:$0xff] %v14095_v38  ;;  %v3457_v36 = vadd.f32 %v3456_v24, %v14079_v15  ;;  %v14099_v30 = vadd.f32 %v3511_v47, %v3493_v61  ;;  %v12549_v47 = vld [vmem:[#allocation2 + $0x1ac] sm:$0xf0] }
 0x1ae   :  { %3828 = vmatpush.bf16.msra.mxu0 %v9454_v48  ;;  %v12773_v24 = vld [vmem:[#allocation2 + $0x8ac] sm:$0xf0]  ;;  %v9118_v10 = vor.u32 %v12549_v47, %v9117_v62  ;;  %v9010_v47 = vor.u32 %v12507_v20, %v9007_v28 }
 0x1af   :  { %3847 = vmatpush.bf16.msra.mxu1 %v10350_v18  ;;  %v3476_v51 = vadd.f32 %v3475_v21, %v3457_v36  ;;  %v10126_v18 = vor.u32 %v12801_v23, %v10125_v29  ;;  %v10015_v21 = vld [vmem:[#allocation2 + $0x8b0] sm:$0xf0]  ;;  %v12521_v29 = vld [vmem:[#allocation2 + $0xcc] sm:$0xf0] }
 0x1b0   :  { %3866 = vmatpush.bf16.msra.mxu2 %v9458_v45  ;;  %v3991_v45 = vmax.f32 %v14086_v22, 0.0  ;;  %v12759_v22 = vld [vmem:[#allocation2 + $0x844] sm:$0xf] }
 0x1b1   :  { %3885 = vmatpush.bf16.msra.mxu3 %v10354_v57  ;;  %v4019_v48 = vmax.f32 %v3476_v51, 0.0  ;;  %v10130_v57 = vor.u32 %v12787_v37, %v10127_v6  ;;  %v3494_v8 = vpop.f32.mrf.mxu2  ;;  %v3513_v61 = vpop.f32.mrf.mxu3  ;;  %v9901_v51 = vld [vmem:[#allocation2 + $0x760] sm:$0xf]  ;;  %v10014_v37 = vor.u32 %v12773_v24, %v10013_v60  ;;  %v10018_v6 = vor.u32 %v12759_v22, %v10015_v21  ;;  %3762 = vmatmul.bf16.gmra.mxu0 %v13761_v34  ;;  %v12928_v24 = vld [vmem:[#allocation2 + $0xd8c] sm:$0xf] }
 0x1b2   :  { %3829 = vmatpush.bf16.msra.mxu0 %v9342_v19  ;;  %v3495_v36 = vadd.f32 %v3494_v8, %v14093_v41  ;;  %v9903_v8 = vld [vmem:[#allocation2 + $0x7d0] sm:$0xf0]  ;;  %3781 = vmatmul.bf16.gmra.mxu1 %v13763_v39  ;;  %v9006_v60 = vor.u32 %v12521_v29, %v9005_v17  ;;  %v10695_v22 = vld [vmem:[#allocation2 + $0xdf8] sm:$0xf0] }
 0x1b3   :  { %3848 = vmatpush.bf16.msra.mxu1 %v10238_v5  ;;  %v14102_v35 = vpack.c.bf16 %v4019_v48, %v3991_v45  ;;  %v12745_v45 = vld [vmem:[#allocation2 + $0x7cc] sm:$0xf0]  ;;  %v12731_v48 = vld [vmem:[#allocation2 + $0x764] sm:$0xf]  ;;  %3800 = vmatmul.bf16.gmra.mxu2 %v13761_v34  ;;  %v10698_v29 = vor.u32 %v12928_v24, %v10695_v22  ;;  %v9575_v24 = vld [vmem:[#allocation2 + $0x538] sm:$0xf0] }
 0x1b4   :  { %3867 = vmatpush.bf16.msra.mxu2 %v9346_v1  ;;  %v3459_v1 = vpop.f32.mrf.mxu0  ;;  %v3478_v19 = vpop.f32.mrf.mxu1  ;;  %v3514_v23 = vadd.f32 %v3513_v61, %v3495_v36  ;;  %3819 = vmatmul.bf16.gmra.mxu3 %v13763_v39  ;;  %v12942_v61 = vld [vmem:[#allocation2 + $0xdf4] sm:$0xf0]  ;;  %v9902_v36 = vor.u32 %v12745_v45, %v9901_v51  ;;  %v12900_v45 = vld [vmem:[#allocation2 + $0xcac] sm:$0xf]  ;;  %v9573_v22 = vld [vmem:[#allocation2 + $0x4c8] sm:$0xf] }
 0x1b5   :  { %3886 = vmatpush.bf16.msra.mxu3 %v10242_v14  ;;  %14718 = vst [vmem:[#allocation29_spill] sm:$0xff] %v14102_v35  ;;  %v3460_v5 = vadd.f32 %v3459_v1, %v14079_v15  ;;  %v9122_v14 = vor.u32 %v12535_v2, %v9119_v55  ;;  %v9797_v2 = vld [vmem:[#allocation2 + $0x688] sm:$0xf]  ;;  %v3992_v55 = vmax.f32 %v14099_v30, 0.0  ;;  %v9906_v30 = vor.u32 %v12731_v48, %v9903_v8  ;;  %v12676_v35 = vld [vmem:[#allocation2 + $0x5ac] sm:$0xf] }
 0x1b6   :  { %3830 = vmatpush.bf16.msra.mxu0 %v9230_v25  ;;  %v9799_v25 = vld [vmem:[#allocation2 + $0x6f8] sm:$0xf0]  ;;  %v4020_v62 = vmax.f32 %v3514_v23, 0.0 }
 0x1b7   :  { %3849 = vmatpush.bf16.msra.mxu1 %v10126_v18  ;;  %v14106_v38 = vadd.f32 %v3478_v19, %v3460_v5  ;;  %v12718_v18 = vld [vmem:[#allocation2 + $0x6f4] sm:$0xf0]  ;;  %v14115_v5 = vld [vmem:[#allocation4 + $0x10] sm:$0xff]  ;;  %v10583_v48 = vld [vmem:[#allocation2 + $0xd18] sm:$0xf0] }
 0x1b8   :  { %3868 = vmatpush.bf16.msra.mxu2 %v9234_v52  ;;  %v12704_v52 = vld [vmem:[#allocation2 + $0x68c] sm:$0xf]  ;;  %v14113_v21 = vpack.c.bf16 %v4020_v62, %v3992_v55  ;;  %v9798_v16 = vor.u32 %v12718_v18, %v9797_v2  ;;  %v9685_v55 = vld [vmem:[#allocation2 + $0x5a8] sm:$0xf]  ;;  %v12690_v62 = vld [vmem:[#allocation2 + $0x614] sm:$0xf0] }
 0x1b9   :  { %3887 = vmatpush.bf16.msra.mxu3 %v10130_v57  ;;  %v10693_v57 = vld [vmem:[#allocation2 + $0xd88] sm:$0xf]  ;;  %v3497_v1 = vpop.f32.mrf.mxu2  ;;  %v3516_v19 = vpop.f32.mrf.mxu3  ;;  %v9802_v23 = vor.u32 %v12704_v52, %v9799_v25  ;;  %v9686_v2 = vor.u32 %v12690_v62, %v9685_v55  ;;  %v14122_v18 = vperm.slane %v14115_v5, 0  ;;  %v12620_v55 = vld [vmem:[#allocation2 + $0x3ec] sm:$0xf] }
 0x1ba   :  { %3831 = vmatpush.bf16.msra.mxu0 %v9118_v10  ;;  %14719 = vst [vmem:[#allocation30_spill] sm:$0xff] %v14113_v21  ;;  %v3498_v20 = vadd.f32 %v3497_v1, %v14093_v41  ;;  %v10694_v17 = vor.u32 %v12942_v61, %v10693_v57  ;;  %v10586_v57 = vor.u32 %v12900_v45, %v10583_v48  ;;  %v12648_v61 = vld [vmem:[#allocation2 + $0x4cc] sm:$0xf]  ;;  %v9463_v62 = vld [vmem:[#allocation2 + $0x458] sm:$0xf0] }
 0x1bb   :  { %3850 = vmatpush.bf16.msra.mxu1 %v10014_v37  ;;  %v10581_v37 = vld [vmem:[#allocation2 + $0xca8] sm:$0xf]  ;;  %v12634_v48 = vld [vmem:[#allocation2 + $0x454] sm:$0xf0] }
 0x1bc   :  { %3869 = vmatpush.bf16.msra.mxu2 %v9122_v14  ;;  %v9687_v14 = vld [vmem:[#allocation2 + $0x618] sm:$0xf0]  ;;  %v3461_v28 = vpop.f32.mrf.mxu0  ;;  %v3480_v10 = vpop.f32.mrf.mxu1  ;;  %v14119_v8 = vadd.f32 %v3516_v19, %v3498_v20  ;;  %v9461_v45 = vld [vmem:[#allocation2 + $0x3e8] sm:$0xf] }
 0x1bd   :  { %3888 = vmatpush.bf16.msra.mxu3 %v10018_v6  ;;  %v3462_v51 = vadd.f32 %v3461_v28, %v14079_v15  ;;  %v12914_v6 = vld [vmem:[#allocation2 + $0xd14] sm:$0xf0]  ;;  %v9690_v25 = vor.u32 %v12676_v35, %v9687_v14  ;;  %v12872_v35 = vld [vmem:[#allocation2 + $0xbcc] sm:$0xf] }
 0x1be   :  { %3832 = vmatpush.bf16.msra.mxu0 %v9006_v60  ;;  %v10582_v15 = vor.u32 %v12914_v6, %v10581_v37 }
 0x1bf   :  { %3851 = vmatpush.bf16.msra.mxu1 %v9902_v36  ;;  %v3481_v52 = vadd.f32 %v3480_v10, %v3462_v51  ;;  %v12662_v36 = vld [vmem:[#allocation2 + $0x534] sm:$0xf0] }
 0x1c0   :  { %3870 = vmatpush.bf16.msra.mxu2 %v9010_v47  ;;  %v4047_v47 = vmax.f32 %v14106_v38, 0.0 }
 0x1c1   :  { %3889 = vmatpush.bf16.msra.mxu3 %v9906_v30  ;;  %v4075_v60 = vmax.f32 %v3481_v52, 0.0  ;;  %v10469_v30 = vld [vmem:[#allocation2 + $0xbc8] sm:$0xf]  ;;  %v3499_v1 = vpop.f32.mrf.mxu2  ;;  %v3518_v19 = vpop.f32.mrf.mxu3  ;;  %3833 = vmatmul.bf16.vlgmr.msra.gmra.mxu0 %v13741_v44 }
 0x1c2   :  { %3901 = vmatpush.bf16.msrb.mxu0 %v9798_v16  ;;  %v12886_v16 = vld [vmem:[#allocation2 + $0xc34] sm:$0xf0]  ;;  %v3500_v20 = vadd.f32 %v3499_v1, %v14093_v41  ;;  %v10357_v52 = vld [vmem:[#allocation2 + $0xae8] sm:$0xf]  ;;  %3852 = vmatmul.bf16.vlgmr.msra.gmra.mxu1 %v13743_v49 }
 0x1c3   :  { %3920 = vmatpush.bf16.msrb.mxu1 %v10694_v17  ;;  %v14125_v14 = vpack.c.bf16 %v4075_v60, %v4047_v47  ;;  %v9578_v17 = vor.u32 %v12648_v61, %v9575_v24  ;;  %v10470_v51 = vor.u32 %v12886_v16, %v10469_v30  ;;  %v12858_v41 = vld [vmem:[#allocation2 + $0xb54] sm:$0xf0]  ;;  %3871 = vmatmul.bf16.vlgmr.msra.gmra.mxu2 %v13741_v44  ;;  %v14137_v60 = vperm.slane %v14115_v5, 1  ;;  %v10245_v16 = vld [vmem:[#allocation2 + $0xa08] sm:$0xf] }
 0x1c4   :  { %3939 = vmatpush.bf16.msrb.mxu2 %v9802_v23  ;;  %v10471_v23 = vld [vmem:[#allocation2 + $0xc38] sm:$0xf0]  ;;  %v3530_v28 = vpop.f32.mrf.mxu0  ;;  %v3549_v10 = vpop.f32.mrf.mxu1  ;;  %v3519_v37 = vadd.f32 %v3518_v19, %v3500_v20  ;;  %3890 = vmatmul.bf16.vlgmr.msra.gmra.mxu3 %v13743_v49  ;;  %v9466_v61 = vor.u32 %v12620_v55, %v9463_v62  ;;  %v9462_v24 = vor.u32 %v12634_v48, %v9461_v45  ;;  %v9349_v19 = vld [vmem:[#allocation2 + $0x308] sm:$0xf] }
 0x1c5   :  { %3958 = vmatpush.bf16.msrb.mxu3 %v10698_v29  ;;  %14720 = vst [vmem:[#allocation31_spill] sm:$0xff] %v14125_v14  ;;  %v3531_v38 = vadd.f32 %v3530_v28, %v14122_v18  ;;  %v9574_v29 = vor.u32 %v12662_v36, %v9573_v22  ;;  %v10474_v6 = vor.u32 %v12872_v35, %v10471_v23  ;;  %v12592_v22 = vld [vmem:[#allocation2 + $0x30c] sm:$0xf]  ;;  %v9351_v36 = vld [vmem:[#allocation2 + $0x378] sm:$0xf0] }
 0x1c6   :  { %3902 = vmatpush.bf16.msrb.mxu0 %v9686_v2  ;;  %v12844_v2 = vld [vmem:[#allocation2 + $0xaec] sm:$0xf]  ;;  %v4076_v47 = vmax.f32 %v3519_v37, 0.0  ;;  %v10358_v30 = vor.u32 %v12858_v41, %v10357_v52  ;;  %v12830_v28 = vld [vmem:[#allocation2 + $0xa74] sm:$0xf0]  ;;  %v9354_v37 = vor.u32 %v12592_v22, %v9351_v36 }
 0x1c7   :  { %3921 = vmatpush.bf16.msrb.mxu1 %v10582_v15  ;;  %v10359_v15 = vld [vmem:[#allocation2 + $0xb58] sm:$0xf0]  ;;  %v10246_v52 = vor.u32 %v12830_v28, %v10245_v16  ;;  %v9125_v16 = vld [vmem:[#allocation2 + $0x148] sm:$0xf] }
 0x1c8   :  { %3940 = vmatpush.bf16.msrb.mxu2 %v9690_v25  ;;  %v14129_v25 = vadd.f32 %v3549_v10, %v3531_v38  ;;  %v10362_v1 = vor.u32 %v12844_v2, %v10359_v15  ;;  %v12816_v10 = vld [vmem:[#allocation2 + $0xa0c] sm:$0xf]  ;;  %v10247_v38 = vld [vmem:[#allocation2 + $0xa78] sm:$0xf0]  ;;  %v9237_v2 = vld [vmem:[#allocation2 + $0x228] sm:$0xf] }
 0x1c9   :  { %3959 = vmatpush.bf16.msrb.mxu3 %v10586_v57  ;;  %v4048_v57 = vmax.f32 %v14119_v8, 0.0  ;;  %v12606_v8 = vld [vmem:[#allocation2 + $0x374] sm:$0xf0]  ;;  %v3568_v23 = vpop.f32.mrf.mxu2  ;;  %v3587_v20 = vpop.f32.mrf.mxu3  ;;  %v9239_v45 = vld [vmem:[#allocation2 + $0x298] sm:$0xf0]  ;;  %v10250_v41 = vor.u32 %v12816_v10, %v10247_v38 }
 0x1ca   :  { %3903 = vmatpush.bf16.msrb.mxu0 %v9574_v29  ;;  %v12578_v15 = vld [vmem:[#allocation2 + $0x294] sm:$0xf0]  ;;  %v10135_v14 = vld [vmem:[#allocation2 + $0x998] sm:$0xf0]  ;;  %v10021_v28 = vld [vmem:[#allocation2 + $0x848] sm:$0xf] }
 0x1cb   :  { %3922 = vmatpush.bf16.msrb.mxu1 %v10470_v51  ;;  %v14139_v35 = vpack.c.bf16 %v4076_v47, %v4048_v57  ;;  %v9350_v51 = vor.u32 %v12606_v8, %v9349_v19  ;;  %v10133_v57 = vld [vmem:[#allocation2 + $0x928] sm:$0xf]  ;;  %v9238_v36 = vor.u32 %v12578_v15, %v9237_v2  ;;  %v12536_v19 = vld [vmem:[#allocation2 + $0x14c] sm:$0xf]  ;;  %v9127_v8 = vld [vmem:[#allocation2 + $0x1b8] sm:$0xf0] }
 0x1cc   :  { %3941 = vmatpush.bf16.msrb.mxu2 %v9578_v17  ;;  %v3569_v17 = vadd.f32 %v3568_v23, %v14137_v60  ;;  %v3532_v29 = vpop.f32.mrf.mxu0  ;;  %v3551_v55 = vpop.f32.mrf.mxu1  ;;  %v12802_v23 = vld [vmem:[#allocation2 + $0x994] sm:$0xf0] }
 0x1cd   :  { %3960 = vmatpush.bf16.msrb.mxu3 %v10474_v6  ;;  %14721 = vst [vmem:[#allocation32_spill] sm:$0xff] %v14139_v35  ;;  %v3533_v62 = vadd.f32 %v3532_v29, %v14122_v18  ;;  %v12564_v6 = vld [vmem:[#allocation2 + $0x22c] sm:$0xf]  ;;  %v12774_v29 = vld [vmem:[#allocation2 + $0x8b4] sm:$0xf0] }
 0x1ce   :  { %3904 = vmatpush.bf16.msrb.mxu0 %v9462_v24  ;;  %v14143_v48 = vadd.f32 %v3587_v20, %v3569_v17  ;;  %v12788_v35 = vld [vmem:[#allocation2 + $0x92c] sm:$0xf]  ;;  %v9242_v22 = vor.u32 %v12564_v6, %v9239_v45  ;;  %v12550_v20 = vld [vmem:[#allocation2 + $0x1b4] sm:$0xf0]  ;;  %v9130_v45 = vor.u32 %v12536_v19, %v9127_v8  ;;  %v10022_v2 = vor.u32 %v12774_v29, %v10021_v28 }
 0x1cf   :  { %3923 = vmatpush.bf16.msrb.mxu1 %v10358_v30  ;;  %v3552_v47 = vadd.f32 %v3551_v55, %v3533_v62  ;;  %v10134_v30 = vor.u32 %v12802_v23, %v10133_v57  ;;  %v10023_v55 = vld [vmem:[#allocation2 + $0x8b8] sm:$0xf0]  ;;  %v9013_v57 = vld [vmem:[#allocation2 + $0x68] sm:$0xf]  ;;  %v12966_v29 = vld [vmem:[#allocation6 + $0xb8] sm:$0xff] }
 0x1d0   :  { %3942 = vmatpush.bf16.msrb.mxu2 %v9466_v61  ;;  %v3993_v61 = vmax.f32 %v14129_v25, 0.0  ;;  %v12760_v25 = vld [vmem:[#allocation2 + $0x84c] sm:$0xf]  ;;  %v9909_v23 = vld [vmem:[#allocation2 + $0x768] sm:$0xf]  ;;  %v3994_v19 = vmax.f32 %v14143_v48, 0.0 }
 0x1d1   :  { %3961 = vmatpush.bf16.msrb.mxu3 %v10362_v1  ;;  %v4021_v24 = vmax.f32 %v3552_v47, 0.0  ;;  %v10138_v1 = vor.u32 %v12788_v35, %v10135_v14  ;;  %v3570_v38 = vpop.f32.mrf.mxu2  ;;  %v3589_v17 = vpop.f32.mrf.mxu3  ;;  %v9126_v14 = vor.u32 %v12550_v20, %v9125_v16  ;;  %v12508_v35 = vld [vmem:[#allocation2 + $0x6c] sm:$0xf]  ;;  %v10026_v15 = vor.u32 %v12760_v25, %v10023_v55  ;;  %v12522_v47 = vld [vmem:[#allocation2 + $0xd4] sm:$0xf0]  ;;  %3838 = vmatmul.bf16.gmra.mxu0 %v13761_v34 }
 0x1d2   :  { %3905 = vmatpush.bf16.msrb.mxu0 %v9350_v51  ;;  %v3571_v62 = vadd.f32 %v3570_v38, %v14137_v60  ;;  %3857 = vmatmul.bf16.gmra.mxu1 %v13763_v39  ;;  %v12950_v25 = vld [vmem:[#allocation6 + $0x38] sm:$0xff] }
 0x1d3   :  { %3924 = vmatpush.bf16.msrb.mxu1 %v10246_v52  ;;  %v14146_v10 = vpack.c.bf16 %v4021_v24, %v3993_v61  ;;  %v9015_v52 = vld [vmem:[#allocation2 + $0xd8] sm:$0xf0]  ;;  %v12746_v24 = vld [vmem:[#allocation2 + $0x7d4] sm:$0xf0]  ;;  %3876 = vmatmul.bf16.gmra.mxu2 %v13761_v34 }
 0x1d4   :  { %3943 = vmatpush.bf16.msrb.mxu2 %v9354_v37  ;;  %v3535_v37 = vpop.f32.mrf.mxu0  ;;  %v3554_v51 = vpop.f32.mrf.mxu1  ;;  %3895 = vmatmul.bf16.gmra.mxu3 %v13763_v39  ;;  %v9910_v20 = vor.u32 %v12746_v24, %v9909_v23 }
 0x1d5   :  { %3962 = vmatpush.bf16.msrb.mxu3 %v10250_v41  ;;  %v3536_v6 = vadd.f32 %v3535_v37, %v14122_v18  ;;  %v3590_v41 = vadd.f32 %v3589_v17, %v3571_v62  ;;  %v12958_v37 = vld [vmem:[#allocation6 + $0x78] sm:$0xff] }
 0x1d6   :  { %3906 = vmatpush.bf16.msrb.mxu0 %v9238_v36  ;;  %v9911_v36 = vld [vmem:[#allocation2 + $0x7d8] sm:$0xf0] }
 0x1d7   :  { %3925 = vmatpush.bf16.msrb.mxu1 %v10134_v30  ;;  %v3555_v61 = vadd.f32 %v3554_v51, %v3536_v6  ;;  %v4022_v8 = vmax.f32 %v3590_v41, 0.0  ;;  %v9018_v30 = vor.u32 %v12508_v35, %v9015_v52  ;;  %v12974_v51 = vld [vmem:[#allocation6 + $0xf8] sm:$0xff]  ;;  %v12965_v35 = vld [vmem:[#allocation6 + $0xb0] sm:$0xff] }
 0x1d8   :  { %3944 = vmatpush.bf16.msrb.mxu2 %v9242_v22  ;;  %v12732_v22 = vld [vmem:[#allocation2 + $0x76c] sm:$0xf] }
 0x1d9   :  { %3963 = vmatpush.bf16.msrb.mxu3 %v10138_v1  ;;  %v9014_v1 = vor.u32 %v12522_v47, %v9013_v57  ;;  %v14155_v16 = vpack.c.bf16 %v4022_v8, %v3994_v19  ;;  %v9914_v28 = vor.u32 %v12732_v22, %v9911_v36  ;;  %v3573_v38 = vpop.f32.mrf.mxu2  ;;  %v3592_v17 = vpop.f32.mrf.mxu3  ;;  %v12949_v52 = vld [vmem:[#allocation6 + $0x30] sm:$0xff]  ;;  %v14160_v47 = vperm.slane %v14115_v5, 2 }
 0x1da   :  { %3907 = vmatpush.bf16.msrb.mxu0 %v9126_v14  ;;  %v3574_v48 = vadd.f32 %v3573_v38, %v14137_v60  ;;  %v12957_v41 = vld [vmem:[#allocation6 + $0x70] sm:$0xff] }
 0x1db   :  { %3926 = vmatpush.bf16.msrb.mxu1 %v10022_v2  ;;  %v12973_v2 = vld [vmem:[#allocation6 + $0xf0] sm:$0xff] }
 0x1dc   :  { %3945 = vmatpush.bf16.msrb.mxu2 %v9130_v45  ;;  %v3537_v55 = vpop.f32.mrf.mxu0  ;;  %v3556_v62 = vpop.f32.mrf.mxu1  ;;  %v3593_v45 = vadd.f32 %v3592_v17, %v3574_v48  ;;  %v12947_v48 = vld [vmem:[#allocation6 + $0x20] sm:$0xff] }
 0x1dd   :  { %3964 = vmatpush.bf16.msrb.mxu3 %v10026_v15  ;;  %v3538_v6 = vadd.f32 %v3537_v55, %v14122_v18  ;;  %v4049_v15 = vmax.f32 %v3555_v61, 0.0  ;;  %v12948_v61 = vld [vmem:[#allocation6 + $0x28] sm:$0xff]  ;;  %v12955_v55 = vld [vmem:[#allocation6 + $0x60] sm:$0xff] }
 0x1de   :  { %3908 = vmatpush.bf16.msrb.mxu0 %v9014_v1  ;;  %v4050_v17 = vmax.f32 %v3593_v45, 0.0 }
 0x1df   :  { %3927 = vmatpush.bf16.msrb.mxu1 %v9910_v20  ;;  %v3557_v14 = vadd.f32 %v3556_v62, %v3538_v6  ;;  %v12956_v20 = vld [vmem:[#allocation6 + $0x68] sm:$0xff]  ;;  %v12971_v62 = vld [vmem:[#allocation6 + $0xe0] sm:$0xff] }
 0x1e0   :  { %3946 = vmatpush.bf16.msrb.mxu2 %v9018_v30  ;;  %v12964_v30 = vld [vmem:[#allocation6 + $0xa8] sm:$0xff] }
 0x1e1   :  { %3965 = vmatpush.bf16.msrb.mxu3 %v9914_v28  ;;  %v4077_v57 = vmax.f32 %v3557_v14, 0.0  ;;  %v3575_v18 = vpop.f32.mrf.mxu2  ;;  %v3594_v23 = vpop.f32.mrf.mxu3  ;;  %v12972_v28 = vld [vmem:[#allocation6 + $0xe8] sm:$0xff]  ;;  %3909 = vmatmul.bf16.vlgmr.msrb.gmra.mxu0 %v13741_v44 }
 0x1e2   :  { %5941 = vmatpush.bf16.msra.mxu0 %v12950_v25  ;;  %v3576_v22 = vadd.f32 %v3575_v18, %v14137_v60  ;;  %3928 = vmatmul.bf16.vlgmr.msrb.gmra.mxu1 %v13743_v49  ;;  %v14171_v60 = vperm.slane %v14115_v5, 3  ;;  %v12963_v25 = vld [vmem:[#allocation6 + $0xa0] sm:$0xff] }
 0x1e3   :  { %5960 = vmatpush.bf16.msra.mxu1 %v12958_v37  ;;  %v14162_v24 = vpack.c.bf16 %v4077_v57, %v4049_v15  ;;  %3947 = vmatmul.bf16.vlgmr.msrb.gmra.mxu2 %v13741_v44  ;;  %v12970_v15 = vld [vmem:[#allocation6 + $0xd8] sm:$0xff] }
 0x1e4   :  { %5979 = vmatpush.bf16.msra.mxu2 %v12966_v29  ;;  %v3606_v36 = vpop.f32.mrf.mxu0  ;;  %v3625_v19 = vpop.f32.mrf.mxu1  ;;  %v3595_v1 = vadd.f32 %v3594_v23, %v3576_v22  ;;  %3966 = vmatmul.bf16.vlgmr.msrb.gmra.mxu3 %v13743_v49  ;;  %v12961_v22 = vld [vmem:[#allocation6 + $0x90] sm:$0xff] }
 0x1e5   :  { %5998 = vmatpush.bf16.msra.mxu3 %v12974_v51  ;;  %v3607_v8 = vadd.f32 %v3606_v36, %v14160_v47  ;;  %v12945_v36 = vld [vmem:[#allocation6 + $0x10] sm:$0xff] }
 0x1e6   :  { %5942 = vmatpush.bf16.msra.mxu0 %v12949_v52  ;;  %v4078_v29 = vmax.f32 %v3595_v1, 0.0  ;;  %v12946_v52 = vld [vmem:[#allocation6 + $0x18] sm:$0xff] }
 0x1e7   :  { %5961 = vmatpush.bf16.msra.mxu1 %v12957_v41  ;;  %v3626_v38 = vadd.f32 %v3625_v19, %v3607_v8  ;;  %v12953_v19 = vld [vmem:[#allocation6 + $0x50] sm:$0xff] }
 0x1e8   :  { %5980 = vmatpush.bf16.msra.mxu2 %v12965_v35  ;;  %v14173_v37 = vpack.c.bf16 %v4078_v29, %v4050_v17  ;;  %v12962_v35 = vld [vmem:[#allocation6 + $0x98] sm:$0xff]  ;;  %v12969_v8 = vld [vmem:[#allocation6 + $0xd0] sm:$0xff] }
 0x1e9   :  { %5999 = vmatpush.bf16.msra.mxu3 %v12973_v2  ;;  %v3644_v51 = vpop.f32.mrf.mxu2  ;;  %v3663_v6 = vpop.f32.mrf.mxu3  ;;  %v12954_v2 = vld [vmem:[#allocation6 + $0x58] sm:$0xff]  ;;  %v3995_v18 = vmax.f32 %v3626_v38, 0.0  ;;  %v12960_v38 = vld [vmem:[#allocation6 + $0x88] sm:$0xff] }
 0x1ea   :  { %5943 = vmatpush.bf16.msra.mxu0 %v12948_v61  ;;  %v3645_v45 = vadd.f32 %v3644_v51, %v14171_v60 }
 0x1eb   :  { %5962 = vmatpush.bf16.msra.mxu1 %v12956_v20 }
 0x1ec   :  { %5981 = vmatpush.bf16.msra.mxu2 %v12964_v30  ;;  %v3608_v44 = vpop.f32.mrf.mxu0  ;;  %v3627_v14 = vpop.f32.mrf.mxu1  ;;  %v3664_v41 = vadd.f32 %v3663_v6, %v3645_v45 }
 0x1ed   :  { %6000 = vmatpush.bf16.msra.mxu3 %v12972_v28  ;;  %v3609_v49 = vadd.f32 %v3608_v44, %v14160_v47  ;;  %v12959_v44 = vld [vmem:[#allocation6 + $0x80] sm:$0xff] }
 0x1ee   :  { %5944 = vmatpush.bf16.msra.mxu0 %v12947_v48  ;;  %v3996_v6 = vmax.f32 %v3664_v41, 0.0 }
 0x1ef   :  { %5963 = vmatpush.bf16.msra.mxu1 %v12955_v55  ;;  %v3628_v57 = vadd.f32 %v3627_v14, %v3609_v49  ;;  %v12952_v55 = vld [vmem:[#allocation6 + $0x48] sm:$0xff]  ;;  %v12943_v14 = vld [vmem:[#allocation6] sm:$0xff] }
 0x1f0   :  { %5982 = vmatpush.bf16.msra.mxu2 %v12963_v25  ;;  %v12944_v25 = vld [vmem:[#allocation6 + $0x8] sm:$0xff] }
 0x1f1   :  { %6001 = vmatpush.bf16.msra.mxu3 %v12971_v62  ;;  %v4023_v23 = vmax.f32 %v3628_v57, 0.0  ;;  %v3646_v61 = vpop.f32.mrf.mxu2  ;;  %v3665_v1 = vpop.f32.mrf.mxu3  ;;  %v12968_v62 = vld [vmem:[#allocation6 + $0xc8] sm:$0xff]  ;;  %3914 = vmatmul.bf16.gmra.mxu0 %v13761_v34  ;;  %v12998_v57 = vld [vmem:[#allocation6 + $0x1b8] sm:$0xff] }
 0x1f2   :  { %5945 = vmatpush.bf16.msra.mxu0 %v12946_v52  ;;  %v3647_v20 = vadd.f32 %v3646_v61, %v14171_v60  ;;  %3933 = vmatmul.bf16.gmra.mxu1 %v13763_v39  ;;  %v12967_v52 = vld [vmem:[#allocation6 + $0xc0] sm:$0xff]  ;;  %v12997_v61 = vld [vmem:[#allocation6 + $0x1b0] sm:$0xff] }
 0x1f3   :  { %5964 = vmatpush.bf16.msra.mxu1 %v12954_v2  ;;  %v14177_v30 = vpack.c.bf16 %v4023_v23, %v3995_v18  ;;  %3952 = vmatmul.bf16.gmra.mxu2 %v13761_v34  ;;  %v12982_v18 = vld [vmem:[#allocation6 + $0x138] sm:$0xff] }
 0x1f4   :  { %5983 = vmatpush.bf16.msra.mxu2 %v12962_v35  ;;  %v3611_v28 = vpop.f32.mrf.mxu0  ;;  %v3630_v17 = vpop.f32.mrf.mxu1  ;;  %v3666_v48 = vadd.f32 %v3665_v1, %v3647_v20  ;;  %3971 = vmatmul.bf16.gmra.mxu3 %v13763_v39  ;;  %v12951_v35 = vld [vmem:[#allocation6 + $0x40] sm:$0xff]  ;;  %v13006_v39 = vld [vmem:[#allocation6 + $0x1f8] sm:$0xff]  ;;  %v12981_v1 = vld [vmem:[#allocation6 + $0x130] sm:$0xff] }
 0x1f5   :  { %6002 = vmatpush.bf16.msra.mxu3 %v12970_v15  ;;  %v3612_v29 = vadd.f32 %v3611_v28, %v14160_v47  ;;  %v12989_v20 = vld [vmem:[#allocation6 + $0x170] sm:$0xff] }
 0x1f6   :  { %5946 = vmatpush.bf16.msra.mxu0 %v12945_v36  ;;  %v4024_v45 = vmax.f32 %v3666_v48, 0.0  ;;  %v13005_v28 = vld [vmem:[#allocation6 + $0x1f0] sm:$0xff] }
 0x1f7   :  { %5965 = vmatpush.bf16.msra.mxu1 %v12953_v19  ;;  %v3631_v51 = vadd.f32 %v3630_v17, %v3612_v29 }
 0x1f8   :  { %5984 = vmatpush.bf16.msra.mxu2 %v12961_v22  ;;  %v14185_v49 = vpack.c.bf16 %v4024_v45, %v3996_v6  ;;  %v12990_v22 = vld [vmem:[#allocation6 + $0x178] sm:$0xff] }
 0x1f9   :  { %6003 = vmatpush.bf16.msra.mxu3 %v12969_v8  ;;  %v3649_v2 = vpop.f32.mrf.mxu2  ;;  %v3668_v15 = vpop.f32.mrf.mxu3  ;;  %v4051_v17 = vmax.f32 %v3631_v51, 0.0  ;;  %v12980_v51 = vld [vmem:[#allocation6 + $0x128] sm:$0xff] }
 0x1fa   :  { %5947 = vmatpush.bf16.msra.mxu0 %v12944_v25  ;;  %v3650_v41 = vadd.f32 %v3649_v2, %v14171_v60 }
 0x1fb   :  { %5966 = vmatpush.bf16.msra.mxu1 %v12952_v55 }
 0x1fc   :  { %5985 = vmatpush.bf16.msra.mxu2 %v12960_v38  ;;  %v3613_v23 = vpop.f32.mrf.mxu0  ;;  %v3632_v34 = vpop.f32.mrf.mxu1  ;;  %v3669_v19 = vadd.f32 %v3668_v15, %v3650_v41  ;;  %v14190_v38 = vperm.slane %v14115_v5, 4  ;;  %v12979_v41 = vld [vmem:[#allocation6 + $0x120] sm:$0xff] }
 0x1fd   :  { %6004 = vmatpush.bf16.msra.mxu3 %v12968_v62  ;;  %v3614_v36 = vadd.f32 %v3613_v23, %v14160_v47  ;;  %v12987_v23 = vld [vmem:[#allocation6 + $0x160] sm:$0xff] }
 0x1fe   :  { %5948 = vmatpush.bf16.msra.mxu0 %v12943_v14  ;;  %v4052_v15 = vmax.f32 %v3669_v19, 0.0 }
 0x1ff   :  { %5967 = vmatpush.bf16.msra.mxu1 %v12951_v35  ;;  %v3633_v8 = vadd.f32 %v3632_v34, %v3614_v36  ;;  %v12988_v35 = vld [vmem:[#allocation6 + $0x168] sm:$0xff]  ;;  %v13003_v34 = vld [vmem:[#allocation6 + $0x1e0] sm:$0xff] }
 0x200   :  { %5986 = vmatpush.bf16.msra.mxu2 %v12959_v44  ;;  %v12996_v44 = vld [vmem:[#allocation6 + $0x1a8] sm:$0xff] }
 0x201   :  { %6005 = vmatpush.bf16.msra.mxu3 %v12967_v52  ;;  %v4079_v29 = vmax.f32 %v3633_v8, 0.0  ;;  %v3651_v47 = vpop.f32.mrf.mxu2  ;;  %v3670_v25 = vpop.f32.mrf.mxu3  ;;  %v13004_v52 = vld [vmem:[#allocation6 + $0x1e8] sm:$0xff]  ;;  %5949 = vmatmul.bf16.vlgmr.msra.gmra.mxu0 %v13810_v33 }
 0x202   :  { %6017 = vmatpush.bf16.msrb.mxu0 %v12982_v18  ;;  %v3652_v55 = vadd.f32 %v3651_v47, %v14171_v60  ;;  %5968 = vmatmul.bf16.vlgmr.msra.gmra.mxu1 %v13821_v11  ;;  %v14201_v60 = vperm.slane %v14115_v5, 5  ;;  %v12995_v18 = vld [vmem:[#allocation6 + $0x1a0] sm:$0xff]  ;;  %v13002_v47 = vld [vmem:[#allocation6 + $0x1d8] sm:$0xff] }
 0x203   :  { %6036 = vmatpush.bf16.msrb.mxu1 %v12990_v22  ;;  %v14192_v48 = vpack.c.bf16 %v4079_v29, %v4051_v17  ;;  %5987 = vmatmul.bf16.vlgmr.msra.gmra.mxu2 %v13852_v9  ;;  %v12986_v29 = vld [vmem:[#allocation6 + $0x158] sm:$0xff] }
 0x204   :  { %6055 = vmatpush.bf16.msrb.mxu2 %v12998_v57  ;;  %v3682_v62 = vpop.f32.mrf.mxu0  ;;  %v3701_v6 = vpop.f32.mrf.mxu1  ;;  %v3671_v14 = vadd.f32 %v3670_v25, %v3652_v55  ;;  %6006 = vmatmul.bf16.vlgmr.msra.gmra.mxu3 %v13863_v56 }
 0x205   :  { %6074 = vmatpush.bf16.msrb.mxu3 %v13006_v39  ;;  %v3683_v45 = vadd.f32 %v3682_v62, %v14190_v38 }
 0x206   :  { %6018 = vmatpush.bf16.msrb.mxu0 %v12981_v1  ;;  %v4080_v57 = vmax.f32 %v3671_v14, 0.0 }
 0x207   :  { %6037 = vmatpush.bf16.msrb.mxu1 %v12989_v20  ;;  %v3702_v2 = vadd.f32 %v3701_v6, %v3683_v45  ;;  %v12994_v20 = vld [vmem:[#allocation6 + $0x198] sm:$0xff]  ;;  %v12993_v6 = vld [vmem:[#allocation6 + $0x190] sm:$0xff] }
 0x208   :  { %6056 = vmatpush.bf16.msrb.mxu2 %v12997_v61  ;;  %v14203_v22 = vpack.c.bf16 %v4080_v57, %v4052_v15  ;;  %v12977_v45 = vld [vmem:[#allocation6 + $0x110] sm:$0xff] }
 0x209   :  { %6075 = vmatpush.bf16.msrb.mxu3 %v13005_v28  ;;  %v3720_v39 = vpop.f32.mrf.mxu2  ;;  %v3739_v36 = vpop.f32.mrf.mxu3  ;;  %v12978_v28 = vld [vmem:[#allocation6 + $0x118] sm:$0xff]  ;;  %v3997_v55 = vmax.f32 %v3702_v2, 0.0  ;;  %v12992_v2 = vld [vmem:[#allocation6 + $0x188] sm:$0xff] }
 0x20a   :  { %6019 = vmatpush.bf16.msrb.mxu0 %v12980_v51  ;;  %v3721_v19 = vadd.f32 %v3720_v39, %v14201_v60  ;;  %v13001_v51 = vld [vmem:[#allocation6 + $0x1d0] sm:$0xff]  ;;  %v12984_v39 = vld [vmem:[#allocation6 + $0x148] sm:$0xff] }
 0x20b   :  { %6038 = vmatpush.bf16.msrb.mxu1 %v12988_v35 }
 0x20c   :  { %6057 = vmatpush.bf16.msrb.mxu2 %v12996_v44  ;;  %v3684_v8 = vpop.f32.mrf.mxu0  ;;  %v3703_v61 = vpop.f32.mrf.mxu1  ;;  %v3740_v17 = vadd.f32 %v3739_v36, %v3721_v19  ;;  %v12985_v44 = vld [vmem:[#allocation6 + $0x150] sm:$0xff]  ;;  %v13000_v36 = vld [vmem:[#allocation6 + $0x1c8] sm:$0xff] }
 0x20d   :  { %6076 = vmatpush.bf16.msrb.mxu3 %v13004_v52  ;;  %v3685_v1 = vadd.f32 %v3684_v8, %v14190_v38 }
 0x20e   :  { %6020 = vmatpush.bf16.msrb.mxu0 %v12979_v41  ;;  %v3998_v8 = vmax.f32 %v3740_v17, 0.0 }
 0x20f   :  { %6039 = vmatpush.bf16.msrb.mxu1 %v12987_v23  ;;  %v3704_v25 = vadd.f32 %v3703_v61, %v3685_v1  ;;  %v12976_v23 = vld [vmem:[#allocation6 + $0x108] sm:$0xff]  ;;  %v12991_v1 = vld [vmem:[#allocation6 + $0x180] sm:$0xff] }
 0x210   :  { %6058 = vmatpush.bf16.msrb.mxu2 %v12995_v18 }
 0x211   :  { %6077 = vmatpush.bf16.msrb.mxu3 %v13003_v34  ;;  %v4025_v62 = vmax.f32 %v3704_v25, 0.0  ;;  %v3722_v35 = vpop.f32.mrf.mxu2  ;;  %v3741_v52 = vpop.f32.mrf.mxu3  ;;  %5954 = vmatmul.bf16.gmra.mxu0 %v13831_v58 }
 0x212   :  { %6021 = vmatpush.bf16.msrb.mxu0 %v12978_v28  ;;  %v3723_v15 = vadd.f32 %v3722_v35, %v14201_v60  ;;  %5973 = vmatmul.bf16.gmra.mxu1 %v13845_v26  ;;  %v13038_v35 = vld [vmem:[#allocation6 + $0x2f8] sm:$0xff] }
 0x213   :  { %6040 = vmatpush.bf16.msrb.mxu1 %v12986_v29  ;;  %v14207_v14 = vpack.c.bf16 %v4025_v62, %v3997_v55  ;;  %5992 = vmatmul.bf16.gmra.mxu2 %v13873_v40  ;;  %v12983_v29 = vld [vmem:[#allocation6 + $0x140] sm:$0xff]  ;;  %v13030_v62 = vld [vmem:[#allocation6 + $0x2b8] sm:$0xff] }
 0x214   :  { %6059 = vmatpush.bf16.msrb.mxu2 %v12994_v20  ;;  %v3687_v57 = vpop.f32.mrf.mxu0  ;;  %v3706_v18 = vpop.f32.mrf.mxu1  ;;  %v3742_v34 = vadd.f32 %v3741_v52, %v3723_v15  ;;  %6011 = vmatmul.bf16.gmra.mxu3 %v13887_v13  ;;  %v12975_v20 = vld [vmem:[#allocation6 + $0x100] sm:$0xff] }
 0x215   :  { %6078 = vmatpush.bf16.msrb.mxu3 %v13002_v47  ;;  %v3688_v41 = vadd.f32 %v3687_v57, %v14190_v38  ;;  %v12999_v47 = vld [vmem:[#allocation6 + $0x1c0] sm:$0xff] }
 0x216   :  { %6022 = vmatpush.bf16.msrb.mxu0 %v12977_v45  ;;  %v4026_v61 = vmax.f32 %v3742_v34, 0.0 }
 0x217   :  { %6041 = vmatpush.bf16.msrb.mxu1 %v12985_v44  ;;  %v3707_v19 = vadd.f32 %v3706_v18, %v3688_v41  ;;  %v13029_v18 = vld [vmem:[#allocation6 + $0x2b0] sm:$0xff] }
 0x218   :  { %6060 = vmatpush.bf16.msrb.mxu2 %v12993_v6  ;;  %v14215_v28 = vpack.c.bf16 %v4026_v61, %v3998_v8  ;;  %v13014_v6 = vld [vmem:[#allocation6 + $0x238] sm:$0xff]  ;;  %v13013_v41 = vld [vmem:[#allocation6 + $0x230] sm:$0xff] }
 0x219   :  { %6079 = vmatpush.bf16.msrb.mxu3 %v13001_v51  ;;  %v3725_v25 = vpop.f32.mrf.mxu2  ;;  %v3744_v55 = vpop.f32.mrf.mxu3  ;;  %v13022_v51 = vld [vmem:[#allocation6 + $0x278] sm:$0xff]  ;;  %v4053_v34 = vmax.f32 %v3707_v19, 0.0  ;;  %v13012_v19 = vld [vmem:[#allocation6 + $0x228] sm:$0xff] }
 0x21a   :  { %6023 = vmatpush.bf16.msrb.mxu0 %v12976_v23  ;;  %v3726_v17 = vadd.f32 %v3725_v25, %v14201_v60  ;;  %v13037_v23 = vld [vmem:[#allocation6 + $0x2f0] sm:$0xff]  ;;  %v13028_v25 = vld [vmem:[#allocation6 + $0x2a8] sm:$0xff] }
 0x21b   :  { %6042 = vmatpush.bf16.msrb.mxu1 %v12984_v39 }
 0x21c   :  { %6061 = vmatpush.bf16.msrb.mxu2 %v12992_v2  ;;  %v3689_v45 = vpop.f32.mrf.mxu0  ;;  %v3708_v44 = vpop.f32.mrf.mxu1  ;;  %v3745_v15 = vadd.f32 %v3744_v55, %v3726_v17  ;;  %v13021_v2 = vld [vmem:[#allocation6 + $0x270] sm:$0xff] }
 0x21d   :  { %6080 = vmatpush.bf16.msrb.mxu3 %v13000_v36  ;;  %v3690_v52 = vadd.f32 %v3689_v45, %v14190_v38  ;;  %v14220_v36 = vperm.slane %v14115_v5, 6 }
 0x21e   :  { %6024 = vmatpush.bf16.msrb.mxu0 %v12975_v20  ;;  %v4054_v45 = vmax.f32 %v3745_v15, 0.0 }
 0x21f   :  { %6043 = vmatpush.bf16.msrb.mxu1 %v12983_v29  ;;  %v3709_v57 = vadd.f32 %v3708_v44, %v3690_v52  ;;  %v13019_v52 = vld [vmem:[#allocation6 + $0x260] sm:$0xff] }
 0x220   :  { %6062 = vmatpush.bf16.msrb.mxu2 %v12991_v1 }
 0x221   :  { %6081 = vmatpush.bf16.msrb.mxu3 %v12999_v47  ;;  %v4081_v39 = vmax.f32 %v3709_v57, 0.0  ;;  %v3727_v38 = vpop.f32.mrf.mxu2  ;;  %v3746_v8 = vpop.f32.mrf.mxu3  ;;  %6025 = vmatmul.bf16.vlgmr.msrb.gmra.mxu0 %v13894_v50  ;;  %v13035_v57 = vld [vmem:[#allocation6 + $0x2e0] sm:$0xff] }
 0x222   :  { %6093 = vmatpush.bf16.msra.mxu0 %v13014_v6  ;;  %v3728_v1 = vadd.f32 %v3727_v38, %v14201_v60  ;;  %v13036_v6 = vld [vmem:[#allocation6 + $0x2e8] sm:$0xff]  ;;  %6044 = vmatmul.bf16.vlgmr.msrb.gmra.mxu1 %v13905_v42  ;;  %v14231_v60 = vperm.slane %v14115_v5, 7  ;;  %v13026_v5 = vld [vmem:[#allocation6 + $0x298] sm:$0xff] }
 0x223   :  { %6112 = vmatpush.bf16.msra.mxu1 %v13022_v51  ;;  %v14222_v61 = vpack.c.bf16 %v4081_v39, %v4053_v34  ;;  %6063 = vmatmul.bf16.vlgmr.msrb.gmra.mxu2 %v13934_v53  ;;  %v13027_v51 = vld [vmem:[#allocation6 + $0x2a0] sm:$0xff]  ;;  %v13010_v38 = vld [vmem:[#allocation6 + $0x218] sm:$0xff] }
 0x224   :  { %6131 = vmatpush.bf16.msra.mxu2 %v13030_v62  ;;  %v3758_v20 = vpop.f32.mrf.mxu0  ;;  %v3777_v29 = vpop.f32.mrf.mxu1  ;;  %v3747_v55 = vadd.f32 %v3746_v8, %v3728_v1  ;;  %v13020_v62 = vld [vmem:[#allocation6 + $0x268] sm:$0xff]  ;;  %6082 = vmatmul.bf16.vlgmr.msrb.gmra.mxu3 %v13945_v43  ;;  %v13018_v1 = vld [vmem:[#allocation6 + $0x258] sm:$0xff] }
 0x225   :  { %6150 = vmatpush.bf16.msra.mxu3 %v13038_v35  ;;  %v3759_v47 = vadd.f32 %v3758_v20, %v14220_v36  ;;  %v13011_v35 = vld [vmem:[#allocation6 + $0x220] sm:$0xff]  ;;  %v13034_v20 = vld [vmem:[#allocation6 + $0x2d8] sm:$0xff] }
 0x226   :  { %6094 = vmatpush.bf16.msra.mxu0 %v13013_v41  ;;  %v4082_v44 = vmax.f32 %v3747_v55, 0.0  ;;  %v13009_v55 = vld [vmem:[#allocation6 + $0x210] sm:$0xff] }
 0x227   :  { %6113 = vmatpush.bf16.msra.mxu1 %v13021_v2  ;;  %v3778_v17 = vadd.f32 %v3777_v29, %v3759_v47 }
 0x228   :  { %6132 = vmatpush.bf16.msra.mxu2 %v13029_v18  ;;  %v14233_v18 = vpack.c.bf16 %v4082_v44, %v4054_v45 }
 0x229   :  { %6151 = vmatpush.bf16.msra.mxu3 %v13037_v23  ;;  %v3796_v41 = vpop.f32.mrf.mxu2  ;;  %v3815_v15 = vpop.f32.mrf.mxu3  ;;  %v3999_v47 = vmax.f32 %v3778_v17, 0.0  ;;  %v13024_v17 = vld [vmem:[#allocation6 + $0x288] sm:$0xff] }
 0x22a   :  { %6095 = vmatpush.bf16.msra.mxu0 %v13012_v19  ;;  %v3797_v2 = vadd.f32 %v3796_v41, %v14231_v60  ;;  %v13025_v19 = vld [vmem:[#allocation6 + $0x290] sm:$0xff] }
 0x22b   :  { %6114 = vmatpush.bf16.msra.mxu1 %v13020_v62  ;;  %v13017_v62 = vld [vmem:[#allocation6 + $0x250] sm:$0xff] }
 0x22c   :  { %6133 = vmatpush.bf16.msra.mxu2 %v13028_v25  ;;  %v3760_v23 = vpop.f32.mrf.mxu0  ;;  %v3779_v34 = vpop.f32.mrf.mxu1  ;;  %v3816_v8 = vadd.f32 %v3815_v15, %v3797_v2  ;;  %v13008_v15 = vld [vmem:[#allocation6 + $0x208] sm:$0xff] }
 0x22d   :  { %6152 = vmatpush.bf16.msra.mxu3 %v13036_v6  ;;  %v3761_v39 = vadd.f32 %v3760_v23, %v14220_v36  ;;  %v13033_v6 = vld [vmem:[#allocation6 + $0x2d0] sm:$0xff]  ;;  %v13016_v23 = vld [vmem:[#allocation6 + $0x248] sm:$0xff] }
 0x22e   :  { %6096 = vmatpush.bf16.msra.mxu0 %v13011_v35 }
 0x22f   :  { %6115 = vmatpush.bf16.msra.mxu1 %v13019_v52  ;;  %v3780_v29 = vadd.f32 %v3779_v34, %v3761_v39  ;;  %v13032_v34 = vld [vmem:[#allocation6 + $0x2c8] sm:$0xff] }
 0x230   :  { %6134 = vmatpush.bf16.msra.mxu2 %v13027_v51 }
 0x231   :  { %6153 = vmatpush.bf16.msra.mxu3 %v13035_v57  ;;  %v4027_v25 = vmax.f32 %v3780_v29, 0.0  ;;  %v3798_v44 = vpop.f32.mrf.mxu2  ;;  %v3817_v51 = vpop.f32.mrf.mxu3  ;;  %6030 = vmatmul.bf16.gmra.mxu0 %v13914_v27 }
 0x232   :  { %6097 = vmatpush.bf16.msra.mxu0 %v13010_v38  ;;  %v3799_v35 = vadd.f32 %v3798_v44, %v14231_v60  ;;  %6049 = vmatmul.bf16.gmra.mxu1 %v13927_v3 }
 0x233   :  { %6116 = vmatpush.bf16.msra.mxu1 %v13018_v1  ;;  %v14237_v45 = vpack.c.bf16 %v4027_v25, %v3999_v47  ;;  %6068 = vmatmul.bf16.gmra.mxu2 %v13957_v32  ;;  %v13023_v1 = vld [vmem:[#allocation6 + $0x280] sm:$0xff] }
 0x234   :  { %6135 = vmatpush.bf16.msra.mxu2 %v13026_v5  ;;  %v3763_v52 = vpop.f32.mrf.mxu0  ;;  %v3782_v57 = vpop.f32.mrf.mxu1  ;;  %v3818_v2 = vadd.f32 %v3817_v51, %v3799_v35  ;;  %v4000_v5 = vmax.f32 %v3816_v8, 0.0  ;;  %6087 = vmatmul.bf16.gmra.mxu3 %v13971_v12  ;;  %v13015_v47 = vld [vmem:[#allocation6 + $0x240] sm:$0xff]  ;;  %v13054_v35 = vld [vmem:[#allocation6 + $0x378] sm:$0xff] }
 0x235   :  { %6154 = vmatpush.bf16.msra.mxu3 %v13034_v20  ;;  %v3764_v41 = vadd.f32 %v3763_v52, %v14220_v36  ;;  %v13007_v20 = vld [vmem:[#allocation6 + $0x200] sm:$0xff]  ;;  %v13070_v52 = vld [vmem:[#allocation6 + $0x3f8] sm:$0xff] }
 0x236   :  { %6098 = vmatpush.bf16.msra.mxu0 %v13009_v55  ;;  %v4028_v38 = vmax.f32 %v3818_v2, 0.0  ;;  %v13031_v25 = vld [vmem:[#allocation6 + $0x2c0] sm:$0xff]  ;;  %v13061_v2 = vld [vmem:[#allocation6 + $0x3b0] sm:$0xff] }
 0x237   :  { %6117 = vmatpush.bf16.msra.mxu1 %v13017_v62  ;;  %v3783_v39 = vadd.f32 %v3782_v57, %v3764_v41  ;;  %v13062_v62 = vld [vmem:[#allocation6 + $0x3b8] sm:$0xff] }
 0x238   :  { %6136 = vmatpush.bf16.msra.mxu2 %v13025_v19  ;;  %v14245_v29 = vpack.c.bf16 %v4028_v38, %v4000_v5  ;;  %v13069_v5 = vld [vmem:[#allocation6 + $0x3f0] sm:$0xff] }
 0x239   :  { %6155 = vmatpush.bf16.msra.mxu3 %v13033_v6  ;;  %v3801_v19 = vpop.f32.mrf.mxu2  ;;  %v3820_v55 = vpop.f32.mrf.mxu3  ;;  %v13046_v6 = vld [vmem:[#allocation6 + $0x338] sm:$0xff]  ;;  %v4055_v38 = vmax.f32 %v3783_v39, 0.0  ;;  %v13044_v39 = vld [vmem:[#allocation6 + $0x328] sm:$0xff] }
 0x23a   :  { %6099 = vmatpush.bf16.msra.mxu0 %v13008_v15  ;;  %v3802_v8 = vadd.f32 %v3801_v19, %v14231_v60 }
 0x23b   :  { %6118 = vmatpush.bf16.msra.mxu1 %v13016_v23  ;;  %v13045_v23 = vld [vmem:[#allocation6 + $0x330] sm:$0xff] }
 0x23c   :  { %6137 = vmatpush.bf16.msra.mxu2 %v13024_v17  ;;  %v3765_v44 = vpop.f32.mrf.mxu0  ;;  %v3784_v51 = vpop.f32.mrf.mxu1  ;;  %v3821_v41 = vadd.f32 %v3820_v55, %v3802_v8  ;;  %v14249_v17 = vld [vmem:[#allocation4 + $0x18] sm:$0xf]  ;;  %v13060_v8 = vld [vmem:[#allocation6 + $0x3a8] sm:$0xff] }
 0x23d   :  { %6156 = vmatpush.bf16.msra.mxu3 %v13032_v34  ;;  %v3766_v57 = vadd.f32 %v3765_v44, %v14220_v36  ;;  %v13053_v34 = vld [vmem:[#allocation6 + $0x370] sm:$0xff]  ;;  %v14252_v36 = vperm.slane %v14249_v17, 0 }
 0x23e   :  { %6100 = vmatpush.bf16.msra.mxu0 %v13007_v20 }
 0x23f   :  { %6119 = vmatpush.bf16.msra.mxu1 %v13015_v47  ;;  %v3785_v15 = vadd.f32 %v3784_v51, %v3766_v57  ;;  %v13052_v51 = vld [vmem:[#allocation6 + $0x368] sm:$0xff]  ;;  %v4056_v57 = vmax.f32 %v3821_v41, 0.0 }
 0x240   :  { %6138 = vmatpush.bf16.msra.mxu2 %v13023_v1 }
 0x241   :  { %6157 = vmatpush.bf16.msra.mxu3 %v13031_v25  ;;  %v4083_v19 = vmax.f32 %v3785_v15, 0.0  ;;  %v3803_v1 = vpop.f32.mrf.mxu2  ;;  %v3822_v20 = vpop.f32.mrf.mxu3  ;;  %6101 = vmatmul.bf16.vlgmr.msra.gmra.mxu0 %v13978_v4 }
 0x242   :  { %6169 = vmatpush.bf16.msrb.mxu0 %v13046_v6  ;;  %v3804_v25 = vadd.f32 %v3803_v1, %v14231_v60  ;;  %6120 = vmatmul.bf16.vlgmr.msra.gmra.mxu1 %v13989_v59  ;;  %v14263_v60 = vperm.slane %v14249_v17, 1  ;;  %v14311_v59 = vld [vmem:[#allocation7] ss:$0 sm:$0xff] }
 0x243   :  { %6188 = vmatpush.bf16.msrb.mxu1 %v13054_v35  ;;  %v14254_v47 = vpack.c.bf16 %v4083_v19, %v4055_v38  ;;  %v13068_v35 = vld [vmem:[#allocation6 + $0x3e8] sm:$0xff]  ;;  %6139 = vmatmul.bf16.vlgmr.msra.gmra.mxu2 %v14020_v31 }
 0x244   :  { %6207 = vmatpush.bf16.msrb.mxu2 %v13062_v62  ;;  %v3834_v55 = vpop.f32.mrf.mxu0  ;;  %v3853_v62 = vpop.f32.mrf.mxu1  ;;  %v3823_v44 = vadd.f32 %v3822_v20, %v3804_v25  ;;  %6158 = vmatmul.bf16.vlgmr.msra.gmra.mxu3 %v14031_v46  ;;  %v13049_v46 = vld [vmem:[#allocation6 + $0x350] sm:$0xff] }
 0x245   :  { %6226 = vmatpush.bf16.msrb.mxu3 %v13070_v52  ;;  %v3835_v6 = vadd.f32 %v3834_v55, %v14252_v36 }
 0x246   :  { %6170 = vmatpush.bf16.msrb.mxu0 %v13045_v23  ;;  %v4084_v15 = vmax.f32 %v3823_v44, 0.0  ;;  %v13043_v23 = vld [vmem:[#allocation6 + $0x320] sm:$0xff]  ;;  %v13066_v44 = vld [vmem:[#allocation6 + $0x3d8] sm:$0xff] }
 0x247   :  { %6189 = vmatpush.bf16.msrb.mxu1 %v13053_v34  ;;  %v3854_v52 = vadd.f32 %v3853_v62, %v3835_v6  ;;  %v13051_v34 = vld [vmem:[#allocation6 + $0x360] sm:$0xff]  ;;  %v13058_v62 = vld [vmem:[#allocation6 + $0x398] sm:$0xff] }
 0x248   :  { %6208 = vmatpush.bf16.msrb.mxu2 %v13061_v2  ;;  %v13059_v2 = vld [vmem:[#allocation6 + $0x3a0] sm:$0xff]  ;;  %v14265_v38 = vpack.c.bf16 %v4084_v15, %v4056_v57  ;;  %v13042_v6 = vld [vmem:[#allocation6 + $0x318] sm:$0xff]  ;;  %v13057_v15 = vld [vmem:[#allocation6 + $0x390] sm:$0xff] }
 0x249   :  { %6227 = vmatpush.bf16.msrb.mxu3 %v13069_v5  ;;  %v13067_v5 = vld [vmem:[#allocation6 + $0x3e0] sm:$0xff]  ;;  %v3872_v19 = vpop.f32.mrf.mxu2  ;;  %v3891_v41 = vpop.f32.mrf.mxu3 }
 0x24a   :  { %6171 = vmatpush.bf16.msrb.mxu0 %v13044_v39  ;;  %v3873_v1 = vadd.f32 %v3872_v19, %v14263_v60  ;;  %v13050_v39 = vld [vmem:[#allocation6 + $0x358] sm:$0xff]  ;;  %v13041_v19 = vld [vmem:[#allocation6 + $0x310] sm:$0xff] }
 0x24b   :  { %6190 = vmatpush.bf16.msrb.mxu1 %v13052_v51 }
 0x24c   :  { %6209 = vmatpush.bf16.msrb.mxu2 %v13060_v8  ;;  %v3836_v20 = vpop.f32.mrf.mxu0  ;;  %v3855_v25 = vpop.f32.mrf.mxu1  ;;  %v3892_v8 = vadd.f32 %v3891_v41, %v3873_v1 }
 0x24d   :  { %6228 = vmatpush.bf16.msrb.mxu3 %v13068_v35  ;;  %v3837_v55 = vadd.f32 %v3836_v20, %v14252_v36  ;;  %v4001_v35 = vmax.f32 %v3854_v52, 0.0  ;;  %v13065_v20 = vld [vmem:[#allocation6 + $0x3d0] sm:$0xff]  ;;  %v13056_v52 = vld [vmem:[#allocation6 + $0x388] sm:$0xff] }
 0x24e   :  { %6172 = vmatpush.bf16.msrb.mxu0 %v13043_v23 }
 0x24f   :  { %6191 = vmatpush.bf16.msrb.mxu1 %v13051_v34  ;;  %v3856_v51 = vadd.f32 %v3855_v25, %v3837_v55  ;;  %v13040_v25 = vld [vmem:[#allocation6 + $0x308] sm:$0xff] }
 0x250   :  { %6210 = vmatpush.bf16.msrb.mxu2 %v13059_v2 }
 0x251   :  { %6229 = vmatpush.bf16.msrb.mxu3 %v13067_v5  ;;  %v4029_v57 = vmax.f32 %v3856_v51, 0.0  ;;  %v3874_v23 = vpop.f32.mrf.mxu2  ;;  %v3893_v31 = vpop.f32.mrf.mxu3  ;;  %6106 = vmatmul.bf16.gmra.mxu0 %v13999_v63  ;;  %v14282_v63 = vperm.slane %v14249_v17, 2 }
 0x252   :  { %6173 = vmatpush.bf16.msrb.mxu0 %v13042_v6  ;;  %v3875_v34 = vadd.f32 %v3874_v23, %v14263_v60  ;;  %v13064_v6 = vld [vmem:[#allocation6 + $0x3c8] sm:$0xff]  ;;  %6125 = vmatmul.bf16.gmra.mxu1 %v14013_v0 }
 0x253   :  { %6192 = vmatpush.bf16.msrb.mxu1 %v13050_v39  ;;  %v14269_v2 = vpack.c.bf16 %v4029_v57, %v4001_v35  ;;  %6144 = vmatmul.bf16.gmra.mxu2 %v14041_v54  ;;  %v14722_v35 = vld [vmem:[#allocation24_spill] sm:$0xff] }
 0x254   :  { %6211 = vmatpush.bf16.msrb.mxu2 %v13058_v62  ;;  %v3839_v5 = vpop.f32.mrf.mxu0  ;;  %v3858_v41 = vpop.f32.mrf.mxu1  ;;  %v3894_v55 = vadd.f32 %v3893_v31, %v3875_v34  ;;  %v13048_v62 = vld [vmem:[#allocation6 + $0x348] sm:$0xff]  ;;  %6163 = vmatmul.bf16.gmra.mxu3 %v14722_v35  ;;  %v13055_v57 = vld [vmem:[#allocation6 + $0x380] sm:$0xff]  ;;  %v13094_v34 = vld [vmem:[#allocation6 + $0x4b8] sm:$0xff] }
 0x255   :  { %6230 = vmatpush.bf16.msrb.mxu3 %v13066_v44  ;;  %v3840_v1 = vadd.f32 %v3839_v5, %v14252_v36  ;;  %v4002_v44 = vmax.f32 %v3892_v8, 0.0  ;;  %v13078_v5 = vld [vmem:[#allocation6 + $0x438] sm:$0xff] }
 0x256   :  { %6174 = vmatpush.bf16.msrb.mxu0 %v13041_v19  ;;  %v4030_v51 = vmax.f32 %v3894_v55, 0.0  ;;  %v13063_v19 = vld [vmem:[#allocation6 + $0x3c0] sm:$0xff]  ;;  %v13086_v55 = vld [vmem:[#allocation6 + $0x478] sm:$0xff] }
 0x257   :  { %6193 = vmatpush.bf16.msrb.mxu1 %v13049_v46  ;;  %v3859_v39 = vadd.f32 %v3858_v41, %v3840_v1  ;;  %v13047_v46 = vld [vmem:[#allocation6 + $0x340] sm:$0xff]  ;;  %v13102_v35 = vld [vmem:[#allocation6 + $0x4f8] sm:$0xff] }
 0x258   :  { %6212 = vmatpush.bf16.msrb.mxu2 %v13057_v15  ;;  %v13039_v15 = vld [vmem:[#allocation6 + $0x300] sm:$0xff]  ;;  %v14277_v31 = vpack.c.bf16 %v4030_v51, %v4002_v44  ;;  %v13077_v44 = vld [vmem:[#allocation6 + $0x430] sm:$0xff] }
 0x259   :  { %6231 = vmatpush.bf16.msrb.mxu3 %v13065_v20  ;;  %v3877_v20 = vpop.f32.mrf.mxu2  ;;  %v3896_v23 = vpop.f32.mrf.mxu3  ;;  %v13085_v51 = vld [vmem:[#allocation6 + $0x470] sm:$0xff]  ;;  %v4057_v54 = vmax.f32 %v3859_v39, 0.0  ;;  %v13076_v39 = vld [vmem:[#allocation6 + $0x428] sm:$0xff] }
 0x25a   :  { %6175 = vmatpush.bf16.msrb.mxu0 %v13040_v25  ;;  %v3878_v8 = vadd.f32 %v3877_v20, %v14263_v60  ;;  %v13101_v20 = vld [vmem:[#allocation6 + $0x4f0] sm:$0xff] }
 0x25b   :  { %6194 = vmatpush.bf16.msrb.mxu1 %v13048_v62 }
 0x25c   :  { %6213 = vmatpush.bf16.msrb.mxu2 %v13056_v52  ;;  %v3841_v41 = vpop.f32.mrf.mxu0  ;;  %v3860_v1 = vpop.f32.mrf.mxu1  ;;  %v3897_v25 = vadd.f32 %v3896_v23, %v3878_v8  ;;  %v13084_v8 = vld [vmem:[#allocation6 + $0x468] sm:$0xff] }
 0x25d   :  { %6232 = vmatpush.bf16.msrb.mxu3 %v13064_v6  ;;  %v3842_v52 = vadd.f32 %v3841_v41, %v14252_v36  ;;  %v13093_v6 = vld [vmem:[#allocation6 + $0x4b0] sm:$0xff]  ;;  %v13100_v41 = vld [vmem:[#allocation6 + $0x4e8] sm:$0xff] }
 0x25e   :  { %6176 = vmatpush.bf16.msrb.mxu0 %v13039_v15 }
 0x25f   :  { %6195 = vmatpush.bf16.msrb.mxu1 %v13047_v46  ;;  %v3861_v62 = vadd.f32 %v3860_v1, %v3842_v52  ;;  %v14724_v52 = vld [vmem:[#allocation29_spill] sm:$0xff] }
 0x260   :  { %6214 = vmatpush.bf16.msrb.mxu2 %v13055_v57 }
 0x261   :  { %6233 = vmatpush.bf16.msrb.mxu3 %v13063_v19  ;;  %v4085_v0 = vmax.f32 %v3861_v62, 0.0  ;;  %v3879_v36 = vpop.f32.mrf.mxu2  ;;  %v3898_v57 = vpop.f32.mrf.mxu3  ;;  %v13091_v62 = vld [vmem:[#allocation6 + $0x4a0] sm:$0xff] }
 0x262   :  { %6245 = vmatpush.bf16.msra.mxu0 %v13078_v5  ;;  %v3880_v46 = vadd.f32 %v3879_v36, %v14263_v60  ;;  %6196 = vmatmul.bf16.vlgmr.msrb.gmra.mxu1 %v14073_v7  ;;  %v14293_v60 = vperm.slane %v14249_v17, 3  ;;  %v13090_v17 = vld [vmem:[#allocation6 + $0x498] sm:$0xff] }
 0x263   :  { %6264 = vmatpush.bf16.msra.mxu1 %v13086_v55  ;;  %v14284_v15 = vpack.c.bf16 %v4085_v0, %v4057_v54  ;;  %v14723_v55 = vld [vmem:[#allocation25_spill] sm:$0xff]  ;;  %v4058_v0 = vmax.f32 %v3897_v25, 0.0  ;;  %6215 = vmatmul.bf16.vlgmr.msrb.gmra.mxu2 %v14724_v52  ;;  %v14728_v7 = vld [vmem:[#allocation32_spill] sm:$0xff] }
 0x264   :  { %6283 = vmatpush.bf16.msra.mxu2 %v13094_v34  ;;  %v3910_v19 = vpop.f32.mrf.mxu0  ;;  %v3929_v23 = vpop.f32.mrf.mxu1  ;;  %v13092_v34 = vld [vmem:[#allocation6 + $0x4a8] sm:$0xff]  ;;  %v3899_v5 = vadd.f32 %v3898_v57, %v3880_v46  ;;  %6177 = vmatmul.bf16.vlgmr.msrb.gmra.mxu0 %v14723_v55 }
 0x265   :  { %6302 = vmatpush.bf16.msra.mxu3 %v13102_v35  ;;  %v3911_v35 = vadd.f32 %v3910_v19, %v14282_v63 }
 0x266   :  { %6246 = vmatpush.bf16.msra.mxu0 %v13077_v44  ;;  %v4086_v54 = vmax.f32 %v3899_v5, 0.0  ;;  %6234 = vmatmul.bf16.vlgmr.msrb.gmra.mxu3 %v14113_v21  ;;  %v13083_v44 = vld [vmem:[#allocation6 + $0x460] sm:$0xff]  ;;  %v13098_v5 = vld [vmem:[#allocation6 + $0x4d8] sm:$0xff]  ;;  %v13081_v21 = vld [vmem:[#allocation6 + $0x450] sm:$0xff] }
 0x267   :  { %6265 = vmatpush.bf16.msra.mxu1 %v13085_v51  ;;  %v3930_v1 = vadd.f32 %v3929_v23, %v3911_v35  ;;  %v13099_v51 = vld [vmem:[#allocation6 + $0x4e0] sm:$0xff]  ;;  %v13074_v35 = vld [vmem:[#allocation6 + $0x418] sm:$0xff] }
 0x268   :  { %6284 = vmatpush.bf16.msra.mxu2 %v13093_v6  ;;  %v13075_v6 = vld [vmem:[#allocation6 + $0x420] sm:$0xff] }
 0x269   :  { %6303 = vmatpush.bf16.msra.mxu3 %v13101_v20  ;;  %v14295_v20 = vpack.c.bf16 %v4086_v54, %v4058_v0  ;;  %v3948_v36 = vpop.f32.mrf.mxu2  ;;  %v3967_v25 = vpop.f32.mrf.mxu3  ;;  %v13089_v54 = vld [vmem:[#allocation6 + $0x490] sm:$0xff] }
 0x26a   :  { %6247 = vmatpush.bf16.msra.mxu0 %v13076_v39  ;;  %v3949_v57 = vadd.f32 %v3948_v36, %v14293_v60  ;;  %v13082_v39 = vld [vmem:[#allocation6 + $0x458] sm:$0xff]  ;;  %v13073_v36 = vld [vmem:[#allocation6 + $0x410] sm:$0xff] }
 0x26b   :  { %6266 = vmatpush.bf16.msra.mxu1 %v13084_v8 }
 0x26c   :  { %6285 = vmatpush.bf16.msra.mxu2 %v13092_v34  ;;  %v3912_v46 = vpop.f32.mrf.mxu0  ;;  %v3931_v19 = vpop.f32.mrf.mxu1  ;;  %v3968_v34 = vadd.f32 %v3967_v25, %v3949_v57 }
 0x26d   :  { %6304 = vmatpush.bf16.msra.mxu3 %v13100_v41  ;;  %v3913_v23 = vadd.f32 %v3912_v46, %v14282_v63  ;;  %v4003_v41 = vmax.f32 %v3930_v1, 0.0  ;;  %v13097_v46 = vld [vmem:[#allocation6 + $0x4d0] sm:$0xff]  ;;  %v13088_v1 = vld [vmem:[#allocation6 + $0x488] sm:$0xff] }
 0x26e   :  { %6248 = vmatpush.bf16.msra.mxu0 %v13075_v6 }
 0x26f   :  { %6267 = vmatpush.bf16.msra.mxu1 %v13083_v44  ;;  %v3932_v8 = vadd.f32 %v3931_v19, %v3913_v23  ;;  %v13072_v19 = vld [vmem:[#allocation6 + $0x408] sm:$0xff] }
 0x270   :  { %6286 = vmatpush.bf16.msra.mxu2 %v13091_v62 }
 0x271   :  { %6305 = vmatpush.bf16.msra.mxu3 %v13099_v51  ;;  %v4031_v0 = vmax.f32 %v3932_v8, 0.0  ;;  %v3950_v6 = vpop.f32.mrf.mxu2  ;;  %v3969_v52 = vpop.f32.mrf.mxu3  ;;  %v14726_v8 = vld [vmem:[#allocation28_spill] sm:$0xff] }
 0x272   :  { %6249 = vmatpush.bf16.msra.mxu0 %v13074_v35  ;;  %v3951_v44 = vadd.f32 %v3950_v6, %v14293_v60  ;;  %v13096_v35 = vld [vmem:[#allocation6 + $0x4c8] sm:$0xff]  ;;  %6201 = vmatmul.bf16.gmra.mxu1 %v14726_v8  ;;  %v14727_v6 = vld [vmem:[#allocation31_spill] sm:$0xff] }
 0x273   :  { %6268 = vmatpush.bf16.msra.mxu1 %v13082_v39  ;;  %v14299_v62 = vpack.c.bf16 %v4031_v0, %v4003_v41  ;;  %v4004_v41 = vmax.f32 %v3968_v34, 0.0  ;;  %6220 = vmatmul.bf16.gmra.mxu2 %v14727_v6  ;;  %v13118_v8 = vld [vmem:[#allocation6 + $0x578] sm:$0xff] }
 0x274   :  { %6287 = vmatpush.bf16.msra.mxu2 %v13090_v17  ;;  %v3915_v51 = vpop.f32.mrf.mxu0  ;;  %v3934_v25 = vpop.f32.mrf.mxu1  ;;  %v3970_v23 = vadd.f32 %v3969_v52, %v3951_v44  ;;  %v13080_v17 = vld [vmem:[#allocation6 + $0x448] sm:$0xff] }
 0x275   :  { %6306 = vmatpush.bf16.msra.mxu3 %v13098_v5  ;;  %v3916_v57 = vadd.f32 %v3915_v51, %v14282_v63  ;;  %v14725_v5 = vld [vmem:[#allocation27_spill] sm:$0xff] }
 0x276   :  { %6250 = vmatpush.bf16.msra.mxu0 %v13073_v36  ;;  %v4032_v0 = vmax.f32 %v3970_v23, 0.0  ;;  %6239 = vmatmul.bf16.gmra.mxu3 %v14728_v7  ;;  %v13071_v36 = vld [vmem:[#allocation6 + $0x400] sm:$0xff]  ;;  %v13134_v7 = vld [vmem:[#allocation6 + $0x5f8] sm:$0xff] }
 0x277   :  { %6269 = vmatpush.bf16.msra.mxu1 %v13081_v21  ;;  %v3935_v39 = vadd.f32 %v3934_v25, %v3916_v57  ;;  %6182 = vmatmul.bf16.gmra.mxu0 %v14725_v5  ;;  %v13079_v21 = vld [vmem:[#allocation6 + $0x440] sm:$0xff]  ;;  %v13126_v25 = vld [vmem:[#allocation6 + $0x5b8] sm:$0xff] }
 0x278   :  { %6288 = vmatpush.bf16.msra.mxu2 %v13089_v54  ;;  %v13087_v54 = vld [vmem:[#allocation6 + $0x480] sm:$0xff]  ;;  %v14307_v52 = vpack.c.bf16 %v4032_v0, %v4004_v41  ;;  %v13110_v57 = vld [vmem:[#allocation6 + $0x538] sm:$0xff]  ;;  %v13109_v41 = vld [vmem:[#allocation6 + $0x530] sm:$0xff] }
 0x279   :  { %6307 = vmatpush.bf16.msra.mxu3 %v13097_v46  ;;  %v13095_v46 = vld [vmem:[#allocation6 + $0x4c0] sm:$0xff]  ;;  %v3953_v44 = vpop.f32.mrf.mxu2  ;;  %v3972_v51 = vpop.f32.mrf.mxu3  ;;  %v13117_v0 = vld [vmem:[#allocation6 + $0x570] sm:$0xff]  ;;  %v4059_v5 = vmax.f32 %v3935_v39, 0.0 }
 0x27a   :  { %6251 = vmatpush.bf16.msra.mxu0 %v13072_v19  ;;  %v3954_v34 = vadd.f32 %v3953_v44, %v14293_v60  ;;  %v13133_v44 = vld [vmem:[#allocation6 + $0x5f0] sm:$0xff] }
 0x27b   :  { %6270 = vmatpush.bf16.msra.mxu1 %v13080_v17 }
 0x27c   :  { %6289 = vmatpush.bf16.msra.mxu2 %v13088_v1  ;;  %v3917_v23 = vpop.f32.mrf.mxu0  ;;  %v3936_v6 = vpop.f32.mrf.mxu1  ;;  %v3973_v19 = vadd.f32 %v3972_v51, %v3954_v34  ;;  %v13116_v51 = vld [vmem:[#allocation6 + $0x568] sm:$0xff]  ;;  %v13115_v34 = vld [vmem:[#allocation6 + $0x560] sm:$0xff] }
 0x27d   :  { %6308 = vmatpush.bf16.msra.mxu3 %v13096_v35  ;;  %v3918_v1 = vadd.f32 %v3917_v23, %v14282_v63  ;;  %v13125_v35 = vld [vmem:[#allocation6 + $0x5b0] sm:$0xff]  ;;  %v13131_v23 = vld [vmem:[#allocation6 + $0x5e0] sm:$0xff] }
 0x27e   :  { %6252 = vmatpush.bf16.msra.mxu0 %v13071_v36 }
 0x27f   :  { %6271 = vmatpush.bf16.msra.mxu1 %v13079_v21  ;;  %v3937_v17 = vadd.f32 %v3936_v6, %v3918_v1 }
 0x280   :  { %6290 = vmatpush.bf16.msra.mxu2 %v13087_v54 }
 0x281   :  { %6309 = vmatpush.bf16.msra.mxu3 %v13095_v46  ;;  %v4087_v55 = vmax.f32 %v3937_v17, 0.0  ;;  %v3955_v4 = vpop.f32.mrf.mxu2  ;;  %v3974_v63 = vpop.f32.mrf.mxu3  ;;  %v13108_v46 = vld [vmem:[#allocation6 + $0x528] sm:$0xff] }
 0x282   :  { %6321 = vmatpush.bf16.msrb.mxu0 %v13110_v57  ;;  %v3956_v6 = vadd.f32 %v3955_v4, %v14293_v60  ;;  %6272 = vmatmul.bf16.vlgmr.msra.gmra.mxu1 %v14155_v16  ;;  %v13123_v4 = vld [vmem:[#allocation6 + $0x5a0] sm:$0xff] }
 0x283   :  { %6340 = vmatpush.bf16.msrb.mxu1 %v13118_v8  ;;  %v14313_v54 = vpack.c.bf16 %v4087_v55, %v4059_v5  ;;  %v13124_v8 = vld [vmem:[#allocation6 + $0x5a8] sm:$0xff]  ;;  %v4060_v55 = vmax.f32 %v3973_v19, 0.0  ;;  %6291 = vmatmul.bf16.vlgmr.msra.gmra.mxu2 %v14177_v30  ;;  %v13107_v60 = vld [vmem:[#allocation6 + $0x520] sm:$0xff] }
 0x284   :  { %6359 = vmatpush.bf16.msrb.mxu2 %v13126_v25  ;;  %v5950_v36 = vpop.f32.mrf.mxu0  ;;  %v5969_v21 = vpop.f32.mrf.mxu1  ;;  %v3975_v39 = vadd.f32 %v3974_v63, %v3956_v6  ;;  %v13132_v25 = vld [vmem:[#allocation6 + $0x5e8] sm:$0xff]  ;;  %v13122_v63 = vld [vmem:[#allocation6 + $0x598] sm:$0xff] }
 0x285   :  { %6378 = vmatpush.bf16.msrb.mxu3 %v13134_v7  ;;  %v5951_v7 = vadd.f32 %v14311_v59, %v5950_v36  ;;  %v13106_v6 = vld [vmem:[#allocation6 + $0x518] sm:$0xff] }
 0x286   :  { %6322 = vmatpush.bf16.msrb.mxu0 %v13109_v41  ;;  %v4088_v5 = vmax.f32 %v3975_v39, 0.0  ;;  %6310 = vmatmul.bf16.vlgmr.msra.gmra.mxu3 %v14185_v49  ;;  %v13105_v39 = vld [vmem:[#allocation6 + $0x510] sm:$0xff] }
 0x287   :  { %6341 = vmatpush.bf16.msrb.mxu1 %v13117_v0  ;;  %v5970_v57 = vadd.f32 %v5969_v21, %v5951_v7  ;;  %6253 = vmatmul.bf16.vlgmr.msra.gmra.mxu0 %v14146_v10  ;;  %v13114_v21 = vld [vmem:[#allocation6 + $0x558] sm:$0xff] }
 0x288   :  { %6360 = vmatpush.bf16.msrb.mxu2 %v13125_v35  ;;  %v14321_v1 = vpack.c.bf16 %v4088_v5, %v4060_v55  ;;  %v13130_v7 = vld [vmem:[#allocation6 + $0x5d8] sm:$0xff] }
 0x289   :  { %6379 = vmatpush.bf16.msrb.mxu3 %v13133_v44  ;;  %v5988_v17 = vpop.f32.mrf.mxu2  ;;  %v6007_v35 = vpop.f32.mrf.mxu3 }
 0x28a   :  { %6323 = vmatpush.bf16.msrb.mxu0 %v13108_v46  ;;  %14729 = vst [vmem:[#allocation33_spill] sm:$0xff] %v14321_v1  ;;  %v5989_v41 = vadd.f32 %v5988_v17, %v5970_v57  ;;  %v13121_v46 = vld [vmem:[#allocation6 + $0x590] sm:$0xff] }
 0x28b   :  { %6342 = vmatpush.bf16.msrb.mxu1 %v13116_v51  ;;  %v13113_v51 = vld [vmem:[#allocation6 + $0x550] sm:$0xff] }
 0x28c   :  { %6361 = vmatpush.bf16.msrb.mxu2 %v13124_v8  ;;  %v5952_v0 = vpop.f32.mrf.mxu0  ;;  %v5971_v19 = vpop.f32.mrf.mxu1  ;;  %v14324_v36 = vadd.f32 %v6007_v35, %v5989_v41  ;;  %v13112_v41 = vld [vmem:[#allocation6 + $0x548] sm:$0xff] }
 0x28d   :  { %6380 = vmatpush.bf16.msrb.mxu3 %v13132_v25  ;;  %v5953_v44 = vadd.f32 %v14311_v59, %v5952_v0  ;;  %v13129_v25 = vld [vmem:[#allocation6 + $0x5d0] sm:$0xff]  ;;  %v13128_v0 = vld [vmem:[#allocation6 + $0x5c8] sm:$0xff] }
 0x28e   :  { %6324 = vmatpush.bf16.msrb.mxu0 %v13107_v60 }
 0x28f   :  { %6343 = vmatpush.bf16.msrb.mxu1 %v13115_v34  ;;  %v5972_v8 = vadd.f32 %v5971_v19, %v5953_v44  ;;  %v13120_v34 = vld [vmem:[#allocation6 + $0x588] sm:$0xff]  ;;  %v13119_v44 = vld [vmem:[#allocation6 + $0x580] sm:$0xff] }
 0x290   :  { %6362 = vmatpush.bf16.msrb.mxu2 %v13123_v4 }
 0x291   :  { %6381 = vmatpush.bf16.msrb.mxu3 %v13131_v23  ;;  %v5990_v57 = vpop.f32.mrf.mxu2  ;;  %v6009_v55 = vpop.f32.mrf.mxu3  ;;  %v13104_v23 = vld [vmem:[#allocation6 + $0x508] sm:$0xff] }
 0x292   :  { %6325 = vmatpush.bf16.msrb.mxu0 %v13106_v6  ;;  %v5991_v5 = vadd.f32 %v5990_v57, %v5972_v8  ;;  %6277 = vmatmul.bf16.gmra.mxu1 %v14173_v37  ;;  %v13111_v6 = vld [vmem:[#allocation6 + $0x540] sm:$0xff] }
 0x293   :  { %6344 = vmatpush.bf16.msrb.mxu1 %v13114_v21  ;;  %6296 = vmatmul.bf16.gmra.mxu2 %v14192_v48  ;;  %v13127_v21 = vld [vmem:[#allocation6 + $0x5c0] sm:$0xff] }
 0x294   :  { %6363 = vmatpush.bf16.msrb.mxu2 %v13122_v63  ;;  %v5955_v4 = vpop.f32.mrf.mxu0  ;;  %v5974_v60 = vpop.f32.mrf.mxu1  ;;  %v14327_v35 = vadd.f32 %v6009_v55, %v5991_v5  ;;  %v13103_v63 = vld [vmem:[#allocation6 + $0x500] sm:$0xff]  ;;  %v13150_v55 = vld [vmem:[#allocation6 + $0x678] sm:$0xff] }
 0x295   :  { %6382 = vmatpush.bf16.msrb.mxu3 %v13130_v7  ;;  %v5956_v17 = vadd.f32 %v14311_v59, %v5955_v4  ;;  %v13166_v5 = vld [vmem:[#allocation6 + $0x6f8] sm:$0xff] }
 0x296   :  { %6326 = vmatpush.bf16.msrb.mxu0 %v13105_v39  ;;  %6315 = vmatmul.bf16.gmra.mxu3 %v14203_v22  ;;  %v13142_v39 = vld [vmem:[#allocation6 + $0x638] sm:$0xff] }
 0x297   :  { %6345 = vmatpush.bf16.msrb.mxu1 %v13113_v51  ;;  %v5975_v19 = vadd.f32 %v5974_v60, %v5956_v17  ;;  %6258 = vmatmul.bf16.gmra.mxu0 %v14162_v24 }
 0x298   :  { %6364 = vmatpush.bf16.msrb.mxu2 %v13121_v46  ;;  %v13158_v46 = vld [vmem:[#allocation6 + $0x6b8] sm:$0xff] }
 0x299   :  { %6383 = vmatpush.bf16.msrb.mxu3 %v13129_v25  ;;  %v5993_v7 = vpop.f32.mrf.mxu2  ;;  %v6012_v8 = vpop.f32.mrf.mxu3 }
 0x29a   :  { %6327 = vmatpush.bf16.msrb.mxu0 %v13104_v23  ;;  %v5994_v51 = vadd.f32 %v5993_v7, %v5975_v19  ;;  %v13141_v23 = vld [vmem:[#allocation6 + $0x630] sm:$0xff] }
 0x29b   :  { %6346 = vmatpush.bf16.msrb.mxu1 %v13112_v41  ;;  %v13149_v41 = vld [vmem:[#allocation6 + $0x670] sm:$0xff] }
 0x29c   :  { %6365 = vmatpush.bf16.msrb.mxu2 %v13120_v34  ;;  %v5957_v25 = vpop.f32.mrf.mxu0  ;;  %v5976_v57 = vpop.f32.mrf.mxu1  ;;  %v14334_v60 = vadd.f32 %v6012_v8, %v5994_v51  ;;  %v13157_v34 = vld [vmem:[#allocation6 + $0x6b0] sm:$0xff]  ;;  %v13140_v8 = vld [vmem:[#allocation6 + $0x628] sm:$0xff] }
 0x29d   :  { %6384 = vmatpush.bf16.msrb.mxu3 %v13128_v0  ;;  %v5958_v4 = vadd.f32 %v14311_v59, %v5957_v25  ;;  %v13165_v0 = vld [vmem:[#allocation6 + $0x6f0] sm:$0xff]  ;;  %v13164_v51 = vld [vmem:[#allocation6 + $0x6e8] sm:$0xff] }
 0x29e   :  { %6328 = vmatpush.bf16.msrb.mxu0 %v13103_v63 }
 0x29f   :  { %6347 = vmatpush.bf16.msrb.mxu1 %v13111_v6  ;;  %v5977_v17 = vadd.f32 %v5976_v57, %v5958_v4  ;;  %v13155_v57 = vld [vmem:[#allocation6 + $0x6a0] sm:$0xff] }
 0x2a0   :  { %6366 = vmatpush.bf16.msrb.mxu2 %v13119_v44 }
 0x2a1   :  { %6385 = vmatpush.bf16.msrb.mxu3 %v13127_v21  ;;  %v5995_v19 = vpop.f32.mrf.mxu2  ;;  %v6014_v7 = vpop.f32.mrf.mxu3  ;;  %v13156_v21 = vld [vmem:[#allocation6 + $0x6a8] sm:$0xff] }
 0x2a2   :  { %6397 = vmatpush.bf16.msra.mxu0 %v13142_v39  ;;  %v5996_v59 = vadd.f32 %v5995_v19, %v5977_v17  ;;  %v13148_v39 = vld [vmem:[#allocation6 + $0x668] sm:$0xff]  ;;  %6348 = vmatmul.bf16.vlgmr.msrb.gmra.mxu1 %v14215_v28  ;;  %v13154_v19 = vld [vmem:[#allocation6 + $0x698] sm:$0xff] }
 0x2a3   :  { %6416 = vmatpush.bf16.msra.mxu1 %v13150_v55  ;;  %6367 = vmatmul.bf16.vlgmr.msrb.gmra.mxu2 %v14237_v45  ;;  %v13139_v55 = vld [vmem:[#allocation6 + $0x620] sm:$0xff] }
 0x2a4   :  { %6435 = vmatpush.bf16.msra.mxu2 %v13158_v46  ;;  %v6026_v44 = vpop.f32.mrf.mxu0  ;;  %v6045_v63 = vpop.f32.mrf.mxu1  ;;  %v14337_v46 = vadd.f32 %v6014_v7, %v5996_v59  ;;  %v13138_v7 = vld [vmem:[#allocation6 + $0x618] sm:$0xff] }
 0x2a5   :  { %6454 = vmatpush.bf16.msra.mxu3 %v13166_v5  ;;  %v6027_v6 = vadd.f32 %v6026_v44, %v14324_v36  ;;  %v13147_v36 = vld [vmem:[#allocation6 + $0x660] sm:$0xff]  ;;  %v13146_v44 = vld [vmem:[#allocation6 + $0x658] sm:$0xff] }
 0x2a6   :  { %6398 = vmatpush.bf16.msra.mxu0 %v13141_v23  ;;  %6386 = vmatmul.bf16.vlgmr.msrb.gmra.mxu3 %v14245_v29  ;;  %v13163_v5 = vld [vmem:[#allocation6 + $0x6e0] sm:$0xff] }
 0x2a7   :  { %6417 = vmatpush.bf16.msra.mxu1 %v13149_v41  ;;  %v6046_v25 = vadd.f32 %v6045_v63, %v6027_v6  ;;  %6329 = vmatmul.bf16.vlgmr.msrb.gmra.mxu0 %v14207_v14  ;;  %v13162_v63 = vld [vmem:[#allocation6 + $0x6d8] sm:$0xff] }
 0x2a8   :  { %6436 = vmatpush.bf16.msra.mxu2 %v13157_v34 }
 0x2a9   :  { %6455 = vmatpush.bf16.msra.mxu3 %v13165_v0  ;;  %v6064_v4 = vpop.f32.mrf.mxu2  ;;  %v6083_v17 = vpop.f32.mrf.mxu3 }
 0x2aa   :  { %6399 = vmatpush.bf16.msra.mxu0 %v13140_v8  ;;  %v6065_v34 = vadd.f32 %v6064_v4, %v6046_v25  ;;  %v13137_v8 = vld [vmem:[#allocation6 + $0x610] sm:$0xff] }
 0x2ab   :  { %6418 = vmatpush.bf16.msra.mxu1 %v13148_v39  ;;  %v13145_v39 = vld [vmem:[#allocation6 + $0x650] sm:$0xff] }
 0x2ac   :  { %6437 = vmatpush.bf16.msra.mxu2 %v13156_v21  ;;  %v6028_v23 = vpop.f32.mrf.mxu0  ;;  %v6047_v41 = vpop.f32.mrf.mxu1  ;;  %v14344_v59 = vadd.f32 %v6083_v17, %v6065_v34  ;;  %v13153_v21 = vld [vmem:[#allocation6 + $0x690] sm:$0xff] }
 0x2ad   :  { %6456 = vmatpush.bf16.msra.mxu3 %v13164_v51  ;;  %v6029_v0 = vadd.f32 %v6028_v23, %v14327_v35  ;;  %v13161_v51 = vld [vmem:[#allocation6 + $0x6d0] sm:$0xff]  ;;  %v13144_v23 = vld [vmem:[#allocation6 + $0x648] sm:$0xff] }
 0x2ae   :  { %6400 = vmatpush.bf16.msra.mxu0 %v13139_v55 }
 0x2af   :  { %6419 = vmatpush.bf16.msra.mxu1 %v13147_v36  ;;  %v6048_v6 = vadd.f32 %v6047_v41, %v6029_v0  ;;  %v13152_v36 = vld [vmem:[#allocation6 + $0x688] sm:$0xff] }
 0x2b0   :  { %6438 = vmatpush.bf16.msra.mxu2 %v13155_v57  ;;  %v13160_v41 = vld [vmem:[#allocation6 + $0x6c8] sm:$0xff] }
 0x2b1   :  { %6457 = vmatpush.bf16.msra.mxu3 %v13163_v5  ;;  %v6066_v35 = vpop.f32.mrf.mxu2  ;;  %v6085_v25 = vpop.f32.mrf.mxu3  ;;  %v13136_v5 = vld [vmem:[#allocation6 + $0x608] sm:$0xff] }
 0x2b2   :  { %6401 = vmatpush.bf16.msra.mxu0 %v13138_v7  ;;  %v6067_v57 = vadd.f32 %v6066_v35, %v6048_v6  ;;  %6353 = vmatmul.bf16.gmra.mxu1 %v14233_v18  ;;  %v13143_v7 = vld [vmem:[#allocation6 + $0x640] sm:$0xff] }
 0x2b3   :  { %6420 = vmatpush.bf16.msra.mxu1 %v13146_v44  ;;  %6372 = vmatmul.bf16.gmra.mxu2 %v14254_v47  ;;  %v13159_v44 = vld [vmem:[#allocation6 + $0x6c0] sm:$0xff] }
 0x2b4   :  { %6439 = vmatpush.bf16.msra.mxu2 %v13154_v19  ;;  %v6031_v55 = vpop.f32.mrf.mxu0  ;;  %v6050_v4 = vpop.f32.mrf.mxu1  ;;  %v14347_v34 = vadd.f32 %v6085_v25, %v6067_v57  ;;  %v13135_v19 = vld [vmem:[#allocation6 + $0x600] sm:$0xff] }
 0x2b5   :  { %6458 = vmatpush.bf16.msra.mxu3 %v13162_v63  ;;  %v6032_v17 = vadd.f32 %v6031_v55, %v14334_v60  ;;  %v13151_v60 = vld [vmem:[#allocation6 + $0x680] sm:$0xff] }
 0x2b6   :  { %6402 = vmatpush.bf16.msra.mxu0 %v13137_v8  ;;  %6391 = vmatmul.bf16.gmra.mxu3 %v14265_v38  ;;  %v13174_v8 = vld [vmem:[#allocation9 + $0x38] sm:$0xff] }
 0x2b7   :  { %6421 = vmatpush.bf16.msra.mxu1 %v13145_v39  ;;  %v6051_v0 = vadd.f32 %v6050_v4, %v6032_v17  ;;  %6334 = vmatmul.bf16.gmra.mxu0 %v14222_v61  ;;  %v13182_v25 = vld [vmem:[#allocation9 + $0x78] sm:$0xff] }
 0x2b8   :  { %6440 = vmatpush.bf16.msra.mxu2 %v13153_v21  ;;  %v13190_v21 = vld [vmem:[#allocation9 + $0xb8] sm:$0xff] }
 0x2b9   :  { %6459 = vmatpush.bf16.msra.mxu3 %v13161_v51  ;;  %v6069_v63 = vpop.f32.mrf.mxu2  ;;  %v6088_v6 = vpop.f32.mrf.mxu3  ;;  %v13198_v57 = vld [vmem:[#allocation9 + $0xf8] sm:$0xff] }
 0x2ba   :  { %6403 = vmatpush.bf16.msra.mxu0 %v13136_v5  ;;  %v6070_v39 = vadd.f32 %v6069_v63, %v6051_v0  ;;  %v13173_v5 = vld [vmem:[#allocation9 + $0x30] sm:$0xff] }
 0x2bb   :  { %6422 = vmatpush.bf16.msra.mxu1 %v13144_v23  ;;  %v13181_v23 = vld [vmem:[#allocation9 + $0x70] sm:$0xff] }
 0x2bc   :  { %6441 = vmatpush.bf16.msra.mxu2 %v13152_v36  ;;  %v6033_v51 = vpop.f32.mrf.mxu0  ;;  %v6052_v35 = vpop.f32.mrf.mxu1  ;;  %v14354_v4 = vadd.f32 %v6088_v6, %v6070_v39  ;;  %v13189_v36 = vld [vmem:[#allocation9 + $0xb0] sm:$0xff]  ;;  %v13172_v6 = vld [vmem:[#allocation9 + $0x28] sm:$0xff] }
 0x2bd   :  { %6460 = vmatpush.bf16.msra.mxu3 %v13160_v41  ;;  %v6034_v55 = vadd.f32 %v6033_v51, %v14337_v46  ;;  %v13197_v41 = vld [vmem:[#allocation9 + $0xf0] sm:$0xff]  ;;  %v13196_v39 = vld [vmem:[#allocation9 + $0xe8] sm:$0xff] }
 0x2be   :  { %6404 = vmatpush.bf16.msra.mxu0 %v13135_v19 }
 0x2bf   :  { %6423 = vmatpush.bf16.msra.mxu1 %v13143_v7  ;;  %v6053_v17 = vadd.f32 %v6052_v35, %v6034_v55  ;;  %v13187_v35 = vld [vmem:[#allocation9 + $0xa0] sm:$0xff] }
 0x2c0   :  { %6442 = vmatpush.bf16.msra.mxu2 %v13151_v60 }
 0x2c1   :  { %6461 = vmatpush.bf16.msra.mxu3 %v13159_v44  ;;  %v6071_v0 = vpop.f32.mrf.mxu2  ;;  %v6090_v63 = vpop.f32.mrf.mxu3  ;;  %v13188_v44 = vld [vmem:[#allocation9 + $0xa8] sm:$0xff] }
 0x2c2   :  { %8273 = vmatpush.bf16.msrb.mxu0 %v13174_v8  ;;  %v6072_v46 = vadd.f32 %v6071_v0, %v6053_v17  ;;  %v13180_v8 = vld [vmem:[#allocation9 + $0x68] sm:$0xff]  ;;  %6424 = vmatmul.bf16.vlgmr.msra.gmra.mxu1 %v14277_v31  ;;  %v13186_v0 = vld [vmem:[#allocation9 + $0x98] sm:$0xff] }
 0x2c3   :  { %8292 = vmatpush.bf16.msrb.mxu1 %v13182_v25  ;;  %6443 = vmatmul.bf16.vlgmr.msra.gmra.mxu2 %v14299_v62  ;;  %v13171_v25 = vld [vmem:[#allocation9 + $0x20] sm:$0xff] }
 0x2c4   :  { %8311 = vmatpush.bf16.msrb.mxu2 %v13190_v21  ;;  %v6102_v60 = vpop.f32.mrf.mxu0  ;;  %v6121_v19 = vpop.f32.mrf.mxu1  ;;  %v14357_v21 = vadd.f32 %v6090_v63, %v6072_v46  ;;  %v13170_v63 = vld [vmem:[#allocation9 + $0x18] sm:$0xff] }
 0x2c5   :  { %8330 = vmatpush.bf16.msrb.mxu3 %v13198_v57  ;;  %v6103_v7 = vadd.f32 %v6102_v60, %v14344_v59  ;;  %v13179_v59 = vld [vmem:[#allocation9 + $0x60] sm:$0xff]  ;;  %v13178_v60 = vld [vmem:[#allocation9 + $0x58] sm:$0xff] }
 0x2c6   :  { %8274 = vmatpush.bf16.msrb.mxu0 %v13173_v5  ;;  %6462 = vmatmul.bf16.vlgmr.msra.gmra.mxu3 %v14307_v52  ;;  %v13195_v57 = vld [vmem:[#allocation9 + $0xe0] sm:$0xff] }
 0x2c7   :  { %8293 = vmatpush.bf16.msrb.mxu1 %v13181_v23  ;;  %v6122_v51 = vadd.f32 %v6121_v19, %v6103_v7  ;;  %6405 = vmatmul.bf16.vlgmr.msra.gmra.mxu0 %v14269_v2  ;;  %v13194_v19 = vld [vmem:[#allocation9 + $0xd8] sm:$0xff] }
 0x2c8   :  { %8312 = vmatpush.bf16.msrb.mxu2 %v13189_v36 }
 0x2c9   :  { %8331 = vmatpush.bf16.msrb.mxu3 %v13197_v41  ;;  %v6140_v55 = vpop.f32.mrf.mxu2  ;;  %v6159_v17 = vpop.f32.mrf.mxu3 }
 0x2ca   :  { %8275 = vmatpush.bf16.msrb.mxu0 %v13172_v6  ;;  %v6141_v36 = vadd.f32 %v6140_v55, %v6122_v51  ;;  %v13169_v6 = vld [vmem:[#allocation9 + $0x10] sm:$0xff] }
 0x2cb   :  { %8294 = vmatpush.bf16.msrb.mxu1 %v13180_v8  ;;  %v13177_v8 = vld [vmem:[#allocation9 + $0x50] sm:$0xff] }
 0x2cc   :  { %8313 = vmatpush.bf16.msrb.mxu2 %v13188_v44  ;;  %v6104_v5 = vpop.f32.mrf.mxu0  ;;  %v6123_v23 = vpop.f32.mrf.mxu1  ;;  %v14364_v46 = vadd.f32 %v6159_v17, %v6141_v36  ;;  %v13185_v44 = vld [vmem:[#allocation9 + $0x90] sm:$0xff] }
 0x2cd   :  { %8332 = vmatpush.bf16.msrb.mxu3 %v13196_v39  ;;  %v6105_v41 = vadd.f32 %v6104_v5, %v14347_v34  ;;  %v13193_v39 = vld [vmem:[#allocation9 + $0xd0] sm:$0xff]  ;;  %v13176_v5 = vld [vmem:[#allocation9 + $0x48] sm:$0xff] }
 0x2ce   :  { %8276 = vmatpush.bf16.msrb.mxu0 %v13171_v25 }
 0x2cf   :  { %8295 = vmatpush.bf16.msrb.mxu1 %v13179_v59  ;;  %v6124_v7 = vadd.f32 %v6123_v23, %v6105_v41  ;;  %v13184_v59 = vld [vmem:[#allocation9 + $0x88] sm:$0xff] }
 0x2d0   :  { %8314 = vmatpush.bf16.msrb.mxu2 %v13187_v35  ;;  %v13192_v23 = vld [vmem:[#allocation9 + $0xc8] sm:$0xff] }
 0x2d1   :  { %8333 = vmatpush.bf16.msrb.mxu3 %v13195_v57  ;;  %v6142_v34 = vpop.f32.mrf.mxu2  ;;  %v6161_v51 = vpop.f32.mrf.mxu3  ;;  %v13168_v57 = vld [vmem:[#allocation9 + $0x8] sm:$0xff] }
 0x2d2   :  { %8277 = vmatpush.bf16.msrb.mxu0 %v13170_v63  ;;  %v6143_v35 = vadd.f32 %v6142_v34, %v6124_v7  ;;  %6429 = vmatmul.bf16.gmra.mxu1 %v14295_v20  ;;  %v13175_v63 = vld [vmem:[#allocation9 + $0x40] sm:$0xff] }
 0x2d3   :  { %8296 = vmatpush.bf16.msrb.mxu1 %v13178_v60  ;;  %6448 = vmatmul.bf16.gmra.mxu2 %v14313_v54  ;;  %v13191_v60 = vld [vmem:[#allocation9 + $0xc0] sm:$0xff] }
 0x2d4   :  { %8315 = vmatpush.bf16.msrb.mxu2 %v13186_v0  ;;  %v6107_v25 = vpop.f32.mrf.mxu0  ;;  %v6126_v55 = vpop.f32.mrf.mxu1  ;;  %v14367_v36 = vadd.f32 %v6161_v51, %v6143_v35  ;;  %v13167_v0 = vld [vmem:[#allocation9] sm:$0xff]  ;;  %v13214_v51 = vld [vmem:[#allocation9 + $0x178] sm:$0xff] }
 0x2d5   :  { %8334 = vmatpush.bf16.msrb.mxu3 %v13194_v19  ;;  %v6108_v17 = vadd.f32 %v6107_v25, %v14354_v4  ;;  %v13183_v4 = vld [vmem:[#allocation9 + $0x80] sm:$0xff]  ;;  %v13230_v35 = vld [vmem:[#allocation9 + $0x1f8] sm:$0xff] }
 0x2d6   :  { %8278 = vmatpush.bf16.msrb.mxu0 %v13169_v6  ;;  %6467 = vmatmul.bf16.gmra.mxu3 %v14321_v1  ;;  %v13206_v6 = vld [vmem:[#allocation9 + $0x138] sm:$0xff] }
 0x2d7   :  { %8297 = vmatpush.bf16.msrb.mxu1 %v13177_v8  ;;  %v6127_v41 = vadd.f32 %v6126_v55, %v6108_v17  ;;  %6410 = vmatmul.bf16.gmra.mxu0 %v14284_v15  ;;  %v14737_v1 = vld [vmem:[#allocation24_spill] sm:$0xff] }
 0x2d8   :  { %8316 = vmatpush.bf16.msrb.mxu2 %v13185_v44  ;;  %v13222_v44 = vld [vmem:[#allocation9 + $0x1b8] sm:$0xff] }
 0x2d9   :  { %8335 = vmatpush.bf16.msrb.mxu3 %v13193_v39  ;;  %v6145_v19 = vpop.f32.mrf.mxu2  ;;  %v6164_v7 = vpop.f32.mrf.mxu3 }
 0x2da   :  { %8279 = vmatpush.bf16.msrb.mxu0 %v13168_v57  ;;  %v6146_v8 = vadd.f32 %v6145_v19, %v6127_v41  ;;  %v13205_v57 = vld [vmem:[#allocation9 + $0x130] sm:$0xff] }
 0x2db   :  { %8298 = vmatpush.bf16.msrb.mxu1 %v13176_v5  ;;  %v13213_v5 = vld [vmem:[#allocation9 + $0x170] sm:$0xff] }
 0x2dc   :  { %8317 = vmatpush.bf16.msrb.mxu2 %v13184_v59  ;;  %v6109_v39 = vpop.f32.mrf.mxu0  ;;  %v6128_v34 = vpop.f32.mrf.mxu1  ;;  %v14374_v55 = vadd.f32 %v6164_v7, %v6146_v8  ;;  %v13221_v59 = vld [vmem:[#allocation9 + $0x1b0] sm:$0xff]  ;;  %v13204_v7 = vld [vmem:[#allocation9 + $0x128] sm:$0xff] }
 0x2dd   :  { %8336 = vmatpush.bf16.msrb.mxu3 %v13192_v23  ;;  %v6110_v25 = vadd.f32 %v6109_v39, %v14357_v21  ;;  %v13229_v23 = vld [vmem:[#allocation9 + $0x1f0] sm:$0xff]  ;;  %v13228_v8 = vld [vmem:[#allocation9 + $0x1e8] sm:$0xff] }
 0x2de   :  { %8280 = vmatpush.bf16.msrb.mxu0 %v13167_v0 }
 0x2df   :  { %8299 = vmatpush.bf16.msrb.mxu1 %v13175_v63  ;;  %v6129_v17 = vadd.f32 %v6128_v34, %v6110_v25  ;;  %v13219_v34 = vld [vmem:[#allocation9 + $0x1a0] sm:$0xff] }
 0x2e0   :  { %8318 = vmatpush.bf16.msrb.mxu2 %v13183_v4 }
 0x2e1   :  { %8337 = vmatpush.bf16.msrb.mxu3 %v13191_v60  ;;  %v6147_v41 = vpop.f32.mrf.mxu2  ;;  %v6166_v19 = vpop.f32.mrf.mxu3  ;;  %v13220_v60 = vld [vmem:[#allocation9 + $0x1a8] sm:$0xff] }
 0x2e2   :  { %8349 = vmatpush.bf16.msra.mxu0 %v13206_v6  ;;  %v6148_v21 = vadd.f32 %v6147_v41, %v6129_v17  ;;  %v13212_v6 = vld [vmem:[#allocation9 + $0x168] sm:$0xff]  ;;  %8300 = vmatmul.bf16.vlgmr.msrb.gmra.mxu1 %v13821_v11  ;;  %v13218_v11 = vld [vmem:[#allocation9 + $0x198] sm:$0xff] }
 0x2e3   :  { %8368 = vmatpush.bf16.msra.mxu1 %v13214_v51  ;;  %8319 = vmatmul.bf16.vlgmr.msrb.gmra.mxu2 %v13852_v9  ;;  %v13203_v51 = vld [vmem:[#allocation9 + $0x120] sm:$0xff]  ;;  %v13202_v9 = vld [vmem:[#allocation9 + $0x118] sm:$0xff] }
 0x2e4   :  { %8387 = vmatpush.bf16.msra.mxu2 %v13222_v44  ;;  %v6178_v4 = vpop.f32.mrf.mxu0  ;;  %v6197_v0 = vpop.f32.mrf.mxu1  ;;  %v14377_v44 = vadd.f32 %v6166_v19, %v6148_v21  ;;  %v13226_v41 = vld [vmem:[#allocation9 + $0x1d8] sm:$0xff]  ;;  %v13217_v21 = vld [vmem:[#allocation9 + $0x190] sm:$0xff] }
 0x2e5   :  { %8406 = vmatpush.bf16.msra.mxu3 %v13230_v35  ;;  %v6179_v63 = vadd.f32 %v6178_v4, %v14364_v46  ;;  %v13211_v46 = vld [vmem:[#allocation9 + $0x160] sm:$0xff]  ;;  %v13201_v4 = vld [vmem:[#allocation9 + $0x110] sm:$0xff] }
 0x2e6   :  { %8350 = vmatpush.bf16.msra.mxu0 %v13205_v57  ;;  %8338 = vmatmul.bf16.vlgmr.msrb.gmra.mxu3 %v13863_v56  ;;  %v13227_v35 = vld [vmem:[#allocation9 + $0x1e0] sm:$0xff] }
 0x2e7   :  { %8369 = vmatpush.bf16.msra.mxu1 %v13213_v5  ;;  %v6198_v39 = vadd.f32 %v6197_v0, %v6179_v63  ;;  %8281 = vmatmul.bf16.vlgmr.msrb.gmra.mxu0 %v13810_v33  ;;  %v13209_v0 = vld [vmem:[#allocation9 + $0x150] sm:$0xff] }
 0x2e8   :  { %8388 = vmatpush.bf16.msra.mxu2 %v13221_v59  ;;  %v13225_v63 = vld [vmem:[#allocation9 + $0x1d0] sm:$0xff] }
 0x2e9   :  { %8407 = vmatpush.bf16.msra.mxu3 %v13229_v23  ;;  %v6216_v25 = vpop.f32.mrf.mxu2  ;;  %v6235_v17 = vpop.f32.mrf.mxu3  ;;  %v13210_v23 = vld [vmem:[#allocation9 + $0x158] sm:$0xff] }
 0x2ea   :  { %8351 = vmatpush.bf16.msra.mxu0 %v13204_v7  ;;  %v6217_v59 = vadd.f32 %v6216_v25, %v6198_v39  ;;  %v13224_v25 = vld [vmem:[#allocation9 + $0x1c8] sm:$0xff] }
 0x2eb   :  { %8370 = vmatpush.bf16.msra.mxu1 %v13212_v6 }
 0x2ec   :  { %8389 = vmatpush.bf16.msra.mxu2 %v13220_v60  ;;  %v6180_v57 = vpop.f32.mrf.mxu0  ;;  %v6199_v5 = vpop.f32.mrf.mxu1  ;;  %v14384_v56 = vadd.f32 %v6235_v17, %v6217_v59  ;;  %v13199_v59 = vld [vmem:[#allocation9 + $0x100] sm:$0xff] }
 0x2ed   :  { %8408 = vmatpush.bf16.msra.mxu3 %v13228_v8  ;;  %v6181_v33 = vadd.f32 %v6180_v57, %v14367_v36  ;;  %v13207_v57 = vld [vmem:[#allocation9 + $0x140] sm:$0xff] }
 0x2ee   :  { %8352 = vmatpush.bf16.msra.mxu0 %v13203_v51  ;;  %v13200_v51 = vld [vmem:[#allocation9 + $0x108] sm:$0xff] }
 0x2ef   :  { %8371 = vmatpush.bf16.msra.mxu1 %v13211_v46  ;;  %v6200_v19 = vadd.f32 %v6199_v5, %v6181_v33  ;;  %v13223_v5 = vld [vmem:[#allocation9 + $0x1c0] sm:$0xff] }
 0x2f0   :  { %8390 = vmatpush.bf16.msra.mxu2 %v13219_v34  ;;  %v13216_v34 = vld [vmem:[#allocation9 + $0x188] sm:$0xff] }
 0x2f1   :  { %8409 = vmatpush.bf16.msra.mxu3 %v13227_v35  ;;  %v6218_v36 = vpop.f32.mrf.mxu2  ;;  %v6237_v60 = vpop.f32.mrf.mxu3  ;;  %v13208_v35 = vld [vmem:[#allocation9 + $0x148] sm:$0xff] }
 0x2f2   :  { %8353 = vmatpush.bf16.msra.mxu0 %v13202_v9  ;;  %v6219_v7 = vadd.f32 %v6218_v36, %v6200_v19  ;;  %8305 = vmatmul.bf16.gmra.mxu1 %v13845_v26  ;;  %v13254_v9 = vld [vmem:[#allocation9 + $0x2b8] sm:$0xff]  ;;  %v13245_v36 = vld [vmem:[#allocation9 + $0x270] sm:$0xff] }
 0x2f3   :  { %8372 = vmatpush.bf16.msra.mxu1 %v13210_v23  ;;  %8324 = vmatmul.bf16.gmra.mxu2 %v13873_v40  ;;  %v13238_v23 = vld [vmem:[#allocation9 + $0x238] sm:$0xff] }
 0x2f4   :  { %8391 = vmatpush.bf16.msra.mxu2 %v13218_v11  ;;  %v6183_v6 = vpop.f32.mrf.mxu0  ;;  %v6202_v8 = vpop.f32.mrf.mxu1  ;;  %v14387_v46 = vadd.f32 %v6237_v60, %v6219_v7  ;;  %v13246_v26 = vld [vmem:[#allocation9 + $0x278] sm:$0xff]  ;;  %v13261_v60 = vld [vmem:[#allocation9 + $0x2f0] sm:$0xff] }
 0x2f5   :  { %8410 = vmatpush.bf16.msra.mxu3 %v13226_v41  ;;  %v6184_v39 = vadd.f32 %v6183_v6, %v14374_v55  ;;  %v13215_v55 = vld [vmem:[#allocation9 + $0x180] sm:$0xff] }
 0x2f6   :  { %8354 = vmatpush.bf16.msra.mxu0 %v13201_v4  ;;  %8343 = vmatmul.bf16.gmra.mxu3 %v13887_v13 }
 0x2f7   :  { %8373 = vmatpush.bf16.msra.mxu1 %v13209_v0  ;;  %v6203_v17 = vadd.f32 %v6202_v8, %v6184_v39  ;;  %8286 = vmatmul.bf16.gmra.mxu0 %v13831_v58  ;;  %v13253_v0 = vld [vmem:[#allocation9 + $0x2b0] sm:$0xff] }
 0x2f8   :  { %8392 = vmatpush.bf16.msra.mxu2 %v13217_v21  ;;  %v13262_v21 = vld [vmem:[#allocation9 + $0x2f8] sm:$0xff] }
 0x2f9   :  { %8411 = vmatpush.bf16.msra.mxu3 %v13225_v63  ;;  %v6221_v33 = vpop.f32.mrf.mxu2  ;;  %v6240_v11 = vpop.f32.mrf.mxu3  ;;  %v13237_v63 = vld [vmem:[#allocation9 + $0x230] sm:$0xff] }
 0x2fa   :  { %8355 = vmatpush.bf16.msra.mxu0 %v13200_v51  ;;  %v6222_v41 = vadd.f32 %v6221_v33, %v6203_v17  ;;  %v13236_v51 = vld [vmem:[#allocation9 + $0x228] sm:$0xff] }
 0x2fb   :  { %8374 = vmatpush.bf16.msra.mxu1 %v13208_v35  ;;  %v13260_v17 = vld [vmem:[#allocation9 + $0x2e8] sm:$0xff] }
 0x2fc   :  { %8393 = vmatpush.bf16.msra.mxu2 %v13216_v34  ;;  %v6185_v58 = vpop.f32.mrf.mxu0  ;;  %v6204_v19 = vpop.f32.mrf.mxu1  ;;  %v14394_v13 = vadd.f32 %v6240_v11, %v6222_v41  ;;  %v13252_v34 = vld [vmem:[#allocation9 + $0x2a8] sm:$0xff]  ;;  %v13249_v41 = vld [vmem:[#allocation9 + $0x290] sm:$0xff] }
 0x2fd   :  { %8412 = vmatpush.bf16.msra.mxu3 %v13224_v25  ;;  %v6186_v40 = vadd.f32 %v6185_v58, %v14377_v44  ;;  %v13244_v25 = vld [vmem:[#allocation9 + $0x268] sm:$0xff]  ;;  %v13233_v58 = vld [vmem:[#allocation9 + $0x210] sm:$0xff] }
 0x2fe   :  { %8356 = vmatpush.bf16.msra.mxu0 %v13199_v59  ;;  %v13235_v59 = vld [vmem:[#allocation9 + $0x220] sm:$0xff] }
 0x2ff   :  { %8375 = vmatpush.bf16.msra.mxu1 %v13207_v57  ;;  %v6205_v4 = vadd.f32 %v6204_v19, %v6186_v40  ;;  %v13243_v57 = vld [vmem:[#allocation9 + $0x260] sm:$0xff]  ;;  %v13241_v19 = vld [vmem:[#allocation9 + $0x250] sm:$0xff] }
 0x300   :  { %8394 = vmatpush.bf16.msra.mxu2 %v13215_v55  ;;  %v13251_v55 = vld [vmem:[#allocation9 + $0x2a0] sm:$0xff] }
 0x301   :  { %8413 = vmatpush.bf16.msra.mxu3 %v13223_v5  ;;  %v6223_v7 = vpop.f32.mrf.mxu2  ;;  %v6242_v6 = vpop.f32.mrf.mxu3  ;;  %v13259_v5 = vld [vmem:[#allocation9 + $0x2e0] sm:$0xff] }
 0x302   :  { %8425 = vmatpush.bf16.msrb.mxu0 %v13238_v23  ;;  %v6224_v44 = vadd.f32 %v6223_v7, %v6205_v4  ;;  %8376 = vmatmul.bf16.vlgmr.msra.gmra.mxu1 %v13905_v42  ;;  %v13250_v42 = vld [vmem:[#allocation9 + $0x298] sm:$0xff]  ;;  %v13256_v7 = vld [vmem:[#allocation9 + $0x2c8] sm:$0xff] }
 0x303   :  { %8444 = vmatpush.bf16.msrb.mxu1 %v13246_v26  ;;  %8395 = vmatmul.bf16.vlgmr.msra.gmra.mxu2 %v13934_v53  ;;  %v13234_v53 = vld [vmem:[#allocation9 + $0x218] sm:$0xff]  ;;  %v13257_v26 = vld [vmem:[#allocation9 + $0x2d0] sm:$0xff] }
 0x304   :  { %8463 = vmatpush.bf16.msrb.mxu2 %v13254_v9  ;;  %v14396_v8 = vpop.f32.mrf.mxu0  ;;  %v14398_v39 = vpop.f32.mrf.mxu1  ;;  %v14400_v35 = vadd.f32 %v6242_v6, %v6224_v44  ;;  %v13258_v23 = vld [vmem:[#allocation9 + $0x2d8] sm:$0xff]  ;;  %v13247_v6 = vld [vmem:[#allocation9 + $0x280] sm:$0xff] }
 0x305   :  { %8482 = vmatpush.bf16.msrb.mxu3 %v13262_v21  ;;  %v13231_v44 = vld [vmem:[#allocation9 + $0x200] sm:$0xff] }
 0x306   :  { %8426 = vmatpush.bf16.msrb.mxu0 %v13237_v63  ;;  %8414 = vmatmul.bf16.vlgmr.msra.gmra.mxu3 %v13945_v43  ;;  %v13242_v43 = vld [vmem:[#allocation9 + $0x258] sm:$0xff]  ;;  %v13248_v63 = vld [vmem:[#allocation9 + $0x288] sm:$0xff] }
 0x307   :  { %8445 = vmatpush.bf16.msrb.mxu1 %v13245_v36  ;;  %8357 = vmatmul.bf16.vlgmr.msra.gmra.mxu0 %v13894_v50  ;;  %v13232_v36 = vld [vmem:[#allocation9 + $0x208] sm:$0xff] }
 0x308   :  { %8464 = vmatpush.bf16.msrb.mxu2 %v13253_v0 }
 0x309   :  { %8483 = vmatpush.bf16.msrb.mxu3 %v13261_v60  ;;  %v14406_v33 = vpop.f32.mrf.mxu2  ;;  %v14408_v11 = vpop.f32.mrf.mxu3  ;;  %v13240_v60 = vld [vmem:[#allocation9 + $0x248] sm:$0xff] }
 0x30a   :  { %8427 = vmatpush.bf16.msrb.mxu0 %v13236_v51  ;;  %v13255_v51 = vld [vmem:[#allocation9 + $0x2c0] sm:$0xff] }
 0x30b   :  { %8446 = vmatpush.bf16.msrb.mxu1 %v13244_v25 }
 0x30c   :  { %8465 = vmatpush.bf16.msrb.mxu2 %v13252_v34  ;;  %v14410_v9 = vpop.f32.mrf.mxu0  ;;  %v14412_v50 = vpop.f32.mrf.mxu1  ;;  %v13239_v34 = vld [vmem:[#allocation9 + $0x240] sm:$0xff] }
 0x30d   :  { %8484 = vmatpush.bf16.msrb.mxu3 %v13260_v17 }
 0x30e   :  { %8428 = vmatpush.bf16.msrb.mxu0 %v13235_v59 }
 0x30f   :  { %8447 = vmatpush.bf16.msrb.mxu1 %v13243_v57  ;;  %v13285_v57 = vld [vmem:[#allocation9 + $0x3b0] sm:$0xff] }
 0x310   :  { %8466 = vmatpush.bf16.msrb.mxu2 %v13251_v55  ;;  %v13286_v55 = vld [vmem:[#allocation9 + $0x3b8] sm:$0xff] }
 0x311   :  { %8485 = vmatpush.bf16.msrb.mxu3 %v13259_v5  ;;  %v14414_v21 = vpop.f32.mrf.mxu2  ;;  %v14416_v40 = vpop.f32.mrf.mxu3  ;;  %v13269_v5 = vld [vmem:[#allocation9 + $0x330] sm:$0xff] }
 0x312   :  { %8429 = vmatpush.bf16.msrb.mxu0 %v13234_v53  ;;  %8381 = vmatmul.bf16.gmra.mxu1 %v13927_v3  ;;  %v13293_v53 = vld [vmem:[#allocation9 + $0x3f0] sm:$0xff] }
 0x313   :  { %8448 = vmatpush.bf16.msrb.mxu1 %v13242_v43  ;;  %8400 = vmatmul.bf16.gmra.mxu2 %v13957_v32  ;;  %v13278_v32 = vld [vmem:[#allocation9 + $0x378] sm:$0xff] }
 0x314   :  { %8467 = vmatpush.bf16.msrb.mxu2 %v13250_v42  ;;  %v14418_v4 = vpop.f32.mrf.mxu0  ;;  %v14420_v0 = vpop.f32.mrf.mxu1  ;;  %v13277_v42 = vld [vmem:[#allocation9 + $0x370] sm:$0xff] }
 0x315   :  { %8486 = vmatpush.bf16.msrb.mxu3 %v13258_v23 }
 0x316   :  { %8430 = vmatpush.bf16.msrb.mxu0 %v13233_v58  ;;  %8419 = vmatmul.bf16.gmra.mxu3 %v13971_v12  ;;  %v13294_v12 = vld [vmem:[#allocation9 + $0x3f8] sm:$0xff] }
 0x317   :  { %8449 = vmatpush.bf16.msrb.mxu1 %v13241_v19  ;;  %8362 = vmatmul.bf16.gmra.mxu0 %v13914_v27  ;;  %v13270_v27 = vld [vmem:[#allocation9 + $0x338] sm:$0xff]  ;;  %v13284_v19 = vld [vmem:[#allocation9 + $0x3a8] sm:$0xff] }
 0x318   :  { %8468 = vmatpush.bf16.msrb.mxu2 %v13249_v41 }
 0x319   :  { %8487 = vmatpush.bf16.msrb.mxu3 %v13257_v26  ;;  %v14426_v25 = vpop.f32.mrf.mxu2  ;;  %v14428_v17 = vpop.f32.mrf.mxu3  ;;  %v13268_v26 = vld [vmem:[#allocation9 + $0x328] sm:$0xff] }
 0x31a   :  { %8431 = vmatpush.bf16.msrb.mxu0 %v13232_v36  ;;  %v13292_v36 = vld [vmem:[#allocation9 + $0x3e8] sm:$0xff] }
 0x31b   :  { %8450 = vmatpush.bf16.msrb.mxu1 %v13240_v60  ;;  %v14730_v60 = vld [vmem:[#allocation17_spill] sm:$0xff] }
 0x31c   :  { %8469 = vmatpush.bf16.msrb.mxu2 %v13248_v63  ;;  %v14430_v59 = vpop.f32.mrf.mxu0  ;;  %v14432_v3 = vpop.f32.mrf.mxu1  ;;  %v13276_v63 = vld [vmem:[#allocation9 + $0x368] sm:$0xff] }
 0x31d   :  { %8488 = vmatpush.bf16.msrb.mxu3 %v13256_v7  ;;  %v14731_v7 = vld [vmem:[#allocation18_spill] sm:$0xff] }
 0x31e   :  { %8432 = vmatpush.bf16.msrb.mxu0 %v13231_v44  ;;  %v14733_v44 = vld [vmem:[#allocation22_spill] sm:$0xff] }
 0x31f   :  { %8451 = vmatpush.bf16.msrb.mxu1 %v13239_v34  ;;  %v13283_v34 = vld [vmem:[#allocation9 + $0x3a0] sm:$0xff] }
 0x320   :  { %8470 = vmatpush.bf16.msrb.mxu2 %v13247_v6  ;;  %v14732_v6 = vld [vmem:[#allocation21_spill] sm:$0xff] }
 0x321   :  { %8489 = vmatpush.bf16.msrb.mxu3 %v13255_v51  ;;  %v14434_v43 = vpop.f32.mrf.mxu2  ;;  %v14436_v23 = vpop.f32.mrf.mxu3  ;;  %v13267_v51 = vld [vmem:[#allocation9 + $0x320] sm:$0xff] }
 0x322   :  { %8501 = vmatpush.bf16.msra.mxu0 %v13270_v27  ;;  %8452 = vmatmul.bf16.vlgmr.msrb.gmra.mxu1 %v14731_v7  ;;  %v13291_v27 = vld [vmem:[#allocation9 + $0x3e0] sm:$0xff] }
 0x323   :  { %8520 = vmatpush.bf16.msra.mxu1 %v13278_v32  ;;  %8471 = vmatmul.bf16.vlgmr.msrb.gmra.mxu2 %v14732_v6  ;;  %v13273_v6 = vld [vmem:[#allocation9 + $0x350] sm:$0xff] }
 0x324   :  { %8539 = vmatpush.bf16.msra.mxu2 %v13286_v55  ;;  %v14438_v41 = vpop.f32.mrf.mxu0  ;;  %v14440_v58 = vpop.f32.mrf.mxu1  ;;  %v13275_v55 = vld [vmem:[#allocation9 + $0x360] sm:$0xff] }
 0x325   :  { %8558 = vmatpush.bf16.msra.mxu3 %v13294_v12 }
 0x326   :  { %8502 = vmatpush.bf16.msra.mxu0 %v13269_v5  ;;  %8490 = vmatmul.bf16.vlgmr.msrb.gmra.mxu3 %v14733_v44  ;;  %v13289_v44 = vld [vmem:[#allocation9 + $0x3d0] sm:$0xff] }
 0x327   :  { %8521 = vmatpush.bf16.msra.mxu1 %v13277_v42  ;;  %8433 = vmatmul.bf16.vlgmr.msrb.gmra.mxu0 %v14730_v60  ;;  %v13282_v42 = vld [vmem:[#allocation9 + $0x398] sm:$0xff]  ;;  %v13265_v60 = vld [vmem:[#allocation9 + $0x310] sm:$0xff] }
 0x328   :  { %8540 = vmatpush.bf16.msra.mxu2 %v13285_v57 }
 0x329   :  { %8559 = vmatpush.bf16.msra.mxu3 %v13293_v53  ;;  %v14446_v32 = vpop.f32.mrf.mxu2  ;;  %v14448_v12 = vpop.f32.mrf.mxu3  ;;  %v13266_v53 = vld [vmem:[#allocation9 + $0x318] sm:$0xff] }
 0x32a   :  { %8503 = vmatpush.bf16.msra.mxu0 %v13268_v26  ;;  %v13274_v26 = vld [vmem:[#allocation9 + $0x358] sm:$0xff] }
 0x32b   :  { %8522 = vmatpush.bf16.msra.mxu1 %v13276_v63  ;;  %v13290_v63 = vld [vmem:[#allocation9 + $0x3d8] sm:$0xff] }
 0x32c   :  { %8541 = vmatpush.bf16.msra.mxu2 %v13284_v19  ;;  %v14450_v57 = vpop.f32.mrf.mxu0  ;;  %v14452_v5 = vpop.f32.mrf.mxu1  ;;  %v6255_v19 = vadd.f32 %v14396_v8, %v14384_v56 }
 0x32d   :  { %8560 = vmatpush.bf16.msra.mxu3 %v13292_v36  ;;  %v13281_v36 = vld [vmem:[#allocation9 + $0x390] sm:$0xff] }
 0x32e   :  { %8504 = vmatpush.bf16.msra.mxu0 %v13267_v51  ;;  %v6274_v7 = vadd.f32 %v14398_v39, %v6255_v19  ;;  %v6257_v39 = vadd.f32 %v14410_v9, %v14387_v46  ;;  %v13288_v19 = vld [vmem:[#allocation9 + $0x3c8] sm:$0xff] }
 0x32f   :  { %8523 = vmatpush.bf16.msra.mxu1 %v13275_v55 }
 0x330   :  { %8542 = vmatpush.bf16.msra.mxu2 %v13283_v34  ;;  %v6293_v56 = vadd.f32 %v14406_v33, %v6274_v7  ;;  %v14736_v7 = vld [vmem:[#allocation23_spill] sm:$0xff]  ;;  %v6276_v46 = vadd.f32 %v14412_v50, %v6257_v39 }
 0x331   :  { %8561 = vmatpush.bf16.msra.mxu3 %v13291_v27  ;;  %v14457_v34 = vpop.f32.mrf.mxu2  ;;  %v14459_v51 = vpop.f32.mrf.mxu3  ;;  %v13280_v27 = vld [vmem:[#allocation9 + $0x388] sm:$0xff]  ;;  %v13326_v50 = vld [vmem:[#allocation9 + $0x4f8] sm:$0xff] }
 0x332   :  { %8505 = vmatpush.bf16.msra.mxu0 %v13266_v53  ;;  %v13272_v53 = vld [vmem:[#allocation9 + $0x348] sm:$0xff]  ;;  %v6312_v33 = vadd.f32 %v14408_v11, %v6293_v56  ;;  %v13318_v11 = vld [vmem:[#allocation9 + $0x4b8] sm:$0xff] }
 0x333   :  { %8524 = vmatpush.bf16.msra.mxu1 %v13274_v26  ;;  %v14734_v26 = vld [vmem:[#allocation19_spill] sm:$0xff]  ;;  %8476 = vmatmul.bf16.gmra.mxu2 %v14736_v7 }
 0x334   :  { %8543 = vmatpush.bf16.msra.mxu2 %v13282_v42  ;;  %v14462_v8 = vpop.f32.mrf.mxu0  ;;  %v14464_v55 = vpop.f32.mrf.mxu1  ;;  %v13264_v42 = vld [vmem:[#allocation9 + $0x308] sm:$0xff]  ;;  %v6331_v9 = vadd.f32 %v14438_v41, %v6312_v33  ;;  %v13302_v56 = vld [vmem:[#allocation9 + $0x438] sm:$0xff]  ;;  %v6260_v41 = vadd.f32 %v14418_v4, %v14394_v13 }
 0x335   :  { %8562 = vmatpush.bf16.msra.mxu3 %v13290_v63  ;;  %v14735_v63 = vld [vmem:[#allocation20_spill] sm:$0xff] }
 0x336   :  { %8506 = vmatpush.bf16.msra.mxu0 %v13265_v60  ;;  %8457 = vmatmul.bf16.gmra.mxu1 %v14735_v63  ;;  %v13263_v60 = vld [vmem:[#allocation9 + $0x300] sm:$0xff]  ;;  %v13310_v7 = vld [vmem:[#allocation9 + $0x478] sm:$0xff]  ;;  %v6350_v39 = vadd.f32 %v14440_v58, %v6331_v9 }
 0x337   :  { %8525 = vmatpush.bf16.msra.mxu1 %v13273_v6  ;;  %8438 = vmatmul.bf16.gmra.mxu0 %v14734_v26  ;;  %v13271_v6 = vld [vmem:[#allocation9 + $0x340] sm:$0xff] }
 0x338   :  { %8544 = vmatpush.bf16.msra.mxu2 %v13281_v36  ;;  %8495 = vmatmul.bf16.gmra.mxu3 %v14737_v1  ;;  %v13279_v36 = vld [vmem:[#allocation9 + $0x380] sm:$0xff]  ;;  %v6295_v1 = vadd.f32 %v14414_v21, %v6276_v46  ;;  %v6369_v33 = vadd.f32 %v14446_v32, %v6350_v39  ;;  %v13309_v46 = vld [vmem:[#allocation9 + $0x470] sm:$0xff] }
 0x339   :  { %8563 = vmatpush.bf16.msra.mxu3 %v13289_v44  ;;  %v13287_v44 = vld [vmem:[#allocation9 + $0x3c0] sm:$0xff]  ;;  %v14475_v26 = vpop.f32.mrf.mxu2  ;;  %v14477_v63 = vpop.f32.mrf.mxu3 }
 0x33a   :  { %8507 = vmatpush.bf16.msra.mxu0 %v13264_v42  ;;  %v6314_v21 = vadd.f32 %v14416_v40, %v6295_v1  ;;  %v6388_v40 = vadd.f32 %v14448_v12, %v6369_v33  ;;  %v13308_v1 = vld [vmem:[#allocation9 + $0x468] sm:$0xff]  ;;  %v13307_v33 = vld [vmem:[#allocation9 + $0x460] sm:$0xff] }
 0x33b   :  { %8526 = vmatpush.bf16.msra.mxu1 %v13272_v53  ;;  %v13317_v53 = vld [vmem:[#allocation9 + $0x4b0] sm:$0xff]  ;;  %v14740_v39 = vld [vmem:[#allocation29_spill] sm:$0xff] }
 0x33c   :  { %8545 = vmatpush.bf16.msra.mxu2 %v13280_v27  ;;  %v14480_v27 = vpop.f32.mrf.mxu0  ;;  %v14482_v42 = vpop.f32.mrf.mxu1  ;;  %v6333_v13 = vadd.f32 %v14450_v57, %v6314_v21 }
 0x33d   :  { %8564 = vmatpush.bf16.msra.mxu3 %v13288_v19  ;;  %v13301_v19 = vld [vmem:[#allocation9 + $0x430] sm:$0xff] }
 0x33e   :  { %8508 = vmatpush.bf16.msra.mxu0 %v13263_v60  ;;  %v6279_v60 = vadd.f32 %v14420_v0, %v6260_v41  ;;  %v6262_v0 = vadd.f32 %v14430_v59, %v14400_v35  ;;  %v6352_v57 = vadd.f32 %v14452_v5, %v6333_v13  ;;  %v14739_v41 = vld [vmem:[#allocation26_spill] sm:$0xff]  ;;  %v13315_v35 = vld [vmem:[#allocation9 + $0x4a0] sm:$0xff] }
 0x33f   :  { %8527 = vmatpush.bf16.msra.mxu1 %v13271_v6  ;;  %v13299_v59 = vld [vmem:[#allocation9 + $0x420] sm:$0xff] }
 0x340   :  { %8546 = vmatpush.bf16.msra.mxu2 %v13279_v36  ;;  %v13325_v36 = vld [vmem:[#allocation9 + $0x4f0] sm:$0xff]  ;;  %v6298_v9 = vadd.f32 %v14426_v25, %v6279_v60  ;;  %v6371_v12 = vadd.f32 %v14457_v34, %v6352_v57  ;;  %v6281_v5 = vadd.f32 %v14432_v3, %v6262_v0  ;;  %v13298_v3 = vld [vmem:[#allocation9 + $0x418] sm:$0xff] }
 0x341   :  { %8565 = vmatpush.bf16.msra.mxu3 %v13287_v44  ;;  %v14491_v4 = vpop.f32.mrf.mxu2  ;;  %v14493_v58 = vpop.f32.mrf.mxu3  ;;  %v13316_v44 = vld [vmem:[#allocation9 + $0x4a8] sm:$0xff]  ;;  %v13322_v0 = vld [vmem:[#allocation9 + $0x4d8] sm:$0xff] }
 0x342   :  { %8577 = vmatpush.bf16.msrb.mxu0 %v13302_v56  ;;  %v6317_v25 = vadd.f32 %v14428_v17, %v6298_v9  ;;  %v6300_v34 = vadd.f32 %v14434_v43, %v6281_v5  ;;  %v6390_v60 = vadd.f32 %v14459_v51, %v6371_v12  ;;  %v13313_v51 = vld [vmem:[#allocation9 + $0x490] sm:$0xff] }
 0x343   :  { %8596 = vmatpush.bf16.msrb.mxu1 %v13310_v7  ;;  %v13324_v7 = vld [vmem:[#allocation9 + $0x4e8] sm:$0xff]  ;;  %8547 = vmatmul.bf16.vlgmr.msra.gmra.mxu2 %v14740_v39 }
 0x344   :  { %8615 = vmatpush.bf16.msrb.mxu2 %v13318_v11  ;;  %v6406_v6 = vpop.f32.mrf.mxu0  ;;  %v6425_v32 = vpop.f32.mrf.mxu1  ;;  %v13300_v11 = vld [vmem:[#allocation9 + $0x428] sm:$0xff]  ;;  %v6319_v57 = vadd.f32 %v14436_v23, %v6300_v34  ;;  %v13295_v34 = vld [vmem:[#allocation9 + $0x400] sm:$0xff] }
 0x345   :  { %8634 = vmatpush.bf16.msrb.mxu3 %v13326_v50  ;;  %v6407_v56 = vadd.f32 %v6406_v6, %v6388_v40  ;;  %v14738_v50 = vld [vmem:[#allocation25_spill] sm:$0xff]  ;;  %v13314_v6 = vld [vmem:[#allocation9 + $0x498] sm:$0xff] }
 0x346   :  { %8578 = vmatpush.bf16.msrb.mxu0 %v13301_v19  ;;  %8528 = vmatmul.bf16.vlgmr.msra.gmra.mxu1 %v14739_v41  ;;  %v6336_v19 = vadd.f32 %v14462_v8, %v6317_v25 }
 0x347   :  { %8597 = vmatpush.bf16.msrb.mxu1 %v13309_v46  ;;  %8509 = vmatmul.bf16.vlgmr.msra.gmra.mxu0 %v14738_v50  ;;  %v6426_v21 = vadd.f32 %v6425_v32, %v6407_v56  ;;  %v13323_v46 = vld [vmem:[#allocation9 + $0x4e0] sm:$0xff]  ;;  %v13297_v56 = vld [vmem:[#allocation9 + $0x410] sm:$0xff] }
 0x348   :  { %8616 = vmatpush.bf16.msrb.mxu2 %v13317_v53  ;;  %v14741_v53 = vld [vmem:[#allocation30_spill] sm:$0xff]  ;;  %v6355_v8 = vadd.f32 %v14464_v55, %v6336_v19  ;;  %v6338_v55 = vadd.f32 %v14480_v27, %v6319_v57  ;;  %v13358_v57 = vld [vmem:[#allocation9 + $0x5f8] sm:$0xff] }
 0x349   :  { %8635 = vmatpush.bf16.msrb.mxu3 %v13325_v36  ;;  %v6444_v17 = vpop.f32.mrf.mxu2  ;;  %v6463_v36 = vpop.f32.mrf.mxu3  ;;  %v13321_v50 = vld [vmem:[#allocation9 + $0x4d0] sm:$0xff]  ;;  %v13304_v19 = vld [vmem:[#allocation9 + $0x448] sm:$0xff] }
 0x34a   :  { %8566 = vmatmul.bf16.vlgmr.msra.gmra.mxu3 %v14741_v53  ;;  %8579 = vmatpush.bf16.msrb.mxu0 %v13300_v11  ;;  %v6445_v13 = vadd.f32 %v6444_v17, %v6426_v21  ;;  %v13306_v11 = vld [vmem:[#allocation9 + $0x458] sm:$0xff]  ;;  %v6374_v43 = vadd.f32 %v14475_v26, %v6355_v8  ;;  %v13312_v53 = vld [vmem:[#allocation9 + $0x488] sm:$0xff] }
 0x34b   :  { %8598 = vmatpush.bf16.msrb.mxu1 %v13308_v1  ;;  %v13320_v21 = vld [vmem:[#allocation9 + $0x4c8] sm:$0xff]  ;;  %v14744_v17 = vld [vmem:[#allocation31_spill] sm:$0xff] }
 0x34c   :  { %8617 = vmatpush.bf16.msrb.mxu2 %v13316_v44  ;;  %v6408_v9 = vpop.f32.mrf.mxu0  ;;  %v6427_v40 = vpop.f32.mrf.mxu1  ;;  %v6464_v32 = vadd.f32 %v6463_v36, %v6445_v13  ;;  %v6393_v23 = vadd.f32 %v14477_v63, %v6374_v43  ;;  %v14745_v36 = vld [vmem:[#allocation32_spill] sm:$0xff] }
 0x34d   :  { %8636 = vmatpush.bf16.msrb.mxu3 %v13324_v7  ;;  %v6409_v44 = vadd.f32 %v6408_v9, %v6390_v60  ;;  %v13305_v7 = vld [vmem:[#allocation9 + $0x450] sm:$0xff]  ;;  %v13303_v13 = vld [vmem:[#allocation9 + $0x440] sm:$0xff] }
 0x34e   :  { %8580 = vmatpush.bf16.msrb.mxu0 %v13299_v59  ;;  %6473 = vst [vmem:[%s14687_s9] sm:$0xff] %v6464_v32  ;;  %v6357_v59 = vadd.f32 %v14482_v42, %v6338_v55  ;;  %v13311_v42 = vld [vmem:[#allocation9 + $0x480] sm:$0xff]  ;;  %v13333_v55 = vld [vmem:[#allocation9 + $0x530] sm:$0xff] }
 0x34f   :  { %8599 = vmatpush.bf16.msrb.mxu1 %v13307_v33  ;;  %v6428_v1 = vadd.f32 %v6427_v40, %v6409_v44  ;;  %v14742_v33 = vld [vmem:[#allocation27_spill] sm:$0xff]  ;;  %v13319_v9 = vld [vmem:[#allocation9 + $0x4c0] sm:$0xff] }
 0x350   :  { %8618 = vmatpush.bf16.msrb.mxu2 %v13315_v35  ;;  %v13296_v35 = vld [vmem:[#allocation9 + $0x408] sm:$0xff]  ;;  %v6376_v63 = vadd.f32 %v14491_v4, %v6357_v59  ;;  %v13350_v4 = vld [vmem:[#allocation9 + $0x5b8] sm:$0xff] }
 0x351   :  { %8637 = vmatpush.bf16.msrb.mxu3 %v13323_v46  ;;  %v6446_v41 = vpop.f32.mrf.mxu2  ;;  %v6465_v25 = vpop.f32.mrf.mxu3  ;;  %v14743_v46 = vld [vmem:[#allocation28_spill] sm:$0xff] }
 0x352   :  { %8581 = vmatpush.bf16.msrb.mxu0 %v13298_v3  ;;  %v6447_v26 = vadd.f32 %v6446_v41, %v6428_v1  ;;  %v13334_v3 = vld [vmem:[#allocation9 + $0x538] sm:$0xff]  ;;  %v6395_v8 = vadd.f32 %v14493_v58, %v6376_v63  ;;  %v13341_v58 = vld [vmem:[#allocation9 + $0x570] sm:$0xff] }
 0x353   :  { %8600 = vmatpush.bf16.msrb.mxu1 %v13306_v11  ;;  %8552 = vmatmul.bf16.gmra.mxu2 %v14744_v17  ;;  %v13357_v1 = vld [vmem:[#allocation9 + $0x5f0] sm:$0xff] }
 0x354   :  { %8619 = vmatpush.bf16.msrb.mxu2 %v13314_v6  ;;  %v6411_v12 = vpop.f32.mrf.mxu0  ;;  %v6430_v39 = vpop.f32.mrf.mxu1  ;;  %v6466_v5 = vadd.f32 %v6465_v25, %v6447_v26 }
 0x355   :  { %8638 = vmatpush.bf16.msrb.mxu3 %v13322_v0  ;;  %v6412_v27 = vadd.f32 %v6411_v12, %v6393_v23  ;;  %v13342_v0 = vld [vmem:[#allocation9 + $0x578] sm:$0xff] }
 0x356   :  { %8582 = vmatpush.bf16.msrb.mxu0 %v13297_v56  ;;  %8533 = vmatmul.bf16.gmra.mxu1 %v14743_v46  ;;  %6474 = vst [vmem:[%s14687_s9 + $0x8] sm:$0xff] %v6466_v5  ;;  %v13349_v56 = vld [vmem:[#allocation9 + $0x5b0] sm:$0xff]  ;;  %v13340_v5 = vld [vmem:[#allocation9 + $0x568] sm:$0xff] }
 0x357   :  { %8601 = vmatpush.bf16.msrb.mxu1 %v13305_v7  ;;  %8514 = vmatmul.bf16.gmra.mxu0 %v14742_v33  ;;  %v6431_v60 = vadd.f32 %v6430_v39, %v6412_v27  ;;  %v13356_v27 = vld [vmem:[#allocation9 + $0x5e8] sm:$0xff]  ;;  %v13331_v33 = vld [vmem:[#allocation9 + $0x520] sm:$0xff] }
 0x358   :  { %8620 = vmatpush.bf16.msrb.mxu2 %v13313_v51  ;;  %v6926_v46 = vld [vmem:[%s14684_s6 + $0x8] sm:$0xff] }
 0x359   :  { %8639 = vmatpush.bf16.msrb.mxu3 %v13321_v50  ;;  %v6449_v40 = vpop.f32.mrf.mxu2  ;;  %v6468_v6 = vpop.f32.mrf.mxu3  ;;  %v6925_v50 = vld [vmem:[%s14684_s6] sm:$0xff] }
 0x35a   :  { %8571 = vmatmul.bf16.gmra.mxu3 %v14745_v36  ;;  %8583 = vmatpush.bf16.msrb.mxu0 %v13296_v35  ;;  %v6450_v32 = vadd.f32 %v6449_v40, %v6431_v60  ;;  %v13332_v35 = vld [vmem:[#allocation9 + $0x528] sm:$0xff]  ;;  %v13330_v60 = vld [vmem:[#allocation9 + $0x518] sm:$0xff] }
 0x35b   :  { %8602 = vmatpush.bf16.msrb.mxu1 %v13304_v19  ;;  %v13354_v40 = vld [vmem:[#allocation9 + $0x5d8] sm:$0xff] }
 0x35c   :  { %8621 = vmatpush.bf16.msrb.mxu2 %v13312_v53  ;;  %v6413_v44 = vpop.f32.mrf.mxu0  ;;  %v6432_v11 = vpop.f32.mrf.mxu1  ;;  %v6469_v43 = vadd.f32 %v6468_v6, %v6450_v32  ;;  %v13348_v53 = vld [vmem:[#allocation9 + $0x5a8] sm:$0xff]  ;;  %v13337_v32 = vld [vmem:[#allocation9 + $0x550] sm:$0xff] }
 0x35d   :  { %8640 = vmatpush.bf16.msrb.mxu3 %v13320_v21  ;;  %v6414_v51 = vadd.f32 %v6413_v44, %v6395_v8  ;;  %v13347_v21 = vld [vmem:[#allocation9 + $0x5a0] sm:$0xff]  ;;  %v6927_v8 = vld [vmem:[%s14684_s6 + $0x10] sm:$0xff] }
 0x35e   :  { %8584 = vmatpush.bf16.msrb.mxu0 %v13295_v34  ;;  %6475 = vst [vmem:[%s14687_s9 + $0x10] sm:$0xff] %v6469_v43  ;;  %v13353_v44 = vld [vmem:[#allocation9 + $0x5d0] sm:$0xff] }
 0x35f   :  { %8603 = vmatpush.bf16.msrb.mxu1 %v13303_v13  ;;  %v6433_v7 = vadd.f32 %v6432_v11, %v6414_v51 }
 0x360   :  { %8622 = vmatpush.bf16.msrb.mxu2 %v13311_v42 }
 0x361   :  { %8641 = vmatpush.bf16.msrb.mxu3 %v13319_v9  ;;  %v6451_v41 = vpop.f32.mrf.mxu2  ;;  %v6470_v25 = vpop.f32.mrf.mxu3  ;;  %v13338_v9 = vld [vmem:[#allocation9 + $0x558] sm:$0xff] }
 0x362   :  { %8653 = vmatpush.bf16.msra.mxu0 %v13334_v3  ;;  %v6452_v23 = vadd.f32 %v6451_v41, %v6433_v7  ;;  %v13329_v3 = vld [vmem:[#allocation9 + $0x510] sm:$0xff]  ;;  %v13336_v7 = vld [vmem:[#allocation9 + $0x548] sm:$0xff] }
 0x363   :  { %8672 = vmatpush.bf16.msra.mxu1 %v13342_v0  ;;  %8623 = vmatmul.bf16.vlgmr.msrb.gmra.mxu2 %v14177_v30 }
 0x364   :  { %8691 = vmatpush.bf16.msra.mxu2 %v13350_v4  ;;  %v8282_v26 = vpop.f32.mrf.mxu0  ;;  %v8301_v12 = vpop.f32.mrf.mxu1  ;;  %v6471_v59 = vadd.f32 %v6470_v25, %v6452_v23  ;;  %v13345_v4 = vld [vmem:[#allocation9 + $0x590] sm:$0xff]  ;;  %v13343_v25 = vld [vmem:[#allocation9 + $0x580] sm:$0xff] }
 0x365   :  { %8710 = vmatpush.bf16.msra.mxu3 %v13358_v57  ;;  %v8283_v39 = vadd.f32 %v8282_v26, %v6925_v50  ;;  %v13352_v50 = vld [vmem:[#allocation9 + $0x5c8] sm:$0xff]  ;;  %v13327_v23 = vld [vmem:[#allocation9 + $0x500] sm:$0xff] }
 0x366   :  { %8654 = vmatpush.bf16.msra.mxu0 %v13333_v55  ;;  %8604 = vmatmul.bf16.vlgmr.msrb.gmra.mxu1 %v14155_v16  ;;  %6476 = vst [vmem:[%s14687_s9 + $0x18] sm:$0xff] %v6471_v59  ;;  %v13355_v16 = vld [vmem:[#allocation9 + $0x5e0] sm:$0xff]  ;;  %v13344_v55 = vld [vmem:[#allocation9 + $0x588] sm:$0xff] }
 0x367   :  { %8673 = vmatpush.bf16.msra.mxu1 %v13341_v58  ;;  %v8302_v19 = vadd.f32 %v8301_v12, %v8283_v39  ;;  %8585 = vmatmul.bf16.vlgmr.msrb.gmra.mxu0 %v14146_v10  ;;  %v13339_v10 = vld [vmem:[#allocation9 + $0x560] sm:$0xff]  ;;  %v13328_v58 = vld [vmem:[#allocation9 + $0x508] sm:$0xff] }
 0x368   :  { %8692 = vmatpush.bf16.msra.mxu2 %v13349_v56  ;;  %v6928_v26 = vld [vmem:[%s14684_s6 + $0x18] sm:$0xff] }
 0x369   :  { %8711 = vmatpush.bf16.msra.mxu3 %v13357_v1  ;;  %v8320_v63 = vpop.f32.mrf.mxu2  ;;  %v8339_v17 = vpop.f32.mrf.mxu3  ;;  %v13335_v12 = vld [vmem:[#allocation9 + $0x540] sm:$0xff] }
 0x36a   :  { %8642 = vmatmul.bf16.vlgmr.msrb.gmra.mxu3 %v14185_v49  ;;  %8655 = vmatpush.bf16.msra.mxu0 %v13332_v35  ;;  %v8321_v36 = vadd.f32 %v8320_v63, %v8302_v19  ;;  %v13346_v49 = vld [vmem:[#allocation9 + $0x598] sm:$0xff]  ;;  %v13351_v39 = vld [vmem:[#allocation9 + $0x5c0] sm:$0xff]  ;;  %v13389_v63 = vld [vmem:[#allocation9 + $0x6f0] sm:$0xff] }
 0x36b   :  { %8674 = vmatpush.bf16.msra.mxu1 %v13340_v5  ;;  %v13382_v35 = vld [vmem:[#allocation9 + $0x6b8] sm:$0xff] }
 0x36c   :  { %8693 = vmatpush.bf16.msra.mxu2 %v13348_v53  ;;  %v8284_v42 = vpop.f32.mrf.mxu0  ;;  %v8303_v34 = vpop.f32.mrf.mxu1  ;;  %v14544_v13 = vadd.f32 %v8339_v17, %v8321_v36 }
 0x36d   :  { %8712 = vmatpush.bf16.msra.mxu3 %v13356_v27  ;;  %v8285_v30 = vadd.f32 %v8284_v42, %v6926_v46  ;;  %v13390_v27 = vld [vmem:[#allocation9 + $0x6f8] sm:$0xff]  ;;  %v13381_v46 = vld [vmem:[#allocation9 + $0x6b0] sm:$0xff] }
 0x36e   :  { %8656 = vmatpush.bf16.msra.mxu0 %v13331_v33 }
 0x36f   :  { %8675 = vmatpush.bf16.msra.mxu1 %v13339_v10  ;;  %v8304_v6 = vadd.f32 %v8303_v34, %v8285_v30  ;;  %v13365_v10 = vld [vmem:[#allocation9 + $0x630] sm:$0xff] }
 0x370   :  { %8694 = vmatpush.bf16.msra.mxu2 %v13347_v21 }
 0x371   :  { %8713 = vmatpush.bf16.msra.mxu3 %v13355_v16  ;;  %v8322_v11 = vpop.f32.mrf.mxu2  ;;  %v8341_v0 = vpop.f32.mrf.mxu3  ;;  %v13373_v16 = vld [vmem:[#allocation9 + $0x670] sm:$0xff] }
 0x372   :  { %8657 = vmatpush.bf16.msra.mxu0 %v13330_v60  ;;  %v8323_v57 = vadd.f32 %v8322_v11, %v8304_v6  ;;  %v13364_v60 = vld [vmem:[#allocation9 + $0x628] sm:$0xff] }
 0x373   :  { %8676 = vmatpush.bf16.msra.mxu1 %v13338_v9  ;;  %8628 = vmatmul.bf16.gmra.mxu2 %v14192_v48  ;;  %v13388_v6 = vld [vmem:[#allocation9 + $0x6e8] sm:$0xff] }
 0x374   :  { %8695 = vmatpush.bf16.msra.mxu2 %v13346_v49  ;;  %v8287_v43 = vpop.f32.mrf.mxu0  ;;  %v8306_v51 = vpop.f32.mrf.mxu1  ;;  %v14549_v1 = vadd.f32 %v8341_v0, %v8323_v57  ;;  %v13380_v49 = vld [vmem:[#allocation9 + $0x6a8] sm:$0xff]  ;;  %v13370_v57 = vld [vmem:[#allocation9 + $0x658] sm:$0xff] }
 0x375   :  { %8714 = vmatpush.bf16.msra.mxu3 %v13354_v40  ;;  %v8288_v56 = vadd.f32 %v8287_v43, %v6927_v8  ;;  %v13372_v40 = vld [vmem:[#allocation9 + $0x668] sm:$0xff]  ;;  %v13371_v8 = vld [vmem:[#allocation9 + $0x660] sm:$0xff]  ;;  %v13386_v43 = vld [vmem:[#allocation9 + $0x6d8] sm:$0xff] }
 0x376   :  { %8658 = vmatpush.bf16.msra.mxu0 %v13329_v3  ;;  %8609 = vmatmul.bf16.gmra.mxu1 %v14173_v37  ;;  %v13366_v37 = vld [vmem:[#allocation9 + $0x638] sm:$0xff]  ;;  %v13363_v3 = vld [vmem:[#allocation9 + $0x620] sm:$0xff] }
 0x377   :  { %8677 = vmatpush.bf16.msra.mxu1 %v13337_v32  ;;  %v8307_v41 = vadd.f32 %v8306_v51, %v8288_v56  ;;  %8590 = vmatmul.bf16.gmra.mxu0 %v14162_v24  ;;  %v13387_v32 = vld [vmem:[#allocation9 + $0x6e0] sm:$0xff]  ;;  %v13377_v56 = vld [vmem:[#allocation9 + $0x690] sm:$0xff] }
 0x378   :  { %8696 = vmatpush.bf16.msra.mxu2 %v13345_v4  ;;  %v13379_v4 = vld [vmem:[#allocation9 + $0x6a0] sm:$0xff] }
 0x379   :  { %8715 = vmatpush.bf16.msra.mxu3 %v13353_v44  ;;  %v8325_v53 = vpop.f32.mrf.mxu2  ;;  %v8344_v24 = vpop.f32.mrf.mxu3 }
 0x37a   :  { %8647 = vmatmul.bf16.gmra.mxu3 %v14203_v22  ;;  %8659 = vmatpush.bf16.msra.mxu0 %v13328_v58  ;;  %v8326_v59 = vadd.f32 %v8325_v53, %v8307_v41  ;;  %v13374_v22 = vld [vmem:[#allocation9 + $0x678] sm:$0xff]  ;;  %v13369_v58 = vld [vmem:[#allocation9 + $0x650] sm:$0xff] }
 0x37b   :  { %8678 = vmatpush.bf16.msra.mxu1 %v13336_v7  ;;  %v13385_v7 = vld [vmem:[#allocation9 + $0x6d0] sm:$0xff] }
 0x37c   :  { %8697 = vmatpush.bf16.msra.mxu2 %v13344_v55  ;;  %v8289_v48 = vpop.f32.mrf.mxu0  ;;  %v8308_v5 = vpop.f32.mrf.mxu1  ;;  %v14558_v21 = vadd.f32 %v8344_v24, %v8326_v59  ;;  %v13361_v55 = vld [vmem:[#allocation9 + $0x610] sm:$0xff]  ;;  %v13368_v24 = vld [vmem:[#allocation9 + $0x648] sm:$0xff] }
 0x37d   :  { %8716 = vmatpush.bf16.msra.mxu3 %v13352_v50  ;;  %v8290_v19 = vadd.f32 %v8289_v48, %v6928_v26  ;;  %v13375_v48 = vld [vmem:[#allocation9 + $0x680] sm:$0xff] }
 0x37e   :  { %8660 = vmatpush.bf16.msra.mxu0 %v13327_v23 }
 0x37f   :  { %8679 = vmatpush.bf16.msra.mxu1 %v13335_v12  ;;  %v8309_v33 = vadd.f32 %v8308_v5, %v8290_v19  ;;  %v13376_v12 = vld [vmem:[#allocation9 + $0x688] sm:$0xff]  ;;  %v13359_v5 = vld [vmem:[#allocation9 + $0x600] sm:$0xff] }
 0x380   :  { %8698 = vmatpush.bf16.msra.mxu2 %v13343_v25 }
 0x381   :  { %8717 = vmatpush.bf16.msra.mxu3 %v13351_v39  ;;  %v8327_v17 = vpop.f32.mrf.mxu2  ;;  %v8346_v36 = vpop.f32.mrf.mxu3  ;;  %v13360_v39 = vld [vmem:[#allocation9 + $0x608] sm:$0xff] }
 0x382   :  { %8729 = vmatpush.bf16.msrb.mxu0 %v13366_v37  ;;  %v8328_v42 = vadd.f32 %v8327_v17, %v8309_v33 }
 0x383   :  { %8748 = vmatpush.bf16.msrb.mxu1 %v13374_v22  ;;  %8699 = vmatmul.bf16.vlgmr.msra.gmra.mxu2 %v14237_v45  ;;  %v13378_v45 = vld [vmem:[#allocation9 + $0x698] sm:$0xff]  ;;  %v13367_v22 = vld [vmem:[#allocation9 + $0x640] sm:$0xff] }
 0x384   :  { %8767 = vmatpush.bf16.msrb.mxu2 %v13382_v35  ;;  %v14560_v34 = vpop.f32.mrf.mxu0  ;;  %v14562_v30 = vpop.f32.mrf.mxu1  ;;  %v14564_v9 = vadd.f32 %v8346_v36, %v8328_v42  ;;  %v13384_v35 = vld [vmem:[#allocation9 + $0x6c8] sm:$0xff] }
 0x385   :  { %8786 = vmatpush.bf16.msrb.mxu3 %v13390_v27  ;;  %v8359_v59 = vadd.f32 %v14560_v34, %v14544_v13  ;;  %v13383_v27 = vld [vmem:[#allocation9 + $0x6c0] sm:$0xff] }
 0x386   :  { %8730 = vmatpush.bf16.msrb.mxu0 %v13365_v10  ;;  %8680 = vmatmul.bf16.vlgmr.msra.gmra.mxu1 %v14215_v28 }
 0x387   :  { %8749 = vmatpush.bf16.msrb.mxu1 %v13373_v16  ;;  %8661 = vmatmul.bf16.vlgmr.msra.gmra.mxu0 %v14207_v14 }
 0x388   :  { %8768 = vmatpush.bf16.msrb.mxu2 %v13381_v46 }
 0x389   :  { %8787 = vmatpush.bf16.msrb.mxu3 %v13389_v63  ;;  %v14570_v44 = vpop.f32.mrf.mxu2  ;;  %v14572_v11 = vpop.f32.mrf.mxu3 }
 0x38a   :  { %8718 = vmatmul.bf16.vlgmr.msra.gmra.mxu3 %v14245_v29  ;;  %8731 = vmatpush.bf16.msrb.mxu0 %v13364_v60  ;;  %v13362_v29 = vld [vmem:[#allocation9 + $0x618] sm:$0xff] }
 0x38b   :  { %8750 = vmatpush.bf16.msrb.mxu1 %v13372_v40 }
 0x38c   :  { %8769 = vmatpush.bf16.msrb.mxu2 %v13380_v49  ;;  %v8360_v0 = vpop.f32.mrf.mxu0  ;;  %v8379_v14 = vpop.f32.mrf.mxu1 }
 0x38d   :  { %8788 = vmatpush.bf16.msrb.mxu3 %v13388_v6  ;;  %v8361_v28 = vadd.f32 %v8360_v0, %v14549_v1 }
 0x38e   :  { %8732 = vmatpush.bf16.msrb.mxu0 %v13363_v3 }
 0x38f   :  { %8751 = vmatpush.bf16.msrb.mxu1 %v13371_v8  ;;  %v8380_v51 = vadd.f32 %v8379_v14, %v8361_v28 }
 0x390   :  { %8770 = vmatpush.bf16.msrb.mxu2 %v13379_v4 }
 0x391   :  { %8789 = vmatpush.bf16.msrb.mxu3 %v13387_v32  ;;  %v8398_v50 = vpop.f32.mrf.mxu2  ;;  %v8417_v41 = vpop.f32.mrf.mxu3 }
 0x392   :  { %8733 = vmatpush.bf16.msrb.mxu0 %v13362_v29  ;;  %v8399_v1 = vadd.f32 %v8398_v50, %v8380_v51 }
 0x393   :  { %8752 = vmatpush.bf16.msrb.mxu1 %v13370_v57  ;;  %8704 = vmatmul.bf16.gmra.mxu2 %v14254_v47  ;;  %v8378_v47 = vadd.f32 %v14562_v30, %v8359_v59 }
 0x394   :  { %8771 = vmatpush.bf16.msrb.mxu2 %v13378_v45  ;;  %v8363_v25 = vpop.f32.mrf.mxu0  ;;  %v8382_v23 = vpop.f32.mrf.mxu1  ;;  %v8418_v53 = vadd.f32 %v8417_v41, %v8399_v1 }
 0x395   :  { %8790 = vmatpush.bf16.msrb.mxu3 %v13386_v43  ;;  %v8364_v26 = vadd.f32 %v8363_v25, %v14558_v21  ;;  %v8397_v46 = vadd.f32 %v14570_v44, %v8378_v47 }
 0x396   :  { %8734 = vmatpush.bf16.msrb.mxu0 %v13361_v55  ;;  %8685 = vmatmul.bf16.gmra.mxu1 %v14233_v18 }
 0x397   :  { %8753 = vmatpush.bf16.msrb.mxu1 %v13369_v58  ;;  %v8383_v37 = vadd.f32 %v8382_v23, %v8364_v26  ;;  %8666 = vmatmul.bf16.gmra.mxu0 %v14222_v61  ;;  %v8416_v16 = vadd.f32 %v14572_v11, %v8397_v46 }
 0x398   :  { %8772 = vmatpush.bf16.msrb.mxu2 %v13377_v56 }
 0x399   :  { %8791 = vmatpush.bf16.msrb.mxu3 %v13385_v7  ;;  %v8401_v19 = vpop.f32.mrf.mxu2  ;;  %v8420_v21 = vpop.f32.mrf.mxu3 }
 0x39a   :  { %8723 = vmatmul.bf16.gmra.mxu3 %v14265_v38  ;;  %8735 = vmatpush.bf16.msrb.mxu0 %v13360_v39  ;;  %v8402_v61 = vadd.f32 %v8401_v19, %v8383_v37 }
 0x39b   :  { %8754 = vmatpush.bf16.msrb.mxu1 %v13368_v24 }
 0x39c   :  { %8773 = vmatpush.bf16.msrb.mxu2 %v13376_v12  ;;  %v8365_v33 = vpop.f32.mrf.mxu0  ;;  %v8384_v18 = vpop.f32.mrf.mxu1  ;;  %v8421_v13 = vadd.f32 %v8420_v21, %v8402_v61 }
 0x39d   :  { %8792 = vmatpush.bf16.msrb.mxu3 %v13384_v35  ;;  %v8366_v38 = vadd.f32 %v8365_v33, %v14564_v9 }
 0x39e   :  { %8736 = vmatpush.bf16.msrb.mxu0 %v13359_v5 }
 0x39f   :  { %8755 = vmatpush.bf16.msrb.mxu1 %v13367_v22  ;;  %v8385_v10 = vadd.f32 %v8384_v18, %v8366_v38 }
 0x3a0   :  { %8774 = vmatpush.bf16.msrb.mxu2 %v13375_v48 }
 0x3a1   :  { %8793 = vmatpush.bf16.msrb.mxu3 %v13383_v27  ;;  %v8403_v63 = vpop.f32.mrf.mxu2  ;;  %v8422_v17 = vpop.f32.mrf.mxu3 }
 0x3a2   :  { %v8404_v36 = vadd.f32 %v8403_v63, %v8385_v10 }
 0x3a3   :  { %8775 = vmatmul.bf16.vlgmr.msrb.gmra.mxu2 %v14299_v62  ;;  %v14746_v62 = vld [vmem:[#allocation33_spill] sm:$0xff] }
 0x3a4   :  { %v8434_v42 = vpop.f32.mrf.mxu0  ;;  %v8453_v34 = vpop.f32.mrf.mxu1  ;;  %v8423_v60 = vadd.f32 %v8422_v17, %v8404_v36 }
 0x3a5   :  { %v8435_v49 = vadd.f32 %v8434_v42, %v8416_v16 }
 0x3a6   :  { %8756 = vmatmul.bf16.vlgmr.msrb.gmra.mxu1 %v14277_v31 }
 0x3a7   :  { %v8454_v30 = vadd.f32 %v8453_v34, %v8435_v49  ;;  %8737 = vmatmul.bf16.vlgmr.msrb.gmra.mxu0 %v14269_v2 }
 0x3a9   :  { %v8472_v9 = vpop.f32.mrf.mxu2  ;;  %v8491_v40 = vpop.f32.mrf.mxu3 }
 0x3aa   :  { %8794 = vmatmul.bf16.vlgmr.msrb.gmra.mxu3 %v14307_v52  ;;  %v8473_v6 = vadd.f32 %v8472_v9, %v8454_v30 }
 0x3ac   :  { %v8436_v4 = vpop.f32.mrf.mxu0  ;;  %v8455_v3 = vpop.f32.mrf.mxu1  ;;  %v8492_v32 = vadd.f32 %v8491_v40, %v8473_v6 }
 0x3ad   :  { %v8437_v8 = vadd.f32 %v8436_v4, %v8418_v53  ;;  %v8824_v4 = vld [vmem:[#allocation10 + $0x78] sm:$0xff] }
 0x3ae   :  { %8829 = vmatpush.msra.mxu0 %v8824_v4  ;;  %13391 = vmatpush.msra.mxu1 %v8824_v4 }
 0x3af   :  { %v8456_v44 = vadd.f32 %v8455_v3, %v8437_v8  ;;  %13392 = vmatpush.msra.mxu2 %v8824_v4  ;;  %13393 = vmatpush.msra.mxu3 %v8824_v4 }
 0x3b1   :  { %v8474_v11 = vpop.f32.mrf.mxu2  ;;  %v8493_v0 = vpop.f32.mrf.mxu3 }
 0x3b2   :  { %v8475_v14 = vadd.f32 %v8474_v11, %v8456_v44  ;;  %v8823_v11 = vld [vmem:[#allocation10 + $0x70] sm:$0xff] }
 0x3b3   :  { %8780 = vmatmul.bf16.gmra.mxu2 %v14313_v54  ;;  %8830 = vmatpush.msra.mxu0 %v8823_v11 }
 0x3b4   :  { %v8439_v28 = vpop.f32.mrf.mxu0  ;;  %v8458_v45 = vpop.f32.mrf.mxu1  ;;  %v8494_v29 = vadd.f32 %v8493_v0, %v8475_v14  ;;  %13394 = vmatpush.msra.mxu1 %v8823_v11  ;;  %v8822_v0 = vld [vmem:[#allocation10 + $0x68] sm:$0xff]  ;;  %13395 = vmatpush.msra.mxu2 %v8823_v11  ;;  %v8821_v14 = vld [vmem:[#allocation10 + $0x60] sm:$0xff] }
 0x3b5   :  { %v8440_v2 = vadd.f32 %v8439_v28, %v8421_v13  ;;  %13396 = vmatpush.msra.mxu3 %v8823_v11  ;;  %8831 = vmatpush.msra.mxu0 %v8822_v0  ;;  %v8820_v28 = vld [vmem:[#allocation10 + $0x58] sm:$0xff] }
 0x3b6   :  { %8761 = vmatmul.bf16.gmra.mxu1 %v14295_v20  ;;  %13398 = vmatpush.msra.mxu2 %v8822_v0 }
 0x3b7   :  { %v8459_v31 = vadd.f32 %v8458_v45, %v8440_v2  ;;  %8742 = vmatmul.bf16.gmra.mxu0 %v14284_v15  ;;  %13397 = vmatpush.msra.mxu1 %v8822_v0 }
 0x3b8   :  { %13399 = vmatpush.msra.mxu3 %v8822_v0  ;;  %8832 = vmatpush.msra.mxu0 %v8821_v14 }
 0x3b9   :  { %v8477_v52 = vpop.f32.mrf.mxu2  ;;  %13400 = vmatpush.msra.mxu1 %v8821_v14  ;;  %13401 = vmatpush.msra.mxu2 %v8821_v14 }
 0x3ba   :  { %8799 = vmatmul.bf16.gmra.mxu3 %v14746_v62  ;;  %v8478_v43 = vadd.f32 %v8477_v52, %v8459_v31  ;;  %8833 = vmatpush.msra.mxu0 %v8820_v28  ;;  %v8819_v62 = vld [vmem:[#allocation10 + $0x50] sm:$0xff]  ;;  %v8818_v52 = vld [vmem:[#allocation10 + $0x48] sm:$0xff] }
 0x3bb   :  { %v8496_v57 = vpop.f32.mrf.mxu3  ;;  %13402 = vmatpush.msra.mxu3 %v8821_v14  ;;  %13403 = vmatpush.msra.mxu1 %v8820_v28 }
 0x3bc   :  { %v8441_v51 = vpop.f32.mrf.mxu0  ;;  %v8460_v56 = vpop.f32.mrf.mxu1  ;;  %v8497_v58 = vadd.f32 %v8496_v57, %v8478_v43  ;;  %13404 = vmatpush.msra.mxu2 %v8820_v28  ;;  %8834 = vmatpush.msra.mxu0 %v8819_v62  ;;  %v8817_v57 = vld [vmem:[#allocation10 + $0x40] sm:$0xff]  ;;  %v8816_v43 = vld [vmem:[#allocation10 + $0x38] sm:$0xff] }
 0x3bd   :  { %v8442_v55 = vadd.f32 %v8441_v51, %v8423_v60  ;;  %13405 = vmatpush.msra.mxu3 %v8820_v28  ;;  %13406 = vmatpush.msra.mxu1 %v8819_v62 }
 0x3be   :  { %13407 = vmatpush.msra.mxu2 %v8819_v62  ;;  %8835 = vmatpush.msra.mxu0 %v8818_v52 }
 0x3bf   :  { %v8461_v7 = vadd.f32 %v8460_v56, %v8442_v55  ;;  %13408 = vmatpush.msra.mxu3 %v8819_v62  ;;  %13409 = vmatpush.msra.mxu1 %v8818_v52 }
 0x3c0   :  { %13410 = vmatpush.msra.mxu2 %v8818_v52  ;;  %8836 = vmatpush.msra.mxu0 %v8817_v57 }
 0x3c1   :  { %v8479_v50 = vpop.f32.mrf.mxu2  ;;  %13411 = vmatpush.msra.mxu3 %v8818_v52  ;;  %13412 = vmatpush.msra.mxu1 %v8817_v57 }
 0x3c2   :  { %v8480_v1 = vadd.f32 %v8479_v50, %v8461_v7  ;;  %13413 = vmatpush.msra.mxu2 %v8817_v57  ;;  %8837 = vmatpush.msra.mxu0 %v8816_v43  ;;  %v8815_v7 = vld [vmem:[#allocation10 + $0x30] sm:$0xff]  ;;  %v8814_v50 = vld [vmem:[#allocation10 + $0x28] sm:$0xff] }
 0x3c3   :  { %v8498_v41 = vpop.f32.mrf.mxu3  ;;  %13414 = vmatpush.msra.mxu3 %v8817_v57  ;;  %13415 = vmatpush.msra.mxu1 %v8816_v43 }
 0x3c4   :  { %v8510_v25 = vpop.f32.mrf.mxu0  ;;  %v8529_v23 = vpop.f32.mrf.mxu1  ;;  %v8499_v26 = vadd.f32 %v8498_v41, %v8480_v1  ;;  %13416 = vmatpush.msra.mxu2 %v8816_v43  ;;  %8838 = vmatpush.msra.mxu0 %v8815_v7  ;;  %v8813_v41 = vld [vmem:[#allocation10 + $0x20] sm:$0xff]  ;;  %v8812_v1 = vld [vmem:[#allocation10 + $0x18] sm:$0xff] }
 0x3c5   :  { %v8511_v15 = vadd.f32 %v8510_v25, %v8492_v32  ;;  %13417 = vmatpush.msra.mxu3 %v8816_v43  ;;  %13418 = vmatpush.msra.mxu1 %v8815_v7 }
 0x3c6   :  { %13419 = vmatpush.msra.mxu2 %v8815_v7  ;;  %8839 = vmatpush.msra.mxu0 %v8814_v50 }
 0x3c7   :  { %v8530_v20 = vadd.f32 %v8529_v23, %v8511_v15  ;;  %13420 = vmatpush.msra.mxu3 %v8815_v7  ;;  %13421 = vmatpush.msra.mxu1 %v8814_v50 }
 0x3c8   :  { %13422 = vmatpush.msra.mxu2 %v8814_v50  ;;  %8840 = vmatpush.msra.mxu0 %v8813_v41 }
 0x3c9   :  { %v8548_v12 = vpop.f32.mrf.mxu2  ;;  %13423 = vmatpush.msra.mxu3 %v8814_v50  ;;  %13424 = vmatpush.msra.mxu1 %v8813_v41 }
 0x3ca   :  { %v8549_v39 = vadd.f32 %v8548_v12, %v8530_v20  ;;  %13425 = vmatpush.msra.mxu2 %v8813_v41  ;;  %8841 = vmatpush.msra.mxu0 %v8812_v1  ;;  %v8811_v20 = vld [vmem:[#allocation10 + $0x10] sm:$0xff] }
 0x3cb   :  { %13426 = vmatpush.msra.mxu3 %v8813_v41  ;;  %13427 = vmatpush.msra.mxu1 %v8812_v1 }
 0x3cc   :  { %v8512_v53 = vpop.f32.mrf.mxu0  ;;  %v8531_v24 = vpop.f32.mrf.mxu1  ;;  %13428 = vmatpush.msra.mxu2 %v8812_v1  ;;  %8842 = vmatpush.msra.mxu0 %v8811_v20 }
 0x3cd   :  { %v8567_v54 = vpop.f32.mrf.mxu3  ;;  %v8513_v35 = vadd.f32 %v8512_v53, %v8494_v29  ;;  %13429 = vmatpush.msra.mxu3 %v8812_v1  ;;  %13430 = vmatpush.msra.mxu1 %v8811_v20 }
 0x3ce   :  { %v14594_v37 = vadd.f32 %v8567_v54, %v8549_v39  ;;  %v8810_v54 = vld [vmem:[#allocation10 + $0x8] sm:$0xff]  ;;  %13431 = vmatpush.msra.mxu2 %v8811_v20  ;;  %v8809_v39 = vld [vmem:[#allocation10] sm:$0xff] }
 0x3cf   :  { %v8532_v59 = vadd.f32 %v8531_v24, %v8513_v35  ;;  %13432 = vmatpush.msra.mxu3 %v8811_v20  ;;  %8843 = vmatpush.msra.mxu0 %v8810_v54 }
 0x3d0   :  { %13433 = vmatpush.msra.mxu1 %v8810_v54  ;;  %13434 = vmatpush.msra.mxu2 %v8810_v54 }
 0x3d1   :  { %v8550_v48 = vpop.f32.mrf.mxu2  ;;  %13435 = vmatpush.msra.mxu3 %v8810_v54  ;;  %8844 = vmatpush.msra.mxu0 %v8809_v39 }
 0x3d2   :  { %v8551_v22 = vadd.f32 %v8550_v48, %v8532_v59  ;;  %13436 = vmatpush.msra.mxu1 %v8809_v39  ;;  %13437 = vmatpush.msra.mxu2 %v8809_v39 }
 0x3d3   :  { %13438 = vmatpush.msra.mxu3 %v8809_v39 }
 0x3d4   :  { %v8515_v27 = vpop.f32.mrf.mxu0  ;;  %v8534_v19 = vpop.f32.mrf.mxu1 }
 0x3d5   :  { %v8569_v5 = vpop.f32.mrf.mxu3  ;;  %v8516_v21 = vadd.f32 %v8515_v27, %v8497_v58 }
 0x3d6   :  { %v14596_v61 = vadd.f32 %v8569_v5, %v8551_v22 }
 0x3d7   :  { %v8535_v33 = vadd.f32 %v8534_v19, %v8516_v21 }
 0x3d9   :  { %v8553_v18 = vpop.f32.mrf.mxu2 }
 0x3da   :  { %v8554_v38 = vadd.f32 %v8553_v18, %v8535_v33 }
 0x3dc   :  { %v8517_v13 = vpop.f32.mrf.mxu0  ;;  %v8536_v46 = vpop.f32.mrf.mxu1 }
 0x3dd   :  { %v8572_v47 = vpop.f32.mrf.mxu3  ;;  %v8518_v10 = vadd.f32 %v8517_v13, %v8499_v26 }
 0x3de   :  { %v14598_v16 = vadd.f32 %v8572_v47, %v8554_v38 }
 0x3df   :  { %v8537_v63 = vadd.f32 %v8536_v46, %v8518_v10 }
 0x3e1   :  { %v8555_v17 = vpop.f32.mrf.mxu2 }
 0x3e2   :  { %v8556_v42 = vadd.f32 %v8555_v17, %v8537_v63 }
 0x3e4   :  { %v14600_v34 = vpop.f32.mrf.mxu0  ;;  %v14602_v49 = vpop.f32.mrf.mxu1 }
 0x3e5   :  { %v8574_v36 = vpop.f32.mrf.mxu3  ;;  %v8587_v12 = vadd.f32 %v14600_v34, %v14594_v37 }
 0x3e6   :  { %v14604_v60 = vadd.f32 %v8574_v36, %v8556_v42 }
 0x3e7   :  { %v8606_v53 = vadd.f32 %v14602_v49, %v8587_v12 }
 0x3e9   :  { %v14606_v30 = vpop.f32.mrf.mxu2 }
 0x3ea   :  { %v8625_v59 = vadd.f32 %v14606_v30, %v8606_v53 }
 0x3ec   :  { %v14610_v40 = vpop.f32.mrf.mxu0  ;;  %v14612_v6 = vpop.f32.mrf.mxu1 }
 0x3ed   :  { %v14608_v9 = vpop.f32.mrf.mxu3  ;;  %v8589_v5 = vadd.f32 %v14610_v40, %v14596_v61 }
 0x3ee   :  { %v8644_v22 = vadd.f32 %v14608_v9, %v8625_v59 }
 0x3ef   :  { %v8608_v27 = vadd.f32 %v14612_v6, %v8589_v5 }
 0x3f1   :  { %v14614_v3 = vpop.f32.mrf.mxu2 }
 0x3f2   :  { %v8627_v18 = vadd.f32 %v14614_v3, %v8608_v27 }
 0x3f4   :  { %v14618_v32 = vpop.f32.mrf.mxu0  ;;  %v14620_v44 = vpop.f32.mrf.mxu1 }
 0x3f5   :  { %v14616_v8 = vpop.f32.mrf.mxu3  ;;  %v8592_v13 = vadd.f32 %v14618_v32, %v14598_v16 }
 0x3f6   :  { %v8646_v10 = vadd.f32 %v14616_v8, %v8627_v18 }
 0x3f7   :  { %v8611_v61 = vadd.f32 %v14620_v44, %v8592_v13 }
 0x3f9   :  { %v14622_v45 = vpop.f32.mrf.mxu2 }
 0x3fa   :  { %v8630_v34 = vadd.f32 %v14622_v45, %v8611_v61 }
 0x3fc   :  { %v14626_v29 = vpop.f32.mrf.mxu0  ;;  %v14628_v31 = vpop.f32.mrf.mxu1 }
 0x3fd   :  { %v14624_v2 = vpop.f32.mrf.mxu3  ;;  %v8594_v40 = vadd.f32 %v14626_v29, %v14604_v60 }
 0x3fe   :  { %v8649_v16 = vadd.f32 %v14624_v2, %v8630_v34 }
 0x3ff   :  { %v8613_v8 = vadd.f32 %v14628_v31, %v8594_v40 }
 0x401   :  { %v14630_v51 = vpop.f32.mrf.mxu2 }
 0x402   :  { %v8632_v14 = vadd.f32 %v14630_v51, %v8613_v8 }
 0x404   :  { %v8662_v55 = vpop.f32.mrf.mxu0  ;;  %v8681_v58 = vpop.f32.mrf.mxu1 }
 0x405   :  { %v14632_v56 = vpop.f32.mrf.mxu3  ;;  %v8663_v19 = vadd.f32 %v8662_v55, %v8644_v22 }
 0x406   :  { %v8651_v29 = vadd.f32 %v14632_v56, %v8632_v14 }
 0x407   :  { %v8682_v46 = vadd.f32 %v8681_v58, %v8663_v19 }
 0x409   :  { %v8700_v25 = vpop.f32.mrf.mxu2 }
 0x40a   :  { %v8701_v63 = vadd.f32 %v8700_v25, %v8682_v46 }
 0x40c   :  { %v8664_v15 = vpop.f32.mrf.mxu0  ;;  %v8683_v26 = vpop.f32.mrf.mxu1 }
 0x40d   :  { %v8719_v23 = vpop.f32.mrf.mxu3  ;;  %v8665_v17 = vadd.f32 %v8664_v15, %v8646_v10 }
 0x40e   :  { %v8720_v49 = vadd.f32 %v8719_v23, %v8701_v63 }
 0x40f   :  { %v8684_v6 = vadd.f32 %v8683_v26, %v8665_v17 }
 0x411   :  { %v8702_v24 = vpop.f32.mrf.mxu2 }
 0x412   :  { %v8703_v3 = vadd.f32 %v8702_v24, %v8684_v6 }
 0x414   :  { %v8667_v48 = vpop.f32.mrf.mxu0  ;;  %v8686_v37 = vpop.f32.mrf.mxu1 }
 0x415   :  { %v8721_v35 = vpop.f32.mrf.mxu3  ;;  %v8668_v32 = vadd.f32 %v8667_v48, %v8649_v16 }
 0x416   :  { %v8722_v28 = vadd.f32 %v8721_v35, %v8703_v3 }
 0x417   :  { %v8687_v57 = vadd.f32 %v8686_v37, %v8668_v32 }
 0x419   :  { %v8705_v21 = vpop.f32.mrf.mxu2 }
 0x41a   :  { %v8706_v55 = vadd.f32 %v8705_v21, %v8687_v57 }
 0x41c   :  { %v8669_v47 = vpop.f32.mrf.mxu0  ;;  %v8688_v38 = vpop.f32.mrf.mxu1 }
 0x41d   :  { %v8724_v33 = vpop.f32.mrf.mxu3  ;;  %v8670_v58 = vadd.f32 %v8669_v47, %v8651_v29  ;;  %v13453_v47 = vld [vmem:[#allocation12] ss:$0 sm:$0xff] }
 0x41e   :  { %v8725_v41 = vadd.f32 %v8724_v33, %v8706_v55 }
 0x41f   :  { %v8689_v51 = vadd.f32 %v8688_v38, %v8670_v58  ;;  %v8858_v38 = vlaneseq }
 0x421   :  { %v8707_v36 = vpop.f32.mrf.mxu2  ;;  %v8859_v10 = vand.u32 127, %v8858_v38 }
 0x422   :  { %v8708_v20 = vadd.f32 %v8707_v36, %v8689_v51 }
 0x423   :  { %vm8860_vm0 = vcmp.ge.s32.totalorder %v8859_v10, 2  ;;  %vm8861_vm1 = vcmp.lt.s32.totalorder %v8859_v10, 6 }
 0x424   :  { %v8738_v30 = vpop.f32.mrf.mxu0  ;;  %v8757_v9 = vpop.f32.mrf.mxu1  ;;  %vm14654_vm2 = vmand %vm8860_vm0, %vm8861_vm1 }
 0x425   :  { %v8726_v42 = vpop.f32.mrf.mxu3  ;;  %v8739_v4 = vadd.f32 %v8738_v30, %v8720_v49 }
 0x426   :  { %v8727_v53 = vadd.f32 %v8726_v42, %v8708_v20 }
 0x427   :  { %v8758_v44 = vadd.f32 %v8757_v9, %v8739_v4 }
 0x429   :  { %v8776_v11 = vpop.f32.mrf.mxu2 }
 0x42a   :  { %v8777_v45 = vadd.f32 %v8776_v11, %v8758_v44 }
 0x42c   :  { %v8740_v62 = vpop.f32.mrf.mxu0  ;;  %v8759_v52 = vpop.f32.mrf.mxu1 }
 0x42d   :  { %v8795_v0 = vpop.f32.mrf.mxu3  ;;  %v8741_v60 = vadd.f32 %v8740_v62, %v8722_v28 }
 0x42e   :  { %v8796_v43 = vadd.f32 %v8795_v0, %v8777_v45 }
 0x42f   :  { %v8760_v7 = vadd.f32 %v8759_v52, %v8741_v60 }
 0x430   :  { %v8805_v2 = vmax.f32 %v8796_v43, 0.0 }
 0x431   :  { %v8778_v31 = vpop.f32.mrf.mxu2 }
 0x432   :  { %8845 = vmatmul.f32.vlgmr.msra.gmra.mxu0 %v8805_v2  ;;  %v8779_v1 = vadd.f32 %v8778_v31, %v8760_v7 }
 0x434   :  { %v8743_v25 = vpop.f32.mrf.mxu0  ;;  %v8762_v26 = vpop.f32.mrf.mxu1 }
 0x435   :  { %v8797_v50 = vpop.f32.mrf.mxu3  ;;  %v8744_v15 = vadd.f32 %v8743_v25, %v8725_v41 }
 0x436   :  { %v8798_v23 = vadd.f32 %v8797_v50, %v8779_v1 }
 0x437   :  { %v8763_v54 = vadd.f32 %v8762_v26, %v8744_v15 }
 0x438   :  { %v8806_v12 = vmax.f32 %v8798_v23, 0.0 }
 0x439   :  { %v8781_v39 = vpop.f32.mrf.mxu2 }
 0x43a   :  { %8848 = vmatmul.f32.vlgmr.msra.gmra.mxu1 %v8806_v12  ;;  %v8782_v24 = vadd.f32 %v8781_v39, %v8763_v54 }
 0x43c   :  { %v8745_v35 = vpop.f32.mrf.mxu0  ;;  %v8764_v5 = vpop.f32.mrf.mxu1 }
 0x43d   :  { %v8800_v56 = vpop.f32.mrf.mxu3  ;;  %v8746_v48 = vadd.f32 %v8745_v35, %v8727_v53 }
 0x43e   :  { %v8801_v59 = vadd.f32 %v8800_v56, %v8782_v24 }
 0x43f   :  { %v8765_v22 = vadd.f32 %v8764_v5, %v8746_v48 }
 0x440   :  { %v8807_v37 = vmax.f32 %v8801_v59, 0.0 }
 0x441   :  { %v8783_v27 = vpop.f32.mrf.mxu2 }
 0x442   :  { %8851 = vmatmul.f32.vlgmr.msra.gmra.mxu2 %v8807_v37  ;;  %v8784_v19 = vadd.f32 %v8783_v27, %v8765_v22 }
 0x445   :  { %v8802_v21 = vpop.f32.mrf.mxu3 }
 0x446   :  { %v8803_v33 = vadd.f32 %v8802_v21, %v8784_v19 }
 0x448   :  { %v8808_v18 = vmax.f32 %v8803_v33, 0.0 }
 0x44a   :  { %8854 = vmatmul.f32.vlgmr.msra.gmra.mxu3 %v8808_v18 }
 0x4af   :  { %v8846_v13 = vpop.f32.mrf.mxu0 }
 0x4b0   :  { %v8847_v46 = vadd.f32 %v13453_v47, %v8846_v13 }
 0x4b2   :  { %v8863_v63 = vmul.f32 1.442695, %v8847_v46 }
 0x4b4   :  { %13454 = vpow2.f32 %v8863_v63 }
 0x4b7   :  { %v8849_v61 = vpop.f32.mrf.mxu1 }
 0x4b8   :  { %v8850_v36 = vadd.f32 %v13453_v47, %v8849_v61 }
 0x4ba   :  { %v13455_v42 = vpop.eup %13454  ;;  %v8865_v34 = vmul.f32 1.442695, %v8850_v36 }
 0x4bb   :  { %v8871_v49 = vsel %vm14654_vm2, %v13455_v42, %v8847_v46 }
 0x4bc   :  { %8875 = vst [vmem:[%s14688_s10] sm:$0xff] %v8871_v49  ;;  %13456 = vpow2.f32 %v8865_v34 }
 0x4c2   :  { %v13457_v30 = vpop.eup %13456 }
 0x4c3   :  { %v8872_v9 = vsel %vm14654_vm2, %v13457_v30, %v8850_v36 }
 0x4c4   :  { %8876 = vst [vmem:[%s14688_s10 + $0x8] sm:$0xff] %v8872_v9 }
 0x4c5   :  { %v8852_v40 = vpop.f32.mrf.mxu2 }
 0x4c6   :  { %v8853_v6 = vadd.f32 %v13453_v47, %v8852_v40 }
 0x4c8   :  { %v8867_v4 = vmul.f32 1.442695, %v8853_v6 }
 0x4ca   :  { %13458 = vpow2.f32 %v8867_v4 }
 0x4cd   :  { %v8855_v16 = vpop.f32.mrf.mxu3 }
 0x4ce   :  { %v8856_v3 = vadd.f32 %v13453_v47, %v8855_v16 }
 0x4d0   :  { %v13459_v8 = vpop.eup %13458  ;;  %v8869_v32 = vmul.f32 1.442695, %v8856_v3 }
 0x4d1   :  { %v8873_v44 = vsel %vm14654_vm2, %v13459_v8, %v8853_v6 }
 0x4d2   :  { %8877 = vst [vmem:[%s14688_s10 + $0x10] sm:$0xff] %v8873_v44  ;;  %13460 = vpow2.f32 %v8869_v32 }
 0x4d8   :  { %v13461_v11 = vpop.eup %13460 }
 0x4d9   :  { %v8874_v0 = vsel %vm14654_vm2, %v13461_v11, %v8856_v3 }
 0x4da   :  { %8878 = vst [vmem:[%s14688_s10 + $0x18] sm:$0xff] %v8874_v0 }
 0x4db   :  { %8887 = vsyncpa [#allocation3], 1 }
 0x4dc   :  { %8888 = vsyncpa [#allocation5], 1 }
 0x4dd   :  { %8889 = vsyncpa [#allocation8], 1 }
 0x4de   :  { %8890 = vsyncpa [#allocation11], 1 }

// kernel: cotr_forward.10
= control target key start
LH: loop header
LB: loop body
LE: loop exit
PB: predicated region body
PF: predicated region fallthrough
CT: control target
= control target key end

     0   :  { %s1835_s12 = smov 0   ;;  %s1837_s13 = smov 0   ;;  %s2196_s0 = inlined_call_operand.vmem [shape: bf16[512,384], index: 0, kind: input, shape index: {}]   ;;  %s2197_s1 = inlined_call_operand.vmem [shape: bf16[384,128], index: 1, kind: input, shape index: {}]   ;;  %s2198_s2 = inlined_call_operand.vmem [shape: f32[1,128], index: 2, kind: input, shape index: {}]   ;;  %s2199_s3 = inlined_call_operand.vmem [shape: bf16[512,128], index: 3, kind: output, shape index: {}]  }
   0x1   :  { %s1839_s14 = smov 0  }
   0x2 LB: > { %s25_s15 = sadd.s32 1, %s1809_s13  ;;  %p1279_p0 = scmp.ge.s32.totalorder %s1813_s14, 1  ;;  %s1813_s14 = sphi %s1839_s14, %s13_s14   ;;  %s1809_s13 = sphi %s1837_s13, %s2201_s13   ;;  %s1805_s12 = sphi %s1835_s12, %s2200_s12  }
   0x3   : > { %p27_p1 = scmp.ge.s32.totalorder %s25_s15, 2  ;;  %p170_p2 = scmp.lt.s32.totalorder %s1813_s14, 3 }
   0x5   : > { %s2203_s15 = smov (%p27_p1, %s25_s15), 0  ;;  %p171_p3 = pnand %p1279_p0, %p170_p2 }
   0x6   : > { %s1280_s7 = sshll.u32 (!%p171_p3), %s1805_s12, 5 }
   0x7   : > { %174 = sbr.rel (%p171_p3) target bundleno = 370 (0x172), region = 32  ;;  %p206_p4 = scmp.lt.s32.totalorder (!%p171_p3), %s1280_s7, 63 }
   0xc   : > { %v1629_v0 = vld [vmem:[%s2197_s1 + $0x38] sm:$0xff]  ;;  %v1628_v3 = vld [vmem:[%s2197_s1 + $0x30] sm:$0xff]  ;;  %v1627_v6 = vld [vmem:[%s2197_s1 + $0x28] sm:$0xff]  ;;  %s2205_s7 = smov (!%p206_p4, %s1280_s7), 63 }
   0xd   : > { %v1861_v1 = vld [vmem:[%s2197_s1 + $0x78] sm:$0xff]  ;;  %744 = vmatpush.bf16.msra.mxu0 %v1629_v0  ;;  %1741 = vmatpush.bf16.msra.mxu3 %v1629_v0  ;;  %v1876_v4 = vld [vmem:[%s2197_s1 + $0x70] sm:$0xff]  ;;  %v1891_v7 = vld [vmem:[%s2197_s1 + $0x68] sm:$0xff]  ;;  %s1765_s25 = smul.u32 12, %s2205_s7  ;;  %s1283_s24 = sshll.u32 %s2205_s7, 2 }
   0xe   : > { %v1866_v2 = vld [vmem:[%s2197_s1 + $0xb8] sm:$0xff]  ;;  %833 = vmatpush.bf16.msra.mxu1 %v1861_v1  ;;  %v1881_v5 = vld [vmem:[%s2197_s1 + $0xb0] sm:$0xff]  ;;  %v1896_v8 = vld [vmem:[%s2197_s1 + $0xa8] sm:$0xff]  ;;  %s2079_s27 = scalar_lea.vmem %s2199_s3, %s1283_s24 }
   0xf   : > { %922 = vmatpush.bf16.msra.mxu2 %v1866_v2  ;;  %v1626_v9 = vld [vmem:[%s2197_s1 + $0x20] sm:$0xff]  ;;  %v1625_v12 = vld [vmem:[%s2197_s1 + $0x18] sm:$0xff]  ;;  %v1624_v15 = vld [vmem:[%s2197_s1 + $0x10] sm:$0xff]  ;;  %s1948_s8 = scalar_lea.vmem %s2196_s0, %s1765_s25 }
  0x10   : > { %v1907_v10 = vld [vmem:[%s2197_s1 + $0x60] sm:$0xff]  ;;  %v1633_v13 = vld [vmem:[%s2197_s1 + $0x58] sm:$0xff]  ;;  %v1632_v16 = vld [vmem:[%s2197_s1 + $0x50] sm:$0xff] }
  0x11   : > { %745 = vmatpush.bf16.msra.mxu0 %v1628_v3  ;;  %1742 = vmatpush.bf16.msra.mxu3 %v1628_v3  ;;  %v1912_v11 = vld [vmem:[%s2197_s1 + $0xa0] sm:$0xff]  ;;  %v1927_v14 = vld [vmem:[%s2197_s1 + $0x98] sm:$0xff]  ;;  %v1940_v17 = vld [vmem:[%s2197_s1 + $0x90] sm:$0xff] }
  0x12   : > { %834 = vmatpush.bf16.msra.mxu1 %v1876_v4  ;;  %v1623_v18 = vld [vmem:[%s2197_s1 + $0x8] sm:$0xff]  ;;  %v1622_v21 = vld [vmem:[%s2197_s1] sm:$0xff]  ;;  %v1288_v29 = vld [vmem:[%s1948_s8 + $0xc] sm:$0xf0] }
  0x13   : > { %923 = vmatpush.bf16.msra.mxu2 %v1881_v5  ;;  %v1631_v19 = vld [vmem:[%s2197_s1 + $0x48] sm:$0xff]  ;;  %v1630_v22 = vld [vmem:[%s2197_s1 + $0x40] sm:$0xff]  ;;  %v1576_v31 = vld [vmem:[%s1948_s8 + $0x10] sm:$0xf0] }
  0x14   : > { %v1957_v20 = vld [vmem:[%s2197_s1 + $0x88] sm:$0xff]  ;;  %v1968_v23 = vld [vmem:[%s2197_s1 + $0x80] sm:$0xff]  ;;  %v1298_v36 = vld [vmem:[%s1948_s8 + $0x18] sm:$0xf] }
  0x15   : > { %746 = vmatpush.bf16.msra.mxu0 %v1627_v6  ;;  %1743 = vmatpush.bf16.msra.mxu3 %v1627_v6  ;;  %v1286_v24 = vld [vmem:[%s1948_s8] sm:$0xf]  ;;  %v1575_v25 = vld [vmem:[%s1948_s8 + $0x8] sm:$0xf0]  ;;  %v1574_v28 = vld [vmem:[%s1948_s8 + $0x4] sm:$0xf] }
  0x16   : > { %835 = vmatpush.bf16.msra.mxu1 %v1891_v7  ;;  %v1430_v26 = vld [vmem:[%s1948_s8 + $0x120] sm:$0xf]  ;;  %v1611_v27 = vld [vmem:[%s1948_s8 + $0x128] sm:$0xf0]  ;;  %v1294_v30 = vld [vmem:[%s1948_s8 + $0x8] sm:$0xf]  ;;  %v1287_v32 = vor.u32 %v1575_v25, %v1286_v24  ;;  %v1291_v34 = vor.u32 %v1574_v28, %v1288_v29 }
  0x17   : > { %924 = vmatpush.bf16.msra.mxu2 %v1896_v8  ;;  %v1431_v33 = vor.u32 %v1611_v27, %v1430_v26  ;;  %v1295_v35 = vor.u32 %v1576_v31, %v1294_v30  ;;  %v1578_v37 = vld [vmem:[%s1948_s8 + $0x20] sm:$0xf0]  ;;  %v1442_v38 = vld [vmem:[%s1948_s8 + $0x138] sm:$0xf]  ;;  %v1577_v40 = vld [vmem:[%s1948_s8 + $0x1c] sm:$0xf] }
  0x18   : > { %v1614_v39 = vld [vmem:[%s1948_s8 + $0x140] sm:$0xf0]  ;;  %v1300_v41 = vld [vmem:[%s1948_s8 + $0x24] sm:$0xf0]  ;;  %v1306_v42 = vld [vmem:[%s1948_s8 + $0x20] sm:$0xf]  ;;  %v1299_v44 = vor.u32 %v1578_v37, %v1298_v36 }
  0x19   : > { %747 = vmatpush.bf16.msra.mxu0 %v1626_v9  ;;  %1744 = vmatpush.bf16.msra.mxu3 %v1626_v9  ;;  %v1579_v43 = vld [vmem:[%s1948_s8 + $0x28] sm:$0xf0]  ;;  %v1443_v45 = vor.u32 %v1614_v39, %v1442_v38  ;;  %v1303_v46 = vor.u32 %v1577_v40, %v1300_v41  ;;  %v1310_v48 = vld [vmem:[%s1948_s8 + $0x30] sm:$0xf]  ;;  %v1581_v49 = vld [vmem:[%s1948_s8 + $0x38] sm:$0xf0] }
  0x1a   : > { %836 = vmatpush.bf16.msra.mxu1 %v1907_v10  ;;  %v1307_v47 = vor.u32 %v1579_v43, %v1306_v42  ;;  %v1454_v50 = vld [vmem:[%s1948_s8 + $0x150] sm:$0xf]  ;;  %v1617_v51 = vld [vmem:[%s1948_s8 + $0x158] sm:$0xf0]  ;;  %v1580_v52 = vld [vmem:[%s1948_s8 + $0x34] sm:$0xf]  ;;  %v1311_v56 = vor.u32 %v1581_v49, %v1310_v48 }
  0x1b   : > { %925 = vmatpush.bf16.msra.mxu2 %v1912_v11  ;;  %v1312_v53 = vld [vmem:[%s1948_s8 + $0x3c] sm:$0xf0]  ;;  %v1318_v54 = vld [vmem:[%s1948_s8 + $0x38] sm:$0xf]  ;;  %v1582_v55 = vld [vmem:[%s1948_s8 + $0x40] sm:$0xf0]  ;;  %v1455_v57 = vor.u32 %v1617_v51, %v1454_v50 }
  0x1c   : > { %v1315_v58 = vor.u32 %v1580_v52, %v1312_v53  ;;  %v1319_v59 = vor.u32 %v1582_v55, %v1318_v54  ;;  %v1322_v60 = vld [vmem:[%s1948_s8 + $0x48] sm:$0xf]  ;;  %v1584_v61 = vld [vmem:[%s1948_s8 + $0x50] sm:$0xf0]  ;;  %v1583_v0 = vld [vmem:[%s1948_s8 + $0x4c] sm:$0xf] }
  0x1d   : > { %748 = vmatpush.bf16.msra.mxu0 %v1625_v12  ;;  %1745 = vmatpush.bf16.msra.mxu3 %v1625_v12  ;;  %v1466_v62 = vld [vmem:[%s1948_s8 + $0x168] sm:$0xf]  ;;  %v1620_v63 = vld [vmem:[%s1948_s8 + $0x170] sm:$0xf0]  ;;  %v1585_v3 = vld [vmem:[%s1948_s8 + $0x58] sm:$0xf0] }
  0x1e   : > { %837 = vmatpush.bf16.msra.mxu1 %v1633_v13  ;;  %v1587_v9 = vld [vmem:[%s1948_s8 + $0x68] sm:$0xf0]  ;;  %v1432_v12 = vld [vmem:[%s1948_s8 + $0x12c] sm:$0xf0]  ;;  %v1613_v24 = vld [vmem:[%s1948_s8 + $0x13c] sm:$0xf] }
  0x1f   : > { %926 = vmatpush.bf16.msra.mxu2 %v1927_v14  ;;  %v1444_v25 = vld [vmem:[%s1948_s8 + $0x144] sm:$0xf0]  ;;  %v1354_v26 = vld [vmem:[%s1948_s8 + $0x80] sm:$0xf]  ;;  %v1591_v27 = vld [vmem:[%s1948_s8 + $0x88] sm:$0xf0] }
  0x20   : > { %v1447_v29 = vor.u32 %v1613_v24, %v1444_v25  ;;  %v1355_v31 = vor.u32 %v1591_v27, %v1354_v26  ;;  %v1456_v36 = vld [vmem:[%s1948_s8 + $0x15c] sm:$0xf0]  ;;  %v1366_v38 = vld [vmem:[%s1948_s8 + $0x98] sm:$0xf]  ;;  %v1594_v39 = vld [vmem:[%s1948_s8 + $0xa0] sm:$0xf0] }
  0x21   : > { %749 = vmatpush.bf16.msra.mxu0 %v1624_v15  ;;  %1746 = vmatpush.bf16.msra.mxu3 %v1624_v15  ;;  %v1588_v15 = vld [vmem:[%s1948_s8 + $0x70] sm:$0xf0]  ;;  %v1360_v37 = vld [vmem:[%s1948_s8 + $0x9c] sm:$0xf0]  ;;  %v1367_v43 = vor.u32 %v1594_v39, %v1366_v38  ;;  %v1468_v48 = vld [vmem:[%s1948_s8 + $0x174] sm:$0xf0] }
  0x22   : > { %838 = vmatpush.bf16.msra.mxu1 %v1632_v16  ;;  %v1372_v49 = vld [vmem:[%s1948_s8 + $0xb4] sm:$0xf0]  ;;  %v1378_v50 = vld [vmem:[%s1948_s8 + $0xb0] sm:$0xf]  ;;  %v1597_v51 = vld [vmem:[%s1948_s8 + $0xb8] sm:$0xf0] }
  0x23   : > { %927 = vmatpush.bf16.msra.mxu2 %v1940_v17  ;;  %v1379_v55 = vor.u32 %v1597_v51, %v1378_v50  ;;  %v1618_v50 = vld [vmem:[%s1948_s8 + $0x160] sm:$0xf0]  ;;  %v1408_v51 = vld [vmem:[%s1948_s8 + $0xfc] sm:$0xf0] }
  0x25   : > { %750 = vmatpush.bf16.msra.mxu0 %v1623_v18  ;;  %1747 = vmatpush.bf16.msra.mxu3 %v1623_v18 }
  0x26   : > { %839 = vmatpush.bf16.msra.mxu1 %v1631_v19 }
  0x27   : > { %928 = vmatpush.bf16.msra.mxu2 %v1957_v20 }
  0x29   : > { %751 = vmatpush.bf16.msra.mxu0 %v1622_v21  ;;  %1748 = vmatpush.bf16.msra.mxu3 %v1622_v21  ;;  %v1590_v21 = vld [vmem:[%s1948_s8 + $0x80] sm:$0xf0] }
  0x2a   : > { %840 = vmatpush.bf16.msra.mxu1 %v1630_v22 }
  0x2b   : > { %929 = vmatpush.bf16.msra.mxu2 %v1968_v23 }
  0x2c   : > { %752 = vmatmul.bf16.vlgmr.msra.gmra.mxu0 %v1287_v32  ;;  %812 = vmatmul.bf16.vlgmr.msra.gmra.mxu3 %v1431_v33  ;;  %v1358_v32 = vld [vmem:[%s1948_s8 + $0x90] sm:$0xf]  ;;  %v1593_v33 = vld [vmem:[%s1948_s8 + $0x98] sm:$0xf0] }
  0x2d   : > { %1749 = vmatpush.bf16.msrb.mxu3 %v1861_v1  ;;  %841 = vmatmul.bf16.vlgmr.msra.gmra.mxu1 %v1291_v34  ;;  %v1324_v1 = vld [vmem:[%s1948_s8 + $0x54] sm:$0xf0]  ;;  %v1592_v34 = vld [vmem:[%s1948_s8 + $0x94] sm:$0xf]  ;;  %v1359_v40 = vor.u32 %v1593_v33, %v1358_v32 }
  0x2e   : > { %930 = vmatmul.bf16.vlgmr.msra.gmra.mxu2 %v1295_v35  ;;  %v1327_v6 = vor.u32 %v1583_v0, %v1324_v1  ;;  %v1616_v35 = vld [vmem:[%s1948_s8 + $0x154] sm:$0xf]  ;;  %v1363_v42 = vor.u32 %v1592_v34, %v1360_v37 }
  0x2f   : > { %v1459_v41 = vor.u32 %v1616_v35, %v1456_v36 }
  0x31   : > { %1750 = vmatpush.bf16.msrb.mxu3 %v1876_v4  ;;  %v1323_v4 = vor.u32 %v1584_v61, %v1322_v60  ;;  %v1612_v60 = vld [vmem:[%s1948_s8 + $0x130] sm:$0xf0]  ;;  %v1384_v61 = vld [vmem:[%s1948_s8 + $0xcc] sm:$0xf0] }
  0x35   : > { %1751 = vmatpush.bf16.msrb.mxu3 %v1891_v7 }
  0x39   : > { %1752 = vmatpush.bf16.msrb.mxu3 %v1907_v10  ;;  %v1586_v10 = vld [vmem:[%s1948_s8 + $0x64] sm:$0xf] }
  0x3c   : > { %757 = vmatmul.bf16.gmra.mxu0 %v1299_v44  ;;  %817 = vmatmul.bf16.gmra.mxu3 %v1443_v45  ;;  %v1370_v44 = vld [vmem:[%s1948_s8 + $0xa8] sm:$0xf]  ;;  %v1596_v45 = vld [vmem:[%s1948_s8 + $0xb0] sm:$0xf0] }
  0x3d   : > { %1753 = vmatpush.bf16.msrb.mxu3 %v1633_v13  ;;  %846 = vmatmul.bf16.gmra.mxu1 %v1303_v46  ;;  %v1336_v13 = vld [vmem:[%s1948_s8 + $0x6c] sm:$0xf0]  ;;  %v1595_v46 = vld [vmem:[%s1948_s8 + $0xac] sm:$0xf]  ;;  %v1371_v52 = vor.u32 %v1596_v45, %v1370_v44 }
  0x3e   : > { %935 = vmatmul.bf16.gmra.mxu2 %v1307_v47  ;;  %v1339_v18 = vor.u32 %v1586_v10, %v1336_v13  ;;  %v1619_v47 = vld [vmem:[%s1948_s8 + $0x16c] sm:$0xf]  ;;  %v1375_v54 = vor.u32 %v1595_v46, %v1372_v49  ;;  %v1406_v45 = vld [vmem:[%s1948_s8 + $0xf0] sm:$0xf]  ;;  %v1605_v46 = vld [vmem:[%s1948_s8 + $0xf8] sm:$0xf0] }
  0x3f   : > { %v1471_v53 = vor.u32 %v1619_v47, %v1468_v48  ;;  %v1604_v48 = vld [vmem:[%s1948_s8 + $0xf4] sm:$0xf]  ;;  %v1462_v49 = vld [vmem:[%s1948_s8 + $0x158] sm:$0xf] }
  0x41   : > { %1754 = vmatpush.bf16.msrb.mxu3 %v1632_v16 }
  0x45   : > { %1755 = vmatpush.bf16.msrb.mxu3 %v1631_v19 }
  0x49   : > { %1756 = vmatpush.bf16.msrb.mxu3 %v1630_v22  ;;  %v1589_v22 = vld [vmem:[%s1948_s8 + $0x7c] sm:$0xf] }
  0x4c   : > { %762 = vmatmul.bf16.gmra.mxu0 %v1311_v56  ;;  %822 = vmatmul.bf16.gmra.mxu3 %v1455_v57  ;;  %v1382_v56 = vld [vmem:[%s1948_s8 + $0xc0] sm:$0xf]  ;;  %v1599_v57 = vld [vmem:[%s1948_s8 + $0xc8] sm:$0xf0] }
  0x4d   : > { %1757 = vmatpush.bf16.msra.mxu3 %v1866_v2  ;;  %851 = vmatmul.bf16.gmra.mxu1 %v1315_v58  ;;  %v1330_v2 = vld [vmem:[%s1948_s8 + $0x50] sm:$0xf]  ;;  %v1598_v58 = vld [vmem:[%s1948_s8 + $0xc4] sm:$0xf]  ;;  %v1383_v0 = vor.u32 %v1599_v57, %v1382_v56  ;;  %v1407_v57 = vor.u32 %v1605_v46, %v1406_v45 }
  0x4e   : > { %940 = vmatmul.bf16.gmra.mxu2 %v1319_v59  ;;  %v1331_v7 = vor.u32 %v1585_v3, %v1330_v2  ;;  %v1438_v59 = vld [vmem:[%s1948_s8 + $0x128] sm:$0xf]  ;;  %v2059_v2 = vld [vmem:[%s2198_s2] ss:$0 sm:$0xff] }
  0x4f   : > { %v1439_v1 = vor.u32 %v1612_v60, %v1438_v59 }
  0x51   : > { %1758 = vmatpush.bf16.msra.mxu3 %v1881_v5  ;;  %v1467_v5 = vor.u32 %v1620_v63, %v1466_v62  ;;  %v1390_v62 = vld [vmem:[%s1948_s8 + $0xc8] sm:$0xf]  ;;  %v1600_v63 = vld [vmem:[%s1948_s8 + $0xd0] sm:$0xf0] }
  0x55   : > { %1759 = vmatpush.bf16.msra.mxu3 %v1896_v8  ;;  %v1334_v8 = vld [vmem:[%s1948_s8 + $0x60] sm:$0xf] }
  0x56   : > { %v1335_v16 = vor.u32 %v1587_v9, %v1334_v8 }
  0x59   : > { %1760 = vmatpush.bf16.msra.mxu3 %v1912_v11  ;;  %v1610_v11 = vld [vmem:[%s1948_s8 + $0x124] sm:$0xf] }
  0x5c   : > { %767 = vmatmul.bf16.gmra.mxu0 %v1323_v4  ;;  %827 = vmatmul.bf16.gmra.mxu3 %v1467_v5  ;;  %v1387_v4 = vor.u32 %v1598_v58, %v1384_v61  ;;  %v1391_v5 = vor.u32 %v1600_v63, %v1390_v62  ;;  %v1463_v58 = vor.u32 %v1618_v50, %v1462_v49 }
  0x5d   : > { %1761 = vmatpush.bf16.msra.mxu3 %v1927_v14  ;;  %856 = vmatmul.bf16.gmra.mxu1 %v1327_v6  ;;  %v1342_v14 = vld [vmem:[%s1948_s8 + $0x68] sm:$0xf]  ;;  %v1411_v62 = vor.u32 %v1604_v48, %v1408_v51 }
  0x5e   : > { %945 = vmatmul.bf16.gmra.mxu2 %v1331_v7  ;;  %v1343_v19 = vor.u32 %v1588_v15, %v1342_v14  ;;  %v1394_v14 = vld [vmem:[%s1948_s8 + $0xd8] sm:$0xf]  ;;  %v1602_v15 = vld [vmem:[%s1948_s8 + $0xe0] sm:$0xf0] }
  0x5f   : > { %v1395_v26 = vor.u32 %v1602_v15, %v1394_v14  ;;  %v1418_v14 = vld [vmem:[%s1948_s8 + $0x108] sm:$0xf]  ;;  %v1608_v15 = vld [vmem:[%s1948_s8 + $0x110] sm:$0xf0] }
  0x61   : > { %1762 = vmatpush.bf16.msra.mxu3 %v1940_v17  ;;  %v1435_v17 = vor.u32 %v1610_v11, %v1432_v12 }
  0x65   : > { %1763 = vmatpush.bf16.msra.mxu3 %v1957_v20  ;;  %v1346_v20 = vld [vmem:[%s1948_s8 + $0x78] sm:$0xf] }
  0x66   : > { %v1347_v28 = vor.u32 %v1590_v21, %v1346_v20  ;;  %v1396_v20 = vld [vmem:[%s1948_s8 + $0xe4] sm:$0xf0]  ;;  %v1402_v21 = vld [vmem:[%s1948_s8 + $0xe0] sm:$0xf] }
  0x69   : > { %1764 = vmatpush.bf16.msra.mxu3 %v1968_v23  ;;  %v1348_v23 = vld [vmem:[%s1948_s8 + $0x84] sm:$0xf0] }
  0x6a   : > { %v1351_v30 = vor.u32 %v1589_v22, %v1348_v23  ;;  %v1603_v22 = vld [vmem:[%s1948_s8 + $0xe8] sm:$0xf0] }
  0x6b   : > { %v1403_v32 = vor.u32 %v1603_v22, %v1402_v21  ;;  %v1426_v21 = vld [vmem:[%s1948_s8 + $0x110] sm:$0xf]  ;;  %v1609_v22 = vld [vmem:[%s1948_s8 + $0x118] sm:$0xf0] }
  0x6c   : > { %772 = vmatmul.bf16.gmra.mxu0 %v1335_v16  ;;  %901 = vmatmul.bf16.vlgmr.msrb.gmra.mxu3 %v1435_v17  ;;  %v1601_v17 = vld [vmem:[%s1948_s8 + $0xdc] sm:$0xf] }
  0x6d   : > { %861 = vmatmul.bf16.gmra.mxu1 %v1339_v18  ;;  %v1450_v18 = vld [vmem:[%s1948_s8 + $0x140] sm:$0xf] }
  0x6e   : > { %950 = vmatmul.bf16.gmra.mxu2 %v1343_v19  ;;  %v1615_v19 = vld [vmem:[%s1948_s8 + $0x148] sm:$0xf0] }
  0x6f   : > { %v1451_v27 = vor.u32 %v1615_v19, %v1450_v18  ;;  %v1474_v18 = vld [vmem:[%s1948_s8 + $0x170] sm:$0xf]  ;;  %v1621_v19 = vld [vmem:[%s1948_s8 + $0x178] sm:$0xf0] }
  0x7c   : > { %777 = vmatmul.bf16.gmra.mxu0 %v1347_v28  ;;  %906 = vmatmul.bf16.gmra.mxu3 %v1447_v29 }
  0x7d   : > { %866 = vmatmul.bf16.gmra.mxu1 %v1351_v30 }
  0x7e   : > { %955 = vmatmul.bf16.gmra.mxu2 %v1355_v31  ;;  %v1399_v31 = vor.u32 %v1601_v17, %v1396_v20  ;;  %v1607_v17 = vld [vmem:[%s1948_s8 + $0x10c] sm:$0xf]  ;;  %v1420_v20 = vld [vmem:[%s1948_s8 + $0x114] sm:$0xf0] }
  0x8c   : > { %782 = vmatmul.bf16.gmra.mxu0 %v1359_v40  ;;  %911 = vmatmul.bf16.gmra.mxu3 %v1459_v41 }
  0x8d   : > { %871 = vmatmul.bf16.gmra.mxu1 %v1363_v42 }
  0x8e   : > { %960 = vmatmul.bf16.gmra.mxu2 %v1367_v43 }
  0x9c   : > { %787 = vmatmul.bf16.gmra.mxu0 %v1371_v52  ;;  %916 = vmatmul.bf16.gmra.mxu3 %v1471_v53  ;;  %v1414_v52 = vld [vmem:[%s1948_s8 + $0xf8] sm:$0xf]  ;;  %v1606_v53 = vld [vmem:[%s1948_s8 + $0x100] sm:$0xf0] }
  0x9d   : > { %876 = vmatmul.bf16.gmra.mxu1 %v1375_v54  ;;  %v1415_v63 = vor.u32 %v1606_v53, %v1414_v52 }
  0x9e   : > { %965 = vmatmul.bf16.gmra.mxu2 %v1379_v55 }
  0xa9   : > { %v753_v3 = vpop.f32.mrf.mxu0 }
  0xaa   : > { %v842_v6 = vpop.f32.mrf.mxu1  ;;  %v754_v7 = vadd.f32 %v2059_v2, %v753_v3 }
  0xac   : > { %792 = vmatmul.bf16.gmra.mxu0 %v1383_v0  ;;  %990 = vmatmul.bf16.vlgmr.msra.gmra.mxu3 %v1439_v1  ;;  %v843_v10 = vadd.f32 %v842_v6, %v754_v7 }
  0xad   : > { %881 = vmatmul.bf16.gmra.mxu1 %v1387_v4 }
  0xae   : > { %970 = vmatmul.bf16.gmra.mxu2 %v1391_v5 }
  0xaf   : > { %v2062_v8 = vpop.f32.mrf.mxu3 }
  0xb1   : > { %v931_v9 = vpop.f32.mrf.mxu2  ;;  %v755_v11 = vpop.f32.mrf.mxu0 }
  0xb2   : > { %v844_v12 = vpop.f32.mrf.mxu1  ;;  %v756_v13 = vadd.f32 %v2059_v2, %v755_v11  ;;  %v932_v16 = vadd.f32 %v931_v9, %v843_v10 }
  0xb4   : > { %v845_v24 = vadd.f32 %v844_v12, %v756_v13  ;;  %v1043_v28 = vmul.f32 0.01, %v932_v16  ;;  %vm1011_vm0 = vcmp.ge.f32.partialorder %v932_v16, 0.0 }
  0xb6   : > { %v1075_v35 = vsel %vm1011_vm0, %v932_v16, %v1043_v28  ;;  %v1475_v28 = vor.u32 %v1621_v19, %v1474_v18 }
  0xb7   : > { %v2073_v25 = vpop.f32.mrf.mxu3 }
  0xb9   : > { %v933_v23 = vpop.f32.mrf.mxu2  ;;  %v758_v30 = vpop.f32.mrf.mxu0 }
  0xba   : > { %v934_v29 = vadd.f32 %v933_v23, %v845_v24  ;;  %v847_v33 = vpop.f32.mrf.mxu1  ;;  %v759_v37 = vadd.f32 %v2059_v2, %v758_v30 }
  0xbc   : > { %vm1012_vm1 = vcmp.ge.f32.partialorder %v934_v29, 0.0  ;;  %v1044_v34 = vmul.f32 0.01, %v934_v29  ;;  %797 = vmatmul.bf16.gmra.mxu0 %v1395_v26  ;;  %995 = vmatmul.bf16.gmra.mxu3 %v1451_v27  ;;  %v848_v41 = vadd.f32 %v847_v33, %v759_v37  ;;  %v1419_v27 = vor.u32 %v1608_v15, %v1418_v14 }
  0xbd   : > { %886 = vmatmul.bf16.gmra.mxu1 %v1399_v31  ;;  %v1427_v33 = vor.u32 %v1609_v22, %v1426_v21 }
  0xbe   : > { %v1076_v36 = vsel %vm1012_vm1, %v934_v29, %v1044_v34  ;;  %975 = vmatmul.bf16.gmra.mxu2 %v1403_v32  ;;  %v1423_v32 = vor.u32 %v1607_v17, %v1420_v20 }
  0xbf   : > { %v1649_v38 = vpack.c.bf16 %v1076_v36, %v1075_v35  ;;  %v2082_v39 = vpop.f32.mrf.mxu3 }
  0xc0   : > { %v819_v19 = vadd.f32 %v2059_v2, %v2082_v39 }
  0xc1   : > { %1650 = vst [vmem:[%s2079_s27] sm:$0xff] %v1649_v38   ;;  %v936_v40 = vpop.f32.mrf.mxu2  ;;  %v760_v42 = vpop.f32.mrf.mxu0 }
  0xc2   : > { %v849_v43 = vpop.f32.mrf.mxu1  ;;  %v761_v44 = vadd.f32 %v2059_v2, %v760_v42  ;;  %v937_v47 = vadd.f32 %v936_v40, %v848_v41 }
  0xc4   : > { %v850_v54 = vadd.f32 %v849_v43, %v761_v44  ;;  %v1045_v59 = vmul.f32 0.01, %v937_v47  ;;  %vm1013_vm2 = vcmp.ge.f32.partialorder %v937_v47, 0.0 }
  0xc6   : > { %v1077_v3 = vsel %vm1013_vm2, %v937_v47, %v1045_v59 }
  0xc7   : > { %v2094_v55 = vpop.f32.mrf.mxu3 }
  0xc9   : > { %v938_v56 = vpop.f32.mrf.mxu2  ;;  %v763_v61 = vpop.f32.mrf.mxu0 }
  0xca   : > { %v939_v60 = vadd.f32 %v938_v56, %v850_v54  ;;  %v852_v0 = vpop.f32.mrf.mxu1  ;;  %v764_v5 = vadd.f32 %v2059_v2, %v763_v61 }
  0xcc   : > { %vm1014_vm3 = vcmp.ge.f32.partialorder %v939_v60, 0.0  ;;  %v1046_v1 = vmul.f32 0.01, %v939_v60  ;;  %802 = vmatmul.bf16.gmra.mxu0 %v1407_v57  ;;  %1000 = vmatmul.bf16.gmra.mxu3 %v1463_v58  ;;  %v853_v10 = vadd.f32 %v852_v0, %v764_v5 }
  0xcd   : > { %891 = vmatmul.bf16.gmra.mxu1 %v1411_v62 }
  0xce   : > { %v1078_v4 = vsel %vm1014_vm3, %v939_v60, %v1046_v1  ;;  %980 = vmatmul.bf16.gmra.mxu2 %v1415_v63  ;;  %v814_v60 = vadd.f32 %v2059_v2, %v2062_v8 }
  0xcf   : > { %v1654_v6 = vpack.c.bf16 %v1078_v4, %v1077_v3  ;;  %v2097_v7 = vpop.f32.mrf.mxu3 }
  0xd1   : > { %1726 = vst [vmem:[%s2079_s27 + $0x8] sm:$0xff] %v1654_v6   ;;  %v941_v9 = vpop.f32.mrf.mxu2  ;;  %v765_v11 = vpop.f32.mrf.mxu0 }
  0xd2   : > { %v854_v12 = vpop.f32.mrf.mxu1  ;;  %v766_v13 = vadd.f32 %v2059_v2, %v765_v11  ;;  %v942_v16 = vadd.f32 %v941_v9, %v853_v10 }
  0xd4   : > { %v855_v24 = vadd.f32 %v854_v12, %v766_v13  ;;  %v1047_v29 = vmul.f32 0.01, %v942_v16  ;;  %vm1015_vm4 = vcmp.ge.f32.partialorder %v942_v16, 0.0 }
  0xd6   : > { %v1079_v36 = vsel %vm1015_vm4, %v942_v16, %v1047_v29 }
  0xd7   : > { %v2109_v23 = vpop.f32.mrf.mxu3 }
  0xd9   : > { %v943_v26 = vpop.f32.mrf.mxu2  ;;  %v768_v31 = vpop.f32.mrf.mxu0 }
  0xda   : > { %v944_v30 = vadd.f32 %v943_v26, %v855_v24  ;;  %v857_v34 = vpop.f32.mrf.mxu1  ;;  %v769_v38 = vadd.f32 %v2059_v2, %v768_v31 }
  0xdc   : > { %vm1016_vm5 = vcmp.ge.f32.partialorder %v944_v30, 0.0  ;;  %v1048_v35 = vmul.f32 0.01, %v944_v30  ;;  %807 = vmatmul.bf16.gmra.mxu0 %v1419_v27  ;;  %1005 = vmatmul.bf16.gmra.mxu3 %v1475_v28  ;;  %v858_v43 = vadd.f32 %v857_v34, %v769_v38 }
  0xdd   : > { %896 = vmatmul.bf16.gmra.mxu1 %v1423_v32 }
  0xde   : > { %v1080_v37 = vsel %vm1016_vm5, %v944_v30, %v1048_v35  ;;  %985 = vmatmul.bf16.gmra.mxu2 %v1427_v33 }
  0xdf   : > { %v1659_v40 = vpack.c.bf16 %v1080_v37, %v1079_v36  ;;  %v2112_v41 = vpop.f32.mrf.mxu3 }
  0xe1   : > { %1727 = vst [vmem:[%s2079_s27 + $0x10] sm:$0xff] %v1659_v40   ;;  %v946_v42 = vpop.f32.mrf.mxu2  ;;  %v770_v44 = vpop.f32.mrf.mxu0 }
  0xe2   : > { %v859_v45 = vpop.f32.mrf.mxu1  ;;  %v771_v46 = vadd.f32 %v2059_v2, %v770_v44  ;;  %v947_v47 = vadd.f32 %v946_v42, %v858_v43  ;;  %v824_v43 = vadd.f32 %v2059_v2, %v2097_v7 }
  0xe4   : > { %v860_v48 = vadd.f32 %v859_v45, %v771_v46  ;;  %v1049_v51 = vmul.f32 0.01, %v947_v47  ;;  %vm1017_vm6 = vcmp.ge.f32.partialorder %v947_v47, 0.0 }
  0xe6   : > { %v1081_v57 = vsel %vm1017_vm6, %v947_v47, %v1049_v51 }
  0xe7   : > { %v2116_v49 = vpop.f32.mrf.mxu3 }
  0xe9   : > { %v948_v50 = vpop.f32.mrf.mxu2  ;;  %v773_v53 = vpop.f32.mrf.mxu0 }
  0xea   : > { %v949_v52 = vadd.f32 %v948_v50, %v860_v48  ;;  %v862_v54 = vpop.f32.mrf.mxu1  ;;  %v774_v59 = vadd.f32 %v2059_v2, %v773_v53 }
  0xec   : > { %vm1018_vm7 = vcmp.ge.f32.partialorder %v949_v52, 0.0  ;;  %v1050_v56 = vmul.f32 0.01, %v949_v52  ;;  %v863_v1 = vadd.f32 %v862_v54, %v774_v59 }
  0xee   : > { %v1082_v58 = vsel %vm1018_vm7, %v949_v52, %v1050_v56 }
  0xef   : > { %v1664_v61 = vpack.c.bf16 %v1082_v58, %v1081_v57  ;;  %v902_v62 = vpop.f32.mrf.mxu3 }
  0xf0   : > { %v2122_v63 = vadd.f32 %v902_v62, %v814_v60 }
  0xf1   : > { %1728 = vst [vmem:[%s2079_s27 + $0x18] sm:$0xff] %v1664_v61   ;;  %v951_v0 = vpop.f32.mrf.mxu2  ;;  %v775_v3 = vpop.f32.mrf.mxu0 }
  0xf2   : > { %v864_v4 = vpop.f32.mrf.mxu1  ;;  %v776_v5 = vadd.f32 %v2059_v2, %v775_v3  ;;  %v952_v6 = vadd.f32 %v951_v0, %v863_v1  ;;  %v829_v3 = vadd.f32 %v2059_v2, %v2112_v41 }
  0xf4   : > { %v865_v9 = vadd.f32 %v864_v4, %v776_v5  ;;  %v1051_v12 = vmul.f32 0.01, %v952_v6  ;;  %vm1019_vm8 = vcmp.ge.f32.partialorder %v952_v6, 0.0 }
  0xf6   : > { %v1083_v16 = vsel %vm1019_vm8, %v952_v6, %v1051_v12 }
  0xf7   : > { %v2125_v10 = vpop.f32.mrf.mxu3 }
  0xf9   : > { %v953_v11 = vpop.f32.mrf.mxu2  ;;  %v778_v8 = vpop.f32.mrf.mxu0 }
  0xfa   : > { %v954_v13 = vadd.f32 %v953_v11, %v865_v9  ;;  %v867_v14 = vpop.f32.mrf.mxu1  ;;  %v779_v18 = vadd.f32 %v2059_v2, %v778_v8 }
  0xfc   : > { %vm1020_vm9 = vcmp.ge.f32.partialorder %v954_v13, 0.0  ;;  %v1052_v15 = vmul.f32 0.01, %v954_v13  ;;  %v868_v26 = vadd.f32 %v867_v14, %v779_v18 }
  0xfe   : > { %v1084_v17 = vsel %vm1020_vm9, %v954_v13, %v1052_v15 }
  0xff   : > { %v1669_v20 = vpack.c.bf16 %v1084_v17, %v1083_v16  ;;  %v907_v21 = vpop.f32.mrf.mxu3 }
 0x100   : > { %v2131_v22 = vadd.f32 %v907_v21, %v819_v19 }
 0x101   : > { %1729 = vst [vmem:[%s2079_s27 + $0x20] sm:$0xff] %v1669_v20   ;;  %v956_v24 = vpop.f32.mrf.mxu2  ;;  %v780_v27 = vpop.f32.mrf.mxu0 }
 0x102   : > { %v869_v28 = vpop.f32.mrf.mxu1  ;;  %v781_v29 = vadd.f32 %v2059_v2, %v780_v27  ;;  %v957_v30 = vadd.f32 %v956_v24, %v868_v26 }
 0x104   : > { %v870_v31 = vadd.f32 %v869_v28, %v781_v29  ;;  %v1053_v34 = vmul.f32 0.01, %v957_v30  ;;  %vm1021_vm10 = vcmp.ge.f32.partialorder %v957_v30, 0.0 }
 0x106   : > { %v1085_v38 = vsel %vm1021_vm10, %v957_v30, %v1053_v34 }
 0x107   : > { %v2134_v32 = vpop.f32.mrf.mxu3 }
 0x109   : > { %v958_v33 = vpop.f32.mrf.mxu2  ;;  %v783_v39 = vpop.f32.mrf.mxu0 }
 0x10a   : > { %v959_v35 = vadd.f32 %v958_v33, %v870_v31  ;;  %v872_v36 = vpop.f32.mrf.mxu1  ;;  %v784_v42 = vadd.f32 %v2059_v2, %v783_v39  ;;  %v816_v39 = vadd.f32 %v2059_v2, %v2073_v25 }
 0x10c   : > { %vm1022_vm11 = vcmp.ge.f32.partialorder %v959_v35, 0.0  ;;  %v1054_v37 = vmul.f32 0.01, %v959_v35  ;;  %v873_v48 = vadd.f32 %v872_v36, %v784_v42 }
 0x10e   : > { %v1086_v40 = vsel %vm1022_vm11, %v959_v35, %v1054_v37 }
 0x10f   : > { %v1674_v44 = vpack.c.bf16 %v1086_v40, %v1085_v38  ;;  %v912_v45 = vpop.f32.mrf.mxu3  ;;  %v905_v38 = vadd.f32 %v2125_v10, %v816_v39 }
 0x110   : > { %v2140_v46 = vadd.f32 %v912_v45, %v824_v43 }
 0x111   : > { %1730 = vst [vmem:[%s2079_s27 + $0x28] sm:$0xff] %v1674_v44   ;;  %v961_v47 = vpop.f32.mrf.mxu2  ;;  %v785_v50 = vpop.f32.mrf.mxu0 }
 0x112   : > { %v874_v51 = vpop.f32.mrf.mxu1  ;;  %v786_v52 = vadd.f32 %v2059_v2, %v785_v50  ;;  %v962_v53 = vadd.f32 %v961_v47, %v873_v48 }
 0x114   : > { %v875_v54 = vadd.f32 %v874_v51, %v786_v52  ;;  %v1055_v58 = vmul.f32 0.01, %v962_v53  ;;  %vm1023_vm12 = vcmp.ge.f32.partialorder %v962_v53, 0.0 }
 0x116   : > { %v1087_v62 = vsel %vm1023_vm12, %v962_v53, %v1055_v58 }
 0x117   : > { %v2143_v56 = vpop.f32.mrf.mxu3 }
 0x119   : > { %v963_v57 = vpop.f32.mrf.mxu2  ;;  %v788_v7 = vpop.f32.mrf.mxu0 }
 0x11a   : > { %v964_v59 = vadd.f32 %v963_v57, %v875_v54  ;;  %v877_v60 = vpop.f32.mrf.mxu1  ;;  %v789_v1 = vadd.f32 %v2059_v2, %v788_v7 }
 0x11c   : > { %vm1024_vm13 = vcmp.ge.f32.partialorder %v964_v59, 0.0  ;;  %v1056_v61 = vmul.f32 0.01, %v964_v59  ;;  %v878_v11 = vadd.f32 %v877_v60, %v789_v1 }
 0x11e   : > { %v1088_v0 = vsel %vm1024_vm13, %v964_v59, %v1056_v61 }
 0x11f   : > { %v1679_v4 = vpack.c.bf16 %v1088_v0, %v1087_v62  ;;  %v917_v5 = vpop.f32.mrf.mxu3 }
 0x120   : > { %v2149_v6 = vadd.f32 %v917_v5, %v829_v3  ;;  %v821_v3 = vadd.f32 %v2059_v2, %v2094_v55 }
 0x121   : > { %1731 = vst [vmem:[%s2079_s27 + $0x30] sm:$0xff] %v1679_v4   ;;  %v966_v9 = vpop.f32.mrf.mxu2  ;;  %v790_v12 = vpop.f32.mrf.mxu0 }
 0x122   : > { %v879_v13 = vpop.f32.mrf.mxu1  ;;  %v791_v8 = vadd.f32 %v2059_v2, %v790_v12  ;;  %v967_v14 = vadd.f32 %v966_v9, %v878_v11  ;;  %v910_v9 = vadd.f32 %v2134_v32, %v821_v3 }
 0x124   : > { %v880_v15 = vadd.f32 %v879_v13, %v791_v8  ;;  %v1057_v18 = vmul.f32 0.01, %v967_v14  ;;  %vm1025_vm14 = vcmp.ge.f32.partialorder %v967_v14, 0.0 }
 0x126   : > { %v1089_v24 = vsel %vm1025_vm14, %v967_v14, %v1057_v18 }
 0x127   : > { %v2152_v16 = vpop.f32.mrf.mxu3 }
 0x129   : > { %v968_v17 = vpop.f32.mrf.mxu2  ;;  %v793_v41 = vpop.f32.mrf.mxu0 }
 0x12a   : > { %v969_v19 = vadd.f32 %v968_v17, %v880_v15  ;;  %v882_v20 = vpop.f32.mrf.mxu1  ;;  %v794_v27 = vadd.f32 %v2059_v2, %v793_v41 }
 0x12c   : > { %vm1026_vm15 = vcmp.ge.f32.partialorder %v969_v19, 0.0  ;;  %v1058_v21 = vmul.f32 0.01, %v969_v19  ;;  %v883_v31 = vadd.f32 %v882_v20, %v794_v27 }
 0x12e   : > { %v1090_v26 = vsel %vm1026_vm15, %v969_v19, %v1058_v21 }
 0x12f   : > { %v1684_v28 = vpack.c.bf16 %v1090_v26, %v1089_v24  ;;  %v991_v29 = vpop.f32.mrf.mxu3 }
 0x130   : > { %v992_v36 = vadd.f32 %v991_v29, %v2122_v63 }
 0x131   : > { %1732 = vst [vmem:[%s2079_s27 + $0x38] sm:$0xff] %v1684_v28   ;;  %v971_v30 = vpop.f32.mrf.mxu2  ;;  %v795_v33 = vpop.f32.mrf.mxu0 }
 0x132   : > { %v884_v34 = vpop.f32.mrf.mxu1  ;;  %v796_v35 = vadd.f32 %v2059_v2, %v795_v33  ;;  %v972_v37 = vadd.f32 %v971_v30, %v883_v31  ;;  %v1067_v43 = vmul.f32 0.01, %v992_v36  ;;  %vm1035_vm0 = vcmp.ge.f32.partialorder %v992_v36, 0.0 }
 0x134   : > { %v885_v40 = vadd.f32 %v884_v34, %v796_v35  ;;  %v1059_v47 = vmul.f32 0.01, %v972_v37  ;;  %vm1027_vm1 = vcmp.ge.f32.partialorder %v972_v37, 0.0  ;;  %v1099_v52 = vsel %vm1035_vm0, %v992_v36, %v1067_v43 }
 0x135   : > { %v826_v35 = vadd.f32 %v2059_v2, %v2109_v23 }
 0x136   : > { %v1091_v10 = vsel %vm1027_vm1, %v972_v37, %v1059_v47 }
 0x137   : > { %v993_v42 = vpop.f32.mrf.mxu3  ;;  %v915_v37 = vadd.f32 %v2143_v56, %v826_v35 }
 0x138   : > { %v994_v45 = vadd.f32 %v993_v42, %v905_v38 }
 0x139   : > { %v973_v44 = vpop.f32.mrf.mxu2  ;;  %v798_v50 = vpop.f32.mrf.mxu0 }
 0x13a   : > { %v974_v48 = vadd.f32 %v973_v44, %v885_v40  ;;  %vm1036_vm2 = vcmp.ge.f32.partialorder %v994_v45, 0.0  ;;  %v1068_v51 = vmul.f32 0.01, %v994_v45  ;;  %v887_v25 = vpop.f32.mrf.mxu1  ;;  %v799_v58 = vadd.f32 %v2059_v2, %v798_v50 }
 0x13c   : > { %vm1028_vm3 = vcmp.ge.f32.partialorder %v974_v48, 0.0  ;;  %v1060_v63 = vmul.f32 0.01, %v974_v48  ;;  %v1100_v53 = vsel %vm1036_vm2, %v994_v45, %v1068_v51  ;;  %v888_v61 = vadd.f32 %v887_v25, %v799_v58 }
 0x13d   : > { %v1709_v57 = vpack.c.bf16 %v1100_v53, %v1099_v52 }
 0x13e   : > { %v1092_v54 = vsel %vm1028_vm3, %v974_v48, %v1060_v63 }
 0x13f   : > { %v1689_v59 = vpack.c.bf16 %v1092_v54, %v1091_v10  ;;  %1737 = vst [vmem:[%s2079_s27 + $0x60] sm:$0xff] %v1709_v57   ;;  %v996_v7 = vpop.f32.mrf.mxu3 }
 0x140   : > { %v997_v4 = vadd.f32 %v996_v7, %v2131_v22 }
 0x141   : > { %1733 = vst [vmem:[%s2079_s27 + $0x40] sm:$0xff] %v1689_v59   ;;  %v976_v60 = vpop.f32.mrf.mxu2  ;;  %v800_v62 = vpop.f32.mrf.mxu0 }
 0x142   : > { %v889_v0 = vpop.f32.mrf.mxu1  ;;  %v801_v1 = vadd.f32 %v2059_v2, %v800_v62  ;;  %v977_v5 = vadd.f32 %v976_v60, %v888_v61  ;;  %v1069_v13 = vmul.f32 0.01, %v997_v4  ;;  %vm1037_vm4 = vcmp.ge.f32.partialorder %v997_v4, 0.0 }
 0x143   : > { %v831_v60 = vadd.f32 %v2059_v2, %v2116_v49 }
 0x144   : > { %v890_v11 = vadd.f32 %v889_v0, %v801_v1  ;;  %v1061_v15 = vmul.f32 0.01, %v977_v5  ;;  %vm1029_vm5 = vcmp.ge.f32.partialorder %v977_v5, 0.0  ;;  %v1101_v41 = vsel %vm1037_vm4, %v997_v4, %v1069_v13 }
 0x145   : > { %v920_v0 = vadd.f32 %v2152_v16, %v831_v60 }
 0x146   : > { %v1093_v32 = vsel %vm1029_vm5, %v977_v5, %v1061_v15 }
 0x147   : > { %v998_v12 = vpop.f32.mrf.mxu3 }
 0x148   : > { %v999_v14 = vadd.f32 %v998_v12, %v910_v9 }
 0x149   : > { %v978_v8 = vpop.f32.mrf.mxu2  ;;  %v803_v18 = vpop.f32.mrf.mxu0 }
 0x14a   : > { %v979_v17 = vadd.f32 %v978_v8, %v890_v11  ;;  %vm1038_vm6 = vcmp.ge.f32.partialorder %v999_v14, 0.0  ;;  %v1070_v19 = vmul.f32 0.01, %v999_v14  ;;  %v892_v55 = vpop.f32.mrf.mxu1  ;;  %v804_v26 = vadd.f32 %v2059_v2, %v803_v18 }
 0x14c   : > { %vm1030_vm7 = vcmp.ge.f32.partialorder %v979_v17, 0.0  ;;  %v1062_v22 = vmul.f32 0.01, %v979_v17  ;;  %v1102_v20 = vsel %vm1038_vm6, %v999_v14, %v1070_v19  ;;  %v893_v30 = vadd.f32 %v892_v55, %v804_v26 }
 0x14d   : > { %v1714_v24 = vpack.c.bf16 %v1102_v20, %v1101_v41 }
 0x14e   : > { %v1094_v21 = vsel %vm1030_vm7, %v979_v17, %v1062_v22 }
 0x14f   : > { %v1694_v27 = vpack.c.bf16 %v1094_v21, %v1093_v32  ;;  %1738 = vst [vmem:[%s2079_s27 + $0x68] sm:$0xff] %v1714_v24   ;;  %v1001_v28 = vpop.f32.mrf.mxu3 }
 0x150   : > { %v1002_v39 = vadd.f32 %v1001_v28, %v2140_v46 }
 0x151   : > { %1734 = vst [vmem:[%s2079_s27 + $0x48] sm:$0xff] %v1694_v27   ;;  %v981_v29 = vpop.f32.mrf.mxu2  ;;  %v805_v31 = vpop.f32.mrf.mxu0 }
 0x152   : > { %v894_v33 = vpop.f32.mrf.mxu1  ;;  %v806_v34 = vadd.f32 %v2059_v2, %v805_v31  ;;  %v982_v36 = vadd.f32 %v981_v29, %v893_v30  ;;  %v1071_v42 = vmul.f32 0.01, %v1002_v39  ;;  %vm1039_vm8 = vcmp.ge.f32.partialorder %v1002_v39, 0.0 }
 0x154   : > { %v895_v38 = vadd.f32 %v894_v33, %v806_v34  ;;  %v1063_v45 = vmul.f32 0.01, %v982_v36  ;;  %vm1031_vm9 = vcmp.ge.f32.partialorder %v982_v36, 0.0  ;;  %v1103_v46 = vsel %vm1039_vm8, %v1002_v39, %v1071_v42 }
 0x156   : > { %v1095_v56 = vsel %vm1031_vm9, %v982_v36, %v1063_v45 }
 0x157   : > { %v1003_v40 = vpop.f32.mrf.mxu3 }
 0x158   : > { %v1004_v44 = vadd.f32 %v1003_v40, %v915_v37 }
 0x159   : > { %v983_v43 = vpop.f32.mrf.mxu2  ;;  %v808_v48 = vpop.f32.mrf.mxu0 }
 0x15a   : > { %v984_v47 = vadd.f32 %v983_v43, %v895_v38  ;;  %vm1040_vm10 = vcmp.ge.f32.partialorder %v1004_v44, 0.0  ;;  %v1072_v50 = vmul.f32 0.01, %v1004_v44  ;;  %v897_v25 = vpop.f32.mrf.mxu1  ;;  %v809_v53 = vadd.f32 %v2059_v2, %v808_v48 }
 0x15c   : > { %vm1032_vm11 = vcmp.ge.f32.partialorder %v984_v47, 0.0  ;;  %v1064_v23 = vmul.f32 0.01, %v984_v47  ;;  %v1104_v51 = vsel %vm1040_vm10, %v1004_v44, %v1072_v50  ;;  %v898_v58 = vadd.f32 %v897_v25, %v809_v53 }
 0x15d   : > { %v1719_v52 = vpack.c.bf16 %v1104_v51, %v1103_v46 }
 0x15e   : > { %v1096_v63 = vsel %vm1032_vm11, %v984_v47, %v1064_v23 }
 0x15f   : > { %v1699_v10 = vpack.c.bf16 %v1096_v63, %v1095_v56  ;;  %1739 = vst [vmem:[%s2079_s27 + $0x70] sm:$0xff] %v1719_v52   ;;  %v1006_v54 = vpop.f32.mrf.mxu3 }
 0x160   : > { %v1007_v61 = vadd.f32 %v1006_v54, %v2149_v6 }
 0x161   : > { %1735 = vst [vmem:[%s2079_s27 + $0x50] sm:$0xff] %v1699_v10   ;;  %v986_v57 = vpop.f32.mrf.mxu2  ;;  %v810_v59 = vpop.f32.mrf.mxu0 }
 0x162   : > { %v811_v7 = vadd.f32 %v2059_v2, %v810_v59  ;;  %v987_v62 = vadd.f32 %v986_v57, %v898_v58  ;;  %v899_v1 = vpop.f32.mrf.mxu1  ;;  %v1073_v5 = vmul.f32 0.01, %v1007_v61  ;;  %vm1041_vm12 = vcmp.ge.f32.partialorder %v1007_v61, 0.0 }
 0x164   : > { %v900_v3 = vadd.f32 %v899_v1, %v811_v7  ;;  %v1065_v12 = vmul.f32 0.01, %v987_v62  ;;  %vm1033_vm13 = vcmp.ge.f32.partialorder %v987_v62, 0.0  ;;  %v1105_v49 = vsel %vm1041_vm12, %v1007_v61, %v1073_v5 }
 0x166   : > { %v1097_v14 = vsel %vm1033_vm13, %v987_v62, %v1065_v12 }
 0x167   : > { %v1008_v4 = vpop.f32.mrf.mxu3 }
 0x168   : > { %v1009_v11 = vadd.f32 %v1008_v4, %v920_v0 }
 0x169   : > { %v988_v9 = vpop.f32.mrf.mxu2 }
 0x16a   : > { %v989_v13 = vadd.f32 %v988_v9, %v900_v3  ;;  %vm1042_vm14 = vcmp.ge.f32.partialorder %v1009_v11, 0.0  ;;  %v1074_v8 = vmul.f32 0.01, %v1009_v11 }
 0x16c   : > { %vm1034_vm15 = vcmp.ge.f32.partialorder %v989_v13, 0.0  ;;  %v1066_v2 = vmul.f32 0.01, %v989_v13  ;;  %v1106_v6 = vsel %vm1042_vm14, %v1009_v11, %v1074_v8 }
 0x16d   : > { %v1724_v15 = vpack.c.bf16 %v1106_v6, %v1105_v49 }
 0x16e   : > { %v1098_v16 = vsel %vm1034_vm15, %v989_v13, %v1066_v2 }
 0x16f   : > { %v1704_v17 = vpack.c.bf16 %v1098_v16, %v1097_v14  ;;  %1740 = vst [vmem:[%s2079_s27 + $0x78] sm:$0xff] %v1724_v15  }
 0x171   : > { %1736 = vst [vmem:[%s2079_s27 + $0x58] sm:$0xff] %v1704_v17  }
 0x172 PF: > { %s13_s14 = sadd.s32 1, %s1813_s14   ;;  %s2200_s12 = smov %s1809_s13 }
 0x173   : > { %p10_p5 = scmp.ge.s32.totalorder %s13_s14, 4   ;;  %s2201_s13 = smov %s2203_s15 }
 0x175   :  { %12 = sbr.rel (!%p10_p5) target bundleno = 2 (0x2), region = 68 }

// kernel: cotr_forward.11
= control target key start
LH: loop header
LB: loop body
LE: loop exit
PB: predicated region body
PF: predicated region fallthrough
CT: control target
= control target key end

     0   :  { %s966_s12 = smov 0   ;;  %s968_s13 = smov 0   ;;  %s1119_s0 = inlined_call_operand.vmem [shape: bf16[2048,128], index: 0, kind: input, shape index: {}]   ;;  %s1120_s1 = inlined_call_operand.vmem [shape: bf16[128,128], index: 1, kind: input, shape index: {}]   ;;  %s1121_s2 = inlined_call_operand.vmem [shape: f32[1,128], index: 2, kind: input, shape index: {}]   ;;  %s1122_s3 = inlined_call_operand.vmem [shape: f32[2048,128], index: 3, kind: output, shape index: {}]  }
   0x1   :  { %s970_s14 = smov 0  }
   0x2 LB: > { %s25_s15 = sadd.s32 1, %s940_s13  ;;  %p746_p0 = scmp.ge.s32.totalorder %s944_s14, 1  ;;  %s944_s14 = sphi %s970_s14, %s13_s14   ;;  %s940_s13 = sphi %s968_s13, %s1124_s13   ;;  %s936_s12 = sphi %s966_s12, %s1123_s12  }
   0x3   : > { %p27_p1 = scmp.ge.s32.totalorder %s25_s15, 8  ;;  %p169_p2 = scmp.lt.s32.totalorder %s944_s14, 9 }
   0x5   : > { %s1126_s15 = smov (%p27_p1, %s25_s15), 0  ;;  %p170_p3 = pnand %p746_p0, %p169_p2 }
   0x6   : > { %s747_s24 = sshll.u32 (!%p170_p3), %s936_s12, 5 }
   0x7   : > { %173 = sbr.rel (%p170_p3) target bundleno = 240 (0xf0), region = 32  ;;  %p204_p4 = scmp.lt.s32.totalorder (!%p170_p3), %s747_s24, 255 }
   0xc   : > { %v872_v0 = vld [vmem:[%s1120_s1 + $0x38] sm:$0xff]  ;;  %v871_v1 = vld [vmem:[%s1120_s1 + $0x30] sm:$0xff]  ;;  %v870_v2 = vld [vmem:[%s1120_s1 + $0x28] sm:$0xff]  ;;  %s1128_s24 = smov (!%p204_p4, %s747_s24), 255 }
   0xd   : > { %421 = vmatpush.bf16.msra.mxu0 %v872_v0  ;;  %873 = vmatpush.bf16.msra.mxu1 %v872_v0  ;;  %v869_v3 = vld [vmem:[%s1120_s1 + $0x20] sm:$0xff]  ;;  %v868_v4 = vld [vmem:[%s1120_s1 + $0x18] sm:$0xff]  ;;  %v867_v5 = vld [vmem:[%s1120_s1 + $0x10] sm:$0xff]  ;;  %s748_s4 = sshll.u32 %s1128_s24, 2  ;;  %s750_s12 = sshll.u32 %s1128_s24, 3 }
   0xe   : > { %874 = vmatpush.bf16.msra.mxu2 %v872_v0  ;;  %875 = vmatpush.bf16.msra.mxu3 %v872_v0  ;;  %v866_v6 = vld [vmem:[%s1120_s1 + $0x8] sm:$0xff]  ;;  %v865_v7 = vld [vmem:[%s1120_s1] sm:$0xff]  ;;  %s1017_s9 = scalar_lea.vmem %s1119_s0, %s748_s4  ;;  %s1046_s18 = scalar_lea.vmem %s1122_s3, %s750_s12 }
   0xf   : > { %v849_v8 = vld [vmem:[%s1017_s9] sm:$0xff]  ;;  %v850_v12 = vld [vmem:[%s1017_s9 + $0x8] sm:$0xff]  ;;  %v851_v16 = vld [vmem:[%s1017_s9 + $0x10] sm:$0xff] }
  0x10   : > { %v853_v9 = vld [vmem:[%s1017_s9 + $0x20] sm:$0xff]  ;;  %v854_v13 = vld [vmem:[%s1017_s9 + $0x28] sm:$0xff]  ;;  %v855_v17 = vld [vmem:[%s1017_s9 + $0x30] sm:$0xff] }
  0x11   : > { %422 = vmatpush.bf16.msra.mxu0 %v871_v1  ;;  %876 = vmatpush.bf16.msra.mxu1 %v871_v1  ;;  %v857_v10 = vld [vmem:[%s1017_s9 + $0x40] sm:$0xff]  ;;  %v858_v14 = vld [vmem:[%s1017_s9 + $0x48] sm:$0xff]  ;;  %v859_v18 = vld [vmem:[%s1017_s9 + $0x50] sm:$0xff] }
  0x12   : > { %877 = vmatpush.bf16.msra.mxu2 %v871_v1  ;;  %878 = vmatpush.bf16.msra.mxu3 %v871_v1  ;;  %v861_v11 = vld [vmem:[%s1017_s9 + $0x60] sm:$0xff]  ;;  %v862_v15 = vld [vmem:[%s1017_s9 + $0x68] sm:$0xff]  ;;  %v863_v19 = vld [vmem:[%s1017_s9 + $0x70] sm:$0xff] }
  0x13   : > { %v852_v20 = vld [vmem:[%s1017_s9 + $0x18] sm:$0xff]  ;;  %v1038_v24 = vld [vmem:[%s1121_s2] ss:$0 sm:$0xff] }
  0x14   : > { %v856_v21 = vld [vmem:[%s1017_s9 + $0x38] sm:$0xff] }
  0x15   : > { %423 = vmatpush.bf16.msra.mxu0 %v870_v2  ;;  %879 = vmatpush.bf16.msra.mxu1 %v870_v2  ;;  %v860_v22 = vld [vmem:[%s1017_s9 + $0x58] sm:$0xff] }
  0x16   : > { %880 = vmatpush.bf16.msra.mxu2 %v870_v2  ;;  %881 = vmatpush.bf16.msra.mxu3 %v870_v2  ;;  %v864_v23 = vld [vmem:[%s1017_s9 + $0x78] sm:$0xff] }
  0x19   : > { %424 = vmatpush.bf16.msra.mxu0 %v869_v3  ;;  %882 = vmatpush.bf16.msra.mxu1 %v869_v3 }
  0x1a   : > { %883 = vmatpush.bf16.msra.mxu2 %v869_v3  ;;  %884 = vmatpush.bf16.msra.mxu3 %v869_v3 }
  0x1d   : > { %425 = vmatpush.bf16.msra.mxu0 %v868_v4  ;;  %885 = vmatpush.bf16.msra.mxu1 %v868_v4 }
  0x1e   : > { %886 = vmatpush.bf16.msra.mxu2 %v868_v4  ;;  %887 = vmatpush.bf16.msra.mxu3 %v868_v4 }
  0x21   : > { %426 = vmatpush.bf16.msra.mxu0 %v867_v5  ;;  %888 = vmatpush.bf16.msra.mxu1 %v867_v5 }
  0x22   : > { %889 = vmatpush.bf16.msra.mxu2 %v867_v5  ;;  %890 = vmatpush.bf16.msra.mxu3 %v867_v5 }
  0x25   : > { %427 = vmatpush.bf16.msra.mxu0 %v866_v6  ;;  %891 = vmatpush.bf16.msra.mxu1 %v866_v6 }
  0x26   : > { %892 = vmatpush.bf16.msra.mxu2 %v866_v6  ;;  %893 = vmatpush.bf16.msra.mxu3 %v866_v6 }
  0x29   : > { %428 = vmatpush.bf16.msra.mxu0 %v865_v7  ;;  %894 = vmatpush.bf16.msra.mxu1 %v865_v7 }
  0x2a   : > { %895 = vmatpush.bf16.msra.mxu2 %v865_v7  ;;  %896 = vmatpush.bf16.msra.mxu3 %v865_v7 }
  0x2c   : > { %429 = vmatmul.bf16.vlgmr.msra.gmra.mxu0 %v849_v8  ;;  %449 = vmatmul.bf16.vlgmr.msra.gmra.mxu1 %v853_v9 }
  0x2d   : > { %469 = vmatmul.bf16.vlgmr.msra.gmra.mxu2 %v857_v10  ;;  %489 = vmatmul.bf16.vlgmr.msra.gmra.mxu3 %v861_v11 }
  0x3c   : > { %434 = vmatmul.bf16.gmra.mxu0 %v850_v12  ;;  %454 = vmatmul.bf16.gmra.mxu1 %v854_v13 }
  0x3d   : > { %474 = vmatmul.bf16.gmra.mxu2 %v858_v14  ;;  %494 = vmatmul.bf16.gmra.mxu3 %v862_v15 }
  0x4c   : > { %439 = vmatmul.bf16.gmra.mxu0 %v851_v16  ;;  %459 = vmatmul.bf16.gmra.mxu1 %v855_v17 }
  0x4d   : > { %479 = vmatmul.bf16.gmra.mxu2 %v859_v18  ;;  %499 = vmatmul.bf16.gmra.mxu3 %v863_v19 }
  0x5c   : > { %444 = vmatmul.bf16.gmra.mxu0 %v852_v20  ;;  %464 = vmatmul.bf16.gmra.mxu1 %v856_v21 }
  0x5d   : > { %484 = vmatmul.bf16.gmra.mxu2 %v860_v22  ;;  %504 = vmatmul.bf16.gmra.mxu3 %v864_v23 }
  0xa9   : > { %v430_v25 = vpop.f32.mrf.mxu0  ;;  %v450_v26 = vpop.f32.mrf.mxu1 }
  0xaa   : > { %v431_v27 = vadd.f32 %v1038_v24, %v430_v25  ;;  %v451_v28 = vadd.f32 %v1038_v24, %v450_v26 }
  0xac   : > { %vm510_vm0 = vcmp.ge.f32.partialorder %v431_v27, 0.0  ;;  %v542_v29 = vmul.f32 0.01, %v431_v27  ;;  %vm518_vm1 = vcmp.ge.f32.partialorder %v451_v28, 0.0  ;;  %v550_v30 = vmul.f32 0.01, %v451_v28 }
  0xae   : > { %v574_v31 = vsel %vm510_vm0, %v431_v27, %v542_v29  ;;  %v582_v32 = vsel %vm518_vm1, %v451_v28, %v550_v30 }
  0xaf   : > { %606 = vst [vmem:[%s1046_s18] sm:$0xff] %v574_v31 }
  0xb0   : > { %614 = vst [vmem:[%s1046_s18 + $0x40] sm:$0xff] %v582_v32  ;;  %v470_v33 = vpop.f32.mrf.mxu2  ;;  %v490_v34 = vpop.f32.mrf.mxu3 }
  0xb1   : > { %v471_v35 = vadd.f32 %v1038_v24, %v470_v33  ;;  %v491_v36 = vadd.f32 %v1038_v24, %v490_v34  ;;  %v432_v37 = vpop.f32.mrf.mxu0  ;;  %v452_v38 = vpop.f32.mrf.mxu1 }
  0xb2   : > { %v433_v39 = vadd.f32 %v1038_v24, %v432_v37  ;;  %v453_v40 = vadd.f32 %v1038_v24, %v452_v38 }
  0xb3   : > { %vm526_vm2 = vcmp.ge.f32.partialorder %v471_v35, 0.0  ;;  %v558_v41 = vmul.f32 0.01, %v471_v35  ;;  %vm534_vm3 = vcmp.ge.f32.partialorder %v491_v36, 0.0  ;;  %v566_v42 = vmul.f32 0.01, %v491_v36 }
  0xb4   : > { %vm511_vm4 = vcmp.ge.f32.partialorder %v433_v39, 0.0  ;;  %v543_v43 = vmul.f32 0.01, %v433_v39  ;;  %vm519_vm5 = vcmp.ge.f32.partialorder %v453_v40, 0.0  ;;  %v551_v44 = vmul.f32 0.01, %v453_v40 }
  0xb5   : > { %v590_v45 = vsel %vm526_vm2, %v471_v35, %v558_v41  ;;  %v598_v46 = vsel %vm534_vm3, %v491_v36, %v566_v42 }
  0xb6   : > { %622 = vst [vmem:[%s1046_s18 + $0x80] sm:$0xff] %v590_v45  ;;  %v575_v47 = vsel %vm511_vm4, %v433_v39, %v543_v43  ;;  %v583_v48 = vsel %vm519_vm5, %v453_v40, %v551_v44 }
  0xb7   : > { %630 = vst [vmem:[%s1046_s18 + $0xc0] sm:$0xff] %v598_v46 }
  0xb8   : > { %607 = vst [vmem:[%s1046_s18 + $0x8] sm:$0xff] %v575_v47  ;;  %v472_v49 = vpop.f32.mrf.mxu2  ;;  %v492_v50 = vpop.f32.mrf.mxu3 }
  0xb9   : > { %615 = vst [vmem:[%s1046_s18 + $0x48] sm:$0xff] %v583_v48  ;;  %v473_v51 = vadd.f32 %v1038_v24, %v472_v49  ;;  %v493_v52 = vadd.f32 %v1038_v24, %v492_v50  ;;  %v435_v53 = vpop.f32.mrf.mxu0  ;;  %v455_v54 = vpop.f32.mrf.mxu1 }
  0xba   : > { %v436_v55 = vadd.f32 %v1038_v24, %v435_v53  ;;  %v456_v56 = vadd.f32 %v1038_v24, %v455_v54 }
  0xbb   : > { %vm527_vm6 = vcmp.ge.f32.partialorder %v473_v51, 0.0  ;;  %v559_v57 = vmul.f32 0.01, %v473_v51  ;;  %vm535_vm7 = vcmp.ge.f32.partialorder %v493_v52, 0.0  ;;  %v567_v58 = vmul.f32 0.01, %v493_v52 }
  0xbc   : > { %vm512_vm8 = vcmp.ge.f32.partialorder %v436_v55, 0.0  ;;  %v544_v59 = vmul.f32 0.01, %v436_v55  ;;  %vm520_vm9 = vcmp.ge.f32.partialorder %v456_v56, 0.0  ;;  %v552_v60 = vmul.f32 0.01, %v456_v56 }
  0xbd   : > { %v591_v61 = vsel %vm527_vm6, %v473_v51, %v559_v57  ;;  %v599_v62 = vsel %vm535_vm7, %v493_v52, %v567_v58 }
  0xbe   : > { %623 = vst [vmem:[%s1046_s18 + $0x88] sm:$0xff] %v591_v61  ;;  %v576_v63 = vsel %vm512_vm8, %v436_v55, %v544_v59  ;;  %v584_v0 = vsel %vm520_vm9, %v456_v56, %v552_v60 }
  0xbf   : > { %631 = vst [vmem:[%s1046_s18 + $0xc8] sm:$0xff] %v599_v62 }
  0xc0   : > { %608 = vst [vmem:[%s1046_s18 + $0x10] sm:$0xff] %v576_v63  ;;  %v475_v1 = vpop.f32.mrf.mxu2  ;;  %v495_v2 = vpop.f32.mrf.mxu3 }
  0xc1   : > { %616 = vst [vmem:[%s1046_s18 + $0x50] sm:$0xff] %v584_v0  ;;  %v476_v3 = vadd.f32 %v1038_v24, %v475_v1  ;;  %v496_v4 = vadd.f32 %v1038_v24, %v495_v2  ;;  %v437_v5 = vpop.f32.mrf.mxu0  ;;  %v457_v6 = vpop.f32.mrf.mxu1 }
  0xc2   : > { %v438_v7 = vadd.f32 %v1038_v24, %v437_v5  ;;  %v458_v8 = vadd.f32 %v1038_v24, %v457_v6 }
  0xc3   : > { %vm528_vm10 = vcmp.ge.f32.partialorder %v476_v3, 0.0  ;;  %v560_v9 = vmul.f32 0.01, %v476_v3  ;;  %vm536_vm11 = vcmp.ge.f32.partialorder %v496_v4, 0.0  ;;  %v568_v10 = vmul.f32 0.01, %v496_v4 }
  0xc4   : > { %vm513_vm12 = vcmp.ge.f32.partialorder %v438_v7, 0.0  ;;  %v545_v11 = vmul.f32 0.01, %v438_v7  ;;  %vm521_vm13 = vcmp.ge.f32.partialorder %v458_v8, 0.0  ;;  %v553_v12 = vmul.f32 0.01, %v458_v8 }
  0xc5   : > { %v592_v13 = vsel %vm528_vm10, %v476_v3, %v560_v9  ;;  %v600_v14 = vsel %vm536_vm11, %v496_v4, %v568_v10 }
  0xc6   : > { %624 = vst [vmem:[%s1046_s18 + $0x90] sm:$0xff] %v592_v13  ;;  %v577_v15 = vsel %vm513_vm12, %v438_v7, %v545_v11  ;;  %v585_v16 = vsel %vm521_vm13, %v458_v8, %v553_v12 }
  0xc7   : > { %632 = vst [vmem:[%s1046_s18 + $0xd0] sm:$0xff] %v600_v14 }
  0xc8   : > { %609 = vst [vmem:[%s1046_s18 + $0x18] sm:$0xff] %v577_v15  ;;  %v477_v17 = vpop.f32.mrf.mxu2  ;;  %v497_v18 = vpop.f32.mrf.mxu3 }
  0xc9   : > { %617 = vst [vmem:[%s1046_s18 + $0x58] sm:$0xff] %v585_v16  ;;  %v478_v19 = vadd.f32 %v1038_v24, %v477_v17  ;;  %v498_v20 = vadd.f32 %v1038_v24, %v497_v18  ;;  %v440_v21 = vpop.f32.mrf.mxu0  ;;  %v460_v22 = vpop.f32.mrf.mxu1 }
  0xca   : > { %v441_v23 = vadd.f32 %v1038_v24, %v440_v21  ;;  %v461_v25 = vadd.f32 %v1038_v24, %v460_v22 }
  0xcb   : > { %vm529_vm14 = vcmp.ge.f32.partialorder %v478_v19, 0.0  ;;  %v561_v26 = vmul.f32 0.01, %v478_v19  ;;  %vm537_vm15 = vcmp.ge.f32.partialorder %v498_v20, 0.0  ;;  %v569_v27 = vmul.f32 0.01, %v498_v20 }
  0xcc   : > { %vm514_vm0 = vcmp.ge.f32.partialorder %v441_v23, 0.0  ;;  %v546_v28 = vmul.f32 0.01, %v441_v23  ;;  %vm522_vm1 = vcmp.ge.f32.partialorder %v461_v25, 0.0  ;;  %v554_v29 = vmul.f32 0.01, %v461_v25 }
  0xcd   : > { %v593_v30 = vsel %vm529_vm14, %v478_v19, %v561_v26  ;;  %v601_v31 = vsel %vm537_vm15, %v498_v20, %v569_v27 }
  0xce   : > { %625 = vst [vmem:[%s1046_s18 + $0x98] sm:$0xff] %v593_v30  ;;  %v578_v32 = vsel %vm514_vm0, %v441_v23, %v546_v28  ;;  %v586_v33 = vsel %vm522_vm1, %v461_v25, %v554_v29 }
  0xcf   : > { %633 = vst [vmem:[%s1046_s18 + $0xd8] sm:$0xff] %v601_v31 }
  0xd0   : > { %610 = vst [vmem:[%s1046_s18 + $0x20] sm:$0xff] %v578_v32  ;;  %v480_v34 = vpop.f32.mrf.mxu2  ;;  %v500_v35 = vpop.f32.mrf.mxu3 }
  0xd1   : > { %618 = vst [vmem:[%s1046_s18 + $0x60] sm:$0xff] %v586_v33  ;;  %v481_v36 = vadd.f32 %v1038_v24, %v480_v34  ;;  %v501_v37 = vadd.f32 %v1038_v24, %v500_v35  ;;  %v442_v38 = vpop.f32.mrf.mxu0  ;;  %v462_v39 = vpop.f32.mrf.mxu1 }
  0xd2   : > { %v443_v40 = vadd.f32 %v1038_v24, %v442_v38  ;;  %v463_v41 = vadd.f32 %v1038_v24, %v462_v39 }
  0xd3   : > { %vm530_vm2 = vcmp.ge.f32.partialorder %v481_v36, 0.0  ;;  %v562_v42 = vmul.f32 0.01, %v481_v36  ;;  %vm538_vm3 = vcmp.ge.f32.partialorder %v501_v37, 0.0  ;;  %v570_v43 = vmul.f32 0.01, %v501_v37 }
  0xd4   : > { %vm515_vm4 = vcmp.ge.f32.partialorder %v443_v40, 0.0  ;;  %v547_v44 = vmul.f32 0.01, %v443_v40  ;;  %vm523_vm5 = vcmp.ge.f32.partialorder %v463_v41, 0.0  ;;  %v555_v45 = vmul.f32 0.01, %v463_v41 }
  0xd5   : > { %v594_v46 = vsel %vm530_vm2, %v481_v36, %v562_v42  ;;  %v602_v47 = vsel %vm538_vm3, %v501_v37, %v570_v43 }
  0xd6   : > { %626 = vst [vmem:[%s1046_s18 + $0xa0] sm:$0xff] %v594_v46  ;;  %v579_v48 = vsel %vm515_vm4, %v443_v40, %v547_v44  ;;  %v587_v49 = vsel %vm523_vm5, %v463_v41, %v555_v45 }
  0xd7   : > { %634 = vst [vmem:[%s1046_s18 + $0xe0] sm:$0xff] %v602_v47 }
  0xd8   : > { %611 = vst [vmem:[%s1046_s18 + $0x28] sm:$0xff] %v579_v48  ;;  %v482_v50 = vpop.f32.mrf.mxu2  ;;  %v502_v51 = vpop.f32.mrf.mxu3 }
  0xd9   : > { %619 = vst [vmem:[%s1046_s18 + $0x68] sm:$0xff] %v587_v49  ;;  %v483_v52 = vadd.f32 %v1038_v24, %v482_v50  ;;  %v503_v53 = vadd.f32 %v1038_v24, %v502_v51  ;;  %v445_v54 = vpop.f32.mrf.mxu0  ;;  %v465_v55 = vpop.f32.mrf.mxu1 }
  0xda   : > { %v446_v56 = vadd.f32 %v1038_v24, %v445_v54  ;;  %v466_v57 = vadd.f32 %v1038_v24, %v465_v55 }
  0xdb   : > { %vm531_vm6 = vcmp.ge.f32.partialorder %v483_v52, 0.0  ;;  %v563_v58 = vmul.f32 0.01, %v483_v52  ;;  %vm539_vm7 = vcmp.ge.f32.partialorder %v503_v53, 0.0  ;;  %v571_v59 = vmul.f32 0.01, %v503_v53 }
  0xdc   : > { %vm516_vm8 = vcmp.ge.f32.partialorder %v446_v56, 0.0  ;;  %v548_v60 = vmul.f32 0.01, %v446_v56  ;;  %vm524_vm9 = vcmp.ge.f32.partialorder %v466_v57, 0.0  ;;  %v556_v61 = vmul.f32 0.01, %v466_v57 }
  0xdd   : > { %v595_v62 = vsel %vm531_vm6, %v483_v52, %v563_v58  ;;  %v603_v63 = vsel %vm539_vm7, %v503_v53, %v571_v59 }
  0xde   : > { %627 = vst [vmem:[%s1046_s18 + $0xa8] sm:$0xff] %v595_v62  ;;  %v580_v0 = vsel %vm516_vm8, %v446_v56, %v548_v60  ;;  %v588_v1 = vsel %vm524_vm9, %v466_v57, %v556_v61 }
  0xdf   : > { %635 = vst [vmem:[%s1046_s18 + $0xe8] sm:$0xff] %v603_v63 }
  0xe0   : > { %612 = vst [vmem:[%s1046_s18 + $0x30] sm:$0xff] %v580_v0  ;;  %v485_v2 = vpop.f32.mrf.mxu2  ;;  %v505_v3 = vpop.f32.mrf.mxu3 }
  0xe1   : > { %620 = vst [vmem:[%s1046_s18 + $0x70] sm:$0xff] %v588_v1  ;;  %v486_v4 = vadd.f32 %v1038_v24, %v485_v2  ;;  %v506_v5 = vadd.f32 %v1038_v24, %v505_v3  ;;  %v447_v6 = vpop.f32.mrf.mxu0  ;;  %v467_v7 = vpop.f32.mrf.mxu1 }
  0xe2   : > { %v448_v8 = vadd.f32 %v1038_v24, %v447_v6  ;;  %v468_v9 = vadd.f32 %v1038_v24, %v467_v7 }
  0xe3   : > { %vm532_vm10 = vcmp.ge.f32.partialorder %v486_v4, 0.0  ;;  %v564_v10 = vmul.f32 0.01, %v486_v4  ;;  %vm540_vm11 = vcmp.ge.f32.partialorder %v506_v5, 0.0  ;;  %v572_v11 = vmul.f32 0.01, %v506_v5 }
  0xe4   : > { %vm517_vm12 = vcmp.ge.f32.partialorder %v448_v8, 0.0  ;;  %v549_v12 = vmul.f32 0.01, %v448_v8  ;;  %vm525_vm13 = vcmp.ge.f32.partialorder %v468_v9, 0.0  ;;  %v557_v13 = vmul.f32 0.01, %v468_v9 }
  0xe5   : > { %v596_v14 = vsel %vm532_vm10, %v486_v4, %v564_v10  ;;  %v604_v15 = vsel %vm540_vm11, %v506_v5, %v572_v11 }
  0xe6   : > { %628 = vst [vmem:[%s1046_s18 + $0xb0] sm:$0xff] %v596_v14  ;;  %v581_v16 = vsel %vm517_vm12, %v448_v8, %v549_v12  ;;  %v589_v17 = vsel %vm525_vm13, %v468_v9, %v557_v13 }
  0xe7   : > { %636 = vst [vmem:[%s1046_s18 + $0xf0] sm:$0xff] %v604_v15 }
  0xe8   : > { %613 = vst [vmem:[%s1046_s18 + $0x38] sm:$0xff] %v581_v16  ;;  %v487_v18 = vpop.f32.mrf.mxu2  ;;  %v507_v19 = vpop.f32.mrf.mxu3 }
  0xe9   : > { %621 = vst [vmem:[%s1046_s18 + $0x78] sm:$0xff] %v589_v17  ;;  %v488_v20 = vadd.f32 %v1038_v24, %v487_v18  ;;  %v508_v21 = vadd.f32 %v1038_v24, %v507_v19 }
  0xeb   : > { %vm533_vm14 = vcmp.ge.f32.partialorder %v488_v20, 0.0  ;;  %v565_v22 = vmul.f32 0.01, %v488_v20  ;;  %vm541_vm15 = vcmp.ge.f32.partialorder %v508_v21, 0.0  ;;  %v573_v23 = vmul.f32 0.01, %v508_v21 }
  0xed   : > { %v597_v25 = vsel %vm533_vm14, %v488_v20, %v565_v22  ;;  %v605_v26 = vsel %vm541_vm15, %v508_v21, %v573_v23 }
  0xee   : > { %629 = vst [vmem:[%s1046_s18 + $0xb8] sm:$0xff] %v597_v25 }
  0xef   : > { %637 = vst [vmem:[%s1046_s18 + $0xf8] sm:$0xff] %v605_v26 }
  0xf0 PF: > { %s13_s14 = sadd.s32 1, %s944_s14   ;;  %s1123_s12 = smov %s940_s13 }
  0xf1   : > { %p10_p5 = scmp.ge.s32.totalorder %s13_s14, 10   ;;  %s1124_s13 = smov %s1126_s15 }
  0xf3   :  { %12 = sbr.rel (!%p10_p5) target bundleno = 2 (0x2), region = 68 }

</bundles_post_ra>
